<compile_context>
chip_gen: v5e
topology: v5e:2x2
jax: 0.10.0
libtpu: 0.0.40
codegen_flags: <defaults>
</compile_context>

<pallas_src>
import math

import jax
import jax.numpy as jnp
from jax import lax
from jax.experimental import pallas as pl
from jax.experimental.pallas import tpu as pltpu

# ----------------------------- configuration ------------------------------
B           = 2                     # batch
T           = 4                     # num_frames
IMG         = 28                    # input resolution
PATCH       = 14                    # patch size
GRID_HW     = IMG // PATCH
N_PATCH     = GRID_HW * GRID_HW     # patches per frame
WIDTH       = 128                   # encoder width
ENC_LAYERS  = 2
ENC_HEADS   = 4
DH          = WIDTH // ENC_HEADS    # head dim
OUT_DIM     = 128                   # encoder output dim == classifier d_model
CLS_LAYERS  = 2
CLS_HEADS   = 4                     # unused: S=1 attention reduces to out_proj(V)
CLS_FF      = 4 * OUT_DIM           # classifier feed-forward dim
HEAD_HID    = 64                    # classifier head hidden dim
NUM_CLASSES = 1
OUT_PAD     = 128                   # lane-dense padded logits width
LN_EPS      = 1e-5

L_SEQ       = 1 + N_PATCH * T       # 17 real tokens (cls + patches*frames)
L_PAD       = 24                    # padded to a multiple of 8 sublanes
PATCH_DIM   = 3 * PATCH * PATCH     # 588 (flattened conv3d receptive field)
PATCH_PAD   = 640                   # padded contraction dim (5 x 128)
MXU_DT      = jnp.bfloat16          # MXU operand dtype (f32 accumulation)


# ------------------------------ small helpers ------------------------------

def _zero_index_map_spec(a):
    """Whole-array VMEM block with a constant (0,...,0) block index."""
    zero = (0,) * a.ndim
    return pl.BlockSpec(a.shape, lambda *_, z=zero: z)


def _ln(x, g, b):
    """LayerNorm over the last axis (element-wise math kept in f32)."""
    mu = jnp.mean(x, axis=-1, keepdims=True)
    xc = x - mu
    var = jnp.mean(xc * xc, axis=-1, keepdims=True)
    return xc * lax.rsqrt(var + LN_EPS) * g + b


def _quick_gelu(x):
    # QuickGELU: x * sigmoid(1.702 x)
    return x * jax.nn.sigmoid(1.702 * x)


def _gelu_erf(x):
    # Exact (erf) GELU of nn.GELU / F.gelu, with erf evaluated via the
    # Abramowitz-Stegun 7.1.26 polynomial (|err| < 1.5e-7).
    # TODO(synk): polynomial used because lax.erf is not guaranteed to lower
    # inside Mosaic; semantics match PyTorch's exact GELU to f32 precision.
    z = x * 0.7071067811865476
    a = jnp.abs(z)
    t = 1.0 / (1.0 + 0.3275911 * a)
    poly = t * (0.254829592 + t * (-0.284496736 + t * (1.421413741
             + t * (-1.453152027 + t * 1.061405429))))
    erf_a = 1.0 - poly * jnp.exp(-a * a)
    erf = jnp.where(z >= 0.0, erf_a, -erf_a)
    return 0.5 * x * (1.0 + erf)


# ----------------- single fused kernel: embed + ViT + classifier -------------

def _fused_kernel(patches_ref, pos_ref, conv_w,
                  ln_pre_g, ln_pre_b,
                  ln1_g, ln1_b, qkv_w, qkv_b, aow, aob,
                  ln2_g, ln2_b, fc_w, fc_b, pj_w, pj_b,
                  ln_post_g, ln_post_b, proj_w,
                  cin_g, cin_b, cqkv_w, cqkv_b, cow, cob,
                  cn1_g, cn1_b, clin1_w, clin1_b, clin2_w, clin2_b,
                  cn2_g, cn2_b, cfc1_w, cfc1_b, cfc2_w, cfc2_b,
                  o_ref):
    # -------- patch embedding + class / positional / temporal embeddings ----
    # Row 0 of patches is zero, so row 0 of x becomes exactly the CLS token
    # (class_embedding + pos[0], stored in pos_ref row 0).  Pad rows stay 0
    # and are masked out of attention below.
    x = jnp.dot(patches_ref[0].astype(MXU_DT), conv_w[...],
                preferred_element_type=jnp.float32) + pos_ref[...]

    # ---------------------- ln_pre + transformer encoder --------------------
    x = _ln(x, ln_pre_g[...], ln_pre_b[...])
    key_valid = lax.broadcasted_iota(jnp.int32, (L_PAD, L_PAD), 1) < L_SEQ
    scale = 1.0 / math.sqrt(DH)

    for l in range(ENC_LAYERS):                           # unrolled (2 layers)
        # ----------------- multi-head self-attention -----------------
        y = _ln(x, ln1_g[l], ln1_b[l])
        qkv = jnp.dot(y.astype(MXU_DT), qkv_w[l],
                      preferred_element_type=jnp.float32) + qkv_b[l]  # (L, 3D)
        head_out = []
        for h in range(ENC_HEADS):                        # unrolled (4 heads)
            q = qkv[:, h * DH:(h + 1) * DH]
            k = qkv[:, WIDTH + h * DH:WIDTH + (h + 1) * DH]
            v = qkv[:, 2 * WIDTH + h * DH:2 * WIDTH + (h + 1) * DH]
            # q @ k^T without materializing a transpose of K.
            s = lax.dot_general(q.astype(MXU_DT), k.astype(MXU_DT),
                                (((1,), (1,)), ((), ())),
                                preferred_element_type=jnp.float32) * scale
            s = jnp.where(key_valid, s, -1e30)
            s = s - jnp.max(s, axis=-1, keepdims=True)
            p = jnp.exp(s)
            p = p * pl.reciprocal(jnp.sum(p, axis=-1, keepdims=True),
                                  approx=True)
            head_out.append(jnp.dot(p.astype(MXU_DT), v.astype(MXU_DT),
                                    preferred_element_type=jnp.float32))
        attn = jnp.concatenate(head_out, axis=-1)         # lane-dense (L, 128)
        x = x + jnp.dot(attn.astype(MXU_DT), aow[l],
                        preferred_element_type=jnp.float32) + aob[l]
        # ----------------------------- MLP ----------------------------
        y = _ln(x, ln2_g[l], ln2_b[l])
        hdn = jnp.dot(y.astype(MXU_DT), fc_w[l],
                      preferred_element_type=jnp.float32) + fc_b[l]
        hdn = _quick_gelu(hdn)
        x = x + jnp.dot(hdn.astype(MXU_DT), pj_w[l],
                        preferred_element_type=jnp.float32) + pj_b[l]

    x = _ln(x, ln_post_g[...], ln_post_b[...])
    pooled = jnp.dot(x[0:1, :].astype(MXU_DT), proj_w[...],   # (1, OUT_DIM)
                     preferred_element_type=jnp.float32)       # no-bias proj

    # -------------- classifier: LN + post-LN transformer (S=1) --------------
    c = _ln(pooled, cin_g[...], cin_b[...])
    for l in range(CLS_LAYERS):                           # unrolled (2 layers)
        # Self-attention with sequence length 1: softmax over a single key is
        # identically 1, so the attention output is exactly out_proj(V).
        qkv = jnp.dot(c.astype(MXU_DT), cqkv_w[l],
                      preferred_element_type=jnp.float32) + cqkv_b[l]
        v = qkv[:, 2 * OUT_DIM:3 * OUT_DIM]
        a = jnp.dot(v.astype(MXU_DT), cow[l],
                    preferred_element_type=jnp.float32) + cob[l]
        c = _ln(c + a, cn1_g[l], cn1_b[l])                # post-LN block
        hh = jnp.dot(c.astype(MXU_DT), clin1_w[l],
                     preferred_element_type=jnp.float32) + clin1_b[l]
        hh = _gelu_erf(hh)
        hh = jnp.dot(hh.astype(MXU_DT), clin2_w[l],
                     preferred_element_type=jnp.float32) + clin2_b[l]
        c = _ln(c + hh, cn2_g[l], cn2_b[l])

    # classification head: Linear -> GELU -> Linear (lane-padded to 128)
    hh = jnp.dot(c.astype(MXU_DT), cfc1_w[...],
                 preferred_element_type=jnp.float32) + cfc1_b[...]
    hh = _gelu_erf(hh)
    logits = jnp.dot(hh.astype(MXU_DT), cfc2_w[...],
                     preferred_element_type=jnp.float32) + cfc2_b[...]
    o_ref[0] = logits.astype(o_ref.dtype)                 # (1, OUT_PAD)


# ------------------------------- forward pass -------------------------------

def video_detection_forward(params, x):
    """VideoDetection.forward (eval mode).  x: (B, 3, T, H, W) -> (B, 1)."""
    enc, cls = params["encoder"], params["classifier"]
    bsz, c, tn, hh, ww = x.shape
    hp, wp = hh // PATCH, ww // PATCH
    n_tok = hp * wp * tn

    # Conv3d(kernel=(1,P,P), stride=(1,P,P), bias=False) == patch-embed matmul.
    # Patch rows are laid out (b, n, t) (patch-major, frame-minor) so the GEMM
    # output already matches the reference's
    # '(b t) n m -> (b n) t m -> b (n t) m' token ordering.
    patches = x.reshape(bsz, c, tn, hp, PATCH, wp, PATCH)
    patches = patches.transpose(0, 3, 5, 2, 1, 4, 6)      # B,Hp,Wp,T,C,ph,pw
    patches = patches.reshape(bsz, n_tok, c * PATCH * PATCH)
    # Row 0 reserved for the CLS token (zero patch), pad rows + lane pad zero.
    patches = jnp.pad(patches, ((0, 0),
                                (1, L_PAD - 1 - n_tok),
                                (0, PATCH_PAD - c * PATCH * PATCH)))

    # Combined class / positional / temporal embedding table (L_PAD, WIDTH).
    pos = enc["pos_embedding"]                            # (N+1, WIDTH)
    tpos = enc["temporal_pos"][0]                         # (T, WIDTH)
    if tn == 1:
        tpos = jnp.mean(enc["temporal_pos"], axis=1)      # (1, WIDTH)
    tok_pos = (pos[1:, None, :] + tpos[None, :, :]).reshape(n_tok, WIDTH)
    # NOTE: the reference's `cls_tokens = x[:B, :1, :]` slices a (B*T, ...)
    # batch-outer tensor; all B*T CLS rows are identical
    # (class_embedding + pos[0]), so this equals one CLS token per sample.
    cls_row = (enc["class_embedding"] + pos[0])[None, :]
    pos_table = jnp.concatenate([cls_row, tok_pos], axis=0)
    pos_table = jnp.pad(pos_table, ((0, L_PAD - L_SEQ), (0, 0)))

    weights = (enc["ln_pre_g"], enc["ln_pre_b"],
               enc["ln1_g"], enc["ln1_b"], enc["qkv_w"], enc["qkv_b"],
               enc["out_w"], enc["out_b"], enc["ln2_g"], enc["ln2_b"],
               enc["fc_w"], enc["fc_b"], enc["pj_w"], enc["pj_b"],
               enc["ln_post_g"], enc["ln_post_b"], enc["proj"],
               cls["in_g"], cls["in_b"], cls["qkv_w"], cls["qkv_b"],
               cls["out_w"], cls["out_b"], cls["n1_g"], cls["n1_b"],
               cls["lin1_w"], cls["lin1_b"], cls["lin2_w"], cls["lin2_b"],
               cls["n2_g"], cls["n2_b"], cls["fc1_w"], cls["fc1_b"],
               cls["fc2_w"], cls["fc2_b"])

    out = pl.pallas_call(
        _fused_kernel,
        out_shape=jax.ShapeDtypeStruct((bsz, 1, OUT_PAD), jnp.float32),
        grid=(bsz,),
        in_specs=[pl.BlockSpec((1, L_PAD, PATCH_PAD), lambda b: (b, 0, 0)),
                  _zero_index_map_spec(pos_table),
                  _zero_index_map_spec(enc["conv_w"])]
                 + [_zero_index_map_spec(w) for w in weights],
        out_specs=pl.BlockSpec((1, 1, OUT_PAD), lambda b: (b, 0, 0)),
        compiler_params=pltpu.CompilerParams(
            dimension_semantics=("parallel",)),          # 2nd TensorCore on v7x
    )(patches, pos_table, enc["conv_w"], *weights)
    return out[:, 0, :NUM_CLASSES]                        # (B, NUM_CLASSES)


# ------------------------------ parameter init ------------------------------

def _normal(key, shape, scale=0.02, dtype=jnp.float32):
    return (scale * jax.random.normal(key, shape, dtype=jnp.float32)).astype(dtype)


def init_params(key):
    ke, kc = jax.random.split(key)
    kenc = jax.random.split(ke, 12)
    nl = ENC_LAYERS
    s = WIDTH ** (-0.5)
    conv_w = _normal(kenc[0], (PATCH_DIM, WIDTH), dtype=MXU_DT)
    conv_w = jnp.pad(conv_w, ((0, PATCH_PAD - PATCH_DIM), (0, 0)))
    encoder = {
        "conv_w": conv_w,
        "class_embedding": s * jax.random.normal(kenc[1], (WIDTH,), jnp.float32),
        "pos_embedding": s * jax.random.normal(kenc[2], (N_PATCH + 1, WIDTH), jnp.float32),
        "temporal_pos": jnp.zeros((1, T, WIDTH), jnp.float32),
        "ln_pre_g": jnp.ones((1, WIDTH), jnp.float32),
        "ln_pre_b": jnp.zeros((1, WIDTH), jnp.float32),
        "ln1_g": jnp.ones((nl, 1, WIDTH), jnp.float32),
        "ln1_b": jnp.zeros((nl, 1, WIDTH), jnp.float32),
        "ln2_g": jnp.ones((nl, 1, WIDTH), jnp.float32),
        "ln2_b": jnp.zeros((nl, 1, WIDTH), jnp.float32),
        "qkv_w": _normal(kenc[3], (nl, WIDTH, 3 * WIDTH), dtype=MXU_DT),
        "qkv_b": _normal(kenc[4], (nl, 1, 3 * WIDTH)),
        "out_w": _normal(kenc[5], (nl, WIDTH, WIDTH), dtype=MXU_DT),
        "out_b": _normal(kenc[6], (nl, 1, WIDTH)),
        "fc_w": _normal(kenc[7], (nl, WIDTH, 4 * WIDTH), dtype=MXU_DT),
        "fc_b": _normal(kenc[8], (nl, 1, 4 * WIDTH)),
        "pj_w": _normal(kenc[9], (nl, 4 * WIDTH, WIDTH), dtype=MXU_DT),
        "pj_b": _normal(kenc[10], (nl, 1, WIDTH)),
        "ln_post_g": jnp.ones((1, WIDTH), jnp.float32),
        "ln_post_b": jnp.zeros((1, WIDTH), jnp.float32),
        "proj": _normal(kenc[11], (WIDTH, OUT_DIM), dtype=MXU_DT),
    }
    kcls = jax.random.split(kc, 12)
    nc = CLS_LAYERS
    fc2_w = jnp.pad(_normal(kcls[10], (HEAD_HID, NUM_CLASSES), dtype=MXU_DT),
                    ((0, 0), (0, OUT_PAD - NUM_CLASSES)))
    fc2_b = jnp.pad(_normal(kcls[11], (1, NUM_CLASSES)),
                    ((0, 0), (0, OUT_PAD - NUM_CLASSES)))
    classifier = {
        "in_g": jnp.ones((1, OUT_DIM), jnp.float32),
        "in_b": jnp.zeros((1, OUT_DIM), jnp.float32),
        "qkv_w": _normal(kcls[0], (nc, OUT_DIM, 3 * OUT_DIM), dtype=MXU_DT),
        "qkv_b": _normal(kcls[1], (nc, 1, 3 * OUT_DIM)),
        "out_w": _normal(kcls[2], (nc, OUT_DIM, OUT_DIM), dtype=MXU_DT),
        "out_b": _normal(kcls[3], (nc, 1, OUT_DIM)),
        "n1_g": jnp.ones((nc, 1, OUT_DIM), jnp.float32),
        "n1_b": jnp.zeros((nc, 1, OUT_DIM), jnp.float32),
        "n2_g": jnp.ones((nc, 1, OUT_DIM), jnp.float32),
        "n2_b": jnp.zeros((nc, 1, OUT_DIM), jnp.float32),
        "lin1_w": _normal(kcls[4], (nc, OUT_DIM, CLS_FF), dtype=MXU_DT),
        "lin1_b": _normal(kcls[5], (nc, 1, CLS_FF)),
        "lin2_w": _normal(kcls[6], (nc, CLS_FF, OUT_DIM), dtype=MXU_DT),
        "lin2_b": _normal(kcls[7], (nc, 1, OUT_DIM)),
        "fc1_w": _normal(kcls[8], (OUT_DIM, HEAD_HID), dtype=MXU_DT),
        "fc1_b": _normal(kcls[9], (1, HEAD_HID)),
        "fc2_w": fc2_w,
        "fc2_b": fc2_b,
    }
    return {"encoder": encoder, "classifier": classifier}


# ----------------------------------- main -----------------------------------

if __name__ == "__main__":
    key = jax.random.PRNGKey(0)
    pkey, xkey = jax.random.split(key)
    params = init_params(pkey)
    x = jax.random.normal(xkey, (B, 3, T, IMG, IMG), dtype=jnp.float32)

    fwd = jax.jit(video_detection_forward)
    out = jax.block_until_ready(fwd(params, x))
    assert out.shape == (B, NUM_CLASSES), out.shape
    assert bool(jnp.all(jnp.isfinite(out)))
    print("KERNEL_OK")
</pallas_src>

<mosaic_0001>
module attributes {stable_mosaic.version = 11 : i64} {
  func.func @_fused_kernel(%arg0: i32, %arg1: memref<1x24x640xf32, #tpu.memory_space<vmem>>, %arg2: memref<24x128xf32, #tpu.memory_space<vmem>>, %arg3: memref<640x128xbf16, #tpu.memory_space<vmem>>, %arg4: memref<1x128xf32, #tpu.memory_space<vmem>>, %arg5: memref<1x128xf32, #tpu.memory_space<vmem>>, %arg6: memref<2x1x128xf32, #tpu.memory_space<vmem>>, %arg7: memref<2x1x128xf32, #tpu.memory_space<vmem>>, %arg8: memref<2x128x384xbf16, #tpu.memory_space<vmem>>, %arg9: memref<2x1x384xf32, #tpu.memory_space<vmem>>, %arg10: memref<2x128x128xbf16, #tpu.memory_space<vmem>>, %arg11: memref<2x1x128xf32, #tpu.memory_space<vmem>>, %arg12: memref<2x1x128xf32, #tpu.memory_space<vmem>>, %arg13: memref<2x1x128xf32, #tpu.memory_space<vmem>>, %arg14: memref<2x128x512xbf16, #tpu.memory_space<vmem>>, %arg15: memref<2x1x512xf32, #tpu.memory_space<vmem>>, %arg16: memref<2x512x128xbf16, #tpu.memory_space<vmem>>, %arg17: memref<2x1x128xf32, #tpu.memory_space<vmem>>, %arg18: memref<1x128xf32, #tpu.memory_space<vmem>>, %arg19: memref<1x128xf32, #tpu.memory_space<vmem>>, %arg20: memref<128x128xbf16, #tpu.memory_space<vmem>>, %arg21: memref<1x128xf32, #tpu.memory_space<vmem>>, %arg22: memref<1x128xf32, #tpu.memory_space<vmem>>, %arg23: memref<2x128x384xbf16, #tpu.memory_space<vmem>>, %arg24: memref<2x1x384xf32, #tpu.memory_space<vmem>>, %arg25: memref<2x128x128xbf16, #tpu.memory_space<vmem>>, %arg26: memref<2x1x128xf32, #tpu.memory_space<vmem>>, %arg27: memref<2x1x128xf32, #tpu.memory_space<vmem>>, %arg28: memref<2x1x128xf32, #tpu.memory_space<vmem>>, %arg29: memref<2x128x512xbf16, #tpu.memory_space<vmem>>, %arg30: memref<2x1x512xf32, #tpu.memory_space<vmem>>, %arg31: memref<2x512x128xbf16, #tpu.memory_space<vmem>>, %arg32: memref<2x1x128xf32, #tpu.memory_space<vmem>>, %arg33: memref<2x1x128xf32, #tpu.memory_space<vmem>>, %arg34: memref<2x1x128xf32, #tpu.memory_space<vmem>>, %arg35: memref<128x64xbf16, #tpu.memory_space<vmem>>, %arg36: memref<1x64xf32, #tpu.memory_space<vmem>>, %arg37: memref<64x128xbf16, #tpu.memory_space<vmem>>, %arg38: memref<1x128xf32, #tpu.memory_space<vmem>>, %arg39: memref<1x1x128xf32, #tpu.memory_space<vmem>>) attributes {dimension_semantics = [#tpu.dimension_semantics<parallel>], iteration_bounds = array<i64: 2>, scalar_prefetch = 0 : i64, scratch_operands = 0 : i64, tpu.core_type = #tpu.core_type<tc>, window_params = [{transform_indices = @transform_0, window_bounds = array<i64: 1, 24, 640>}, {pipeline_mode = #tpu.pipeline_mode<synchronous>, transform_indices = @transform_1, window_bounds = array<i64: 24, 128>}, {pipeline_mode = #tpu.pipeline_mode<synchronous>, transform_indices = @transform_2, window_bounds = array<i64: 640, 128>}, {pipeline_mode = #tpu.pipeline_mode<synchronous>, transform_indices = @transform_3, window_bounds = array<i64: 1, 128>}, {pipeline_mode = #tpu.pipeline_mode<synchronous>, transform_indices = @transform_4, window_bounds = array<i64: 1, 128>}, {pipeline_mode = #tpu.pipeline_mode<synchronous>, transform_indices = @transform_5, window_bounds = array<i64: 2, 1, 128>}, {pipeline_mode = #tpu.pipeline_mode<synchronous>, transform_indices = @transform_6, window_bounds = array<i64: 2, 1, 128>}, {pipeline_mode = #tpu.pipeline_mode<synchronous>, transform_indices = @transform_7, window_bounds = array<i64: 2, 128, 384>}, {pipeline_mode = #tpu.pipeline_mode<synchronous>, transform_indices = @transform_8, window_bounds = array<i64: 2, 1, 384>}, {pipeline_mode = #tpu.pipeline_mode<synchronous>, transform_indices = @transform_9, window_bounds = array<i64: 2, 128, 128>}, {pipeline_mode = #tpu.pipeline_mode<synchronous>, transform_indices = @transform_10, window_bounds = array<i64: 2, 1, 128>}, {pipeline_mode = #tpu.pipeline_mode<synchronous>, transform_indices = @transform_11, window_bounds = array<i64: 2, 1, 128>}, {pipeline_mode = #tpu.pipeline_mode<synchronous>, transform_indices = @transform_12, window_bounds = array<i64: 2, 1, 128>}, {pipeline_mode = #tpu.pipeline_mode<synchronous>, transform_indices = @transform_13, window_bounds = array<i64: 2, 128, 512>}, {pipeline_mode = #tpu.pipeline_mode<synchronous>, transform_indices = @transform_14, window_bounds = array<i64: 2, 1, 512>}, {pipeline_mode = #tpu.pipeline_mode<synchronous>, transform_indices = @transform_15, window_bounds = array<i64: 2, 512, 128>}, {pipeline_mode = #tpu.pipeline_mode<synchronous>, transform_indices = @transform_16, window_bounds = array<i64: 2, 1, 128>}, {pipeline_mode = #tpu.pipeline_mode<synchronous>, transform_indices = @transform_17, window_bounds = array<i64: 1, 128>}, {pipeline_mode = #tpu.pipeline_mode<synchronous>, transform_indices = @transform_18, window_bounds = array<i64: 1, 128>}, {pipeline_mode = #tpu.pipeline_mode<synchronous>, transform_indices = @transform_19, window_bounds = array<i64: 128, 128>}, {pipeline_mode = #tpu.pipeline_mode<synchronous>, transform_indices = @transform_20, window_bounds = array<i64: 1, 128>}, {pipeline_mode = #tpu.pipeline_mode<synchronous>, transform_indices = @transform_21, window_bounds = array<i64: 1, 128>}, {pipeline_mode = #tpu.pipeline_mode<synchronous>, transform_indices = @transform_22, window_bounds = array<i64: 2, 128, 384>}, {pipeline_mode = #tpu.pipeline_mode<synchronous>, transform_indices = @transform_23, window_bounds = array<i64: 2, 1, 384>}, {pipeline_mode = #tpu.pipeline_mode<synchronous>, transform_indices = @transform_24, window_bounds = array<i64: 2, 128, 128>}, {pipeline_mode = #tpu.pipeline_mode<synchronous>, transform_indices = @transform_25, window_bounds = array<i64: 2, 1, 128>}, {pipeline_mode = #tpu.pipeline_mode<synchronous>, transform_indices = @transform_26, window_bounds = array<i64: 2, 1, 128>}, {pipeline_mode = #tpu.pipeline_mode<synchronous>, transform_indices = @transform_27, window_bounds = array<i64: 2, 1, 128>}, {pipeline_mode = #tpu.pipeline_mode<synchronous>, transform_indices = @transform_28, window_bounds = array<i64: 2, 128, 512>}, {pipeline_mode = #tpu.pipeline_mode<synchronous>, transform_indices = @transform_29, window_bounds = array<i64: 2, 1, 512>}, {pipeline_mode = #tpu.pipeline_mode<synchronous>, transform_indices = @transform_30, window_bounds = array<i64: 2, 512, 128>}, {pipeline_mode = #tpu.pipeline_mode<synchronous>, transform_indices = @transform_31, window_bounds = array<i64: 2, 1, 128>}, {pipeline_mode = #tpu.pipeline_mode<synchronous>, transform_indices = @transform_32, window_bounds = array<i64: 2, 1, 128>}, {pipeline_mode = #tpu.pipeline_mode<synchronous>, transform_indices = @transform_33, window_bounds = array<i64: 2, 1, 128>}, {pipeline_mode = #tpu.pipeline_mode<synchronous>, transform_indices = @transform_34, window_bounds = array<i64: 128, 64>}, {pipeline_mode = #tpu.pipeline_mode<synchronous>, transform_indices = @transform_35, window_bounds = array<i64: 1, 64>}, {pipeline_mode = #tpu.pipeline_mode<synchronous>, transform_indices = @transform_36, window_bounds = array<i64: 64, 128>}, {pipeline_mode = #tpu.pipeline_mode<synchronous>, transform_indices = @transform_37, window_bounds = array<i64: 1, 128>}, {transform_indices = @transform_38, window_bounds = array<i64: 1, 1, 128>}]} {
    %c0 = arith.constant 0 : index
    %c0_0 = arith.constant 0 : index
    %c0_1 = arith.constant 0 : index
    %0 = vector.load %arg1[%c0, %c0_0, %c0_1] : memref<1x24x640xf32, #tpu.memory_space<vmem>>, vector<1x24x640xf32>
    %1 = vector.shape_cast %0 : vector<1x24x640xf32> to vector<24x640xf32>
    %2 = arith.truncf %1 : vector<24x640xf32> to vector<24x640xbf16>
    %c0_2 = arith.constant 0 : index
    %c0_3 = arith.constant 0 : index
    %3 = vector.load %arg3[%c0_2, %c0_3] : memref<640x128xbf16, #tpu.memory_space<vmem>>, vector<640x128xbf16>
    %cst = arith.constant dense<0.000000e+00> : vector<24x128xf32>
    %4 = tpu.matmul %2, %3, %cst {dimension_numbers = #tpu.dot_dimension_numbers<[1], [0], [0], [1], [0, 0, 1, 1], [], []>} : vector<24x640xbf16>, vector<640x128xbf16>, vector<24x128xf32> -> vector<24x128xf32>
    %c0_4 = arith.constant 0 : index
    %c0_5 = arith.constant 0 : index
    %5 = vector.load %arg2[%c0_4, %c0_5] : memref<24x128xf32, #tpu.memory_space<vmem>>, vector<24x128xf32>
    %6 = arith.addf %4, %5 : vector<24x128xf32>
    %c0_6 = arith.constant 0 : index
    %c0_7 = arith.constant 0 : index
    %7 = vector.load %arg4[%c0_6, %c0_7] : memref<1x128xf32, #tpu.memory_space<vmem>>, vector<1x128xf32>
    %c0_8 = arith.constant 0 : index
    %c0_9 = arith.constant 0 : index
    %8 = vector.load %arg5[%c0_8, %c0_9] : memref<1x128xf32, #tpu.memory_space<vmem>>, vector<1x128xf32>
    %cst_10 = arith.constant dense<0.000000e+00> : vector<24xf32>
    %9 = vector.multi_reduction <add>, %6, %cst_10 [1] : vector<24x128xf32> to vector<24xf32>
    %10 = vector.shape_cast %9 : vector<24xf32> to vector<24x1xf32>
    %cst_11 = arith.constant 1.280000e+02 : f32
    %11 = vector.broadcast %cst_11 : f32 to vector<24x1xf32>
    %12 = arith.divf %10, %11 : vector<24x1xf32>
    %13 = vector.broadcast %12 : vector<24x1xf32> to vector<24x128xf32>
    %14 = arith.subf %6, %13 : vector<24x128xf32>
    %15 = arith.mulf %14, %14 : vector<24x128xf32>
    %cst_12 = arith.constant dense<0.000000e+00> : vector<24xf32>
    %16 = vector.multi_reduction <add>, %15, %cst_12 [1] : vector<24x128xf32> to vector<24xf32>
    %17 = vector.shape_cast %16 : vector<24xf32> to vector<24x1xf32>
    %cst_13 = arith.constant 1.280000e+02 : f32
    %18 = vector.broadcast %cst_13 : f32 to vector<24x1xf32>
    %19 = arith.divf %17, %18 : vector<24x1xf32>
    %cst_14 = arith.constant 9.99999974E-6 : f32
    %20 = vector.broadcast %cst_14 : f32 to vector<24x1xf32>
    %21 = arith.addf %19, %20 : vector<24x1xf32>
    %22 = math.rsqrt %21 : vector<24x1xf32>
    %23 = vector.broadcast %22 : vector<24x1xf32> to vector<24x128xf32>
    %24 = arith.mulf %14, %23 : vector<24x128xf32>
    %25 = vector.broadcast %7 : vector<1x128xf32> to vector<24x128xf32>
    %26 = arith.mulf %24, %25 : vector<24x128xf32>
    %27 = vector.broadcast %8 : vector<1x128xf32> to vector<24x128xf32>
    %28 = arith.addf %26, %27 : vector<24x128xf32>
    %29 = tpu.iota {dimensions = array<i32: 1>} : vector<24x24xi32>
    %c17_i32 = arith.constant 17 : i32
    %30 = vector.broadcast %c17_i32 : i32 to vector<24x24xi32>
    %31 = arith.cmpi slt, %29, %30 : vector<24x24xi32>
    %c0_15 = arith.constant 0 : index
    %c0_16 = arith.constant 0 : index
    %c0_17 = arith.constant 0 : index
    %32 = vector.load %arg6[%c0_15, %c0_16, %c0_17] : memref<2x1x128xf32, #tpu.memory_space<vmem>>, vector<1x1x128xf32>
    %33 = vector.shape_cast %32 : vector<1x1x128xf32> to vector<1x128xf32>
    %c0_18 = arith.constant 0 : index
    %c0_19 = arith.constant 0 : index
    %c0_20 = arith.constant 0 : index
    %34 = vector.load %arg7[%c0_18, %c0_19, %c0_20] : memref<2x1x128xf32, #tpu.memory_space<vmem>>, vector<1x1x128xf32>
    %35 = vector.shape_cast %34 : vector<1x1x128xf32> to vector<1x128xf32>
    %cst_21 = arith.constant dense<0.000000e+00> : vector<24xf32>
    %36 = vector.multi_reduction <add>, %28, %cst_21 [1] : vector<24x128xf32> to vector<24xf32>
    %37 = vector.shape_cast %36 : vector<24xf32> to vector<24x1xf32>
    %cst_22 = arith.constant 1.280000e+02 : f32
    %38 = vector.broadcast %cst_22 : f32 to vector<24x1xf32>
    %39 = arith.divf %37, %38 : vector<24x1xf32>
    %40 = vector.broadcast %39 : vector<24x1xf32> to vector<24x128xf32>
    %41 = arith.subf %28, %40 : vector<24x128xf32>
    %42 = arith.mulf %41, %41 : vector<24x128xf32>
    %cst_23 = arith.constant dense<0.000000e+00> : vector<24xf32>
    %43 = vector.multi_reduction <add>, %42, %cst_23 [1] : vector<24x128xf32> to vector<24xf32>
    %44 = vector.shape_cast %43 : vector<24xf32> to vector<24x1xf32>
    %cst_24 = arith.constant 1.280000e+02 : f32
    %45 = vector.broadcast %cst_24 : f32 to vector<24x1xf32>
    %46 = arith.divf %44, %45 : vector<24x1xf32>
    %cst_25 = arith.constant 9.99999974E-6 : f32
    %47 = vector.broadcast %cst_25 : f32 to vector<24x1xf32>
    %48 = arith.addf %46, %47 : vector<24x1xf32>
    %49 = math.rsqrt %48 : vector<24x1xf32>
    %50 = vector.broadcast %49 : vector<24x1xf32> to vector<24x128xf32>
    %51 = arith.mulf %41, %50 : vector<24x128xf32>
    %52 = vector.broadcast %33 : vector<1x128xf32> to vector<24x128xf32>
    %53 = arith.mulf %51, %52 : vector<24x128xf32>
    %54 = vector.broadcast %35 : vector<1x128xf32> to vector<24x128xf32>
    %55 = arith.addf %53, %54 : vector<24x128xf32>
    %56 = arith.truncf %55 : vector<24x128xf32> to vector<24x128xbf16>
    %c0_26 = arith.constant 0 : index
    %c0_27 = arith.constant 0 : index
    %c0_28 = arith.constant 0 : index
    %57 = vector.load %arg8[%c0_26, %c0_27, %c0_28] : memref<2x128x384xbf16, #tpu.memory_space<vmem>>, vector<1x128x384xbf16>
    %58 = vector.shape_cast %57 : vector<1x128x384xbf16> to vector<128x384xbf16>
    %cst_29 = arith.constant dense<0.000000e+00> : vector<24x384xf32>
    %59 = tpu.matmul %56, %58, %cst_29 {dimension_numbers = #tpu.dot_dimension_numbers<[1], [0], [0], [1], [0, 0, 1, 1], [], []>} : vector<24x128xbf16>, vector<128x384xbf16>, vector<24x384xf32> -> vector<24x384xf32>
    %c0_30 = arith.constant 0 : index
    %c0_31 = arith.constant 0 : index
    %c0_32 = arith.constant 0 : index
    %60 = vector.load %arg9[%c0_30, %c0_31, %c0_32] : memref<2x1x384xf32, #tpu.memory_space<vmem>>, vector<1x1x384xf32>
    %61 = vector.shape_cast %60 : vector<1x1x384xf32> to vector<1x384xf32>
    %62 = vector.broadcast %61 : vector<1x384xf32> to vector<24x384xf32>
    %63 = arith.addf %59, %62 : vector<24x384xf32>
    %64 = vector.extract_strided_slice %63 {offsets = [0, 0], sizes = [24, 32], strides = [1, 1]} : vector<24x384xf32> to vector<24x32xf32>
    %65 = vector.extract_strided_slice %63 {offsets = [0, 128], sizes = [24, 32], strides = [1, 1]} : vector<24x384xf32> to vector<24x32xf32>
    %66 = vector.extract_strided_slice %63 {offsets = [0, 256], sizes = [24, 32], strides = [1, 1]} : vector<24x384xf32> to vector<24x32xf32>
    %67 = arith.truncf %64 : vector<24x32xf32> to vector<24x32xbf16>
    %68 = arith.truncf %65 : vector<24x32xf32> to vector<24x32xbf16>
    %cst_33 = arith.constant dense<0.000000e+00> : vector<24x24xf32>
    %69 = tpu.matmul %67, %68, %cst_33 {dimension_numbers = #tpu.dot_dimension_numbers<[1], [1], [0], [0], [0, 0, 1, 0], [], []>} : vector<24x32xbf16>, vector<24x32xbf16>, vector<24x24xf32> -> vector<24x24xf32>
    %cst_34 = arith.constant 0.176776692 : f32
    %70 = vector.broadcast %cst_34 : f32 to vector<24x24xf32>
    %71 = arith.mulf %69, %70 : vector<24x24xf32>
    %cst_35 = arith.constant -1.000000e+30 : f32
    %72 = vector.broadcast %cst_35 : f32 to vector<24x24xf32>
    %73 = arith.select %31, %71, %72 : vector<24x24xi1>, vector<24x24xf32>
    %cst_36 = arith.constant dense<0xFF800000> : vector<24xf32>
    %74 = vector.multi_reduction <maximumf>, %73, %cst_36 [1] : vector<24x24xf32> to vector<24xf32>
    %75 = vector.shape_cast %74 : vector<24xf32> to vector<24x1xf32>
    %76 = vector.broadcast %75 : vector<24x1xf32> to vector<24x24xf32>
    %77 = arith.subf %73, %76 : vector<24x24xf32>
    %78 = math.exp %77 : vector<24x24xf32>
    %cst_37 = arith.constant dense<0.000000e+00> : vector<24xf32>
    %79 = vector.multi_reduction <add>, %78, %cst_37 [1] : vector<24x24xf32> to vector<24xf32>
    %80 = vector.shape_cast %79 : vector<24xf32> to vector<24x1xf32>
    %81 = tpu.reciprocal %80 {approx = true} : vector<24x1xf32> -> vector<24x1xf32>
    %82 = vector.broadcast %81 : vector<24x1xf32> to vector<24x24xf32>
    %83 = arith.mulf %78, %82 : vector<24x24xf32>
    %84 = arith.truncf %83 : vector<24x24xf32> to vector<24x24xbf16>
    %85 = arith.truncf %66 : vector<24x32xf32> to vector<24x32xbf16>
    %cst_38 = arith.constant dense<0.000000e+00> : vector<24x32xf32>
    %86 = tpu.matmul %84, %85, %cst_38 {dimension_numbers = #tpu.dot_dimension_numbers<[1], [0], [0], [1], [0, 0, 1, 1], [], []>} : vector<24x24xbf16>, vector<24x32xbf16>, vector<24x32xf32> -> vector<24x32xf32>
    %87 = vector.extract_strided_slice %63 {offsets = [0, 32], sizes = [24, 32], strides = [1, 1]} : vector<24x384xf32> to vector<24x32xf32>
    %88 = vector.extract_strided_slice %63 {offsets = [0, 160], sizes = [24, 32], strides = [1, 1]} : vector<24x384xf32> to vector<24x32xf32>
    %89 = vector.extract_strided_slice %63 {offsets = [0, 288], sizes = [24, 32], strides = [1, 1]} : vector<24x384xf32> to vector<24x32xf32>
    %90 = arith.truncf %87 : vector<24x32xf32> to vector<24x32xbf16>
    %91 = arith.truncf %88 : vector<24x32xf32> to vector<24x32xbf16>
    %cst_39 = arith.constant dense<0.000000e+00> : vector<24x24xf32>
    %92 = tpu.matmul %90, %91, %cst_39 {dimension_numbers = #tpu.dot_dimension_numbers<[1], [1], [0], [0], [0, 0, 1, 0], [], []>} : vector<24x32xbf16>, vector<24x32xbf16>, vector<24x24xf32> -> vector<24x24xf32>
    %cst_40 = arith.constant 0.176776692 : f32
    %93 = vector.broadcast %cst_40 : f32 to vector<24x24xf32>
    %94 = arith.mulf %92, %93 : vector<24x24xf32>
    %cst_41 = arith.constant -1.000000e+30 : f32
    %95 = vector.broadcast %cst_41 : f32 to vector<24x24xf32>
    %96 = arith.select %31, %94, %95 : vector<24x24xi1>, vector<24x24xf32>
    %cst_42 = arith.constant dense<0xFF800000> : vector<24xf32>
    %97 = vector.multi_reduction <maximumf>, %96, %cst_42 [1] : vector<24x24xf32> to vector<24xf32>
    %98 = vector.shape_cast %97 : vector<24xf32> to vector<24x1xf32>
    %99 = vector.broadcast %98 : vector<24x1xf32> to vector<24x24xf32>
    %100 = arith.subf %96, %99 : vector<24x24xf32>
    %101 = math.exp %100 : vector<24x24xf32>
    %cst_43 = arith.constant dense<0.000000e+00> : vector<24xf32>
    %102 = vector.multi_reduction <add>, %101, %cst_43 [1] : vector<24x24xf32> to vector<24xf32>
    %103 = vector.shape_cast %102 : vector<24xf32> to vector<24x1xf32>
    %104 = tpu.reciprocal %103 {approx = true} : vector<24x1xf32> -> vector<24x1xf32>
    %105 = vector.broadcast %104 : vector<24x1xf32> to vector<24x24xf32>
    %106 = arith.mulf %101, %105 : vector<24x24xf32>
    %107 = arith.truncf %106 : vector<24x24xf32> to vector<24x24xbf16>
    %108 = arith.truncf %89 : vector<24x32xf32> to vector<24x32xbf16>
    %cst_44 = arith.constant dense<0.000000e+00> : vector<24x32xf32>
    %109 = tpu.matmul %107, %108, %cst_44 {dimension_numbers = #tpu.dot_dimension_numbers<[1], [0], [0], [1], [0, 0, 1, 1], [], []>} : vector<24x24xbf16>, vector<24x32xbf16>, vector<24x32xf32> -> vector<24x32xf32>
    %110 = vector.extract_strided_slice %63 {offsets = [0, 64], sizes = [24, 32], strides = [1, 1]} : vector<24x384xf32> to vector<24x32xf32>
    %111 = vector.extract_strided_slice %63 {offsets = [0, 192], sizes = [24, 32], strides = [1, 1]} : vector<24x384xf32> to vector<24x32xf32>
    %112 = vector.extract_strided_slice %63 {offsets = [0, 320], sizes = [24, 32], strides = [1, 1]} : vector<24x384xf32> to vector<24x32xf32>
    %113 = arith.truncf %110 : vector<24x32xf32> to vector<24x32xbf16>
    %114 = arith.truncf %111 : vector<24x32xf32> to vector<24x32xbf16>
    %cst_45 = arith.constant dense<0.000000e+00> : vector<24x24xf32>
    %115 = tpu.matmul %113, %114, %cst_45 {dimension_numbers = #tpu.dot_dimension_numbers<[1], [1], [0], [0], [0, 0, 1, 0], [], []>} : vector<24x32xbf16>, vector<24x32xbf16>, vector<24x24xf32> -> vector<24x24xf32>
    %cst_46 = arith.constant 0.176776692 : f32
    %116 = vector.broadcast %cst_46 : f32 to vector<24x24xf32>
    %117 = arith.mulf %115, %116 : vector<24x24xf32>
    %cst_47 = arith.constant -1.000000e+30 : f32
    %118 = vector.broadcast %cst_47 : f32 to vector<24x24xf32>
    %119 = arith.select %31, %117, %118 : vector<24x24xi1>, vector<24x24xf32>
    %cst_48 = arith.constant dense<0xFF800000> : vector<24xf32>
    %120 = vector.multi_reduction <maximumf>, %119, %cst_48 [1] : vector<24x24xf32> to vector<24xf32>
    %121 = vector.shape_cast %120 : vector<24xf32> to vector<24x1xf32>
    %122 = vector.broadcast %121 : vector<24x1xf32> to vector<24x24xf32>
    %123 = arith.subf %119, %122 : vector<24x24xf32>
    %124 = math.exp %123 : vector<24x24xf32>
    %cst_49 = arith.constant dense<0.000000e+00> : vector<24xf32>
    %125 = vector.multi_reduction <add>, %124, %cst_49 [1] : vector<24x24xf32> to vector<24xf32>
    %126 = vector.shape_cast %125 : vector<24xf32> to vector<24x1xf32>
    %127 = tpu.reciprocal %126 {approx = true} : vector<24x1xf32> -> vector<24x1xf32>
    %128 = vector.broadcast %127 : vector<24x1xf32> to vector<24x24xf32>
    %129 = arith.mulf %124, %128 : vector<24x24xf32>
    %130 = arith.truncf %129 : vector<24x24xf32> to vector<24x24xbf16>
    %131 = arith.truncf %112 : vector<24x32xf32> to vector<24x32xbf16>
    %cst_50 = arith.constant dense<0.000000e+00> : vector<24x32xf32>
    %132 = tpu.matmul %130, %131, %cst_50 {dimension_numbers = #tpu.dot_dimension_numbers<[1], [0], [0], [1], [0, 0, 1, 1], [], []>} : vector<24x24xbf16>, vector<24x32xbf16>, vector<24x32xf32> -> vector<24x32xf32>
    %133 = vector.extract_strided_slice %63 {offsets = [0, 96], sizes = [24, 32], strides = [1, 1]} : vector<24x384xf32> to vector<24x32xf32>
    %134 = vector.extract_strided_slice %63 {offsets = [0, 224], sizes = [24, 32], strides = [1, 1]} : vector<24x384xf32> to vector<24x32xf32>
    %135 = vector.extract_strided_slice %63 {offsets = [0, 352], sizes = [24, 32], strides = [1, 1]} : vector<24x384xf32> to vector<24x32xf32>
    %136 = arith.truncf %133 : vector<24x32xf32> to vector<24x32xbf16>
    %137 = arith.truncf %134 : vector<24x32xf32> to vector<24x32xbf16>
    %cst_51 = arith.constant dense<0.000000e+00> : vector<24x24xf32>
    %138 = tpu.matmul %136, %137, %cst_51 {dimension_numbers = #tpu.dot_dimension_numbers<[1], [1], [0], [0], [0, 0, 1, 0], [], []>} : vector<24x32xbf16>, vector<24x32xbf16>, vector<24x24xf32> -> vector<24x24xf32>
    %cst_52 = arith.constant 0.176776692 : f32
    %139 = vector.broadcast %cst_52 : f32 to vector<24x24xf32>
    %140 = arith.mulf %138, %139 : vector<24x24xf32>
    %cst_53 = arith.constant -1.000000e+30 : f32
    %141 = vector.broadcast %cst_53 : f32 to vector<24x24xf32>
    %142 = arith.select %31, %140, %141 : vector<24x24xi1>, vector<24x24xf32>
    %cst_54 = arith.constant dense<0xFF800000> : vector<24xf32>
    %143 = vector.multi_reduction <maximumf>, %142, %cst_54 [1] : vector<24x24xf32> to vector<24xf32>
    %144 = vector.shape_cast %143 : vector<24xf32> to vector<24x1xf32>
    %145 = vector.broadcast %144 : vector<24x1xf32> to vector<24x24xf32>
    %146 = arith.subf %142, %145 : vector<24x24xf32>
    %147 = math.exp %146 : vector<24x24xf32>
    %cst_55 = arith.constant dense<0.000000e+00> : vector<24xf32>
    %148 = vector.multi_reduction <add>, %147, %cst_55 [1] : vector<24x24xf32> to vector<24xf32>
    %149 = vector.shape_cast %148 : vector<24xf32> to vector<24x1xf32>
    %150 = tpu.reciprocal %149 {approx = true} : vector<24x1xf32> -> vector<24x1xf32>
    %151 = vector.broadcast %150 : vector<24x1xf32> to vector<24x24xf32>
    %152 = arith.mulf %147, %151 : vector<24x24xf32>
    %153 = arith.truncf %152 : vector<24x24xf32> to vector<24x24xbf16>
    %154 = arith.truncf %135 : vector<24x32xf32> to vector<24x32xbf16>
    %cst_56 = arith.constant dense<0.000000e+00> : vector<24x32xf32>
    %155 = tpu.matmul %153, %154, %cst_56 {dimension_numbers = #tpu.dot_dimension_numbers<[1], [0], [0], [1], [0, 0, 1, 1], [], []>} : vector<24x24xbf16>, vector<24x32xbf16>, vector<24x32xf32> -> vector<24x32xf32>
    %156 = tpu.concatenate %86, %109, %132, %155 in 1 : vector<24x32xf32>, vector<24x32xf32>, vector<24x32xf32>, vector<24x32xf32> -> vector<24x128xf32>
    %157 = arith.truncf %156 : vector<24x128xf32> to vector<24x128xbf16>
    %c0_57 = arith.constant 0 : index
    %c0_58 = arith.constant 0 : index
    %c0_59 = arith.constant 0 : index
    %158 = vector.load %arg10[%c0_57, %c0_58, %c0_59] : memref<2x128x128xbf16, #tpu.memory_space<vmem>>, vector<1x128x128xbf16>
    %159 = vector.shape_cast %158 : vector<1x128x128xbf16> to vector<128x128xbf16>
    %cst_60 = arith.constant dense<0.000000e+00> : vector<24x128xf32>
    %160 = tpu.matmul %157, %159, %cst_60 {dimension_numbers = #tpu.dot_dimension_numbers<[1], [0], [0], [1], [0, 0, 1, 1], [], []>} : vector<24x128xbf16>, vector<128x128xbf16>, vector<24x128xf32> -> vector<24x128xf32>
    %161 = arith.addf %28, %160 : vector<24x128xf32>
    %c0_61 = arith.constant 0 : index
    %c0_62 = arith.constant 0 : index
    %c0_63 = arith.constant 0 : index
    %162 = vector.load %arg11[%c0_61, %c0_62, %c0_63] : memref<2x1x128xf32, #tpu.memory_space<vmem>>, vector<1x1x128xf32>
    %163 = vector.shape_cast %162 : vector<1x1x128xf32> to vector<1x128xf32>
    %164 = vector.broadcast %163 : vector<1x128xf32> to vector<24x128xf32>
    %165 = arith.addf %161, %164 : vector<24x128xf32>
    %c0_64 = arith.constant 0 : index
    %c0_65 = arith.constant 0 : index
    %c0_66 = arith.constant 0 : index
    %166 = vector.load %arg12[%c0_64, %c0_65, %c0_66] : memref<2x1x128xf32, #tpu.memory_space<vmem>>, vector<1x1x128xf32>
    %167 = vector.shape_cast %166 : vector<1x1x128xf32> to vector<1x128xf32>
    %c0_67 = arith.constant 0 : index
    %c0_68 = arith.constant 0 : index
    %c0_69 = arith.constant 0 : index
    %168 = vector.load %arg13[%c0_67, %c0_68, %c0_69] : memref<2x1x128xf32, #tpu.memory_space<vmem>>, vector<1x1x128xf32>
    %169 = vector.shape_cast %168 : vector<1x1x128xf32> to vector<1x128xf32>
    %cst_70 = arith.constant dense<0.000000e+00> : vector<24xf32>
    %170 = vector.multi_reduction <add>, %165, %cst_70 [1] : vector<24x128xf32> to vector<24xf32>
    %171 = vector.shape_cast %170 : vector<24xf32> to vector<24x1xf32>
    %cst_71 = arith.constant 1.280000e+02 : f32
    %172 = vector.broadcast %cst_71 : f32 to vector<24x1xf32>
    %173 = arith.divf %171, %172 : vector<24x1xf32>
    %174 = vector.broadcast %173 : vector<24x1xf32> to vector<24x128xf32>
    %175 = arith.subf %165, %174 : vector<24x128xf32>
    %176 = arith.mulf %175, %175 : vector<24x128xf32>
    %cst_72 = arith.constant dense<0.000000e+00> : vector<24xf32>
    %177 = vector.multi_reduction <add>, %176, %cst_72 [1] : vector<24x128xf32> to vector<24xf32>
    %178 = vector.shape_cast %177 : vector<24xf32> to vector<24x1xf32>
    %cst_73 = arith.constant 1.280000e+02 : f32
    %179 = vector.broadcast %cst_73 : f32 to vector<24x1xf32>
    %180 = arith.divf %178, %179 : vector<24x1xf32>
    %cst_74 = arith.constant 9.99999974E-6 : f32
    %181 = vector.broadcast %cst_74 : f32 to vector<24x1xf32>
    %182 = arith.addf %180, %181 : vector<24x1xf32>
    %183 = math.rsqrt %182 : vector<24x1xf32>
    %184 = vector.broadcast %183 : vector<24x1xf32> to vector<24x128xf32>
    %185 = arith.mulf %175, %184 : vector<24x128xf32>
    %186 = vector.broadcast %167 : vector<1x128xf32> to vector<24x128xf32>
    %187 = arith.mulf %185, %186 : vector<24x128xf32>
    %188 = vector.broadcast %169 : vector<1x128xf32> to vector<24x128xf32>
    %189 = arith.addf %187, %188 : vector<24x128xf32>
    %190 = arith.truncf %189 : vector<24x128xf32> to vector<24x128xbf16>
    %c0_75 = arith.constant 0 : index
    %c0_76 = arith.constant 0 : index
    %c0_77 = arith.constant 0 : index
    %191 = vector.load %arg14[%c0_75, %c0_76, %c0_77] : memref<2x128x512xbf16, #tpu.memory_space<vmem>>, vector<1x128x512xbf16>
    %192 = vector.shape_cast %191 : vector<1x128x512xbf16> to vector<128x512xbf16>
    %cst_78 = arith.constant dense<0.000000e+00> : vector<24x512xf32>
    %193 = tpu.matmul %190, %192, %cst_78 {dimension_numbers = #tpu.dot_dimension_numbers<[1], [0], [0], [1], [0, 0, 1, 1], [], []>} : vector<24x128xbf16>, vector<128x512xbf16>, vector<24x512xf32> -> vector<24x512xf32>
    %c0_79 = arith.constant 0 : index
    %c0_80 = arith.constant 0 : index
    %c0_81 = arith.constant 0 : index
    %194 = vector.load %arg15[%c0_79, %c0_80, %c0_81] : memref<2x1x512xf32, #tpu.memory_space<vmem>>, vector<1x1x512xf32>
    %195 = vector.shape_cast %194 : vector<1x1x512xf32> to vector<1x512xf32>
    %196 = vector.broadcast %195 : vector<1x512xf32> to vector<24x512xf32>
    %197 = arith.addf %193, %196 : vector<24x512xf32>
    %cst_82 = arith.constant 1.702000e+00 : f32
    %198 = vector.broadcast %cst_82 : f32 to vector<24x512xf32>
    %199 = arith.mulf %198, %197 : vector<24x512xf32>
    %200 = arith.negf %199 : vector<24x512xf32>
    %201 = math.exp %200 : vector<24x512xf32>
    %cst_83 = arith.constant 1.000000e+00 : f32
    %202 = vector.broadcast %cst_83 : f32 to vector<24x512xf32>
    %203 = arith.addf %202, %201 : vector<24x512xf32>
    %204 = arith.divf %202, %203 : vector<24x512xf32>
    %205 = arith.mulf %197, %204 : vector<24x512xf32>
    %206 = arith.truncf %205 : vector<24x512xf32> to vector<24x512xbf16>
    %c0_84 = arith.constant 0 : index
    %c0_85 = arith.constant 0 : index
    %c0_86 = arith.constant 0 : index
    %207 = vector.load %arg16[%c0_84, %c0_85, %c0_86] : memref<2x512x128xbf16, #tpu.memory_space<vmem>>, vector<1x512x128xbf16>
    %208 = vector.shape_cast %207 : vector<1x512x128xbf16> to vector<512x128xbf16>
    %cst_87 = arith.constant dense<0.000000e+00> : vector<24x128xf32>
    %209 = tpu.matmul %206, %208, %cst_87 {dimension_numbers = #tpu.dot_dimension_numbers<[1], [0], [0], [1], [0, 0, 1, 1], [], []>} : vector<24x512xbf16>, vector<512x128xbf16>, vector<24x128xf32> -> vector<24x128xf32>
    %210 = arith.addf %165, %209 : vector<24x128xf32>
    %c0_88 = arith.constant 0 : index
    %c0_89 = arith.constant 0 : index
    %c0_90 = arith.constant 0 : index
    %211 = vector.load %arg17[%c0_88, %c0_89, %c0_90] : memref<2x1x128xf32, #tpu.memory_space<vmem>>, vector<1x1x128xf32>
    %212 = vector.shape_cast %211 : vector<1x1x128xf32> to vector<1x128xf32>
    %213 = vector.broadcast %212 : vector<1x128xf32> to vector<24x128xf32>
    %214 = arith.addf %210, %213 : vector<24x128xf32>
    %c1 = arith.constant 1 : index
    %c0_91 = arith.constant 0 : index
    %c0_92 = arith.constant 0 : index
    %215 = vector.load %arg6[%c1, %c0_91, %c0_92] : memref<2x1x128xf32, #tpu.memory_space<vmem>>, vector<1x1x128xf32>
    %216 = vector.shape_cast %215 : vector<1x1x128xf32> to vector<1x128xf32>
    %c1_93 = arith.constant 1 : index
    %c0_94 = arith.constant 0 : index
    %c0_95 = arith.constant 0 : index
    %217 = vector.load %arg7[%c1_93, %c0_94, %c0_95] : memref<2x1x128xf32, #tpu.memory_space<vmem>>, vector<1x1x128xf32>
    %218 = vector.shape_cast %217 : vector<1x1x128xf32> to vector<1x128xf32>
    %cst_96 = arith.constant dense<0.000000e+00> : vector<24xf32>
    %219 = vector.multi_reduction <add>, %214, %cst_96 [1] : vector<24x128xf32> to vector<24xf32>
    %220 = vector.shape_cast %219 : vector<24xf32> to vector<24x1xf32>
    %cst_97 = arith.constant 1.280000e+02 : f32
    %221 = vector.broadcast %cst_97 : f32 to vector<24x1xf32>
    %222 = arith.divf %220, %221 : vector<24x1xf32>
    %223 = vector.broadcast %222 : vector<24x1xf32> to vector<24x128xf32>
    %224 = arith.subf %214, %223 : vector<24x128xf32>
    %225 = arith.mulf %224, %224 : vector<24x128xf32>
    %cst_98 = arith.constant dense<0.000000e+00> : vector<24xf32>
    %226 = vector.multi_reduction <add>, %225, %cst_98 [1] : vector<24x128xf32> to vector<24xf32>
    %227 = vector.shape_cast %226 : vector<24xf32> to vector<24x1xf32>
    %cst_99 = arith.constant 1.280000e+02 : f32
    %228 = vector.broadcast %cst_99 : f32 to vector<24x1xf32>
    %229 = arith.divf %227, %228 : vector<24x1xf32>
    %cst_100 = arith.constant 9.99999974E-6 : f32
    %230 = vector.broadcast %cst_100 : f32 to vector<24x1xf32>
    %231 = arith.addf %229, %230 : vector<24x1xf32>
    %232 = math.rsqrt %231 : vector<24x1xf32>
    %233 = vector.broadcast %232 : vector<24x1xf32> to vector<24x128xf32>
    %234 = arith.mulf %224, %233 : vector<24x128xf32>
    %235 = vector.broadcast %216 : vector<1x128xf32> to vector<24x128xf32>
    %236 = arith.mulf %234, %235 : vector<24x128xf32>
    %237 = vector.broadcast %218 : vector<1x128xf32> to vector<24x128xf32>
    %238 = arith.addf %236, %237 : vector<24x128xf32>
    %239 = arith.truncf %238 : vector<24x128xf32> to vector<24x128xbf16>
    %c1_101 = arith.constant 1 : index
    %c0_102 = arith.constant 0 : index
    %c0_103 = arith.constant 0 : index
    %240 = vector.load %arg8[%c1_101, %c0_102, %c0_103] : memref<2x128x384xbf16, #tpu.memory_space<vmem>>, vector<1x128x384xbf16>
    %241 = vector.shape_cast %240 : vector<1x128x384xbf16> to vector<128x384xbf16>
    %cst_104 = arith.constant dense<0.000000e+00> : vector<24x384xf32>
    %242 = tpu.matmul %239, %241, %cst_104 {dimension_numbers = #tpu.dot_dimension_numbers<[1], [0], [0], [1], [0, 0, 1, 1], [], []>} : vector<24x128xbf16>, vector<128x384xbf16>, vector<24x384xf32> -> vector<24x384xf32>
    %c1_105 = arith.constant 1 : index
    %c0_106 = arith.constant 0 : index
    %c0_107 = arith.constant 0 : index
    %243 = vector.load %arg9[%c1_105, %c0_106, %c0_107] : memref<2x1x384xf32, #tpu.memory_space<vmem>>, vector<1x1x384xf32>
    %244 = vector.shape_cast %243 : vector<1x1x384xf32> to vector<1x384xf32>
    %245 = vector.broadcast %244 : vector<1x384xf32> to vector<24x384xf32>
    %246 = arith.addf %242, %245 : vector<24x384xf32>
    %247 = vector.extract_strided_slice %246 {offsets = [0, 0], sizes = [24, 32], strides = [1, 1]} : vector<24x384xf32> to vector<24x32xf32>
    %248 = vector.extract_strided_slice %246 {offsets = [0, 128], sizes = [24, 32], strides = [1, 1]} : vector<24x384xf32> to vector<24x32xf32>
    %249 = vector.extract_strided_slice %246 {offsets = [0, 256], sizes = [24, 32], strides = [1, 1]} : vector<24x384xf32> to vector<24x32xf32>
    %250 = arith.truncf %247 : vector<24x32xf32> to vector<24x32xbf16>
    %251 = arith.truncf %248 : vector<24x32xf32> to vector<24x32xbf16>
    %cst_108 = arith.constant dense<0.000000e+00> : vector<24x24xf32>
    %252 = tpu.matmul %250, %251, %cst_108 {dimension_numbers = #tpu.dot_dimension_numbers<[1], [1], [0], [0], [0, 0, 1, 0], [], []>} : vector<24x32xbf16>, vector<24x32xbf16>, vector<24x24xf32> -> vector<24x24xf32>
    %cst_109 = arith.constant 0.176776692 : f32
    %253 = vector.broadcast %cst_109 : f32 to vector<24x24xf32>
    %254 = arith.mulf %252, %253 : vector<24x24xf32>
    %cst_110 = arith.constant -1.000000e+30 : f32
    %255 = vector.broadcast %cst_110 : f32 to vector<24x24xf32>
    %256 = arith.select %31, %254, %255 : vector<24x24xi1>, vector<24x24xf32>
    %cst_111 = arith.constant dense<0xFF800000> : vector<24xf32>
    %257 = vector.multi_reduction <maximumf>, %256, %cst_111 [1] : vector<24x24xf32> to vector<24xf32>
    %258 = vector.shape_cast %257 : vector<24xf32> to vector<24x1xf32>
    %259 = vector.broadcast %258 : vector<24x1xf32> to vector<24x24xf32>
    %260 = arith.subf %256, %259 : vector<24x24xf32>
    %261 = math.exp %260 : vector<24x24xf32>
    %cst_112 = arith.constant dense<0.000000e+00> : vector<24xf32>
    %262 = vector.multi_reduction <add>, %261, %cst_112 [1] : vector<24x24xf32> to vector<24xf32>
    %263 = vector.shape_cast %262 : vector<24xf32> to vector<24x1xf32>
    %264 = tpu.reciprocal %263 {approx = true} : vector<24x1xf32> -> vector<24x1xf32>
    %265 = vector.broadcast %264 : vector<24x1xf32> to vector<24x24xf32>
    %266 = arith.mulf %261, %265 : vector<24x24xf32>
    %267 = arith.truncf %266 : vector<24x24xf32> to vector<24x24xbf16>
    %268 = arith.truncf %249 : vector<24x32xf32> to vector<24x32xbf16>
    %cst_113 = arith.constant dense<0.000000e+00> : vector<24x32xf32>
    %269 = tpu.matmul %267, %268, %cst_113 {dimension_numbers = #tpu.dot_dimension_numbers<[1], [0], [0], [1], [0, 0, 1, 1], [], []>} : vector<24x24xbf16>, vector<24x32xbf16>, vector<24x32xf32> -> vector<24x32xf32>
    %270 = vector.extract_strided_slice %246 {offsets = [0, 32], sizes = [24, 32], strides = [1, 1]} : vector<24x384xf32> to vector<24x32xf32>
    %271 = vector.extract_strided_slice %246 {offsets = [0, 160], sizes = [24, 32], strides = [1, 1]} : vector<24x384xf32> to vector<24x32xf32>
    %272 = vector.extract_strided_slice %246 {offsets = [0, 288], sizes = [24, 32], strides = [1, 1]} : vector<24x384xf32> to vector<24x32xf32>
    %273 = arith.truncf %270 : vector<24x32xf32> to vector<24x32xbf16>
    %274 = arith.truncf %271 : vector<24x32xf32> to vector<24x32xbf16>
    %cst_114 = arith.constant dense<0.000000e+00> : vector<24x24xf32>
    %275 = tpu.matmul %273, %274, %cst_114 {dimension_numbers = #tpu.dot_dimension_numbers<[1], [1], [0], [0], [0, 0, 1, 0], [], []>} : vector<24x32xbf16>, vector<24x32xbf16>, vector<24x24xf32> -> vector<24x24xf32>
    %cst_115 = arith.constant 0.176776692 : f32
    %276 = vector.broadcast %cst_115 : f32 to vector<24x24xf32>
    %277 = arith.mulf %275, %276 : vector<24x24xf32>
    %cst_116 = arith.constant -1.000000e+30 : f32
    %278 = vector.broadcast %cst_116 : f32 to vector<24x24xf32>
    %279 = arith.select %31, %277, %278 : vector<24x24xi1>, vector<24x24xf32>
    %cst_117 = arith.constant dense<0xFF800000> : vector<24xf32>
    %280 = vector.multi_reduction <maximumf>, %279, %cst_117 [1] : vector<24x24xf32> to vector<24xf32>
    %281 = vector.shape_cast %280 : vector<24xf32> to vector<24x1xf32>
    %282 = vector.broadcast %281 : vector<24x1xf32> to vector<24x24xf32>
    %283 = arith.subf %279, %282 : vector<24x24xf32>
    %284 = math.exp %283 : vector<24x24xf32>
    %cst_118 = arith.constant dense<0.000000e+00> : vector<24xf32>
    %285 = vector.multi_reduction <add>, %284, %cst_118 [1] : vector<24x24xf32> to vector<24xf32>
    %286 = vector.shape_cast %285 : vector<24xf32> to vector<24x1xf32>
    %287 = tpu.reciprocal %286 {approx = true} : vector<24x1xf32> -> vector<24x1xf32>
    %288 = vector.broadcast %287 : vector<24x1xf32> to vector<24x24xf32>
    %289 = arith.mulf %284, %288 : vector<24x24xf32>
    %290 = arith.truncf %289 : vector<24x24xf32> to vector<24x24xbf16>
    %291 = arith.truncf %272 : vector<24x32xf32> to vector<24x32xbf16>
    %cst_119 = arith.constant dense<0.000000e+00> : vector<24x32xf32>
    %292 = tpu.matmul %290, %291, %cst_119 {dimension_numbers = #tpu.dot_dimension_numbers<[1], [0], [0], [1], [0, 0, 1, 1], [], []>} : vector<24x24xbf16>, vector<24x32xbf16>, vector<24x32xf32> -> vector<24x32xf32>
    %293 = vector.extract_strided_slice %246 {offsets = [0, 64], sizes = [24, 32], strides = [1, 1]} : vector<24x384xf32> to vector<24x32xf32>
    %294 = vector.extract_strided_slice %246 {offsets = [0, 192], sizes = [24, 32], strides = [1, 1]} : vector<24x384xf32> to vector<24x32xf32>
    %295 = vector.extract_strided_slice %246 {offsets = [0, 320], sizes = [24, 32], strides = [1, 1]} : vector<24x384xf32> to vector<24x32xf32>
    %296 = arith.truncf %293 : vector<24x32xf32> to vector<24x32xbf16>
    %297 = arith.truncf %294 : vector<24x32xf32> to vector<24x32xbf16>
    %cst_120 = arith.constant dense<0.000000e+00> : vector<24x24xf32>
    %298 = tpu.matmul %296, %297, %cst_120 {dimension_numbers = #tpu.dot_dimension_numbers<[1], [1], [0], [0], [0, 0, 1, 0], [], []>} : vector<24x32xbf16>, vector<24x32xbf16>, vector<24x24xf32> -> vector<24x24xf32>
    %cst_121 = arith.constant 0.176776692 : f32
    %299 = vector.broadcast %cst_121 : f32 to vector<24x24xf32>
    %300 = arith.mulf %298, %299 : vector<24x24xf32>
    %cst_122 = arith.constant -1.000000e+30 : f32
    %301 = vector.broadcast %cst_122 : f32 to vector<24x24xf32>
    %302 = arith.select %31, %300, %301 : vector<24x24xi1>, vector<24x24xf32>
    %cst_123 = arith.constant dense<0xFF800000> : vector<24xf32>
    %303 = vector.multi_reduction <maximumf>, %302, %cst_123 [1] : vector<24x24xf32> to vector<24xf32>
    %304 = vector.shape_cast %303 : vector<24xf32> to vector<24x1xf32>
    %305 = vector.broadcast %304 : vector<24x1xf32> to vector<24x24xf32>
    %306 = arith.subf %302, %305 : vector<24x24xf32>
    %307 = math.exp %306 : vector<24x24xf32>
    %cst_124 = arith.constant dense<0.000000e+00> : vector<24xf32>
    %308 = vector.multi_reduction <add>, %307, %cst_124 [1] : vector<24x24xf32> to vector<24xf32>
    %309 = vector.shape_cast %308 : vector<24xf32> to vector<24x1xf32>
    %310 = tpu.reciprocal %309 {approx = true} : vector<24x1xf32> -> vector<24x1xf32>
    %311 = vector.broadcast %310 : vector<24x1xf32> to vector<24x24xf32>
    %312 = arith.mulf %307, %311 : vector<24x24xf32>
    %313 = arith.truncf %312 : vector<24x24xf32> to vector<24x24xbf16>
    %314 = arith.truncf %295 : vector<24x32xf32> to vector<24x32xbf16>
    %cst_125 = arith.constant dense<0.000000e+00> : vector<24x32xf32>
    %315 = tpu.matmul %313, %314, %cst_125 {dimension_numbers = #tpu.dot_dimension_numbers<[1], [0], [0], [1], [0, 0, 1, 1], [], []>} : vector<24x24xbf16>, vector<24x32xbf16>, vector<24x32xf32> -> vector<24x32xf32>
    %316 = vector.extract_strided_slice %246 {offsets = [0, 96], sizes = [24, 32], strides = [1, 1]} : vector<24x384xf32> to vector<24x32xf32>
    %317 = vector.extract_strided_slice %246 {offsets = [0, 224], sizes = [24, 32], strides = [1, 1]} : vector<24x384xf32> to vector<24x32xf32>
    %318 = vector.extract_strided_slice %246 {offsets = [0, 352], sizes = [24, 32], strides = [1, 1]} : vector<24x384xf32> to vector<24x32xf32>
    %319 = arith.truncf %316 : vector<24x32xf32> to vector<24x32xbf16>
    %320 = arith.truncf %317 : vector<24x32xf32> to vector<24x32xbf16>
    %cst_126 = arith.constant dense<0.000000e+00> : vector<24x24xf32>
    %321 = tpu.matmul %319, %320, %cst_126 {dimension_numbers = #tpu.dot_dimension_numbers<[1], [1], [0], [0], [0, 0, 1, 0], [], []>} : vector<24x32xbf16>, vector<24x32xbf16>, vector<24x24xf32> -> vector<24x24xf32>
    %cst_127 = arith.constant 0.176776692 : f32
    %322 = vector.broadcast %cst_127 : f32 to vector<24x24xf32>
    %323 = arith.mulf %321, %322 : vector<24x24xf32>
    %cst_128 = arith.constant -1.000000e+30 : f32
    %324 = vector.broadcast %cst_128 : f32 to vector<24x24xf32>
    %325 = arith.select %31, %323, %324 : vector<24x24xi1>, vector<24x24xf32>
    %cst_129 = arith.constant dense<0xFF800000> : vector<24xf32>
    %326 = vector.multi_reduction <maximumf>, %325, %cst_129 [1] : vector<24x24xf32> to vector<24xf32>
    %327 = vector.shape_cast %326 : vector<24xf32> to vector<24x1xf32>
    %328 = vector.broadcast %327 : vector<24x1xf32> to vector<24x24xf32>
    %329 = arith.subf %325, %328 : vector<24x24xf32>
    %330 = math.exp %329 : vector<24x24xf32>
    %cst_130 = arith.constant dense<0.000000e+00> : vector<24xf32>
    %331 = vector.multi_reduction <add>, %330, %cst_130 [1] : vector<24x24xf32> to vector<24xf32>
    %332 = vector.shape_cast %331 : vector<24xf32> to vector<24x1xf32>
    %333 = tpu.reciprocal %332 {approx = true} : vector<24x1xf32> -> vector<24x1xf32>
    %334 = vector.broadcast %333 : vector<24x1xf32> to vector<24x24xf32>
    %335 = arith.mulf %330, %334 : vector<24x24xf32>
    %336 = arith.truncf %335 : vector<24x24xf32> to vector<24x24xbf16>
    %337 = arith.truncf %318 : vector<24x32xf32> to vector<24x32xbf16>
    %cst_131 = arith.constant dense<0.000000e+00> : vector<24x32xf32>
    %338 = tpu.matmul %336, %337, %cst_131 {dimension_numbers = #tpu.dot_dimension_numbers<[1], [0], [0], [1], [0, 0, 1, 1], [], []>} : vector<24x24xbf16>, vector<24x32xbf16>, vector<24x32xf32> -> vector<24x32xf32>
    %339 = tpu.concatenate %269, %292, %315, %338 in 1 : vector<24x32xf32>, vector<24x32xf32>, vector<24x32xf32>, vector<24x32xf32> -> vector<24x128xf32>
    %340 = arith.truncf %339 : vector<24x128xf32> to vector<24x128xbf16>
    %c1_132 = arith.constant 1 : index
    %c0_133 = arith.constant 0 : index
    %c0_134 = arith.constant 0 : index
    %341 = vector.load %arg10[%c1_132, %c0_133, %c0_134] : memref<2x128x128xbf16, #tpu.memory_space<vmem>>, vector<1x128x128xbf16>
    %342 = vector.shape_cast %341 : vector<1x128x128xbf16> to vector<128x128xbf16>
    %cst_135 = arith.constant dense<0.000000e+00> : vector<24x128xf32>
    %343 = tpu.matmul %340, %342, %cst_135 {dimension_numbers = #tpu.dot_dimension_numbers<[1], [0], [0], [1], [0, 0, 1, 1], [], []>} : vector<24x128xbf16>, vector<128x128xbf16>, vector<24x128xf32> -> vector<24x128xf32>
    %344 = arith.addf %214, %343 : vector<24x128xf32>
    %c1_136 = arith.constant 1 : index
    %c0_137 = arith.constant 0 : index
    %c0_138 = arith.constant 0 : index
    %345 = vector.load %arg11[%c1_136, %c0_137, %c0_138] : memref<2x1x128xf32, #tpu.memory_space<vmem>>, vector<1x1x128xf32>
    %346 = vector.shape_cast %345 : vector<1x1x128xf32> to vector<1x128xf32>
    %347 = vector.broadcast %346 : vector<1x128xf32> to vector<24x128xf32>
    %348 = arith.addf %344, %347 : vector<24x128xf32>
    %c1_139 = arith.constant 1 : index
    %c0_140 = arith.constant 0 : index
    %c0_141 = arith.constant 0 : index
    %349 = vector.load %arg12[%c1_139, %c0_140, %c0_141] : memref<2x1x128xf32, #tpu.memory_space<vmem>>, vector<1x1x128xf32>
    %350 = vector.shape_cast %349 : vector<1x1x128xf32> to vector<1x128xf32>
    %c1_142 = arith.constant 1 : index
    %c0_143 = arith.constant 0 : index
    %c0_144 = arith.constant 0 : index
    %351 = vector.load %arg13[%c1_142, %c0_143, %c0_144] : memref<2x1x128xf32, #tpu.memory_space<vmem>>, vector<1x1x128xf32>
    %352 = vector.shape_cast %351 : vector<1x1x128xf32> to vector<1x128xf32>
    %cst_145 = arith.constant dense<0.000000e+00> : vector<24xf32>
    %353 = vector.multi_reduction <add>, %348, %cst_145 [1] : vector<24x128xf32> to vector<24xf32>
    %354 = vector.shape_cast %353 : vector<24xf32> to vector<24x1xf32>
    %cst_146 = arith.constant 1.280000e+02 : f32
    %355 = vector.broadcast %cst_146 : f32 to vector<24x1xf32>
    %356 = arith.divf %354, %355 : vector<24x1xf32>
    %357 = vector.broadcast %356 : vector<24x1xf32> to vector<24x128xf32>
    %358 = arith.subf %348, %357 : vector<24x128xf32>
    %359 = arith.mulf %358, %358 : vector<24x128xf32>
    %cst_147 = arith.constant dense<0.000000e+00> : vector<24xf32>
    %360 = vector.multi_reduction <add>, %359, %cst_147 [1] : vector<24x128xf32> to vector<24xf32>
    %361 = vector.shape_cast %360 : vector<24xf32> to vector<24x1xf32>
    %cst_148 = arith.constant 1.280000e+02 : f32
    %362 = vector.broadcast %cst_148 : f32 to vector<24x1xf32>
    %363 = arith.divf %361, %362 : vector<24x1xf32>
    %cst_149 = arith.constant 9.99999974E-6 : f32
    %364 = vector.broadcast %cst_149 : f32 to vector<24x1xf32>
    %365 = arith.addf %363, %364 : vector<24x1xf32>
    %366 = math.rsqrt %365 : vector<24x1xf32>
    %367 = vector.broadcast %366 : vector<24x1xf32> to vector<24x128xf32>
    %368 = arith.mulf %358, %367 : vector<24x128xf32>
    %369 = vector.broadcast %350 : vector<1x128xf32> to vector<24x128xf32>
    %370 = arith.mulf %368, %369 : vector<24x128xf32>
    %371 = vector.broadcast %352 : vector<1x128xf32> to vector<24x128xf32>
    %372 = arith.addf %370, %371 : vector<24x128xf32>
    %373 = arith.truncf %372 : vector<24x128xf32> to vector<24x128xbf16>
    %c1_150 = arith.constant 1 : index
    %c0_151 = arith.constant 0 : index
    %c0_152 = arith.constant 0 : index
    %374 = vector.load %arg14[%c1_150, %c0_151, %c0_152] : memref<2x128x512xbf16, #tpu.memory_space<vmem>>, vector<1x128x512xbf16>
    %375 = vector.shape_cast %374 : vector<1x128x512xbf16> to vector<128x512xbf16>
    %cst_153 = arith.constant dense<0.000000e+00> : vector<24x512xf32>
    %376 = tpu.matmul %373, %375, %cst_153 {dimension_numbers = #tpu.dot_dimension_numbers<[1], [0], [0], [1], [0, 0, 1, 1], [], []>} : vector<24x128xbf16>, vector<128x512xbf16>, vector<24x512xf32> -> vector<24x512xf32>
    %c1_154 = arith.constant 1 : index
    %c0_155 = arith.constant 0 : index
    %c0_156 = arith.constant 0 : index
    %377 = vector.load %arg15[%c1_154, %c0_155, %c0_156] : memref<2x1x512xf32, #tpu.memory_space<vmem>>, vector<1x1x512xf32>
    %378 = vector.shape_cast %377 : vector<1x1x512xf32> to vector<1x512xf32>
    %379 = vector.broadcast %378 : vector<1x512xf32> to vector<24x512xf32>
    %380 = arith.addf %376, %379 : vector<24x512xf32>
    %cst_157 = arith.constant 1.702000e+00 : f32
    %381 = vector.broadcast %cst_157 : f32 to vector<24x512xf32>
    %382 = arith.mulf %381, %380 : vector<24x512xf32>
    %383 = arith.negf %382 : vector<24x512xf32>
    %384 = math.exp %383 : vector<24x512xf32>
    %cst_158 = arith.constant 1.000000e+00 : f32
    %385 = vector.broadcast %cst_158 : f32 to vector<24x512xf32>
    %386 = arith.addf %385, %384 : vector<24x512xf32>
    %387 = arith.divf %385, %386 : vector<24x512xf32>
    %388 = arith.mulf %380, %387 : vector<24x512xf32>
    %389 = arith.truncf %388 : vector<24x512xf32> to vector<24x512xbf16>
    %c1_159 = arith.constant 1 : index
    %c0_160 = arith.constant 0 : index
    %c0_161 = arith.constant 0 : index
    %390 = vector.load %arg16[%c1_159, %c0_160, %c0_161] : memref<2x512x128xbf16, #tpu.memory_space<vmem>>, vector<1x512x128xbf16>
    %391 = vector.shape_cast %390 : vector<1x512x128xbf16> to vector<512x128xbf16>
    %cst_162 = arith.constant dense<0.000000e+00> : vector<24x128xf32>
    %392 = tpu.matmul %389, %391, %cst_162 {dimension_numbers = #tpu.dot_dimension_numbers<[1], [0], [0], [1], [0, 0, 1, 1], [], []>} : vector<24x512xbf16>, vector<512x128xbf16>, vector<24x128xf32> -> vector<24x128xf32>
    %393 = arith.addf %348, %392 : vector<24x128xf32>
    %c1_163 = arith.constant 1 : index
    %c0_164 = arith.constant 0 : index
    %c0_165 = arith.constant 0 : index
    %394 = vector.load %arg17[%c1_163, %c0_164, %c0_165] : memref<2x1x128xf32, #tpu.memory_space<vmem>>, vector<1x1x128xf32>
    %395 = vector.shape_cast %394 : vector<1x1x128xf32> to vector<1x128xf32>
    %396 = vector.broadcast %395 : vector<1x128xf32> to vector<24x128xf32>
    %397 = arith.addf %393, %396 : vector<24x128xf32>
    %c0_166 = arith.constant 0 : index
    %c0_167 = arith.constant 0 : index
    %398 = vector.load %arg18[%c0_166, %c0_167] : memref<1x128xf32, #tpu.memory_space<vmem>>, vector<1x128xf32>
    %c0_168 = arith.constant 0 : index
    %c0_169 = arith.constant 0 : index
    %399 = vector.load %arg19[%c0_168, %c0_169] : memref<1x128xf32, #tpu.memory_space<vmem>>, vector<1x128xf32>
    %cst_170 = arith.constant dense<0.000000e+00> : vector<24xf32>
    %400 = vector.multi_reduction <add>, %397, %cst_170 [1] : vector<24x128xf32> to vector<24xf32>
    %401 = vector.shape_cast %400 : vector<24xf32> to vector<24x1xf32>
    %cst_171 = arith.constant 1.280000e+02 : f32
    %402 = vector.broadcast %cst_171 : f32 to vector<24x1xf32>
    %403 = arith.divf %401, %402 : vector<24x1xf32>
    %404 = vector.broadcast %403 : vector<24x1xf32> to vector<24x128xf32>
    %405 = arith.subf %397, %404 : vector<24x128xf32>
    %406 = arith.mulf %405, %405 : vector<24x128xf32>
    %cst_172 = arith.constant dense<0.000000e+00> : vector<24xf32>
    %407 = vector.multi_reduction <add>, %406, %cst_172 [1] : vector<24x128xf32> to vector<24xf32>
    %408 = vector.shape_cast %407 : vector<24xf32> to vector<24x1xf32>
    %cst_173 = arith.constant 1.280000e+02 : f32
    %409 = vector.broadcast %cst_173 : f32 to vector<24x1xf32>
    %410 = arith.divf %408, %409 : vector<24x1xf32>
    %cst_174 = arith.constant 9.99999974E-6 : f32
    %411 = vector.broadcast %cst_174 : f32 to vector<24x1xf32>
    %412 = arith.addf %410, %411 : vector<24x1xf32>
    %413 = math.rsqrt %412 : vector<24x1xf32>
    %414 = vector.broadcast %413 : vector<24x1xf32> to vector<24x128xf32>
    %415 = arith.mulf %405, %414 : vector<24x128xf32>
    %416 = vector.broadcast %398 : vector<1x128xf32> to vector<24x128xf32>
    %417 = arith.mulf %415, %416 : vector<24x128xf32>
    %418 = vector.broadcast %399 : vector<1x128xf32> to vector<24x128xf32>
    %419 = arith.addf %417, %418 : vector<24x128xf32>
    %420 = vector.extract_strided_slice %419 {offsets = [0, 0], sizes = [1, 128], strides = [1, 1]} : vector<24x128xf32> to vector<1x128xf32>
    %421 = arith.truncf %420 : vector<1x128xf32> to vector<1x128xbf16>
    %c0_175 = arith.constant 0 : index
    %c0_176 = arith.constant 0 : index
    %422 = vector.load %arg20[%c0_175, %c0_176] : memref<128x128xbf16, #tpu.memory_space<vmem>>, vector<128x128xbf16>
    %cst_177 = arith.constant dense<0.000000e+00> : vector<1x128xf32>
    %423 = tpu.matmul %421, %422, %cst_177 {dimension_numbers = #tpu.dot_dimension_numbers<[1], [0], [0], [1], [0, 0, 1, 1], [], []>} : vector<1x128xbf16>, vector<128x128xbf16>, vector<1x128xf32> -> vector<1x128xf32>
    %c0_178 = arith.constant 0 : index
    %c0_179 = arith.constant 0 : index
    %424 = vector.load %arg21[%c0_178, %c0_179] : memref<1x128xf32, #tpu.memory_space<vmem>>, vector<1x128xf32>
    %c0_180 = arith.constant 0 : index
    %c0_181 = arith.constant 0 : index
    %425 = vector.load %arg22[%c0_180, %c0_181] : memref<1x128xf32, #tpu.memory_space<vmem>>, vector<1x128xf32>
    %cst_182 = arith.constant dense<0.000000e+00> : vector<1xf32>
    %426 = vector.multi_reduction <add>, %423, %cst_182 [1] : vector<1x128xf32> to vector<1xf32>
    %427 = vector.shape_cast %426 : vector<1xf32> to vector<1x1xf32>
    %cst_183 = arith.constant 1.280000e+02 : f32
    %428 = vector.broadcast %cst_183 : f32 to vector<1x1xf32>
    %429 = arith.divf %427, %428 : vector<1x1xf32>
    %430 = vector.broadcast %429 : vector<1x1xf32> to vector<1x128xf32>
    %431 = arith.subf %423, %430 : vector<1x128xf32>
    %432 = arith.mulf %431, %431 : vector<1x128xf32>
    %cst_184 = arith.constant dense<0.000000e+00> : vector<1xf32>
    %433 = vector.multi_reduction <add>, %432, %cst_184 [1] : vector<1x128xf32> to vector<1xf32>
    %434 = vector.shape_cast %433 : vector<1xf32> to vector<1x1xf32>
    %cst_185 = arith.constant 1.280000e+02 : f32
    %435 = vector.broadcast %cst_185 : f32 to vector<1x1xf32>
    %436 = arith.divf %434, %435 : vector<1x1xf32>
    %cst_186 = arith.constant 9.99999974E-6 : f32
    %437 = vector.broadcast %cst_186 : f32 to vector<1x1xf32>
    %438 = arith.addf %436, %437 : vector<1x1xf32>
    %439 = math.rsqrt %438 : vector<1x1xf32>
    %440 = vector.broadcast %439 : vector<1x1xf32> to vector<1x128xf32>
    %441 = arith.mulf %431, %440 : vector<1x128xf32>
    %442 = arith.mulf %441, %424 : vector<1x128xf32>
    %443 = arith.addf %442, %425 : vector<1x128xf32>
    %444 = arith.truncf %443 : vector<1x128xf32> to vector<1x128xbf16>
    %c0_187 = arith.constant 0 : index
    %c0_188 = arith.constant 0 : index
    %c0_189 = arith.constant 0 : index
    %445 = vector.load %arg23[%c0_187, %c0_188, %c0_189] : memref<2x128x384xbf16, #tpu.memory_space<vmem>>, vector<1x128x384xbf16>
    %446 = vector.shape_cast %445 : vector<1x128x384xbf16> to vector<128x384xbf16>
    %cst_190 = arith.constant dense<0.000000e+00> : vector<1x384xf32>
    %447 = tpu.matmul %444, %446, %cst_190 {dimension_numbers = #tpu.dot_dimension_numbers<[1], [0], [0], [1], [0, 0, 1, 1], [], []>} : vector<1x128xbf16>, vector<128x384xbf16>, vector<1x384xf32> -> vector<1x384xf32>
    %c0_191 = arith.constant 0 : index
    %c0_192 = arith.constant 0 : index
    %c0_193 = arith.constant 0 : index
    %448 = vector.load %arg24[%c0_191, %c0_192, %c0_193] : memref<2x1x384xf32, #tpu.memory_space<vmem>>, vector<1x1x384xf32>
    %449 = vector.shape_cast %448 : vector<1x1x384xf32> to vector<1x384xf32>
    %450 = arith.addf %447, %449 : vector<1x384xf32>
    %451 = vector.extract_strided_slice %450 {offsets = [0, 256], sizes = [1, 128], strides = [1, 1]} : vector<1x384xf32> to vector<1x128xf32>
    %452 = arith.truncf %451 : vector<1x128xf32> to vector<1x128xbf16>
    %c0_194 = arith.constant 0 : index
    %c0_195 = arith.constant 0 : index
    %c0_196 = arith.constant 0 : index
    %453 = vector.load %arg25[%c0_194, %c0_195, %c0_196] : memref<2x128x128xbf16, #tpu.memory_space<vmem>>, vector<1x128x128xbf16>
    %454 = vector.shape_cast %453 : vector<1x128x128xbf16> to vector<128x128xbf16>
    %cst_197 = arith.constant dense<0.000000e+00> : vector<1x128xf32>
    %455 = tpu.matmul %452, %454, %cst_197 {dimension_numbers = #tpu.dot_dimension_numbers<[1], [0], [0], [1], [0, 0, 1, 1], [], []>} : vector<1x128xbf16>, vector<128x128xbf16>, vector<1x128xf32> -> vector<1x128xf32>
    %c0_198 = arith.constant 0 : index
    %c0_199 = arith.constant 0 : index
    %c0_200 = arith.constant 0 : index
    %456 = vector.load %arg26[%c0_198, %c0_199, %c0_200] : memref<2x1x128xf32, #tpu.memory_space<vmem>>, vector<1x1x128xf32>
    %457 = vector.shape_cast %456 : vector<1x1x128xf32> to vector<1x128xf32>
    %458 = arith.addf %455, %457 : vector<1x128xf32>
    %459 = arith.addf %443, %458 : vector<1x128xf32>
    %c0_201 = arith.constant 0 : index
    %c0_202 = arith.constant 0 : index
    %c0_203 = arith.constant 0 : index
    %460 = vector.load %arg27[%c0_201, %c0_202, %c0_203] : memref<2x1x128xf32, #tpu.memory_space<vmem>>, vector<1x1x128xf32>
    %461 = vector.shape_cast %460 : vector<1x1x128xf32> to vector<1x128xf32>
    %c0_204 = arith.constant 0 : index
    %c0_205 = arith.constant 0 : index
    %c0_206 = arith.constant 0 : index
    %462 = vector.load %arg28[%c0_204, %c0_205, %c0_206] : memref<2x1x128xf32, #tpu.memory_space<vmem>>, vector<1x1x128xf32>
    %463 = vector.shape_cast %462 : vector<1x1x128xf32> to vector<1x128xf32>
    %cst_207 = arith.constant dense<0.000000e+00> : vector<1xf32>
    %464 = vector.multi_reduction <add>, %459, %cst_207 [1] : vector<1x128xf32> to vector<1xf32>
    %465 = vector.shape_cast %464 : vector<1xf32> to vector<1x1xf32>
    %cst_208 = arith.constant 1.280000e+02 : f32
    %466 = vector.broadcast %cst_208 : f32 to vector<1x1xf32>
    %467 = arith.divf %465, %466 : vector<1x1xf32>
    %468 = vector.broadcast %467 : vector<1x1xf32> to vector<1x128xf32>
    %469 = arith.subf %459, %468 : vector<1x128xf32>
    %470 = arith.mulf %469, %469 : vector<1x128xf32>
    %cst_209 = arith.constant dense<0.000000e+00> : vector<1xf32>
    %471 = vector.multi_reduction <add>, %470, %cst_209 [1] : vector<1x128xf32> to vector<1xf32>
    %472 = vector.shape_cast %471 : vector<1xf32> to vector<1x1xf32>
    %cst_210 = arith.constant 1.280000e+02 : f32
    %473 = vector.broadcast %cst_210 : f32 to vector<1x1xf32>
    %474 = arith.divf %472, %473 : vector<1x1xf32>
    %cst_211 = arith.constant 9.99999974E-6 : f32
    %475 = vector.broadcast %cst_211 : f32 to vector<1x1xf32>
    %476 = arith.addf %474, %475 : vector<1x1xf32>
    %477 = math.rsqrt %476 : vector<1x1xf32>
    %478 = vector.broadcast %477 : vector<1x1xf32> to vector<1x128xf32>
    %479 = arith.mulf %469, %478 : vector<1x128xf32>
    %480 = arith.mulf %479, %461 : vector<1x128xf32>
    %481 = arith.addf %480, %463 : vector<1x128xf32>
    %482 = arith.truncf %481 : vector<1x128xf32> to vector<1x128xbf16>
    %c0_212 = arith.constant 0 : index
    %c0_213 = arith.constant 0 : index
    %c0_214 = arith.constant 0 : index
    %483 = vector.load %arg29[%c0_212, %c0_213, %c0_214] : memref<2x128x512xbf16, #tpu.memory_space<vmem>>, vector<1x128x512xbf16>
    %484 = vector.shape_cast %483 : vector<1x128x512xbf16> to vector<128x512xbf16>
    %cst_215 = arith.constant dense<0.000000e+00> : vector<1x512xf32>
    %485 = tpu.matmul %482, %484, %cst_215 {dimension_numbers = #tpu.dot_dimension_numbers<[1], [0], [0], [1], [0, 0, 1, 1], [], []>} : vector<1x128xbf16>, vector<128x512xbf16>, vector<1x512xf32> -> vector<1x512xf32>
    %c0_216 = arith.constant 0 : index
    %c0_217 = arith.constant 0 : index
    %c0_218 = arith.constant 0 : index
    %486 = vector.load %arg30[%c0_216, %c0_217, %c0_218] : memref<2x1x512xf32, #tpu.memory_space<vmem>>, vector<1x1x512xf32>
    %487 = vector.shape_cast %486 : vector<1x1x512xf32> to vector<1x512xf32>
    %488 = arith.addf %485, %487 : vector<1x512xf32>
    %cst_219 = arith.constant 0.707106769 : f32
    %489 = vector.broadcast %cst_219 : f32 to vector<1x512xf32>
    %490 = arith.mulf %488, %489 : vector<1x512xf32>
    %491 = math.absf %490 : vector<1x512xf32>
    %cst_220 = arith.constant 0.327591091 : f32
    %492 = vector.broadcast %cst_220 : f32 to vector<1x512xf32>
    %493 = arith.mulf %492, %491 : vector<1x512xf32>
    %cst_221 = arith.constant 1.000000e+00 : f32
    %494 = vector.broadcast %cst_221 : f32 to vector<1x512xf32>
    %495 = arith.addf %494, %493 : vector<1x512xf32>
    %cst_222 = arith.constant 1.000000e+00 : f32
    %496 = vector.broadcast %cst_222 : f32 to vector<1x512xf32>
    %497 = arith.divf %496, %495 : vector<1x512xf32>
    %cst_223 = arith.constant 1.06140542 : f32
    %498 = vector.broadcast %cst_223 : f32 to vector<1x512xf32>
    %499 = arith.mulf %497, %498 : vector<1x512xf32>
    %cst_224 = arith.constant -1.45315206 : f32
    %500 = vector.broadcast %cst_224 : f32 to vector<1x512xf32>
    %501 = arith.addf %500, %499 : vector<1x512xf32>
    %502 = arith.mulf %497, %501 : vector<1x512xf32>
    %cst_225 = arith.constant 1.42141378 : f32
    %503 = vector.broadcast %cst_225 : f32 to vector<1x512xf32>
    %504 = arith.addf %503, %502 : vector<1x512xf32>
    %505 = arith.mulf %497, %504 : vector<1x512xf32>
    %cst_226 = arith.constant -0.284496725 : f32
    %506 = vector.broadcast %cst_226 : f32 to vector<1x512xf32>
    %507 = arith.addf %506, %505 : vector<1x512xf32>
    %508 = arith.mulf %497, %507 : vector<1x512xf32>
    %cst_227 = arith.constant 0.254829586 : f32
    %509 = vector.broadcast %cst_227 : f32 to vector<1x512xf32>
    %510 = arith.addf %509, %508 : vector<1x512xf32>
    %511 = arith.mulf %497, %510 : vector<1x512xf32>
    %cst_228 = arith.constant 0.000000e+00 : f32
    %512 = vector.broadcast %cst_228 : f32 to vector<1x512xf32>
    %513 = arith.subf %512, %491 : vector<1x512xf32>
    %514 = arith.mulf %513, %491 : vector<1x512xf32>
    %515 = math.exp %514 : vector<1x512xf32>
    %516 = arith.mulf %511, %515 : vector<1x512xf32>
    %cst_229 = arith.constant 1.000000e+00 : f32
    %517 = vector.broadcast %cst_229 : f32 to vector<1x512xf32>
    %518 = arith.subf %517, %516 : vector<1x512xf32>
    %cst_230 = arith.constant 0.000000e+00 : f32
    %519 = vector.broadcast %cst_230 : f32 to vector<1x512xf32>
    %520 = arith.cmpf oge, %490, %519 : vector<1x512xf32>
    %cst_231 = arith.constant 0.000000e+00 : f32
    %521 = vector.broadcast %cst_231 : f32 to vector<1x512xf32>
    %522 = arith.subf %521, %518 : vector<1x512xf32>
    %523 = arith.select %520, %518, %522 : vector<1x512xi1>, vector<1x512xf32>
    %cst_232 = arith.constant 5.000000e-01 : f32
    %524 = vector.broadcast %cst_232 : f32 to vector<1x512xf32>
    %525 = arith.mulf %524, %488 : vector<1x512xf32>
    %cst_233 = arith.constant 1.000000e+00 : f32
    %526 = vector.broadcast %cst_233 : f32 to vector<1x512xf32>
    %527 = arith.addf %526, %523 : vector<1x512xf32>
    %528 = arith.mulf %525, %527 : vector<1x512xf32>
    %529 = arith.truncf %528 : vector<1x512xf32> to vector<1x512xbf16>
    %c0_234 = arith.constant 0 : index
    %c0_235 = arith.constant 0 : index
    %c0_236 = arith.constant 0 : index
    %530 = vector.load %arg31[%c0_234, %c0_235, %c0_236] : memref<2x512x128xbf16, #tpu.memory_space<vmem>>, vector<1x512x128xbf16>
    %531 = vector.shape_cast %530 : vector<1x512x128xbf16> to vector<512x128xbf16>
    %cst_237 = arith.constant dense<0.000000e+00> : vector<1x128xf32>
    %532 = tpu.matmul %529, %531, %cst_237 {dimension_numbers = #tpu.dot_dimension_numbers<[1], [0], [0], [1], [0, 0, 1, 1], [], []>} : vector<1x512xbf16>, vector<512x128xbf16>, vector<1x128xf32> -> vector<1x128xf32>
    %c0_238 = arith.constant 0 : index
    %c0_239 = arith.constant 0 : index
    %c0_240 = arith.constant 0 : index
    %533 = vector.load %arg32[%c0_238, %c0_239, %c0_240] : memref<2x1x128xf32, #tpu.memory_space<vmem>>, vector<1x1x128xf32>
    %534 = vector.shape_cast %533 : vector<1x1x128xf32> to vector<1x128xf32>
    %535 = arith.addf %532, %534 : vector<1x128xf32>
    %536 = arith.addf %481, %535 : vector<1x128xf32>
    %c0_241 = arith.constant 0 : index
    %c0_242 = arith.constant 0 : index
    %c0_243 = arith.constant 0 : index
    %537 = vector.load %arg33[%c0_241, %c0_242, %c0_243] : memref<2x1x128xf32, #tpu.memory_space<vmem>>, vector<1x1x128xf32>
    %538 = vector.shape_cast %537 : vector<1x1x128xf32> to vector<1x128xf32>
    %c0_244 = arith.constant 0 : index
    %c0_245 = arith.constant 0 : index
    %c0_246 = arith.constant 0 : index
    %539 = vector.load %arg34[%c0_244, %c0_245, %c0_246] : memref<2x1x128xf32, #tpu.memory_space<vmem>>, vector<1x1x128xf32>
    %540 = vector.shape_cast %539 : vector<1x1x128xf32> to vector<1x128xf32>
    %cst_247 = arith.constant dense<0.000000e+00> : vector<1xf32>
    %541 = vector.multi_reduction <add>, %536, %cst_247 [1] : vector<1x128xf32> to vector<1xf32>
    %542 = vector.shape_cast %541 : vector<1xf32> to vector<1x1xf32>
    %cst_248 = arith.constant 1.280000e+02 : f32
    %543 = vector.broadcast %cst_248 : f32 to vector<1x1xf32>
    %544 = arith.divf %542, %543 : vector<1x1xf32>
    %545 = vector.broadcast %544 : vector<1x1xf32> to vector<1x128xf32>
    %546 = arith.subf %536, %545 : vector<1x128xf32>
    %547 = arith.mulf %546, %546 : vector<1x128xf32>
    %cst_249 = arith.constant dense<0.000000e+00> : vector<1xf32>
    %548 = vector.multi_reduction <add>, %547, %cst_249 [1] : vector<1x128xf32> to vector<1xf32>
    %549 = vector.shape_cast %548 : vector<1xf32> to vector<1x1xf32>
    %cst_250 = arith.constant 1.280000e+02 : f32
    %550 = vector.broadcast %cst_250 : f32 to vector<1x1xf32>
    %551 = arith.divf %549, %550 : vector<1x1xf32>
    %cst_251 = arith.constant 9.99999974E-6 : f32
    %552 = vector.broadcast %cst_251 : f32 to vector<1x1xf32>
    %553 = arith.addf %551, %552 : vector<1x1xf32>
    %554 = math.rsqrt %553 : vector<1x1xf32>
    %555 = vector.broadcast %554 : vector<1x1xf32> to vector<1x128xf32>
    %556 = arith.mulf %546, %555 : vector<1x128xf32>
    %557 = arith.mulf %556, %538 : vector<1x128xf32>
    %558 = arith.addf %557, %540 : vector<1x128xf32>
    %559 = arith.truncf %558 : vector<1x128xf32> to vector<1x128xbf16>
    %c1_252 = arith.constant 1 : index
    %c0_253 = arith.constant 0 : index
    %c0_254 = arith.constant 0 : index
    %560 = vector.load %arg23[%c1_252, %c0_253, %c0_254] : memref<2x128x384xbf16, #tpu.memory_space<vmem>>, vector<1x128x384xbf16>
    %561 = vector.shape_cast %560 : vector<1x128x384xbf16> to vector<128x384xbf16>
    %cst_255 = arith.constant dense<0.000000e+00> : vector<1x384xf32>
    %562 = tpu.matmul %559, %561, %cst_255 {dimension_numbers = #tpu.dot_dimension_numbers<[1], [0], [0], [1], [0, 0, 1, 1], [], []>} : vector<1x128xbf16>, vector<128x384xbf16>, vector<1x384xf32> -> vector<1x384xf32>
    %c1_256 = arith.constant 1 : index
    %c0_257 = arith.constant 0 : index
    %c0_258 = arith.constant 0 : index
    %563 = vector.load %arg24[%c1_256, %c0_257, %c0_258] : memref<2x1x384xf32, #tpu.memory_space<vmem>>, vector<1x1x384xf32>
    %564 = vector.shape_cast %563 : vector<1x1x384xf32> to vector<1x384xf32>
    %565 = arith.addf %562, %564 : vector<1x384xf32>
    %566 = vector.extract_strided_slice %565 {offsets = [0, 256], sizes = [1, 128], strides = [1, 1]} : vector<1x384xf32> to vector<1x128xf32>
    %567 = arith.truncf %566 : vector<1x128xf32> to vector<1x128xbf16>
    %c1_259 = arith.constant 1 : index
    %c0_260 = arith.constant 0 : index
    %c0_261 = arith.constant 0 : index
    %568 = vector.load %arg25[%c1_259, %c0_260, %c0_261] : memref<2x128x128xbf16, #tpu.memory_space<vmem>>, vector<1x128x128xbf16>
    %569 = vector.shape_cast %568 : vector<1x128x128xbf16> to vector<128x128xbf16>
    %cst_262 = arith.constant dense<0.000000e+00> : vector<1x128xf32>
    %570 = tpu.matmul %567, %569, %cst_262 {dimension_numbers = #tpu.dot_dimension_numbers<[1], [0], [0], [1], [0, 0, 1, 1], [], []>} : vector<1x128xbf16>, vector<128x128xbf16>, vector<1x128xf32> -> vector<1x128xf32>
    %c1_263 = arith.constant 1 : index
    %c0_264 = arith.constant 0 : index
    %c0_265 = arith.constant 0 : index
    %571 = vector.load %arg26[%c1_263, %c0_264, %c0_265] : memref<2x1x128xf32, #tpu.memory_space<vmem>>, vector<1x1x128xf32>
    %572 = vector.shape_cast %571 : vector<1x1x128xf32> to vector<1x128xf32>
    %573 = arith.addf %570, %572 : vector<1x128xf32>
    %574 = arith.addf %558, %573 : vector<1x128xf32>
    %c1_266 = arith.constant 1 : index
    %c0_267 = arith.constant 0 : index
    %c0_268 = arith.constant 0 : index
    %575 = vector.load %arg27[%c1_266, %c0_267, %c0_268] : memref<2x1x128xf32, #tpu.memory_space<vmem>>, vector<1x1x128xf32>
    %576 = vector.shape_cast %575 : vector<1x1x128xf32> to vector<1x128xf32>
    %c1_269 = arith.constant 1 : index
    %c0_270 = arith.constant 0 : index
    %c0_271 = arith.constant 0 : index
    %577 = vector.load %arg28[%c1_269, %c0_270, %c0_271] : memref<2x1x128xf32, #tpu.memory_space<vmem>>, vector<1x1x128xf32>
    %578 = vector.shape_cast %577 : vector<1x1x128xf32> to vector<1x128xf32>
    %cst_272 = arith.constant dense<0.000000e+00> : vector<1xf32>
    %579 = vector.multi_reduction <add>, %574, %cst_272 [1] : vector<1x128xf32> to vector<1xf32>
    %580 = vector.shape_cast %579 : vector<1xf32> to vector<1x1xf32>
    %cst_273 = arith.constant 1.280000e+02 : f32
    %581 = vector.broadcast %cst_273 : f32 to vector<1x1xf32>
    %582 = arith.divf %580, %581 : vector<1x1xf32>
    %583 = vector.broadcast %582 : vector<1x1xf32> to vector<1x128xf32>
    %584 = arith.subf %574, %583 : vector<1x128xf32>
    %585 = arith.mulf %584, %584 : vector<1x128xf32>
    %cst_274 = arith.constant dense<0.000000e+00> : vector<1xf32>
    %586 = vector.multi_reduction <add>, %585, %cst_274 [1] : vector<1x128xf32> to vector<1xf32>
    %587 = vector.shape_cast %586 : vector<1xf32> to vector<1x1xf32>
    %cst_275 = arith.constant 1.280000e+02 : f32
    %588 = vector.broadcast %cst_275 : f32 to vector<1x1xf32>
    %589 = arith.divf %587, %588 : vector<1x1xf32>
    %cst_276 = arith.constant 9.99999974E-6 : f32
    %590 = vector.broadcast %cst_276 : f32 to vector<1x1xf32>
    %591 = arith.addf %589, %590 : vector<1x1xf32>
    %592 = math.rsqrt %591 : vector<1x1xf32>
    %593 = vector.broadcast %592 : vector<1x1xf32> to vector<1x128xf32>
    %594 = arith.mulf %584, %593 : vector<1x128xf32>
    %595 = arith.mulf %594, %576 : vector<1x128xf32>
    %596 = arith.addf %595, %578 : vector<1x128xf32>
    %597 = arith.truncf %596 : vector<1x128xf32> to vector<1x128xbf16>
    %c1_277 = arith.constant 1 : index
    %c0_278 = arith.constant 0 : index
    %c0_279 = arith.constant 0 : index
    %598 = vector.load %arg29[%c1_277, %c0_278, %c0_279] : memref<2x128x512xbf16, #tpu.memory_space<vmem>>, vector<1x128x512xbf16>
    %599 = vector.shape_cast %598 : vector<1x128x512xbf16> to vector<128x512xbf16>
    %cst_280 = arith.constant dense<0.000000e+00> : vector<1x512xf32>
    %600 = tpu.matmul %597, %599, %cst_280 {dimension_numbers = #tpu.dot_dimension_numbers<[1], [0], [0], [1], [0, 0, 1, 1], [], []>} : vector<1x128xbf16>, vector<128x512xbf16>, vector<1x512xf32> -> vector<1x512xf32>
    %c1_281 = arith.constant 1 : index
    %c0_282 = arith.constant 0 : index
    %c0_283 = arith.constant 0 : index
    %601 = vector.load %arg30[%c1_281, %c0_282, %c0_283] : memref<2x1x512xf32, #tpu.memory_space<vmem>>, vector<1x1x512xf32>
    %602 = vector.shape_cast %601 : vector<1x1x512xf32> to vector<1x512xf32>
    %603 = arith.addf %600, %602 : vector<1x512xf32>
    %cst_284 = arith.constant 0.707106769 : f32
    %604 = vector.broadcast %cst_284 : f32 to vector<1x512xf32>
    %605 = arith.mulf %603, %604 : vector<1x512xf32>
    %606 = math.absf %605 : vector<1x512xf32>
    %cst_285 = arith.constant 0.327591091 : f32
    %607 = vector.broadcast %cst_285 : f32 to vector<1x512xf32>
    %608 = arith.mulf %607, %606 : vector<1x512xf32>
    %cst_286 = arith.constant 1.000000e+00 : f32
    %609 = vector.broadcast %cst_286 : f32 to vector<1x512xf32>
    %610 = arith.addf %609, %608 : vector<1x512xf32>
    %cst_287 = arith.constant 1.000000e+00 : f32
    %611 = vector.broadcast %cst_287 : f32 to vector<1x512xf32>
    %612 = arith.divf %611, %610 : vector<1x512xf32>
    %cst_288 = arith.constant 1.06140542 : f32
    %613 = vector.broadcast %cst_288 : f32 to vector<1x512xf32>
    %614 = arith.mulf %612, %613 : vector<1x512xf32>
    %cst_289 = arith.constant -1.45315206 : f32
    %615 = vector.broadcast %cst_289 : f32 to vector<1x512xf32>
    %616 = arith.addf %615, %614 : vector<1x512xf32>
    %617 = arith.mulf %612, %616 : vector<1x512xf32>
    %cst_290 = arith.constant 1.42141378 : f32
    %618 = vector.broadcast %cst_290 : f32 to vector<1x512xf32>
    %619 = arith.addf %618, %617 : vector<1x512xf32>
    %620 = arith.mulf %612, %619 : vector<1x512xf32>
    %cst_291 = arith.constant -0.284496725 : f32
    %621 = vector.broadcast %cst_291 : f32 to vector<1x512xf32>
    %622 = arith.addf %621, %620 : vector<1x512xf32>
    %623 = arith.mulf %612, %622 : vector<1x512xf32>
    %cst_292 = arith.constant 0.254829586 : f32
    %624 = vector.broadcast %cst_292 : f32 to vector<1x512xf32>
    %625 = arith.addf %624, %623 : vector<1x512xf32>
    %626 = arith.mulf %612, %625 : vector<1x512xf32>
    %cst_293 = arith.constant 0.000000e+00 : f32
    %627 = vector.broadcast %cst_293 : f32 to vector<1x512xf32>
    %628 = arith.subf %627, %606 : vector<1x512xf32>
    %629 = arith.mulf %628, %606 : vector<1x512xf32>
    %630 = math.exp %629 : vector<1x512xf32>
    %631 = arith.mulf %626, %630 : vector<1x512xf32>
    %cst_294 = arith.constant 1.000000e+00 : f32
    %632 = vector.broadcast %cst_294 : f32 to vector<1x512xf32>
    %633 = arith.subf %632, %631 : vector<1x512xf32>
    %cst_295 = arith.constant 0.000000e+00 : f32
    %634 = vector.broadcast %cst_295 : f32 to vector<1x512xf32>
    %635 = arith.cmpf oge, %605, %634 : vector<1x512xf32>
    %cst_296 = arith.constant 0.000000e+00 : f32
    %636 = vector.broadcast %cst_296 : f32 to vector<1x512xf32>
    %637 = arith.subf %636, %633 : vector<1x512xf32>
    %638 = arith.select %635, %633, %637 : vector<1x512xi1>, vector<1x512xf32>
    %cst_297 = arith.constant 5.000000e-01 : f32
    %639 = vector.broadcast %cst_297 : f32 to vector<1x512xf32>
    %640 = arith.mulf %639, %603 : vector<1x512xf32>
    %cst_298 = arith.constant 1.000000e+00 : f32
    %641 = vector.broadcast %cst_298 : f32 to vector<1x512xf32>
    %642 = arith.addf %641, %638 : vector<1x512xf32>
    %643 = arith.mulf %640, %642 : vector<1x512xf32>
    %644 = arith.truncf %643 : vector<1x512xf32> to vector<1x512xbf16>
    %c1_299 = arith.constant 1 : index
    %c0_300 = arith.constant 0 : index
    %c0_301 = arith.constant 0 : index
    %645 = vector.load %arg31[%c1_299, %c0_300, %c0_301] : memref<2x512x128xbf16, #tpu.memory_space<vmem>>, vector<1x512x128xbf16>
    %646 = vector.shape_cast %645 : vector<1x512x128xbf16> to vector<512x128xbf16>
    %cst_302 = arith.constant dense<0.000000e+00> : vector<1x128xf32>
    %647 = tpu.matmul %644, %646, %cst_302 {dimension_numbers = #tpu.dot_dimension_numbers<[1], [0], [0], [1], [0, 0, 1, 1], [], []>} : vector<1x512xbf16>, vector<512x128xbf16>, vector<1x128xf32> -> vector<1x128xf32>
    %c1_303 = arith.constant 1 : index
    %c0_304 = arith.constant 0 : index
    %c0_305 = arith.constant 0 : index
    %648 = vector.load %arg32[%c1_303, %c0_304, %c0_305] : memref<2x1x128xf32, #tpu.memory_space<vmem>>, vector<1x1x128xf32>
    %649 = vector.shape_cast %648 : vector<1x1x128xf32> to vector<1x128xf32>
    %650 = arith.addf %647, %649 : vector<1x128xf32>
    %651 = arith.addf %596, %650 : vector<1x128xf32>
    %c1_306 = arith.constant 1 : index
    %c0_307 = arith.constant 0 : index
    %c0_308 = arith.constant 0 : index
    %652 = vector.load %arg33[%c1_306, %c0_307, %c0_308] : memref<2x1x128xf32, #tpu.memory_space<vmem>>, vector<1x1x128xf32>
    %653 = vector.shape_cast %652 : vector<1x1x128xf32> to vector<1x128xf32>
    %c1_309 = arith.constant 1 : index
    %c0_310 = arith.constant 0 : index
    %c0_311 = arith.constant 0 : index
    %654 = vector.load %arg34[%c1_309, %c0_310, %c0_311] : memref<2x1x128xf32, #tpu.memory_space<vmem>>, vector<1x1x128xf32>
    %655 = vector.shape_cast %654 : vector<1x1x128xf32> to vector<1x128xf32>
    %cst_312 = arith.constant dense<0.000000e+00> : vector<1xf32>
    %656 = vector.multi_reduction <add>, %651, %cst_312 [1] : vector<1x128xf32> to vector<1xf32>
    %657 = vector.shape_cast %656 : vector<1xf32> to vector<1x1xf32>
    %cst_313 = arith.constant 1.280000e+02 : f32
    %658 = vector.broadcast %cst_313 : f32 to vector<1x1xf32>
    %659 = arith.divf %657, %658 : vector<1x1xf32>
    %660 = vector.broadcast %659 : vector<1x1xf32> to vector<1x128xf32>
    %661 = arith.subf %651, %660 : vector<1x128xf32>
    %662 = arith.mulf %661, %661 : vector<1x128xf32>
    %cst_314 = arith.constant dense<0.000000e+00> : vector<1xf32>
    %663 = vector.multi_reduction <add>, %662, %cst_314 [1] : vector<1x128xf32> to vector<1xf32>
    %664 = vector.shape_cast %663 : vector<1xf32> to vector<1x1xf32>
    %cst_315 = arith.constant 1.280000e+02 : f32
    %665 = vector.broadcast %cst_315 : f32 to vector<1x1xf32>
    %666 = arith.divf %664, %665 : vector<1x1xf32>
    %cst_316 = arith.constant 9.99999974E-6 : f32
    %667 = vector.broadcast %cst_316 : f32 to vector<1x1xf32>
    %668 = arith.addf %666, %667 : vector<1x1xf32>
    %669 = math.rsqrt %668 : vector<1x1xf32>
    %670 = vector.broadcast %669 : vector<1x1xf32> to vector<1x128xf32>
    %671 = arith.mulf %661, %670 : vector<1x128xf32>
    %672 = arith.mulf %671, %653 : vector<1x128xf32>
    %673 = arith.addf %672, %655 : vector<1x128xf32>
    %674 = arith.truncf %673 : vector<1x128xf32> to vector<1x128xbf16>
    %c0_317 = arith.constant 0 : index
    %c0_318 = arith.constant 0 : index
    %675 = vector.load %arg35[%c0_317, %c0_318] : memref<128x64xbf16, #tpu.memory_space<vmem>>, vector<128x64xbf16>
    %cst_319 = arith.constant dense<0.000000e+00> : vector<1x64xf32>
    %676 = tpu.matmul %674, %675, %cst_319 {dimension_numbers = #tpu.dot_dimension_numbers<[1], [0], [0], [1], [0, 0, 1, 1], [], []>} : vector<1x128xbf16>, vector<128x64xbf16>, vector<1x64xf32> -> vector<1x64xf32>
    %c0_320 = arith.constant 0 : index
    %c0_321 = arith.constant 0 : index
    %677 = vector.load %arg36[%c0_320, %c0_321] : memref<1x64xf32, #tpu.memory_space<vmem>>, vector<1x64xf32>
    %678 = arith.addf %676, %677 : vector<1x64xf32>
    %cst_322 = arith.constant 0.707106769 : f32
    %679 = vector.broadcast %cst_322 : f32 to vector<1x64xf32>
    %680 = arith.mulf %678, %679 : vector<1x64xf32>
    %681 = math.absf %680 : vector<1x64xf32>
    %cst_323 = arith.constant 0.327591091 : f32
    %682 = vector.broadcast %cst_323 : f32 to vector<1x64xf32>
    %683 = arith.mulf %682, %681 : vector<1x64xf32>
    %cst_324 = arith.constant 1.000000e+00 : f32
    %684 = vector.broadcast %cst_324 : f32 to vector<1x64xf32>
    %685 = arith.addf %684, %683 : vector<1x64xf32>
    %cst_325 = arith.constant 1.000000e+00 : f32
    %686 = vector.broadcast %cst_325 : f32 to vector<1x64xf32>
    %687 = arith.divf %686, %685 : vector<1x64xf32>
    %cst_326 = arith.constant 1.06140542 : f32
    %688 = vector.broadcast %cst_326 : f32 to vector<1x64xf32>
    %689 = arith.mulf %687, %688 : vector<1x64xf32>
    %cst_327 = arith.constant -1.45315206 : f32
    %690 = vector.broadcast %cst_327 : f32 to vector<1x64xf32>
    %691 = arith.addf %690, %689 : vector<1x64xf32>
    %692 = arith.mulf %687, %691 : vector<1x64xf32>
    %cst_328 = arith.constant 1.42141378 : f32
    %693 = vector.broadcast %cst_328 : f32 to vector<1x64xf32>
    %694 = arith.addf %693, %692 : vector<1x64xf32>
    %695 = arith.mulf %687, %694 : vector<1x64xf32>
    %cst_329 = arith.constant -0.284496725 : f32
    %696 = vector.broadcast %cst_329 : f32 to vector<1x64xf32>
    %697 = arith.addf %696, %695 : vector<1x64xf32>
    %698 = arith.mulf %687, %697 : vector<1x64xf32>
    %cst_330 = arith.constant 0.254829586 : f32
    %699 = vector.broadcast %cst_330 : f32 to vector<1x64xf32>
    %700 = arith.addf %699, %698 : vector<1x64xf32>
    %701 = arith.mulf %687, %700 : vector<1x64xf32>
    %cst_331 = arith.constant 0.000000e+00 : f32
    %702 = vector.broadcast %cst_331 : f32 to vector<1x64xf32>
    %703 = arith.subf %702, %681 : vector<1x64xf32>
    %704 = arith.mulf %703, %681 : vector<1x64xf32>
    %705 = math.exp %704 : vector<1x64xf32>
    %706 = arith.mulf %701, %705 : vector<1x64xf32>
    %cst_332 = arith.constant 1.000000e+00 : f32
    %707 = vector.broadcast %cst_332 : f32 to vector<1x64xf32>
    %708 = arith.subf %707, %706 : vector<1x64xf32>
    %cst_333 = arith.constant 0.000000e+00 : f32
    %709 = vector.broadcast %cst_333 : f32 to vector<1x64xf32>
    %710 = arith.cmpf oge, %680, %709 : vector<1x64xf32>
    %cst_334 = arith.constant 0.000000e+00 : f32
    %711 = vector.broadcast %cst_334 : f32 to vector<1x64xf32>
    %712 = arith.subf %711, %708 : vector<1x64xf32>
    %713 = arith.select %710, %708, %712 : vector<1x64xi1>, vector<1x64xf32>
    %cst_335 = arith.constant 5.000000e-01 : f32
    %714 = vector.broadcast %cst_335 : f32 to vector<1x64xf32>
    %715 = arith.mulf %714, %678 : vector<1x64xf32>
    %cst_336 = arith.constant 1.000000e+00 : f32
    %716 = vector.broadcast %cst_336 : f32 to vector<1x64xf32>
    %717 = arith.addf %716, %713 : vector<1x64xf32>
    %718 = arith.mulf %715, %717 : vector<1x64xf32>
    %719 = arith.truncf %718 : vector<1x64xf32> to vector<1x64xbf16>
    %c0_337 = arith.constant 0 : index
    %c0_338 = arith.constant 0 : index
    %720 = vector.load %arg37[%c0_337, %c0_338] : memref<64x128xbf16, #tpu.memory_space<vmem>>, vector<64x128xbf16>
    %cst_339 = arith.constant dense<0.000000e+00> : vector<1x128xf32>
    %721 = tpu.matmul %719, %720, %cst_339 {dimension_numbers = #tpu.dot_dimension_numbers<[1], [0], [0], [1], [0, 0, 1, 1], [], []>} : vector<1x64xbf16>, vector<64x128xbf16>, vector<1x128xf32> -> vector<1x128xf32>
    %c0_340 = arith.constant 0 : index
    %c0_341 = arith.constant 0 : index
    %722 = vector.load %arg38[%c0_340, %c0_341] : memref<1x128xf32, #tpu.memory_space<vmem>>, vector<1x128xf32>
    %723 = arith.addf %721, %722 : vector<1x128xf32>
    %c0_342 = arith.constant 0 : index
    %c0_343 = arith.constant 0 : index
    %c0_344 = arith.constant 0 : index
    %724 = vector.load %arg39[%c0_342, %c0_343, %c0_344] : memref<1x1x128xf32, #tpu.memory_space<vmem>>, vector<1x1x128xf32>
    %725 = vector.shape_cast %724 : vector<1x1x128xf32> to vector<1x128xf32>
    %726 = vector.shape_cast %723 : vector<1x128xf32> to vector<1x1x128xf32>
    tpu.vector_store %arg39[%c0_342, %c0_343, %c0_344], %726 {strides = array<i32>} : memref<1x1x128xf32, #tpu.memory_space<vmem>>, vector<1x1x128xf32>,
    return
  }
  func.func @transform_0(%arg0: i32) -> (i32, i32, i32) {
    %c0_i32 = arith.constant 0 : i32
    %c0_i32_0 = arith.constant 0 : i32
    %c0_i32_1 = arith.constant 0 : i32
    return %arg0, %c0_i32, %c0_i32_0 : i32, i32, i32
  }
  func.func @transform_1(%arg0: i32) -> (i32, i32) {
    %c0_i32 = arith.constant 0 : i32
    %c0_i32_0 = arith.constant 0 : i32
    %c0_i32_1 = arith.constant 0 : i32
    return %c0_i32, %c0_i32_0 : i32, i32
  }
  func.func @transform_2(%arg0: i32) -> (i32, i32) {
    %c0_i32 = arith.constant 0 : i32
    %c0_i32_0 = arith.constant 0 : i32
    %c0_i32_1 = arith.constant 0 : i32
    return %c0_i32, %c0_i32_0 : i32, i32
  }
  func.func @transform_3(%arg0: i32) -> (i32, i32) {
    %c0_i32 = arith.constant 0 : i32
    %c0_i32_0 = arith.constant 0 : i32
    %c0_i32_1 = arith.constant 0 : i32
    return %c0_i32, %c0_i32_0 : i32, i32
  }
  func.func @transform_4(%arg0: i32) -> (i32, i32) {
    %c0_i32 = arith.constant 0 : i32
    %c0_i32_0 = arith.constant 0 : i32
    %c0_i32_1 = arith.constant 0 : i32
    return %c0_i32, %c0_i32_0 : i32, i32
  }
  func.func @transform_5(%arg0: i32) -> (i32, i32, i32) {
    %c0_i32 = arith.constant 0 : i32
    %c0_i32_0 = arith.constant 0 : i32
    %c0_i32_1 = arith.constant 0 : i32
    %c0_i32_2 = arith.constant 0 : i32
    return %c0_i32, %c0_i32_0, %c0_i32_1 : i32, i32, i32
  }
  func.func @transform_6(%arg0: i32) -> (i32, i32, i32) {
    %c0_i32 = arith.constant 0 : i32
    %c0_i32_0 = arith.constant 0 : i32
    %c0_i32_1 = arith.constant 0 : i32
    %c0_i32_2 = arith.constant 0 : i32
    return %c0_i32, %c0_i32_0, %c0_i32_1 : i32, i32, i32
  }
  func.func @transform_7(%arg0: i32) -> (i32, i32, i32) {
    %c0_i32 = arith.constant 0 : i32
    %c0_i32_0 = arith.constant 0 : i32
    %c0_i32_1 = arith.constant 0 : i32
    %c0_i32_2 = arith.constant 0 : i32
    return %c0_i32, %c0_i32_0, %c0_i32_1 : i32, i32, i32
  }
  func.func @transform_8(%arg0: i32) -> (i32, i32, i32) {
    %c0_i32 = arith.constant 0 : i32
    %c0_i32_0 = arith.constant 0 : i32
    %c0_i32_1 = arith.constant 0 : i32
    %c0_i32_2 = arith.constant 0 : i32
    return %c0_i32, %c0_i32_0, %c0_i32_1 : i32, i32, i32
  }
  func.func @transform_9(%arg0: i32) -> (i32, i32, i32) {
    %c0_i32 = arith.constant 0 : i32
    %c0_i32_0 = arith.constant 0 : i32
    %c0_i32_1 = arith.constant 0 : i32
    %c0_i32_2 = arith.constant 0 : i32
    return %c0_i32, %c0_i32_0, %c0_i32_1 : i32, i32, i32
  }
  func.func @transform_10(%arg0: i32) -> (i32, i32, i32) {
    %c0_i32 = arith.constant 0 : i32
    %c0_i32_0 = arith.constant 0 : i32
    %c0_i32_1 = arith.constant 0 : i32
    %c0_i32_2 = arith.constant 0 : i32
    return %c0_i32, %c0_i32_0, %c0_i32_1 : i32, i32, i32
  }
  func.func @transform_11(%arg0: i32) -> (i32, i32, i32) {
    %c0_i32 = arith.constant 0 : i32
    %c0_i32_0 = arith.constant 0 : i32
    %c0_i32_1 = arith.constant 0 : i32
    %c0_i32_2 = arith.constant 0 : i32
    return %c0_i32, %c0_i32_0, %c0_i32_1 : i32, i32, i32
  }
  func.func @transform_12(%arg0: i32) -> (i32, i32, i32) {
    %c0_i32 = arith.constant 0 : i32
    %c0_i32_0 = arith.constant 0 : i32
    %c0_i32_1 = arith.constant 0 : i32
    %c0_i32_2 = arith.constant 0 : i32
    return %c0_i32, %c0_i32_0, %c0_i32_1 : i32, i32, i32
  }
  func.func @transform_13(%arg0: i32) -> (i32, i32, i32) {
    %c0_i32 = arith.constant 0 : i32
    %c0_i32_0 = arith.constant 0 : i32
    %c0_i32_1 = arith.constant 0 : i32
    %c0_i32_2 = arith.constant 0 : i32
    return %c0_i32, %c0_i32_0, %c0_i32_1 : i32, i32, i32
  }
  func.func @transform_14(%arg0: i32) -> (i32, i32, i32) {
    %c0_i32 = arith.constant 0 : i32
    %c0_i32_0 = arith.constant 0 : i32
    %c0_i32_1 = arith.constant 0 : i32
    %c0_i32_2 = arith.constant 0 : i32
    return %c0_i32, %c0_i32_0, %c0_i32_1 : i32, i32, i32
  }
  func.func @transform_15(%arg0: i32) -> (i32, i32, i32) {
    %c0_i32 = arith.constant 0 : i32
    %c0_i32_0 = arith.constant 0 : i32
    %c0_i32_1 = arith.constant 0 : i32
    %c0_i32_2 = arith.constant 0 : i32
    return %c0_i32, %c0_i32_0, %c0_i32_1 : i32, i32, i32
  }
  func.func @transform_16(%arg0: i32) -> (i32, i32, i32) {
    %c0_i32 = arith.constant 0 : i32
    %c0_i32_0 = arith.constant 0 : i32
    %c0_i32_1 = arith.constant 0 : i32
    %c0_i32_2 = arith.constant 0 : i32
    return %c0_i32, %c0_i32_0, %c0_i32_1 : i32, i32, i32
  }
  func.func @transform_17(%arg0: i32) -> (i32, i32) {
    %c0_i32 = arith.constant 0 : i32
    %c0_i32_0 = arith.constant 0 : i32
    %c0_i32_1 = arith.constant 0 : i32
    return %c0_i32, %c0_i32_0 : i32, i32
  }
  func.func @transform_18(%arg0: i32) -> (i32, i32) {
    %c0_i32 = arith.constant 0 : i32
    %c0_i32_0 = arith.constant 0 : i32
    %c0_i32_1 = arith.constant 0 : i32
    return %c0_i32, %c0_i32_0 : i32, i32
  }
  func.func @transform_19(%arg0: i32) -> (i32, i32) {
    %c0_i32 = arith.constant 0 : i32
    %c0_i32_0 = arith.constant 0 : i32
    %c0_i32_1 = arith.constant 0 : i32
    return %c0_i32, %c0_i32_0 : i32, i32
  }
  func.func @transform_20(%arg0: i32) -> (i32, i32) {
    %c0_i32 = arith.constant 0 : i32
    %c0_i32_0 = arith.constant 0 : i32
    %c0_i32_1 = arith.constant 0 : i32
    return %c0_i32, %c0_i32_0 : i32, i32
  }
  func.func @transform_21(%arg0: i32) -> (i32, i32) {
    %c0_i32 = arith.constant 0 : i32
    %c0_i32_0 = arith.constant 0 : i32
    %c0_i32_1 = arith.constant 0 : i32
    return %c0_i32, %c0_i32_0 : i32, i32
  }
  func.func @transform_22(%arg0: i32) -> (i32, i32, i32) {
    %c0_i32 = arith.constant 0 : i32
    %c0_i32_0 = arith.constant 0 : i32
    %c0_i32_1 = arith.constant 0 : i32
    %c0_i32_2 = arith.constant 0 : i32
    return %c0_i32, %c0_i32_0, %c0_i32_1 : i32, i32, i32
  }
  func.func @transform_23(%arg0: i32) -> (i32, i32, i32) {
    %c0_i32 = arith.constant 0 : i32
    %c0_i32_0 = arith.constant 0 : i32
    %c0_i32_1 = arith.constant 0 : i32
    %c0_i32_2 = arith.constant 0 : i32
    return %c0_i32, %c0_i32_0, %c0_i32_1 : i32, i32, i32
  }
  func.func @transform_24(%arg0: i32) -> (i32, i32, i32) {
    %c0_i32 = arith.constant 0 : i32
    %c0_i32_0 = arith.constant 0 : i32
    %c0_i32_1 = arith.constant 0 : i32
    %c0_i32_2 = arith.constant 0 : i32
    return %c0_i32, %c0_i32_0, %c0_i32_1 : i32, i32, i32
  }
  func.func @transform_25(%arg0: i32) -> (i32, i32, i32) {
    %c0_i32 = arith.constant 0 : i32
    %c0_i32_0 = arith.constant 0 : i32
    %c0_i32_1 = arith.constant 0 : i32
    %c0_i32_2 = arith.constant 0 : i32
    return %c0_i32, %c0_i32_0, %c0_i32_1 : i32, i32, i32
  }
  func.func @transform_26(%arg0: i32) -> (i32, i32, i32) {
    %c0_i32 = arith.constant 0 : i32
    %c0_i32_0 = arith.constant 0 : i32
    %c0_i32_1 = arith.constant 0 : i32
    %c0_i32_2 = arith.constant 0 : i32
    return %c0_i32, %c0_i32_0, %c0_i32_1 : i32, i32, i32
  }
  func.func @transform_27(%arg0: i32) -> (i32, i32, i32) {
    %c0_i32 = arith.constant 0 : i32
    %c0_i32_0 = arith.constant 0 : i32
    %c0_i32_1 = arith.constant 0 : i32
    %c0_i32_2 = arith.constant 0 : i32
    return %c0_i32, %c0_i32_0, %c0_i32_1 : i32, i32, i32
  }
  func.func @transform_28(%arg0: i32) -> (i32, i32, i32) {
    %c0_i32 = arith.constant 0 : i32
    %c0_i32_0 = arith.constant 0 : i32
    %c0_i32_1 = arith.constant 0 : i32
    %c0_i32_2 = arith.constant 0 : i32
    return %c0_i32, %c0_i32_0, %c0_i32_1 : i32, i32, i32
  }
  func.func @transform_29(%arg0: i32) -> (i32, i32, i32) {
    %c0_i32 = arith.constant 0 : i32
    %c0_i32_0 = arith.constant 0 : i32
    %c0_i32_1 = arith.constant 0 : i32
    %c0_i32_2 = arith.constant 0 : i32
    return %c0_i32, %c0_i32_0, %c0_i32_1 : i32, i32, i32
  }
  func.func @transform_30(%arg0: i32) -> (i32, i32, i32) {
    %c0_i32 = arith.constant 0 : i32
    %c0_i32_0 = arith.constant 0 : i32
    %c0_i32_1 = arith.constant 0 : i32
    %c0_i32_2 = arith.constant 0 : i32
    return %c0_i32, %c0_i32_0, %c0_i32_1 : i32, i32, i32
  }
  func.func @transform_31(%arg0: i32) -> (i32, i32, i32) {
    %c0_i32 = arith.constant 0 : i32
    %c0_i32_0 = arith.constant 0 : i32
    %c0_i32_1 = arith.constant 0 : i32
    %c0_i32_2 = arith.constant 0 : i32
    return %c0_i32, %c0_i32_0, %c0_i32_1 : i32, i32, i32
  }
  func.func @transform_32(%arg0: i32) -> (i32, i32, i32) {
    %c0_i32 = arith.constant 0 : i32
    %c0_i32_0 = arith.constant 0 : i32
    %c0_i32_1 = arith.constant 0 : i32
    %c0_i32_2 = arith.constant 0 : i32
    return %c0_i32, %c0_i32_0, %c0_i32_1 : i32, i32, i32
  }
  func.func @transform_33(%arg0: i32) -> (i32, i32, i32) {
    %c0_i32 = arith.constant 0 : i32
    %c0_i32_0 = arith.constant 0 : i32
    %c0_i32_1 = arith.constant 0 : i32
    %c0_i32_2 = arith.constant 0 : i32
    return %c0_i32, %c0_i32_0, %c0_i32_1 : i32, i32, i32
  }
  func.func @transform_34(%arg0: i32) -> (i32, i32) {
    %c0_i32 = arith.constant 0 : i32
    %c0_i32_0 = arith.constant 0 : i32
    %c0_i32_1 = arith.constant 0 : i32
    return %c0_i32, %c0_i32_0 : i32, i32
  }
  func.func @transform_35(%arg0: i32) -> (i32, i32) {
    %c0_i32 = arith.constant 0 : i32
    %c0_i32_0 = arith.constant 0 : i32
    %c0_i32_1 = arith.constant 0 : i32
    return %c0_i32, %c0_i32_0 : i32, i32
  }
  func.func @transform_36(%arg0: i32) -> (i32, i32) {
    %c0_i32 = arith.constant 0 : i32
    %c0_i32_0 = arith.constant 0 : i32
    %c0_i32_1 = arith.constant 0 : i32
    return %c0_i32, %c0_i32_0 : i32, i32
  }
  func.func @transform_37(%arg0: i32) -> (i32, i32) {
    %c0_i32 = arith.constant 0 : i32
    %c0_i32_0 = arith.constant 0 : i32
    %c0_i32_1 = arith.constant 0 : i32
    return %c0_i32, %c0_i32_0 : i32, i32
  }
  func.func @transform_38(%arg0: i32) -> (i32, i32, i32) {
    %c0_i32 = arith.constant 0 : i32
    %c0_i32_0 = arith.constant 0 : i32
    %c0_i32_1 = arith.constant 0 : i32
    return %arg0, %c0_i32, %c0_i32_0 : i32, i32, i32
  }
}

</mosaic_0001>

<bundles_post_ra>
// kernel: video_detection_forward.1
= control target key start
LH: loop header
LB: loop body
LE: loop exit
PB: predicated region body
PF: predicated region fallthrough
CT: control target
= control target key end

     0   :  { %s10413_s6 = smov 1   ;;  %s10414_s10 = smov 2   ;;  %s12768_s0 = inlined_call_operand.smem [shape: u32[39], index: -1, kind: input, shape index: {}] }
   0x1   :  { %s10463_s5 = sld [smem:[%s12768_s0]]   ;;  %s10415_s14 = smov 3  }
   0x2   :  { %s10468_s9 = sld [smem:[%s12768_s0 + %s10413_s6]]   ;;  %s10416_s18 = smov 4  }
   0x3   :  { %s10473_s13 = sld [smem:[%s12768_s0 + %s10414_s10]]   ;;  %s10417_s22 = smov 5  }
   0x4   :  { %s10478_s17 = sld [smem:[%s12768_s0 + %s10415_s14]]   ;;  %s10418_s26 = smov 6  }
   0x5   :  { %s10483_s21 = sld [smem:[%s12768_s0 + %s10416_s18]]   ;;  %s10419_s30 = smov 7  }
   0x6   :  { %s10488_s25 = sld [smem:[%s12768_s0 + %s10417_s22]]   ;;  %s10420_s4 = smov 8  }
   0x7   :  { %12794 = sst [smem:[#allocation2_spill]] %s10463_s5  ;;  %s10421_s10 = smov 9  }
   0x8   :  { %s10493_s29 = sld [smem:[%s12768_s0 + %s10418_s26]]   ;;  %s10422_s15 = smov 10  }
   0x9   :  { %s10498_s3 = sld [smem:[%s12768_s0 + %s10419_s30]]   ;;  %s10423_s20 = smov 11  }
   0xa   :  { %s10503_s8 = sld [smem:[%s12768_s0 + %s10420_s4]]   ;;  %s10424_s26 = smov 12  }
   0xb   :  { %s10508_s14 = sld [smem:[%s12768_s0 + %s10421_s10]]   ;;  %s10425_s1 = smov 13  }
   0xc   :  { %s10513_s19 = sld [smem:[%s12768_s0 + %s10422_s15]]   ;;  %s10426_s7 = smov 14  }
   0xd   :  { %s10518_s24 = sld [smem:[%s12768_s0 + %s10423_s20]]   ;;  %s10427_s15 = smov 15  }
   0xe   :  { %s10523_s30 = sld [smem:[%s12768_s0 + %s10424_s26]]   ;;  %s10428_s22 = smov 16  }
   0xf   :  { %12795 = sst [smem:[#allocation3_spill]] %s10498_s3  ;;  %s10429_s28 = smov 17  }
  0x10   :  { %s10528_s6 = sld [smem:[%s12768_s0 + %s10425_s1]]  }
  0x11   :  { %s10533_s12 = sld [smem:[%s12768_s0 + %s10426_s7]]   ;;  %s10430_s7 = smov 18  }
  0x12   :  { %s10538_s20 = sld [smem:[%s12768_s0 + %s10427_s15]]   ;;  %s10431_s15 = smov 19  }
  0x13   :  { %s10543_s27 = sld [smem:[%s12768_s0 + %s10428_s22]]   ;;  %s10432_s22 = smov 20  }
  0x14   :  { %s10548_s4 = sld [smem:[%s12768_s0 + %s10429_s28]]   ;;  %s10433_s28 = smov 21  }
  0x17   :  { %12796 = sst [smem:[#allocation4_spill]] %s10533_s12 }
  0x18   :  { %12797 = sst [smem:[#allocation5_spill]] %s10538_s20 }
  0x19   :  { %12798 = sst [smem:[#allocation6_spill]] %s10543_s27 }
  0x1a   :  { %12799 = sst [smem:[#allocation7_spill]] %s10548_s4 }
  0x1b   :  { %s10553_s12 = sld [smem:[%s12768_s0 + %s10430_s7]]   ;;  %s10434_s7 = smov 22  }
  0x1c   :  { %s10558_s20 = sld [smem:[%s12768_s0 + %s10431_s15]]   ;;  %s10435_s15 = smov 23  }
  0x1d   :  { %s10563_s27 = sld [smem:[%s12768_s0 + %s10432_s22]]   ;;  %s10436_s22 = smov 24  }
  0x1e   :  { %s10568_s4 = sld [smem:[%s12768_s0 + %s10433_s28]]   ;;  %s10437_s28 = smov 25  }
  0x21   :  { %12800 = sst [smem:[#allocation8_spill]] %s10553_s12 }
  0x22   :  { %12801 = sst [smem:[#allocation9_spill]] %s10558_s20 }
  0x23   :  { %12802 = sst [smem:[#allocation10_spill]] %s10563_s27 }
  0x24   :  { %12803 = sst [smem:[#allocation11_spill]] %s10568_s4 }
  0x25   :  { %s10573_s12 = sld [smem:[%s12768_s0 + %s10434_s7]]   ;;  %s10438_s7 = smov 26  }
  0x26   :  { %s10578_s20 = sld [smem:[%s12768_s0 + %s10435_s15]]   ;;  %s10439_s15 = smov 27  }
  0x27   :  { %s10583_s27 = sld [smem:[%s12768_s0 + %s10436_s22]]   ;;  %s10440_s22 = smov 28  }
  0x28   :  { %s10588_s4 = sld [smem:[%s12768_s0 + %s10437_s28]]   ;;  %s10441_s28 = smov 29  }
  0x2b   :  { %12804 = sst [smem:[#allocation12_spill]] %s10573_s12 }
  0x2c   :  { %12805 = sst [smem:[#allocation13_spill]] %s10578_s20 }
  0x2d   :  { %12806 = sst [smem:[#allocation14_spill]] %s10583_s27 }
  0x2e   :  { %12807 = sst [smem:[#allocation15_spill]] %s10588_s4 }
  0x2f   :  { %s10593_s12 = sld [smem:[%s12768_s0 + %s10438_s7]]   ;;  %s10442_s7 = smov 30  }
  0x30   :  { %s10598_s20 = sld [smem:[%s12768_s0 + %s10439_s15]]   ;;  %s10443_s15 = smov 31  }
  0x31   :  { %s10603_s27 = sld [smem:[%s12768_s0 + %s10440_s22]]   ;;  %s10444_s22 = smov 32  }
  0x32   :  { %s10608_s4 = sld [smem:[%s12768_s0 + %s10441_s28]]   ;;  %s10445_s28 = smov 33  }
  0x35   :  { %12808 = sst [smem:[#allocation16_spill]] %s10593_s12 }
  0x36   :  { %12809 = sst [smem:[#allocation17_spill]] %s10598_s20 }
  0x37   :  { %12810 = sst [smem:[#allocation18_spill]] %s10603_s27 }
  0x38   :  { %12811 = sst [smem:[#allocation19_spill]] %s10608_s4 }
  0x39   :  { %s10613_s12 = sld [smem:[%s12768_s0 + %s10442_s7]]   ;;  %s10446_s7 = smov 34  }
  0x3a   :  { %s10618_s20 = sld [smem:[%s12768_s0 + %s10443_s15]]   ;;  %s10447_s15 = smov 35  }
  0x3b   :  { %s10623_s27 = sld [smem:[%s12768_s0 + %s10444_s22]]   ;;  %s10448_s22 = smov 36  }
  0x3c   :  { %s10628_s4 = sld [smem:[%s12768_s0 + %s10445_s28]]   ;;  %s10449_s28 = smov 37  }
  0x3f   :  { %12812 = sst [smem:[#allocation20_spill]] %s10613_s12 }
  0x40   :  { %12813 = sst [smem:[#allocation21_spill]] %s10618_s20 }
  0x41   :  { %12814 = sst [smem:[#allocation22_spill]] %s10623_s27 }
  0x42   :  { %12815 = sst [smem:[#allocation23_spill]] %s10628_s4 }
  0x43   :  { %s10633_s12 = sld [smem:[%s12768_s0 + %s10446_s7]]   ;;  %s10450_s7 = smov 38  }
  0x44   :  { %s10638_s20 = sld [smem:[%s12768_s0 + %s10447_s15]]   ;;  %s10655_s15 = smov 0  }
  0x45   :  { %s10643_s27 = sld [smem:[%s12768_s0 + %s10448_s22]]  }
  0x46   :  { %s10648_s4 = sld [smem:[%s12768_s0 + %s10449_s28]]  }
  0x49   :  { %12816 = sst [smem:[#allocation24_spill]] %s10633_s12 }
  0x4a   :  { %s10653_s12 = sld [smem:[%s12768_s0 + %s10450_s7]]  }
  0x4b LB: > { %s12817_s3 = sld [smem:[#allocation3_spill]]  ;;  %s7623_s16 = sadd.s32 4294967295, %s10411_s15   ;;  %s10411_s15 = sphi %s10655_s15, %s87_s15  }
  0x4c   : > { %p7627_p0 = scmp.ge.s32.totalorder %s10411_s15, 1  ;;  %p1051_p1 = scmp.lt.s32.totalorder %s10411_s15, 3 }
  0x4e   : > { %p1052_p2 = pnand %p7627_p0, %p1051_p1 }
  0x4f   : > { %p1143_p3 = scmp.lt.s32.totalorder (!%p1052_p2), %s7623_s16, 1  ;;  %s12818_s5 = sld [smem:[#allocation2_spill]] (!%p1052_p2) }
  0x50   : > { %1055 = sbr.rel (%p1052_p2) target bundleno = 7875 (0x1ec3), region = 172  ;;  %s10452_s22 = smov (!%p1052_p2), 96  }
  0x51   : > { %s10453_s23 = smov (!%p1052_p2), 32   ;;  %s10454_s26 = smov (!%p1052_p2), 64  }
  0x52   : > { %s12819_s28 = sld [smem:[#allocation4_spill]] (!%p1052_p2) }
  0x53   : > { %s12820_s1 = sld [smem:[#allocation5_spill]] (!%p1052_p2) }
  0x54   : > { %s12845_s2 = sld [smem:[#allocation6_spill]] (!%p1052_p2) }
  0x55   : > { %v9631_v0 = vld [vmem:[%s10473_s13 + $0x38] sm:$0xff]  ;;  %v9630_v4 = vld [vmem:[%s10473_s13 + $0x30] sm:$0xff]  ;;  %v9629_v8 = vld [vmem:[%s10473_s13 + $0x28] sm:$0xff]  ;;  %s12898_s16 = smov (!%p1143_p3, %s7623_s16), 1  ;;  %s12876_s7 = sld [smem:[#allocation9_spill]] }
  0x56   : > { %v9647_v1 = vld [vmem:[%s10473_s13 + $0xb8] sm:$0xff]  ;;  %1500 = vmatpush.bf16.msra.mxu0 %v9631_v0  ;;  %v9646_v5 = vld [vmem:[%s10473_s13 + $0xb0] sm:$0xff]  ;;  %v9645_v9 = vld [vmem:[%s10473_s13 + $0xa8] sm:$0xff]  ;;  %s10036_s0 = smul.u32 120, %s12898_s16  ;;  %s12877_s10 = sld [smem:[#allocation7_spill]] }
  0x57   : > { %v9639_v2 = vld [vmem:[%s10473_s13 + $0x78] sm:$0xff]  ;;  %1536 = vmatpush.bf16.msra.mxu2 %v9647_v1  ;;  %v9638_v6 = vld [vmem:[%s10473_s13 + $0x70] sm:$0xff]  ;;  %v9637_v10 = vld [vmem:[%s10473_s13 + $0x68] sm:$0xff]  ;;  %s12878_s11 = sld [smem:[#allocation8_spill]] }
  0x58   : > { %v9655_v3 = vld [vmem:[%s10473_s13 + $0xf8] sm:$0xff]  ;;  %1518 = vmatpush.bf16.msra.mxu1 %v9639_v2  ;;  %v9654_v7 = vld [vmem:[%s10473_s13 + $0xf0] sm:$0xff]  ;;  %v9653_v11 = vld [vmem:[%s10473_s13 + $0xe8] sm:$0xff]  ;;  %s10697_s18 = scalar_lea.vmem %s12818_s5, %s10036_s0  ;;  %s12879_s0 = sld [smem:[#allocation12_spill]] }
  0x59   : > { %1554 = vmatpush.bf16.msra.mxu3 %v9655_v3  ;;  %v9628_v12 = vld [vmem:[%s10473_s13 + $0x20] sm:$0xff]  ;;  %v9627_v16 = vld [vmem:[%s10473_s13 + $0x18] sm:$0xff]  ;;  %v9626_v20 = vld [vmem:[%s10473_s13 + $0x10] sm:$0xff]  ;;  %s12893_s5 = sld [smem:[#allocation22_spill]] }
  0x5a   : > { %1501 = vmatpush.bf16.msra.mxu0 %v9630_v4  ;;  %v9644_v13 = vld [vmem:[%s10473_s13 + $0xa0] sm:$0xff]  ;;  %v9643_v17 = vld [vmem:[%s10473_s13 + $0x98] sm:$0xff]  ;;  %v9642_v21 = vld [vmem:[%s10473_s13 + $0x90] sm:$0xff] }
  0x5b   : > { %1537 = vmatpush.bf16.msra.mxu2 %v9646_v5  ;;  %v9636_v14 = vld [vmem:[%s10473_s13 + $0x60] sm:$0xff]  ;;  %v9635_v18 = vld [vmem:[%s10473_s13 + $0x58] sm:$0xff]  ;;  %v9634_v22 = vld [vmem:[%s10473_s13 + $0x50] sm:$0xff] }
  0x5c   : > { %1519 = vmatpush.bf16.msra.mxu1 %v9638_v6  ;;  %v9652_v15 = vld [vmem:[%s10473_s13 + $0xe0] sm:$0xff]  ;;  %v9651_v19 = vld [vmem:[%s10473_s13 + $0xd8] sm:$0xff]  ;;  %v9650_v23 = vld [vmem:[%s10473_s13 + $0xd0] sm:$0xff] }
  0x5d   : > { %1555 = vmatpush.bf16.msra.mxu3 %v9654_v7  ;;  %v9625_v24 = vld [vmem:[%s10473_s13 + $0x8] sm:$0xff]  ;;  %v9624_v28 = vld [vmem:[%s10473_s13] sm:$0xff]  ;;  %v1154_v34 = vld [vmem:[%s10697_s18 + $0x10] sm:$0xff] }
  0x5e   : > { %1502 = vmatpush.bf16.msra.mxu0 %v9629_v8  ;;  %v9641_v25 = vld [vmem:[%s10473_s13 + $0x88] sm:$0xff]  ;;  %v9640_v29 = vld [vmem:[%s10473_s13 + $0x80] sm:$0xff]  ;;  %v1159_v35 = vld [vmem:[%s10697_s18 + $0x38] sm:$0xff] }
  0x5f   : > { %1538 = vmatpush.bf16.msra.mxu2 %v9645_v9  ;;  %v9633_v26 = vld [vmem:[%s10473_s13 + $0x48] sm:$0xff]  ;;  %v9632_v30 = vld [vmem:[%s10473_s13 + $0x40] sm:$0xff]  ;;  %v1158_v37 = vld [vmem:[%s10697_s18 + $0x30] sm:$0xff]  ;;  %v1169_v42 = vpack.c.bf16 %v1159_v35, %v1154_v34 }
  0x60   : > { %1520 = vmatpush.bf16.msra.mxu1 %v9637_v10  ;;  %v9649_v27 = vld [vmem:[%s10473_s13 + $0xc8] sm:$0xff]  ;;  %v9648_v31 = vld [vmem:[%s10473_s13 + $0xc0] sm:$0xff]  ;;  %v1155_v38 = vld [vmem:[%s10697_s18 + $0x18] sm:$0xff] }
  0x61   : > { %1556 = vmatpush.bf16.msra.mxu3 %v9653_v11  ;;  %v1152_v32 = vld [vmem:[%s10697_s18] sm:$0xff]  ;;  %v1157_v33 = vld [vmem:[%s10697_s18 + $0x28] sm:$0xff]  ;;  %v9663_v40 = vld [vmem:[%s10473_s13 + $0x138] sm:$0xff] }
  0x62   : > { %1503 = vmatpush.bf16.msra.mxu0 %v9628_v12  ;;  %v1153_v36 = vld [vmem:[%s10697_s18 + $0x8] sm:$0xff]  ;;  %v1160_v39 = vld [vmem:[%s10697_s18 + $0x40] sm:$0xff]  ;;  %v1167_v41 = vpack.c.bf16 %v1157_v33, %v1152_v32  ;;  %v9662_v45 = vld [vmem:[%s10473_s13 + $0x130] sm:$0xff] }
  0x63   : > { %1539 = vmatpush.bf16.msra.mxu2 %v9644_v13  ;;  %v1168_v43 = vpack.c.bf16 %v1158_v37, %v1153_v36  ;;  %v1170_v44 = vpack.c.bf16 %v1160_v39, %v1155_v38  ;;  %v9661_v46 = vld [vmem:[%s10473_s13 + $0x128] sm:$0xff]  ;;  %v9660_v47 = vld [vmem:[%s10473_s13 + $0x120] sm:$0xff]  ;;  %v1162_v48 = vld [vmem:[%s10697_s18 + $0x50] sm:$0xff]  ;;  %v10451_v39 = vmov 128.0  }
  0x64   : > { %1521 = vmatpush.bf16.msra.mxu1 %v9636_v14  ;;  %v1164_v49 = vld [vmem:[%s10697_s18 + $0x60] sm:$0xff]  ;;  %v1163_v50 = vld [vmem:[%s10697_s18 + $0x58] sm:$0xff]  ;;  %v1165_v51 = vld [vmem:[%s10697_s18 + $0x68] sm:$0xff]  ;;  %v1172_v53 = vpack.c.bf16 %v1162_v48, %v1162_v48  ;;  %10133 = vrcp.f32 %v10451_v39 }
  0x65   : > { %1557 = vmatpush.bf16.msra.mxu3 %v9652_v15  ;;  %v9659_v52 = vld [vmem:[%s10473_s13 + $0x118] sm:$0xff]  ;;  %v1174_v54 = vpack.c.bf16 %v1164_v49, %v1164_v49  ;;  %v1173_v55 = vpack.c.bf16 %v1163_v50, %v1163_v50  ;;  %v1175_v56 = vpack.c.bf16 %v1165_v51, %v1165_v51  ;;  %v9658_v57 = vld [vmem:[%s10473_s13 + $0x110] sm:$0xff]  ;;  %v9657_v58 = vld [vmem:[%s10473_s13 + $0x108] sm:$0xff] }
  0x66   : > { %1504 = vmatpush.bf16.msra.mxu0 %v9627_v16  ;;  %v9656_v59 = vld [vmem:[%s10473_s13 + $0x100] sm:$0xff]  ;;  %v1161_v61 = vld [vmem:[%s10697_s18 + $0x48] sm:$0xff]  ;;  %v1166_v63 = vld [vmem:[%s10697_s18 + $0x70] sm:$0xff] }
  0x67   : > { %1540 = vmatpush.bf16.msra.mxu2 %v9643_v17  ;;  %v1156_v60 = vld [vmem:[%s10697_s18 + $0x20] sm:$0xff]  ;;  %v1176_v0 = vpack.c.bf16 %v1166_v63, %v1166_v63  ;;  %s12880_s18 = sld [smem:[#allocation14_spill]] }
  0x68   : > { %1522 = vmatpush.bf16.msra.mxu1 %v9635_v18  ;;  %v1171_v62 = vpack.c.bf16 %v1161_v61, %v1156_v60  ;;  %v1257_v11 = vld [vmem:[%s10468_s9] sm:$0xff]  ;;  %v1258_v18 = vld [vmem:[%s10468_s9 + $0x8] sm:$0xff] }
  0x69   : > { %1558 = vmatpush.bf16.msra.mxu3 %v9651_v19 }
  0x6a   : > { %1505 = vmatpush.bf16.msra.mxu0 %v9626_v20 }
  0x6b   : > { %1541 = vmatpush.bf16.msra.mxu2 %v9642_v21 }
  0x6c   : > { %1523 = vmatpush.bf16.msra.mxu1 %v9634_v22 }
  0x6d   : > { %1559 = vmatpush.bf16.msra.mxu3 %v9650_v23 }
  0x6e   : > { %1506 = vmatpush.bf16.msra.mxu0 %v9625_v24 }
  0x6f   : > { %1542 = vmatpush.bf16.msra.mxu2 %v9641_v25 }
  0x70   : > { %1524 = vmatpush.bf16.msra.mxu1 %v9633_v26 }
  0x71   : > { %1560 = vmatpush.bf16.msra.mxu3 %v9649_v27  ;;  %v1259_v27 = vld [vmem:[%s10468_s9 + $0x10] sm:$0xff] }
  0x72   : > { %1507 = vmatpush.bf16.msra.mxu0 %v9624_v28 }
  0x73   : > { %1543 = vmatpush.bf16.msra.mxu2 %v9640_v29 }
  0x74   : > { %1525 = vmatpush.bf16.msra.mxu1 %v9632_v30 }
  0x75   : > { %1561 = vmatpush.bf16.msra.mxu3 %v9648_v31  ;;  %1508 = vmatmul.bf16.vlgmr.msra.gmra.mxu0 %v1167_v41 }
  0x76   : > { %1572 = vmatpush.bf16.msrb.mxu0 %v9663_v40  ;;  %1544 = vmatmul.bf16.vlgmr.msra.gmra.mxu2 %v1169_v42  ;;  %v10134_v40 = vpop.eup %10133 }
  0x77   : > { %1526 = vmatmul.bf16.vlgmr.msra.gmra.mxu1 %v1168_v43  ;;  %v1599_v41 = vmul.f32 128.0, %v10134_v40  ;;  %vm1603_vm0 = vweird.f32 %v10134_v40 }
  0x78   : > { %1562 = vmatmul.bf16.vlgmr.msra.gmra.mxu3 %v1170_v44 }
  0x79   : > { %v1600_v42 = vsub.f32 1.0, %v1599_v41 }
  0x7a   : > { %1573 = vmatpush.bf16.msrb.mxu0 %v9662_v45 }
  0x7b   : > { %v1601_v43 = vmul.f32 %v10134_v40, %v1600_v42 }
  0x7d   : > { %v1602_v44 = vadd.f32 %v10134_v40, %v1601_v43 }
  0x7e   : > { %1574 = vmatpush.bf16.msrb.mxu0 %v9661_v46 }
  0x7f   : > { %v10731_v45 = vsel %vm1603_vm0, %v10134_v40, %v1602_v44 }
  0x82   : > { %1575 = vmatpush.bf16.msrb.mxu0 %v9660_v47 }
  0x85   : > { %1513 = vmatmul.bf16.gmra.mxu0 %v1172_v53 }
  0x86   : > { %1576 = vmatpush.bf16.msrb.mxu0 %v9659_v52  ;;  %1549 = vmatmul.bf16.gmra.mxu2 %v1174_v54 }
  0x87   : > { %1531 = vmatmul.bf16.gmra.mxu1 %v1173_v55 }
  0x88   : > { %1567 = vmatmul.bf16.gmra.mxu3 %v1175_v56 }
  0x8a   : > { %1577 = vmatpush.bf16.msrb.mxu0 %v9658_v57 }
  0x8e   : > { %1578 = vmatpush.bf16.msrb.mxu0 %v9657_v58 }
  0x92   : > { %1579 = vmatpush.bf16.msrb.mxu0 %v9656_v59 }
  0x95   : > { %1580 = vmatmul.bf16.vlgmr.msrb.gmra.mxu0 %v1171_v62 }
  0xa5   : > { %1585 = vmatmul.bf16.gmra.mxu0 %v1176_v0 }
  0xf2   : > { %v1509_v1 = vpop.f32.mrf.mxu0 }
  0xf3   : > { %v1510_v12 = vadd.f32 %v1509_v1, %v1257_v11  ;;  %v10117_v11 = vld [vmem:[%s10478_s17] ss:$0 sm:$0xff] }
  0xf4   : > { %v1527_v2 = vpop.f32.mrf.mxu1 }
  0xf5   : > { %v1528_v16 = vadd.f32 %v1527_v2, %v1510_v12 }
  0xf9   : > { %v1545_v3 = vpop.f32.mrf.mxu2 }
  0xfa   : > { %v1511_v5 = vpop.f32.mrf.mxu0  ;;  %v1546_v19 = vadd.f32 %v1545_v3, %v1528_v16 }
  0xfb   : > { %v1563_v4 = vpop.f32.mrf.mxu3  ;;  %v1512_v20 = vadd.f32 %v1511_v5, %v1258_v18 }
  0xfc   : > { %v1529_v6 = vpop.f32.mrf.mxu1  ;;  %v1564_v22 = vadd.f32 %v1563_v4, %v1546_v19 }
  0xfd   : > { %v1530_v25 = vadd.f32 %v1529_v6, %v1512_v20 }
 0x101   : > { %v1547_v7 = vpop.f32.mrf.mxu2 }
 0x102   : > { %v1514_v9 = vpop.f32.mrf.mxu0  ;;  %v1548_v28 = vadd.f32 %v1547_v7, %v1530_v25 }
 0x103   : > { %v1565_v8 = vpop.f32.mrf.mxu3  ;;  %v1515_v29 = vadd.f32 %v1514_v9, %v1259_v27 }
 0x104   : > { %v1532_v10 = vpop.f32.mrf.mxu1  ;;  %v1566_v30 = vadd.f32 %v1565_v8, %v1548_v28 }
 0x105   : > { %v1533_v32 = vadd.f32 %v1532_v10, %v1515_v29 }
 0x109   : > { %v1550_v13 = vpop.f32.mrf.mxu2 }
 0x10a   : > { %v1516_v15 = vpop.f32.mrf.mxu0  ;;  %v1551_v34 = vadd.f32 %v1550_v13, %v1533_v32 }
 0x10b   : > { %v1568_v14 = vpop.f32.mrf.mxu3  ;;  %v10118_v15 = vld [vmem:[%s10483_s21] ss:$0 sm:$0xff] }
 0x10c   : > { %v1534_v17 = vpop.f32.mrf.mxu1  ;;  %v1569_v35 = vadd.f32 %v1568_v14, %v1551_v34 }
 0x111   : > { %v1552_v21 = vpop.f32.mrf.mxu2 }
 0x112   : > { %v1581_v24 = vpop.f32.mrf.mxu0 }
 0x113   : > { %v1570_v23 = vpop.f32.mrf.mxu3  ;;  %v1582_v26 = vadd.f32 %v1581_v24, %v1564_v22 }
 0x115   : > { %1592 = vadd.xlane.f32.xlu0 %v1582_v26 }
 0x11a   : > { %v1583_v31 = vpop.f32.mrf.mxu0 }
 0x11b   : > { %v1584_v33 = vadd.f32 %v1583_v31, %v1566_v30 }
 0x11d   : > { %1594 = vadd.xlane.f32.xlu0 %v1584_v33 }
 0x122   : > { %v1586_v36 = vpop.f32.mrf.mxu0 }
 0x123   : > { %v1587_v37 = vadd.f32 %v1586_v36, %v1569_v35 }
 0x125   : > { %1596 = vadd.xlane.f32.xlu1 %v1587_v37 }
 0x12a   : > { %v1588_v38 = vpop.f32.mrf.mxu0 }
 0x188   : > { %v1593_v46 = vpop.xlane.xlu0 %1592 }
 0x189   : > { %v1605_v47 = vmul.f32 %v10731_v45, %v1593_v46 }
 0x18b   : > { %v1608_v48 = vsub.f32 %v1582_v26, %v1605_v47 }
 0x18d   : > { %v1611_v49 = vmul.f32 %v1608_v48, %v1608_v48 }
 0x18f   : > { %1614 = vadd.xlane.f32.xlu1 %v1611_v49  ;;  %v9686_v49 = vld [vmem:[%s12817_s3 + $0xb0] sm:$0xf0] }
 0x190   : > { %v1595_v50 = vpop.xlane.xlu0 %1594 }
 0x191   : > { %v1606_v51 = vmul.f32 %v10731_v45, %v1595_v50  ;;  %v9685_v50 = vld [vmem:[%s12817_s3 + $0xac] sm:$0xf] }
 0x193   : > { %v1609_v52 = vsub.f32 %v1584_v33, %v1606_v51 }
 0x195   : > { %v1612_v53 = vmul.f32 %v1609_v52, %v1609_v52 }
 0x197   : > { %1616 = vadd.xlane.f32.xlu2 %v1612_v53  ;;  %v7883_v53 = vld [vmem:[%s12817_s3 + $0xb0] sm:$0xf] }
 0x198   : > { %v1597_v54 = vpop.xlane.xlu1 %1596 }
 0x199   : > { %v1607_v55 = vmul.f32 %v10731_v45, %v1597_v54  ;;  %v9687_v54 = vld [vmem:[%s12817_s3 + $0xb8] sm:$0xf0] }
 0x19b   : > { %v1610_v56 = vsub.f32 %v1587_v37, %v1607_v55 }
 0x19d   : > { %v1613_v57 = vmul.f32 %v1610_v56, %v1610_v56 }
 0x19f   : > { %1618 = vadd.xlane.f32.xlu2 %v1613_v57  ;;  %v7863_v57 = vld [vmem:[%s12817_s3 + $0x90] sm:$0xf] }
 0x202   : > { %v1615_v58 = vpop.xlane.xlu1 %1614 }
 0x203   : > { %v1620_v59 = vmul.f32 %v1615_v58, %v10731_v45  ;;  %v9683_v58 = vld [vmem:[%s12817_s3 + $0x98] sm:$0xf0] }
 0x205   : > { %v1623_v60 = vadd.f32 1e-05, %v1620_v59  ;;  %v9682_v59 = vld [vmem:[%s12817_s3 + $0x94] sm:$0xf] }
 0x207   : > { %10135 = vrsqrt.f32 %v1623_v60  ;;  %vm1632_vm2 = vweird.f32 %v1623_v60 }
 0x20a   : > { %v1617_v61 = vpop.xlane.xlu2 %1616 }
 0x20b   : > { %v1621_v62 = vmul.f32 %v1617_v61, %v10731_v45  ;;  %v7865_v61 = vld [vmem:[%s12817_s3 + $0x9c] sm:$0xf0] }
 0x20d   : > { %v10136_v63 = vpop.eup %10135  ;;  %v1624_v0 = vadd.f32 1e-05, %v1621_v62  ;;  %v7871_v62 = vld [vmem:[%s12817_s3 + $0x98] sm:$0xf] }
 0x20e   : > { %v1627_v1 = vmul.f32 %v10136_v63, %v1623_v60  ;;  %vm1633_vm1 = vweird.f32 %v10136_v63  ;;  %v7864_v60 = vor.u32 %v9683_v58, %v7863_v57  ;;  %v9665_v57 = vld [vmem:[%s12817_s3 + $0x8] sm:$0xf0]  ;;  %v9664_v58 = vld [vmem:[%s12817_s3 + $0x4] sm:$0xf] }
 0x20f   : > { %10137 = vrsqrt.f32 %v1624_v0  ;;  %vm1634_vm3 = vmor %vm1632_vm2, %vm1633_vm1  ;;  %vm1642_vm5 = vweird.f32 %v1624_v0 }
 0x210   : > { %v1628_v2 = vmul.f32 %v10136_v63, %v1627_v1 }
 0x212   : > { %v1629_v3 = vmul.f32 0.5, %v1628_v2  ;;  %v1619_v4 = vpop.xlane.xlu2 %1618  ;;  %v7851_v2 = vld [vmem:[%s12817_s3 + $0x78] sm:$0xf] }
 0x213   : > { %v1622_v5 = vmul.f32 %v1619_v4, %v10731_v45  ;;  %v9679_v4 = vld [vmem:[%s12817_s3 + $0x7c] sm:$0xf] }
 0x214   : > { %v1630_v6 = vsub.f32 1.5, %v1629_v3  ;;  %v9680_v3 = vld [vmem:[%s12817_s3 + $0x80] sm:$0xf0] }
 0x215   : > { %v10138_v7 = vpop.eup %10137  ;;  %v1625_v8 = vadd.f32 1e-05, %v1622_v5  ;;  %v7852_v5 = vor.u32 %v9680_v3, %v7851_v2 }
 0x216   : > { %v1631_v9 = vmul.f32 %v10136_v63, %v1630_v6  ;;  %v1637_v10 = vmul.f32 %v10138_v7, %v1624_v0  ;;  %vm1643_vm4 = vweird.f32 %v10138_v7  ;;  %v7868_v0 = vor.u32 %v9682_v59, %v7865_v61  ;;  %v7853_v6 = vld [vmem:[%s12817_s3 + $0x84] sm:$0xf0] }
 0x217   : > { %10139 = vrsqrt.f32 %v1625_v8  ;;  %vm1644_vm6 = vmor %vm1642_vm5, %vm1643_vm4  ;;  %vm1652_vm8 = vweird.f32 %v1625_v8  ;;  %v7799_v61 = vld [vmem:[%s12817_s3 + $0x8] sm:$0xf]  ;;  %vm1976_vm4 = vcmask 261120  }
 0x218   : > { %v1635_v12 = vsel %vm1634_vm3, %v10136_v63, %v1631_v9  ;;  %v1638_v13 = vmul.f32 %v10138_v7, %v1637_v10  ;;  %v9684_v63 = vld [vmem:[%s12817_s3 + $0xa0] sm:$0xf0]  ;;  %v7856_v9 = vor.u32 %v9679_v4, %v7853_v6  ;;  %vm2057_vm3 = vcmask 1043456  }
 0x219   : > { %v1656_v14 = vmul.f32 %v1635_v12, %v1608_v48  ;;  %v7875_v48 = vld [vmem:[%s12817_s3 + $0xa8] sm:$0xf]  ;;  %v7872_v1 = vor.u32 %v9684_v63, %v7871_v62  ;;  %v9677_v12 = vld [vmem:[%s12817_s3 + $0x68] sm:$0xf0]  ;;  %v9666_v62 = vld [vmem:[%s12817_s3 + $0x10] sm:$0xf0] }
 0x21a   : > { %v1639_v16 = vmul.f32 0.5, %v1638_v13  ;;  %v7876_v51 = vor.u32 %v9686_v49, %v7875_v48  ;;  %v9676_v13 = vld [vmem:[%s12817_s3 + $0x64] sm:$0xf]  ;;  %v7805_v49 = vld [vmem:[%s12817_s3 + $0x24] sm:$0xf0] }
 0x21b   : > { %v1662_v17 = vmul.f32 %v10117_v11, %v1656_v14 }
 0x21c   : > { %v1640_v18 = vsub.f32 1.5, %v1639_v16  ;;  %1918 = vmatpush.bf16.msrb.mxu1 %v7876_v51  ;;  %v7847_v16 = vld [vmem:[%s12817_s3 + $0x68] sm:$0xf]  ;;  %v9669_v51 = vld [vmem:[%s12817_s3 + $0x28] sm:$0xf0] }
 0x21d   : > { %v10140_v19 = vpop.eup %10139  ;;  %v10741_v20 = vadd.f32 %v10118_v15, %v1662_v17  ;;  %v9678_v17 = vld [vmem:[%s12817_s3 + $0x70] sm:$0xf0] }
 0x21e   : > { %v1641_v21 = vmul.f32 %v10138_v7, %v1640_v18  ;;  %v1647_v22 = vmul.f32 %v10140_v19, %v1625_v8  ;;  %vm1653_vm7 = vweird.f32 %v10140_v19  ;;  %v9681_v8 = vld [vmem:[%s12817_s3 + $0x88] sm:$0xf0] }
 0x21f   : > { %1676 = vadd.xlane.f32.xlu0 %v10741_v20  ;;  %vm1654_vm9 = vmor %vm1652_vm8, %vm1653_vm7  ;;  %vm12787_vm7 = vcmask 523264   ;;  %vm12786_vm8 = vcmask 785408  }
 0x220   : > { %v1645_v23 = vsel %vm1644_vm6, %v10138_v7, %v1641_v21  ;;  %v1648_v24 = vmul.f32 %v10140_v19, %v1647_v22  ;;  %1919 = vmatpush.bf16.msrb.mxu1 %v7864_v60  ;;  %v7859_v7 = vld [vmem:[%s12817_s3 + $0x80] sm:$0xf]  ;;  %v7827_v21 = vld [vmem:[%s12817_s3 + $0x48] sm:$0xf]  ;;  %v9674_v22 = vld [vmem:[%s12817_s3 + $0x50] sm:$0xf0] }
 0x221   : > { %v1657_v25 = vmul.f32 %v1645_v23, %v1609_v52  ;;  %v7877_v52 = vld [vmem:[%s12817_s3 + $0xb4] sm:$0xf0]  ;;  %v7860_v10 = vor.u32 %v9681_v8, %v7859_v7  ;;  %v9673_v23 = vld [vmem:[%s12817_s3 + $0x4c] sm:$0xf]  ;;  %v7793_v60 = vld [vmem:[%s12817_s3 + $0xc] sm:$0xf0] }
 0x222   : > { %v1649_v26 = vmul.f32 0.5, %v1648_v24  ;;  %v7880_v55 = vor.u32 %v9685_v50, %v7877_v52  ;;  %v7828_v24 = vor.u32 %v9674_v22, %v7827_v21  ;;  %v7811_v50 = vld [vmem:[%s12817_s3 + $0x20] sm:$0xf]  ;;  %vm2013_vm6 = vcmask 195584  }
 0x223   : > { %v1663_v27 = vmul.f32 %v10117_v11, %v1657_v25  ;;  %v7829_v25 = vld [vmem:[%s12817_s3 + $0x54] sm:$0xf0] }
 0x224   : > { %v1650_v28 = vsub.f32 1.5, %v1649_v26  ;;  %1936 = vmatpush.bf16.msrb.mxu2 %v7880_v55  ;;  %1920 = vmatpush.bf16.msrb.mxu1 %v7852_v5  ;;  %v7835_v26 = vld [vmem:[%s12817_s3 + $0x50] sm:$0xf] }
 0x225   : > { %v10744_v29 = vadd.f32 %v10118_v15, %v1663_v27  ;;  %v9675_v27 = vld [vmem:[%s12817_s3 + $0x58] sm:$0xf0] }
 0x226   : > { %v1651_v30 = vmul.f32 %v10140_v19, %v1650_v28  ;;  %v7832_v28 = vor.u32 %v9673_v23, %v7829_v25  ;;  %v10119_v23 = vld [vmem:[%s10488_s25] ss:$0 sm:$0xff] }
 0x227   : > { %1678 = vadd.xlane.f32.xlu1 %v10744_v29 }
 0x228   : > { %v1655_v31 = vsel %vm1654_vm9, %v10140_v19, %v1651_v30  ;;  %1937 = vmatpush.bf16.msrb.mxu2 %v7868_v0  ;;  %v7848_v19 = vor.u32 %v9678_v17, %v7847_v16  ;;  %v7836_v30 = vor.u32 %v9675_v27, %v7835_v26  ;;  %v7796_v0 = vor.u32 %v9664_v58, %v7793_v60 }
 0x229   : > { %v1658_v32 = vmul.f32 %v1655_v31, %v1610_v56  ;;  %v7884_v56 = vor.u32 %v9687_v54, %v7883_v53  ;;  %v7815_v31 = vld [vmem:[%s12817_s3 + $0x30] sm:$0xf]  ;;  %v7812_v53 = vor.u32 %v9669_v51, %v7811_v50 }
 0x22b   : > { %v1664_v33 = vmul.f32 %v10117_v11, %v1658_v32  ;;  %1954 = vmatpush.bf16.msrb.mxu3 %v7884_v56  ;;  %v7839_v11 = vld [vmem:[%s12817_s3 + $0x60] sm:$0xf]  ;;  %v9671_v32 = vld [vmem:[%s12817_s3 + $0x38] sm:$0xf0] }
 0x22c   : > { %1938 = vmatpush.bf16.msrb.mxu2 %v7856_v9  ;;  %v7840_v14 = vor.u32 %v9677_v12, %v7839_v11  ;;  %v7791_v56 = vld [vmem:[%s12817_s3] sm:$0xf] }
 0x22d   : > { %v10747_v34 = vadd.f32 %v10118_v15, %v1664_v33  ;;  %v7841_v15 = vld [vmem:[%s12817_s3 + $0x6c] sm:$0xf0]  ;;  %v9670_v33 = vld [vmem:[%s12817_s3 + $0x34] sm:$0xf]  ;;  %v7792_v59 = vor.u32 %v9665_v57, %v7791_v56 }
 0x22e   : > { %v7844_v18 = vor.u32 %v9676_v13, %v7841_v15  ;;  %1921 = vmatpush.bf16.msrb.mxu1 %v7840_v14 }
 0x22f   : > { %1680 = vadd.xlane.f32.xlu2 %v10747_v34  ;;  %1955 = vmatpush.bf16.msrb.mxu3 %v7872_v1  ;;  %v7800_v1 = vor.u32 %v9666_v62, %v7799_v61 }
 0x230   : > { %1939 = vmatpush.bf16.msrb.mxu2 %v7844_v18 }
 0x232   : > { %1922 = vmatpush.bf16.msrb.mxu1 %v7828_v24 }
 0x233   : > { %1956 = vmatpush.bf16.msrb.mxu3 %v7860_v10 }
 0x234   : > { %1940 = vmatpush.bf16.msrb.mxu2 %v7832_v28 }
 0x237   : > { %1957 = vmatpush.bf16.msrb.mxu3 %v7848_v19 }
 0x23b   : > { %1958 = vmatpush.bf16.msrb.mxu3 %v7836_v30 }
 0x292   : > { %v1677_v35 = vpop.xlane.xlu0 %1676 }
 0x293   : > { %v1682_v36 = vmul.f32 %v1677_v35, %v10731_v45  ;;  %v7816_v35 = vor.u32 %v9671_v32, %v7815_v31  ;;  %v10120_v31 = vld [vmem:[%s10493_s29] ss:$0 sm:$0xff] }
 0x295   : > { %v10752_v37 = vsub.f32 %v10741_v20, %v1682_v36  ;;  %v7817_v36 = vld [vmem:[%s12817_s3 + $0x3c] sm:$0xf0]  ;;  %1923 = vmatpush.bf16.msrb.mxu1 %v7816_v35 }
 0x297   : > { %v1688_v38 = vmul.f32 %v10752_v37, %v10752_v37 }
 0x299   : > { %1691 = vadd.xlane.f32.xlu0 %v1688_v38  ;;  %v7823_v38 = vld [vmem:[%s12817_s3 + $0x38] sm:$0xf] }
 0x29a   : > { %v1679_v39 = vpop.xlane.xlu1 %1678 }
 0x29b   : > { %v1683_v40 = vmul.f32 %v1679_v39, %v10731_v45  ;;  %v9672_v39 = vld [vmem:[%s12817_s3 + $0x40] sm:$0xf0] }
 0x29d   : > { %v10758_v41 = vsub.f32 %v10744_v29, %v1683_v40  ;;  %v7820_v40 = vor.u32 %v9670_v33, %v7817_v36 }
 0x29f   : > { %v1689_v42 = vmul.f32 %v10758_v41, %v10758_v41  ;;  %1941 = vmatpush.bf16.msrb.mxu2 %v7820_v40 }
 0x2a1   : > { %1693 = vadd.xlane.f32.xlu1 %v1689_v42  ;;  %v7824_v42 = vor.u32 %v9672_v39, %v7823_v38 }
 0x2a2   : > { %v1681_v43 = vpop.xlane.xlu2 %1680 }
 0x2a3   : > { %v1684_v44 = vmul.f32 %v1681_v43, %v10731_v45  ;;  %1959 = vmatpush.bf16.msrb.mxu3 %v7824_v42  ;;  %v7803_v43 = vld [vmem:[%s12817_s3 + $0x18] sm:$0xf] }
 0x2a5   : > { %v10764_v46 = vsub.f32 %v10747_v34, %v1684_v44  ;;  %v9668_v44 = vld [vmem:[%s12817_s3 + $0x20] sm:$0xf0] }
 0x2a6   : > { %v7804_v48 = vor.u32 %v9668_v44, %v7803_v43 }
 0x2a7   : > { %v1690_v47 = vmul.f32 %v10764_v46, %v10764_v46  ;;  %1960 = vmatpush.bf16.msrb.mxu3 %v7812_v53 }
 0x2a8   : > { %1924 = vmatpush.bf16.msrb.mxu1 %v7804_v48  ;;  %v1782_v48 = vld [vmem:[%s10503_s8] sm:$0x7] }
 0x2a9   : > { %1695 = vadd.xlane.f32.xlu2 %v1690_v47  ;;  %v9667_v47 = vld [vmem:[%s12817_s3 + $0x1c] sm:$0xf]  ;;  %v1786_v62 = vperm.slane %v1782_v48, 2 }
 0x2aa   : > { %v7808_v52 = vor.u32 %v9667_v47, %v7805_v49  ;;  %v1784_v49 = vperm.slane %v1782_v48, 0 }
 0x2ab   : > { %1961 = vmatpush.bf16.msrb.mxu3 %v7800_v1 }
 0x2ac   : > { %1942 = vmatpush.bf16.msrb.mxu2 %v7808_v52  ;;  %1925 = vmatpush.bf16.msrb.mxu1 %v7792_v59 }
 0x2b0   : > { %1943 = vmatpush.bf16.msrb.mxu2 %v7796_v0 }
 0x30c   : > { %v1692_v54 = vpop.xlane.xlu0 %1691 }
 0x30d   : > { %v1697_v55 = vmul.f32 %v1692_v54, %v10731_v45 }
 0x30f   : > { %v1700_v63 = vadd.f32 1e-05, %v1697_v55  ;;  %v1785_v55 = vperm.slane %v1782_v48, 1 }
 0x311   : > { %10141 = vrsqrt.f32 %v1700_v63  ;;  %vm1709_vm11 = vweird.f32 %v1700_v63 }
 0x314   : > { %v1694_v2 = vpop.xlane.xlu1 %1693 }
 0x315   : > { %v1698_v3 = vmul.f32 %v1694_v2, %v10731_v45 }
 0x317   : > { %v10142_v4 = vpop.eup %10141  ;;  %v1701_v5 = vadd.f32 1e-05, %v1698_v3 }
 0x318   : > { %v1704_v6 = vmul.f32 %v10142_v4, %v1700_v63  ;;  %vm1710_vm10 = vweird.f32 %v10142_v4 }
 0x319   : > { %10143 = vrsqrt.f32 %v1701_v5  ;;  %vm1711_vm12 = vmor %vm1709_vm11, %vm1710_vm10  ;;  %vm1719_vm14 = vweird.f32 %v1701_v5 }
 0x31a   : > { %v1705_v7 = vmul.f32 %v10142_v4, %v1704_v6 }
 0x31c   : > { %v1706_v8 = vmul.f32 0.5, %v1705_v7  ;;  %v1696_v9 = vpop.xlane.xlu2 %1695 }
 0x31d   : > { %v1699_v10 = vmul.f32 %v1696_v9, %v10731_v45 }
 0x31e   : > { %v1707_v11 = vsub.f32 1.5, %v1706_v8 }
 0x31f   : > { %v10144_v12 = vpop.eup %10143  ;;  %v1702_v13 = vadd.f32 1e-05, %v1699_v10 }
 0x320   : > { %v1708_v14 = vmul.f32 %v10142_v4, %v1707_v11  ;;  %v1714_v15 = vmul.f32 %v10144_v12, %v1701_v5  ;;  %vm1720_vm13 = vweird.f32 %v10144_v12 }
 0x321   : > { %10145 = vrsqrt.f32 %v1702_v13  ;;  %vm1721_vm15 = vmor %vm1719_vm14, %vm1720_vm13  ;;  %vm1729_vm1 = vweird.f32 %v1702_v13 }
 0x322   : > { %v1715_v16 = vmul.f32 %v10144_v12, %v1714_v15  ;;  %v1712_v17 = vsel %vm1711_vm12, %v10142_v4, %v1708_v14 }
 0x323   : > { %v1733_v22 = vmul.f32 %v1712_v17, %v10752_v37 }
 0x324   : > { %v1716_v18 = vmul.f32 0.5, %v1715_v16 }
 0x325   : > { %v1739_v30 = vmul.f32 %v10119_v23, %v1733_v22 }
 0x326   : > { %v1717_v19 = vsub.f32 1.5, %v1716_v18 }
 0x327   : > { %v10146_v21 = vpop.eup %10145  ;;  %v1745_v36 = vadd.f32 %v10120_v31, %v1739_v30  ;;  %v1671_v30 = vlaneseq }
 0x328   : > { %v1718_v24 = vmul.f32 %v10144_v12, %v1717_v19  ;;  %v1724_v25 = vmul.f32 %v10146_v21, %v1702_v13  ;;  %vm1730_vm0 = vweird.f32 %v10146_v21 }
 0x329   : > { %vm1731_vm2 = vmor %vm1729_vm1, %vm1730_vm0 }
 0x32a   : > { %v1722_v26 = vsel %vm1721_vm15, %v10144_v12, %v1718_v24  ;;  %v1725_v27 = vmul.f32 %v10146_v21, %v1724_v25 }
 0x32b   : > { %v1734_v28 = vmul.f32 %v1722_v26, %v10758_v41 }
 0x32c   : > { %v1726_v32 = vmul.f32 0.5, %v1725_v27 }
 0x32d   : > { %v1740_v33 = vmul.f32 %v10119_v23, %v1734_v28 }
 0x32e   : > { %v1727_v35 = vsub.f32 1.5, %v1726_v32  ;;  %v10854_v32 = vand.u32 127, %v1671_v30 }
 0x32f   : > { %v1746_v38 = vadd.f32 %v10120_v31, %v1740_v33 }
 0x330   : > { %v1728_v39 = vmul.f32 %v10146_v21, %v1727_v35  ;;  %vm1673_vm5 = vcmp.lt.s32.totalorder %v10854_v32, 17 }
 0x331   : > { %v1748_v37 = vpack.c.bf16 %v1746_v38, %v1745_v36 }
 0x332   : > { %v1732_v40 = vsel %vm1731_vm2, %v10146_v21, %v1728_v39 }
 0x333   : > { %1926 = vmatmul.bf16.vlgmr.msrb.gmra.mxu1 %v1748_v37  ;;  %1944 = vmatmul.bf16.vlgmr.msrb.gmra.mxu2 %v1748_v37  ;;  %v1735_v42 = vmul.f32 %v1732_v40, %v10764_v46 }
 0x334   : > { %1962 = vmatmul.bf16.vlgmr.msrb.gmra.mxu3 %v1748_v37 }
 0x335   : > { %v1741_v41 = vmul.f32 %v10119_v23, %v1735_v42 }
 0x337   : > { %v1747_v43 = vadd.f32 %v10120_v31, %v1741_v41 }
 0x339   : > { %v1749_v44 = vpack.c.bf16 %v1747_v43, %v1747_v43 }
 0x343   : > { %1931 = vmatmul.bf16.gmra.mxu1 %v1749_v44  ;;  %1949 = vmatmul.bf16.gmra.mxu2 %v1749_v44 }
 0x344   : > { %1967 = vmatmul.bf16.gmra.mxu3 %v1749_v44 }
 0x3b0   : > { %v1927_v47 = vpop.f32.mrf.mxu1 }
 0x3b1   : > { %v1928_v53 = vadd.f32 %v1927_v47, %v1784_v49 }
 0x3b6   : > { %v1945_v50 = vpop.f32.mrf.mxu2 }
 0x3b7   : > { %v1963_v51 = vpop.f32.mrf.mxu3  ;;  %v1946_v57 = vadd.f32 %v1945_v50, %v1785_v55 }
 0x3b8   : > { %v1929_v52 = vpop.f32.mrf.mxu1  ;;  %v1964_v9 = vadd.f32 %v1963_v51, %v1786_v62 }
 0x3b9   : > { %v1930_v54 = vadd.f32 %v1929_v52, %v1784_v49 }
 0x3bb   : > { %v1972_v56 = vpack.c.bf16 %v1930_v54, %v1928_v53 }
 0x3bd   : > { %2081 = vrot.lane.b32.xlu2 %v1972_v56, %s10452_s22 }
 0x3be   : > { %v1947_v46 = vpop.f32.mrf.mxu2 }
 0x3bf   : > { %v1948_v58 = vadd.f32 %v1947_v46, %v1785_v55  ;;  %v1965_v59 = vpop.f32.mrf.mxu3 }
 0x3c0   : > { %v1932_v60 = vpop.f32.mrf.mxu1  ;;  %v1966_v6 = vadd.f32 %v1965_v59, %v1786_v62 }
 0x3c1   : > { %v1974_v61 = vpack.c.bf16 %v1948_v58, %v1946_v57  ;;  %v1933_v10 = vadd.f32 %v1932_v60, %v1784_v49 }
 0x3c2   : > { %v10835_v12 = vpack.c.bf16 %v1966_v6, %v1964_v9 }
 0x3c3   : > { %2087 = vrot.lane.b32.xlu1 %v1974_v61, %s10452_s22  ;;  %v1973_v14 = vpack.c.bf16 %v1933_v10, %v1933_v10  ;;  %v1984_v15 = vsel %vm1976_vm4, %v1974_v61, 0 }
 0x3c6   : > { %v1950_v63 = vpop.f32.mrf.mxu2 }
 0x3c7   : > { %v1951_v0 = vadd.f32 %v1950_v63, %v1785_v55  ;;  %v1968_v1 = vpop.f32.mrf.mxu3 }
 0x3c8   : > { %v1969_v2 = vadd.f32 %v1968_v1, %v1786_v62  ;;  %v1934_v3 = vpop.f32.mrf.mxu1 }
 0x3c9   : > { %v1975_v4 = vpack.c.bf16 %v1951_v0, %v1951_v0 }
 0x3ca   : > { %v10827_v5 = vpack.c.bf16 %v1969_v2, %v1969_v2 }
 0x3cb   : > { %2089 = vrot.lane.b32.xlu0 %v1975_v4, %s10452_s22  ;;  %2311 = vrot.lane.b32.xlu1 %v1974_v61, %s10453_s23  ;;  %v1987_v7 = vsel %vm1976_vm4, %v1975_v4, 0 }
 0x3cc   : > { %2313 = vrot.lane.b32.xlu2 %v1975_v4, %s10453_s23  ;;  %1995 = vmatpush.bf16.xpose.msra.mxu0 %v1987_v7  ;;  %v2059_v8 = vsel %vm2057_vm3, %v10827_v5, 0 }
 0x3cd   : > { %2067 = vmatpush.bf16.msra.mxu1 %v2059_v8 }
 0x3ce   : > { %v1952_v11 = vpop.f32.mrf.mxu2 }
 0x3cf   : > { %v1970_v13 = vpop.f32.mrf.mxu3 }
 0x3d1   : > { %2068 = vmatpush.bf16.msra.mxu1 %v10835_v12 }
 0x3d3   : > { %2200 = vrot.lane.b32.xlu1 %v1974_v61, %s10454_s26  ;;  %2083 = vrot.lane.b32.xlu0 %v1973_v14, %s10452_s22 }
 0x3d4   : > { %2307 = vrot.lane.b32.xlu2 %v1972_v56, %s10453_s23  ;;  %1996 = vmatpush.bf16.xpose.msra.mxu0 %v1984_v15 }
 0x3db   : > { %2198 = vrot.lane.b32.xlu1 %v1973_v14, %s10454_s26  ;;  %2202 = vrot.lane.b32.xlu0 %v1975_v4, %s10454_s26 }
 0x3dc   : > { %2309 = vrot.lane.b32.xlu2 %v1973_v14, %s10453_s23  ;;  %7885 = vmatmul.msk.bf16.vlgmr.msra.gmra.mxu0 %vm1976_vm4, %v1972_v56 }
 0x3e3   : > { %2196 = vrot.lane.b32.xlu0 %v1972_v56, %s10454_s26 }
 0x3ec   : > { %7886 = vmatmul.msk.bf16.gmra.mxu0 %vm1976_vm4, %v1973_v14 }
 0x417   : > { %v2082_v16 = vpop.permute.xlu2 %2081 }
 0x426   : > { %v2314_v21 = vpop.permute.xlu2 %2313 }
 0x427   : > { %v2325_v24 = vsel %vm1976_vm4, %v2314_v21, 0 }
 0x42e   : > { %v2308_v49 = vpop.permute.xlu2 %2307 }
 0x435   : > { %v2088_v19 = vpop.permute.xlu1 %2087 }
 0x436   : > { %v2098_v23 = vsel %vm1976_vm4, %v2088_v19, 0  ;;  %v2310_v53 = vpop.permute.xlu2 %2309 }
 0x43d   : > { %v2090_v17 = vpop.permute.xlu0 %2089  ;;  %v2312_v25 = vpop.permute.xlu1 %2311 }
 0x43e   : > { %v2101_v18 = vsel %vm1976_vm4, %v2090_v17, 0  ;;  %v2322_v28 = vsel %vm1976_vm4, %v2312_v25, 0 }
 0x43f   : > { %2109 = vmatpush.bf16.xpose.msra.mxu2 %v2101_v18 }
 0x445   : > { %v2084_v22 = vpop.permute.xlu0 %2083  ;;  %v2201_v31 = vpop.permute.xlu1 %2200 }
 0x446   : > { %v2211_v33 = vsel %vm1976_vm4, %v2201_v31, 0 }
 0x447   : > { %2110 = vmatpush.bf16.xpose.msra.mxu2 %v2098_v23 }
 0x44d   : > { %v2203_v26 = vpop.permute.xlu0 %2202  ;;  %v2199_v51 = vpop.permute.xlu1 %2198 }
 0x44e   : > { %v2214_v27 = vsel %vm1976_vm4, %v2203_v26, 0  ;;  %7889 = vmatmul.msk.bf16.vlgmr.msra.gmra.mxu2 %vm1976_vm4, %v2082_v16 }
 0x44f   : > { %2333 = vmatpush.bf16.xpose.msrb.mxu2 %v2325_v24  ;;  %2222 = vmatpush.bf16.xpose.msrb.mxu0 %v2214_v27 }
 0x455   : > { %v2197_v37 = vpop.permute.xlu0 %2196 }
 0x457   : > { %2334 = vmatpush.bf16.xpose.msrb.mxu2 %v2322_v28  ;;  %2223 = vmatpush.bf16.xpose.msrb.mxu0 %v2211_v33 }
 0x459   : > { %v1998_v35 = vpop.f32.mrf.mxu0 }
 0x45a   : > { %v2007_v36 = vmul.f32 0.17677669, %v1998_v35 }
 0x45c   : > { %v2010_v38 = vsel %vm1673_vm5, %v2007_v36, -1e+30 }
 0x45d   : > { %v2014_v39 = vsel %vm2013_vm6, %v2010_v38, -inf }
 0x45e   : > { %2015 = vmax.xlane.f32.xlu1 %v2014_v39  ;;  %7890 = vmatmul.msk.bf16.gmra.mxu2 %vm1976_vm4, %v2084_v22 }
 0x45f   : > { %7893 = vmatmul.msk.bf16.vlgmr.msrb.gmra.mxu0 %vm1976_vm4, %v2197_v37 }
 0x461   : > { %v2000_v40 = vpop.f32.mrf.mxu0 }
 0x462   : > { %v2008_v42 = vmul.f32 0.17677669, %v2000_v40 }
 0x464   : > { %v2011_v41 = vsel %vm1673_vm5, %v2008_v42, -1e+30 }
 0x465   : > { %v2017_v43 = vsel %vm2013_vm6, %v2011_v41, -inf }
 0x466   : > { %2018 = vmax.xlane.f32.xlu0 %v2017_v43 }
 0x469   : > { %v2003_v44 = vpop.f32.mrf.mxu0 }
 0x46a   : > { %v2009_v47 = vmul.f32 0.17677669, %v2003_v44 }
 0x46c   : > { %v10868_v48 = vsel %vm1673_vm5, %v2009_v47, -1e+30 }
 0x46d   : > { %v2020_v50 = vsel %vm2013_vm6, %v10868_v48, -inf }
 0x46e   : > { %2021 = vmax.xlane.f32.xlu1 %v2020_v50  ;;  %7897 = vmatmul.msk.bf16.vlgmr.msrb.gmra.mxu2 %vm1976_vm4, %v2308_v49 }
 0x46f   : > { %7894 = vmatmul.msk.bf16.gmra.mxu0 %vm1976_vm4, %v2199_v51 }
 0x471   : > { %v2005_v52 = vpop.f32.mrf.mxu0 }
 0x47e   : > { %7898 = vmatmul.msk.bf16.gmra.mxu2 %vm1976_vm4, %v2310_v53 }
 0x4d1   : > { %v2016_v54 = vpop.xlane.xlu1 %2015  ;;  %v2112_v55 = vpop.f32.mrf.mxu2 }
 0x4d2   : > { %v2023_v56 = vsub.f32 %v2010_v38, %v2016_v54  ;;  %v2121_v46 = vmul.f32 0.17677669, %v2112_v55 }
 0x4d4   : > { %v2026_v57 = vmul.f32 1.442695, %v2023_v56  ;;  %v10877_v58 = vsel %vm1673_vm5, %v2121_v46, -1e+30 }
 0x4d5   : > { %v2127_v59 = vsel %vm2013_vm6, %v10877_v58, -inf }
 0x4d6   : > { %10147 = vpow2.f32 %v2026_v57  ;;  %2128 = vmax.xlane.f32.xlu0 %v2127_v59 }
 0x4d9   : > { %v2019_v60 = vpop.xlane.xlu0 %2018  ;;  %v2114_v61 = vpop.f32.mrf.mxu2 }
 0x4da   : > { %v2024_v62 = vsub.f32 %v2011_v41, %v2019_v60  ;;  %v2122_v4 = vmul.f32 0.17677669, %v2114_v61 }
 0x4dc   : > { %v10881_v63 = vpop.eup %10147  ;;  %v2028_v0 = vmul.f32 1.442695, %v2024_v62  ;;  %v2225_v1 = vpop.f32.mrf.mxu0  ;;  %v10890_v9 = vsel %vm1673_vm5, %v2122_v4, -1e+30 }
 0x4dd   : > { %v2234_v2 = vmul.f32 0.17677669, %v2225_v1  ;;  %v2032_v3 = vsel %vm2013_vm6, %v10881_v63, 0.0  ;;  %v2130_v13 = vsel %vm2013_vm6, %v10890_v9, -inf }
 0x4de   : > { %2033 = vadd.xlane.f32.xlu2 %v2032_v3  ;;  %10149 = vpow2.f32 %v2028_v0 }
 0x4df   : > { %v2237_v6 = vsel %vm1673_vm5, %v2234_v2, -1e+30 }
 0x4e0   : > { %v2240_v7 = vsel %vm2013_vm6, %v2237_v6, -inf }
 0x4e1   : > { %2241 = vmax.xlane.f32.xlu1 %v2240_v7  ;;  %v2117_v8 = vpop.f32.mrf.mxu2  ;;  %v2022_v36 = vpop.xlane.xlu1 %2021 }
 0x4e2   : > { %v2123_v14 = vmul.f32 0.17677669, %v2117_v8  ;;  %v2025_v39 = vsub.f32 %v10868_v48, %v2022_v36 }
 0x4e4   : > { %v2227_v10 = vpop.f32.mrf.mxu0  ;;  %v10892_v11 = vpop.eup %10149  ;;  %v10902_v17 = vsel %vm1673_vm5, %v2123_v14, -1e+30  ;;  %v2030_v42 = vmul.f32 1.442695, %v2025_v39 }
 0x4e5   : > { %v2035_v15 = vsel %vm2013_vm6, %v10892_v11, 0.0  ;;  %v2133_v21 = vsel %vm2013_vm6, %v10902_v17, -inf  ;;  %v2235_v35 = vmul.f32 0.17677669, %v2227_v10 }
 0x4e6   : > { %2131 = vmax.xlane.f32.xlu2 %v2130_v13  ;;  %10151 = vpow2.f32 %v2030_v42 }
 0x4e7   : > { %v10922_v38 = vsel %vm1673_vm5, %v2235_v35, -1e+30 }
 0x4e8   : > { %v2243_v37 = vsel %vm2013_vm6, %v10922_v38, -inf }
 0x4e9   : > { %2036 = vadd.xlane.f32.xlu1 %v2035_v15  ;;  %v2119_v16 = vpop.f32.mrf.mxu2 }
 0x4ea   : > { %2166 = vrot.lane.b32.xlu0 %v10827_v5, %s10452_s22 }
 0x4ec   : > { %v2230_v18 = vpop.f32.mrf.mxu0  ;;  %v10935_v44 = vpop.eup %10151 }
 0x4ed   : > { %v2236_v19 = vmul.f32 0.17677669, %v2230_v18  ;;  %v2038_v47 = vsel %vm2013_vm6, %v10935_v44, 0.0 }
 0x4ee   : > { %2134 = vmax.xlane.f32.xlu2 %v2133_v21 }
 0x4ef   : > { %v10908_v22 = vsel %vm1673_vm5, %v2236_v19, -1e+30 }
 0x4f0   : > { %v2246_v23 = vsel %vm2013_vm6, %v10908_v22, -inf }
 0x4f1   : > { %2247 = vmax.xlane.f32.xlu1 %v2246_v23  ;;  %v2336_v24 = vpop.f32.mrf.mxu2 }
 0x4f2   : > { %v2345_v40 = vmul.f32 0.17677669, %v2336_v24 }
 0x4f4   : > { %v2232_v25 = vpop.f32.mrf.mxu0  ;;  %v10931_v41 = vsel %vm1673_vm5, %v2345_v40, -1e+30 }
 0x4f5   : > { %v2351_v43 = vsel %vm2013_vm6, %v10931_v41, -inf }
 0x4f9   : > { %v2338_v26 = vpop.f32.mrf.mxu2 }
 0x4fa   : > { %v2346_v27 = vmul.f32 0.17677669, %v2338_v26 }
 0x4fc   : > { %v10914_v28 = vsel %vm1673_vm5, %v2346_v27, -1e+30 }
 0x4fd   : > { %v2354_v30 = vsel %vm2013_vm6, %v10914_v28, -inf }
 0x4fe   : > { %2355 = vmax.xlane.f32.xlu2 %v2354_v30 }
 0x501   : > { %v2341_v31 = vpop.f32.mrf.mxu2 }
 0x502   : > { %v2347_v48 = vmul.f32 0.17677669, %v2341_v31 }
 0x504   : > { %v10941_v49 = vsel %vm1673_vm5, %v2347_v48, -1e+30 }
 0x505   : > { %v2357_v50 = vsel %vm2013_vm6, %v10941_v49, -inf }
 0x509   : > { %v2343_v33 = vpop.f32.mrf.mxu2 }
 0x50a   : > { %2388 = vrot.lane.b32.xlu1 %v10827_v5, %s10453_s23 }
 0x514   : > { %2244 = vmax.xlane.f32.xlu0 %v2243_v37 }
 0x516   : > { %2164 = vrot.lane.b32.xlu2 %v10835_v12, %s10452_s22 }
 0x51c   : > { %2352 = vmax.xlane.f32.xlu0 %v2351_v43 }
 0x524   : > { %2039 = vadd.xlane.f32.xlu0 %v2038_v47 }
 0x534   : > { %2358 = vmax.xlane.f32.xlu1 %v2357_v50 }
 0x549   : > { %v2129_v51 = vpop.xlane.xlu0 %2128 }
 0x54a   : > { %v2136_v52 = vsub.f32 %v10877_v58, %v2129_v51 }
 0x54c   : > { %v2139_v53 = vmul.f32 1.442695, %v2136_v52 }
 0x54e   : > { %10153 = vpow2.f32 %v2139_v53 }
 0x551   : > { %v2034_v54 = vpop.xlane.xlu2 %2033 }
 0x554   : > { %v10946_v55 = vpop.eup %10153  ;;  %v2242_v56 = vpop.xlane.xlu1 %2241 }
 0x555   : > { %v2249_v46 = vsub.f32 %v2237_v6, %v2242_v56  ;;  %v2145_v57 = vsel %vm2013_vm6, %v10946_v55, 0.0 }
 0x556   : > { %2146 = vadd.xlane.f32.xlu2 %v2145_v57 }
 0x557   : > { %v2252_v59 = vmul.f32 1.442695, %v2249_v46 }
 0x559   : > { %10155 = vpow2.f32 %v2252_v59  ;;  %v2132_v60 = vpop.xlane.xlu2 %2131 }
 0x55a   : > { %v2137_v61 = vsub.f32 %v10890_v9, %v2132_v60  ;;  %10157 = vrcp.f32 %v2034_v54 }
 0x55c   : > { %v2141_v62 = vmul.f32 1.442695, %v2137_v61  ;;  %v2037_v0 = vpop.xlane.xlu1 %2036  ;;  %v2167_v58 = vpop.permute.xlu0 %2166 }
 0x55d   : > { %10159 = vrcp.f32 %v2037_v0  ;;  %v2176_v1 = vsel %vm2057_vm3, %v2167_v58, 0 }
 0x55e   : > { %10161 = vpow2.f32 %v2141_v62  ;;  %2184 = vmatpush.bf16.msra.mxu3 %v2176_v1 }
 0x55f   : > { %v10952_v2 = vpop.eup %10155 }
 0x560   : > { %v2258_v3 = vsel %vm2013_vm6, %v10952_v2, 0.0  ;;  %v10158_v4 = vpop.eup %10157 }
 0x561   : > { %v2135_v6 = vpop.xlane.xlu2 %2134  ;;  %2259 = vadd.xlane.f32.xlu0 %v2258_v3  ;;  %v2044_v10 = vmul.f32 %v10158_v4, %v10881_v63 }
 0x562   : > { %v2138_v7 = vsub.f32 %v10902_v17, %v2135_v6 }
 0x563   : > { %v10160_v8 = vpop.eup %10159 }
 0x564   : > { %v10957_v9 = vpop.eup %10161  ;;  %v2045_v13 = vmul.f32 %v10160_v8, %v10892_v11  ;;  %v2143_v14 = vmul.f32 1.442695, %v2138_v7  ;;  %v2248_v21 = vpop.xlane.xlu1 %2247 }
 0x565   : > { %v2148_v15 = vsel %vm2013_vm6, %v10957_v9, 0.0  ;;  %v2251_v48 = vsub.f32 %v10908_v22, %v2248_v21 }
 0x566   : > { %v2047_v16 = vpack.c.bf16 %v2045_v13, %v2044_v10  ;;  %10163 = vpow2.f32 %v2143_v14  ;;  %2149 = vadd.xlane.f32.xlu1 %v2148_v15 }
 0x567   : > { %v2256_v50 = vmul.f32 1.442695, %v2251_v48 }
 0x568   : > { %7887 = vmatmul.msk.bf16.vlgmr.msra.gmra.mxu1 %vm2013_vm6, %v2047_v16 }
 0x56c   : > { %v10964_v18 = vpop.eup %10163 }
 0x56d   : > { %v2151_v17 = vsel %vm2013_vm6, %v10964_v18, 0.0 }
 0x56e   : > { %2152 = vadd.xlane.f32.xlu1 %v2151_v17 }
 0x571   : > { %v2356_v19 = vpop.xlane.xlu2 %2355 }
 0x572   : > { %v2361_v63 = vsub.f32 %v10914_v28, %v2356_v19 }
 0x574   : > { %v2365_v11 = vmul.f32 1.442695, %v2361_v63 }
 0x576   : > { %10165 = vpow2.f32 %v2365_v11 }
 0x579   : > { %v2165_v23 = vpop.permute.xlu2 %2164 }
 0x57a   : > { %2185 = vmatpush.bf16.msra.mxu3 %v2165_v23 }
 0x57c   : > { %v10969_v24 = vpop.eup %10165  ;;  %v2389_v25 = vpop.permute.xlu1 %2388 }
 0x57d   : > { %v2398_v26 = vsel %vm2057_vm3, %v2389_v25, 0  ;;  %v2372_v27 = vsel %vm2013_vm6, %v10969_v24, 0.0 }
 0x57e   : > { %2406 = vmatpush.bf16.msrb.mxu3 %v2398_v26  ;;  %2373 = vadd.xlane.f32.xlu2 %v2372_v27 }
 0x587   : > { %v2245_v30 = vpop.xlane.xlu0 %2244 }
 0x588   : > { %v2250_v31 = vsub.f32 %v10922_v38, %v2245_v30 }
 0x58a   : > { %v2254_v33 = vmul.f32 1.442695, %v2250_v31 }
 0x58c   : > { %10167 = vpow2.f32 %v2254_v33 }
 0x58f   : > { %v2353_v28 = vpop.xlane.xlu0 %2352 }
 0x590   : > { %v2360_v35 = vsub.f32 %v10931_v41, %v2353_v28 }
 0x592   : > { %v10976_v36 = vpop.eup %10167  ;;  %v2363_v39 = vmul.f32 1.442695, %v2360_v35 }
 0x593   : > { %v2261_v37 = vsel %vm2013_vm6, %v10976_v36, 0.0 }
 0x594   : > { %10169 = vpow2.f32 %v2363_v39  ;;  %2262 = vadd.xlane.f32.xlu0 %v2261_v37 }
 0x596   : > { %2386 = vrot.lane.b32.xlu2 %v10835_v12, %s10453_s23 }
 0x597   : > { %v2040_v40 = vpop.xlane.xlu0 %2039 }
 0x598   : > { %10171 = vrcp.f32 %v2040_v40 }
 0x599   : > { %10173 = vpow2.f32 %v2256_v50 }
 0x59a   : > { %v10170_v42 = vpop.eup %10169 }
 0x59b   : > { %v2369_v38 = vsel %vm2013_vm6, %v10170_v42, 0.0 }
 0x59c   : > { %2370 = vadd.xlane.f32.xlu1 %v2369_v38 }
 0x59e   : > { %v10172_v43 = vpop.eup %10171 }
 0x59f   : > { %v2046_v41 = vmul.f32 %v10172_v43, %v10935_v44  ;;  %v10174_v53 = vpop.eup %10173 }
 0x5a0   : > { %v2264_v44 = vsel %vm2013_vm6, %v10174_v53, 0.0 }
 0x5a1   : > { %v2048_v47 = vpack.c.bf16 %v2046_v41, %v2046_v41 }
 0x5a3   : > { %7888 = vmatmul.msk.bf16.gmra.mxu1 %vm2013_vm6, %v2048_v47 }
 0x5a7   : > { %v2359_v51 = vpop.xlane.xlu1 %2358 }
 0x5a8   : > { %2275 = vrot.lane.b32.xlu0 %v10835_v12, %s10454_s26  ;;  %v2362_v52 = vsub.f32 %v10941_v49, %v2359_v51  ;;  %v9695_v51 = vld [vmem:[%s10508_s14 + $0x38] sm:$0xff] }
 0x5a9   : > { %2531 = vmatpush.bf16.msra.mxu0 %v9695_v51  ;;  %v8049_v51 = vld [vmem:[%s10528_s6 + $0xf0] sm:$0xf0] }
 0x5aa   : > { %v2367_v54 = vmul.f32 1.442695, %v2362_v52 }
 0x5ac   : > { %10175 = vpow2.f32 %v2367_v54  ;;  %v9693_v54 = vld [vmem:[%s10508_s14 + $0x28] sm:$0xff] }
 0x5b2   : > { %v10176_v12 = vpop.eup %10175 }
 0x5b5   : > { %2277 = vrot.lane.b32.xlu1 %v10827_v5, %s10454_s26  ;;  %v2375_v5 = vsel %vm2013_vm6, %v10176_v12, 0.0 }
 0x5c9   : > { %v2147_v56 = vpop.xlane.xlu2 %2146 }
 0x5ca   : > { %10177 = vrcp.f32 %v2147_v56 }
 0x5d0   : > { %v10178_v57 = vpop.eup %10177 }
 0x5d1   : > { %v2157_v59 = vmul.f32 %v10178_v57, %v10946_v55  ;;  %v9691_v57 = vld [vmem:[%s10508_s14 + $0x18] sm:$0xff] }
 0x5d2   : > { %2265 = vadd.xlane.f32.xlu0 %v2264_v44 }
 0x5d4   : > { %v2260_v8 = vpop.xlane.xlu0 %2259 }
 0x5d9   : > { %v2150_v46 = vpop.xlane.xlu1 %2149 }
 0x5da   : > { %10179 = vrcp.f32 %v2150_v46 }
 0x5df   : > { %2376 = vadd.xlane.f32.xlu1 %v2375_v5  ;;  %v9690_v5 = vld [vmem:[%s10508_s14 + $0x10] sm:$0xff] }
 0x5e0   : > { %v10180_v22 = vpop.eup %10179 }
 0x5e1   : > { %v2158_v49 = vmul.f32 %v10180_v22, %v10957_v9  ;;  %v2153_v61 = vpop.xlane.xlu1 %2152  ;;  %v9689_v22 = vld [vmem:[%s10508_s14 + $0x8] sm:$0xff] }
 0x5e2   : > { %10181 = vrcp.f32 %v2153_v61 }
 0x5e3   : > { %v2160_v60 = vpack.c.bf16 %v2158_v49, %v2157_v59  ;;  %v9688_v59 = vld [vmem:[%s10508_s14] sm:$0xff] }
 0x5e5   : > { %7891 = vmatmul.msk.bf16.vlgmr.msra.gmra.mxu3 %vm2013_vm6, %v2160_v60  ;;  %v10998_v4 = vpop.f32.mrf.mxu1 }
 0x5e8   : > { %v10182_v62 = vpop.eup %10181 }
 0x5e9   : > { %v2159_v0 = vmul.f32 %v10182_v62, %v10964_v18 }
 0x5eb   : > { %v2161_v1 = vpack.c.bf16 %v2159_v0, %v2159_v0 }
 0x5ed   : > { %v11001_v13 = vpop.f32.mrf.mxu1 }
 0x5f1   : > { %v2374_v58 = vpop.xlane.xlu2 %2373 }
 0x5f2   : > { %10183 = vrcp.f32 %v2374_v58 }
 0x5f5   : > { %7892 = vmatmul.msk.bf16.gmra.mxu3 %vm2013_vm6, %v2161_v1 }
 0x5f8   : > { %v10184_v6 = vpop.eup %10183 }
 0x5f9   : > { %v2387_v3 = vpop.permute.xlu2 %2386  ;;  %v2382_v9 = vmul.f32 %v10184_v6, %v10969_v24 }
 0x5fa   : > { %2407 = vmatpush.bf16.msrb.mxu3 %v2387_v3 }
 0x607   : > { %v2263_v15 = vpop.xlane.xlu0 %2262 }
 0x60f   : > { %v2371_v55 = vpop.xlane.xlu1 %2370 }
 0x610   : > { %10185 = vrcp.f32 %v2371_v55 }
 0x611   : > { %10187 = vrcp.f32 %v2263_v15 }
 0x612   : > { %10189 = vrcp.f32 %v2260_v8 }
 0x616   : > { %v10186_v7 = vpop.eup %10185 }
 0x617   : > { %v2381_v10 = vmul.f32 %v10186_v7, %v10170_v42  ;;  %v10188_v18 = vpop.eup %10187 }
 0x618   : > { %v10190_v21 = vpop.eup %10189  ;;  %v2271_v11 = vmul.f32 %v10188_v18, %v10976_v36 }
 0x619   : > { %v2384_v14 = vpack.c.bf16 %v2382_v9, %v2381_v10  ;;  %v2270_v23 = vmul.f32 %v10190_v21, %v10952_v2 }
 0x61a   : > { %v2276_v24 = vpop.permute.xlu0 %2275 }
 0x61b   : > { %7899 = vmatmul.msk.bf16.vlgmr.msrb.gmra.mxu3 %vm2013_vm6, %v2384_v14  ;;  %v2273_v25 = vpack.c.bf16 %v2271_v11, %v2270_v23  ;;  %v10121_v11 = vld [vmem:[%s10513_s19] ss:$0 sm:$0xff] }
 0x620   : > { %v11004_v16 = vpop.f32.mrf.mxu1 }
 0x627   : > { %v2278_v17 = vpop.permute.xlu1 %2277 }
 0x628   : > { %v2287_v19 = vsel %vm2057_vm3, %v2278_v17, 0  ;;  %v2077_v63 = vpop.f32.mrf.mxu1 }
 0x629   : > { %2295 = vmatpush.bf16.msrb.mxu1 %v2287_v19 }
 0x62d   : > { %2296 = vmatpush.bf16.msrb.mxu1 %v2276_v24 }
 0x630   : > { %7895 = vmatmul.msk.bf16.vlgmr.msrb.gmra.mxu1 %vm2013_vm6, %v2273_v25 }
 0x645   : > { %v2266_v26 = vpop.xlane.xlu0 %2265 }
 0x646   : > { %10191 = vrcp.f32 %v2266_v26 }
 0x64c   : > { %v10192_v27 = vpop.eup %10191 }
 0x64d   : > { %v2272_v30 = vmul.f32 %v10192_v27, %v10174_v53  ;;  %v9694_v53 = vld [vmem:[%s10508_s14 + $0x30] sm:$0xff] }
 0x64e   : > { %2532 = vmatpush.bf16.msra.mxu0 %v9694_v53  ;;  %v9727_v53 = vld [vmem:[%s10528_s6 + $0xf4] sm:$0xf0] }
 0x64f   : > { %v2274_v31 = vpack.c.bf16 %v2272_v30, %v2272_v30 }
 0x651   : > { %7896 = vmatmul.msk.bf16.gmra.mxu1 %vm2013_vm6, %v2274_v31 }
 0x652   : > { %v2377_v33 = vpop.xlane.xlu1 %2376  ;;  %2533 = vmatpush.bf16.msra.mxu0 %v9693_v54 }
 0x653   : > { %10193 = vrcp.f32 %v2377_v33 }
 0x659   : > { %v10194_v28 = vpop.eup %10193 }
 0x65a   : > { %v2383_v35 = vmul.f32 %v10194_v28, %v10176_v12  ;;  %v9692_v12 = vld [vmem:[%s10508_s14 + $0x20] sm:$0xff] }
 0x65b   : > { %2534 = vmatpush.bf16.msra.mxu0 %v9692_v12 }
 0x65c   : > { %v2385_v39 = vpack.c.bf16 %v2383_v35, %v2383_v35 }
 0x65e   : > { %7900 = vmatmul.msk.bf16.gmra.mxu3 %vm2013_vm6, %v2385_v39 }
 0x65f   : > { %2535 = vmatpush.bf16.msra.mxu0 %v9691_v57  ;;  %v8031_v57 = vld [vmem:[%s10528_s6 + $0xc0] sm:$0xf] }
 0x663   : > { %2536 = vmatpush.bf16.msra.mxu0 %v9690_v5  ;;  %v9722_v5 = vld [vmem:[%s10528_s6 + $0xcc] sm:$0xf0] }
 0x667   : > { %2537 = vmatpush.bf16.msra.mxu0 %v9689_v22  ;;  %v9720_v22 = vld [vmem:[%s10528_s6 + $0xc4] sm:$0xf] }
 0x668   : > { %v2187_v2 = vpop.f32.mrf.mxu3 }
 0x66b   : > { %2538 = vmatpush.bf16.msra.mxu0 %v9688_v59  ;;  %v8032_v59 = vor.u32 %v9722_v5, %v8031_v57  ;;  %v9705_v5 = vld [vmem:[%s10528_s6 + $0x4c] sm:$0xf] }
 0x670   : > { %v2189_v36 = vpop.f32.mrf.mxu3 }
 0x671   : > { %v10092_v47 = vpack.i.bf16 %v2189_v36, %v2187_v2 }
 0x678   : > { %v2192_v37 = vpop.f32.mrf.mxu3 }
 0x679   : > { %2425 = vrot.lane.b32.xlu1 %v2192_v37, %s10453_s23 }
 0x680   : > { %v2194_v40 = vpop.f32.mrf.mxu3 }
 0x69e   : > { %v2409_v41 = vpop.f32.mrf.mxu3 }
 0x6a6   : > { %v2411_v48 = vpop.f32.mrf.mxu3 }
 0x6a7   : > { %v10097_v50 = vpack.i.bf16 %v2411_v48, %v2409_v41  ;;  %v8047_v41 = vld [vmem:[%s10528_s6 + $0xe0] sm:$0xf]  ;;  %v9724_v48 = vld [vmem:[%s10528_s6 + $0xe4] sm:$0xf] }
 0x6a8   : > { %v8052_v54 = vor.u32 %v9724_v48, %v8049_v51  ;;  %v7993_v48 = vld [vmem:[%s10528_s6 + $0x78] sm:$0xf0]  ;;  %v7967_v51 = vld [vmem:[%s10528_s6 + $0x40] sm:$0xf] }
 0x6aa   : > { %2855 = vmatpush.bf16.msra.mxu2 %v8052_v54 }
 0x6ad   : > { %v2298_v42 = vpop.f32.mrf.mxu1 }
 0x6b5   : > { %v2300_v38 = vpop.f32.mrf.mxu1 }
 0x6b6   : > { %v10087_v43 = vpack.i.bf16 %v2300_v38, %v2298_v42 }
 0x6b8   : > { %10088 = vrot.lane.b32.xlu2 %v10087_v43, %s10454_s26 }
 0x6c0   : > { %10093 = vrot.lane.b32.xlu2 %v10092_v47, %s10453_s23  ;;  %v9726_v47 = vld [vmem:[%s10528_s6 + $0xec] sm:$0xf0] }
 0x6c8   : > { %10098 = vrot.lane.b32.xlu2 %v10097_v50, %s10452_s22  ;;  %v8048_v50 = vor.u32 %v9726_v47, %v8047_v41  ;;  %v9709_v47 = vld [vmem:[%s10528_s6 + $0x6c] sm:$0xf] }
 0x6ca   : > { %2837 = vmatpush.bf16.msra.mxu1 %v8048_v50  ;;  %v7996_v50 = vor.u32 %v9709_v47, %v7993_v48 }
 0x6ce   : > { %v2303_v52 = vpop.f32.mrf.mxu1  ;;  %2838 = vmatpush.bf16.msra.mxu1 %v8032_v59 }
 0x6d0   : > { %2437 = vrot.lane.b32.xlu2 %v2303_v52, %s10454_s26  ;;  %v8055_v52 = vld [vmem:[%s10528_s6 + $0xe8] sm:$0xf] }
 0x6d6   : > { %v2305_v44 = vpop.f32.mrf.mxu1 }
 0x6d7   : > { %v8056_v44 = vor.u32 %v9727_v53, %v8055_v52  ;;  %v9706_v52 = vld [vmem:[%s10528_s6 + $0x4c] sm:$0xf0]  ;;  %v9704_v53 = vld [vmem:[%s10528_s6 + $0x44] sm:$0xf] }
 0x6d8   : > { %v7968_v54 = vor.u32 %v9706_v52, %v7967_v51 }
 0x6d9   : > { %2873 = vmatpush.bf16.msra.mxu3 %v8056_v44  ;;  %v7969_v44 = vld [vmem:[%s10528_s6 + $0x50] sm:$0xf0] }
 0x6e1   : > { %v2414_v56 = vpop.f32.mrf.mxu3 }
 0x6e2   : > { %2449 = vrot.lane.b32.xlu2 %v2414_v56, %s10452_s22  ;;  %v9725_v56 = vld [vmem:[%s10528_s6 + $0xec] sm:$0xf] }
 0x6e9   : > { %v2416_v46 = vpop.f32.mrf.mxu3 }
 0x6ea   : > { %v8057_v46 = vld [vmem:[%s10528_s6 + $0xf8] sm:$0xf0] }
 0x6eb   : > { %v8060_v12 = vor.u32 %v9725_v56, %v8057_v46  ;;  %v7975_v56 = vld [vmem:[%s10528_s6 + $0x48] sm:$0xf]  ;;  %v9707_v46 = vld [vmem:[%s10528_s6 + $0x54] sm:$0xf0] }
 0x6ec   : > { %v7976_v57 = vor.u32 %v9707_v46, %v7975_v56 }
 0x6ed   : > { %2891 = vmatpush.bf16.msrb.mxu0 %v8060_v12  ;;  %v7972_v12 = vor.u32 %v9704_v53, %v7969_v44  ;;  %v10122_v53 = vld [vmem:[%s10518_s24] ss:$0 sm:$0xff] }
 0x712   : > { %v10089_v49 = vpop.permute.xlu2 %10088 }
 0x713   : > { %v10091_v1 = vunpack.i.h.bf16 %v10089_v49  ;;  %v10090_v3 = vunpack.i.l.bf16 %v10089_v49  ;;  %v8033_v49 = vld [vmem:[%s10528_s6 + $0xd0] sm:$0xf0] }
 0x71a   : > { %v10094_v60 = vpop.permute.xlu2 %10093 }
 0x71b   : > { %v10096_v61 = vunpack.i.h.bf16 %v10094_v60  ;;  %v10095_v62 = vunpack.i.l.bf16 %v10094_v60  ;;  %v8039_v60 = vld [vmem:[%s10528_s6 + $0xc8] sm:$0xf] }
 0x71d   : > { %v2455_v0 = vsel %vm1976_vm4, %v11001_v13, %v10096_v61  ;;  %v2454_v58 = vsel %vm1976_vm4, %v10998_v4, %v10095_v62  ;;  %v2426_v4 = vpop.permute.xlu1 %2425  ;;  %v9723_v61 = vld [vmem:[%s10528_s6 + $0xd4] sm:$0xf0]  ;;  %v8036_v62 = vor.u32 %v9720_v22, %v8033_v49  ;;  %v7977_v22 = vld [vmem:[%s10528_s6 + $0x58] sm:$0xf0]  ;;  %v7951_v49 = vld [vmem:[%s10528_s6 + $0x20] sm:$0xf] }
 0x71e   : > { %v2458_v8 = vsel %vm12787_vm7, %v2454_v58, %v10090_v3  ;;  %v2459_v9 = vsel %vm12787_vm7, %v2455_v0, %v10091_v1  ;;  %v2456_v18 = vsel %vm1976_vm4, %v11004_v16, %v2426_v4  ;;  %v8040_v0 = vor.u32 %v9723_v61, %v8039_v60  ;;  %v9721_v58 = vld [vmem:[%s10528_s6 + $0xcc] sm:$0xf]  ;;  %v8041_v1 = vld [vmem:[%s10528_s6 + $0xd8] sm:$0xf0]  ;;  %v9702_v60 = vld [vmem:[%s10528_s6 + $0x2c] sm:$0xf0] }
 0x71f   : > { %v8044_v3 = vor.u32 %v9721_v58, %v8041_v1  ;;  %2856 = vmatpush.bf16.msra.mxu2 %v8036_v62  ;;  %v9717_v4 = vld [vmem:[%s10528_s6 + $0xac] sm:$0xf]  ;;  %v7980_v59 = vor.u32 %v9705_v5, %v7977_v22  ;;  %v9700_v61 = vld [vmem:[%s10528_s6 + $0x24] sm:$0xf]  ;;  %v7952_v62 = vor.u32 %v9702_v60, %v7951_v49  ;;  %v7959_v58 = vld [vmem:[%s10528_s6 + $0x28] sm:$0xf] }
 0x720   : > { %2874 = vmatpush.bf16.msra.mxu3 %v8040_v0  ;;  %v7953_v0 = vld [vmem:[%s10528_s6 + $0x30] sm:$0xf0]  ;;  %v9703_v1 = vld [vmem:[%s10528_s6 + $0x34] sm:$0xf0] }
 0x721   : > { %2892 = vmatpush.bf16.msrb.mxu0 %v8044_v3 }
 0x722   : > { %v10099_v55 = vpop.permute.xlu2 %10098 }
 0x723   : > { %v10101_v6 = vunpack.i.h.bf16 %v10099_v55  ;;  %v10100_v7 = vunpack.i.l.bf16 %v10099_v55  ;;  %v8015_v55 = vld [vmem:[%s10528_s6 + $0xa0] sm:$0xf] }
 0x725   : > { %v2462_v10 = vsel %vm12786_vm8, %v2458_v8, %v10100_v7  ;;  %v2463_v14 = vsel %vm12786_vm8, %v2459_v9, %v10101_v6  ;;  %v9718_v6 = vld [vmem:[%s10528_s6 + $0xac] sm:$0xf0]  ;;  %v9716_v7 = vld [vmem:[%s10528_s6 + $0xa4] sm:$0xf]  ;;  %v8017_v9 = vld [vmem:[%s10528_s6 + $0xb0] sm:$0xf0] }
 0x726   : > { %v2465_v13 = vpack.c.bf16 %v2463_v14, %v2462_v10  ;;  %v8016_v8 = vor.u32 %v9718_v6, %v8015_v55  ;;  %v8023_v10 = vld [vmem:[%s10528_s6 + $0xa8] sm:$0xf]  ;;  %v9719_v14 = vld [vmem:[%s10528_s6 + $0xb4] sm:$0xf0]  ;;  %v7956_v55 = vor.u32 %v9700_v61, %v7953_v0  ;;  %v7960_v6 = vor.u32 %v9703_v1, %v7959_v58 }
 0x728   : > { %2539 = vmatmul.bf16.vlgmr.msra.gmra.mxu0 %v2465_v13  ;;  %v8020_v13 = vor.u32 %v9716_v7, %v8017_v9  ;;  %2839 = vmatpush.bf16.msra.mxu1 %v8016_v8  ;;  %v9701_v7 = vld [vmem:[%s10528_s6 + $0x2c] sm:$0xf]  ;;  %v7961_v8 = vld [vmem:[%s10528_s6 + $0x38] sm:$0xf0] }
 0x72a   : > { %v2438_v15 = vpop.permute.xlu2 %2437  ;;  %2857 = vmatpush.bf16.msra.mxu2 %v8020_v13  ;;  %v9698_v13 = vld [vmem:[%s10528_s6 + $0xc] sm:$0xf0] }
 0x72b   : > { %v2460_v17 = vsel %vm12787_vm7, %v2456_v18, %v2438_v15  ;;  %v8024_v15 = vor.u32 %v9719_v14, %v8023_v10  ;;  %v8025_v18 = vld [vmem:[%s10528_s6 + $0xb8] sm:$0xf0]  ;;  %v7964_v10 = vor.u32 %v9701_v7, %v7961_v8  ;;  %v7935_v14 = vld [vmem:[%s10528_s6] sm:$0xf] }
 0x72d   : > { %2875 = vmatpush.bf16.msra.mxu3 %v8024_v15  ;;  %v9696_v15 = vld [vmem:[%s10528_s6 + $0x4] sm:$0xf] }
 0x73c   : > { %v2450_v19 = vpop.permute.xlu2 %2449 }
 0x73d   : > { %v2464_v63 = vsel %vm12786_vm8, %v2460_v17, %v2450_v19  ;;  %v8028_v17 = vor.u32 %v9717_v4, %v8025_v18  ;;  %v7999_v19 = vld [vmem:[%s10528_s6 + $0x80] sm:$0xf]  ;;  %v7936_v18 = vor.u32 %v9698_v13, %v7935_v14 }
 0x73e   : > { %v2466_v21 = vpack.c.bf16 %v2464_v63, %v2464_v63  ;;  %v9714_v63 = vld [vmem:[%s10528_s6 + $0x8c] sm:$0xf0] }
 0x73f   : > { %2893 = vmatpush.bf16.msrb.mxu0 %v8028_v17  ;;  %v7937_v17 = vld [vmem:[%s10528_s6 + $0x10] sm:$0xf0] }
 0x740   : > { %2544 = vmatmul.bf16.gmra.mxu0 %v2466_v21  ;;  %v9712_v21 = vld [vmem:[%s10528_s6 + $0x84] sm:$0xf] }
 0x7a5   : > { %v2540_v23 = vpop.f32.mrf.mxu0 }
 0x7a6   : > { %v2549_v24 = vadd.f32 %v2540_v23, %v10741_v20  ;;  %v8001_v23 = vld [vmem:[%s10528_s6 + $0x90] sm:$0xf0] }
 0x7a8   : > { %v11040_v25 = vadd.f32 %v10121_v11, %v2549_v24  ;;  %v8007_v24 = vld [vmem:[%s10528_s6 + $0x88] sm:$0xf] }
 0x7aa   : > { %2561 = vadd.xlane.f32.xlu0 %v11040_v25 }
 0x7ad   : > { %v2542_v26 = vpop.f32.mrf.mxu0 }
 0x7ae   : > { %v2550_v27 = vadd.f32 %v2542_v26, %v10744_v29  ;;  %v9715_v26 = vld [vmem:[%s10528_s6 + $0x94] sm:$0xf0] }
 0x7b0   : > { %v11044_v30 = vadd.f32 %v10121_v11, %v2550_v27  ;;  %v8004_v27 = vor.u32 %v9712_v21, %v8001_v23  ;;  %v9699_v21 = vld [vmem:[%s10528_s6 + $0x14] sm:$0xf0]  ;;  %v7945_v23 = vld [vmem:[%s10528_s6 + $0x18] sm:$0xf0] }
 0x7b2   : > { %2563 = vadd.xlane.f32.xlu2 %v11044_v30  ;;  %2858 = vmatpush.bf16.msra.mxu2 %v8004_v27 }
 0x7bd   : > { %v2545_v16 = vpop.f32.mrf.mxu0 }
 0x7be   : > { %v2551_v31 = vadd.f32 %v2545_v16, %v10747_v34  ;;  %v8008_v16 = vor.u32 %v9715_v26, %v8007_v24 }
 0x7c0   : > { %v11048_v33 = vadd.f32 %v10121_v11, %v2551_v31  ;;  %v8000_v11 = vor.u32 %v9714_v63, %v7999_v19  ;;  %v9713_v31 = vld [vmem:[%s10528_s6 + $0x8c] sm:$0xf]  ;;  %2876 = vmatpush.bf16.msra.mxu3 %v8008_v16  ;;  %v7943_v19 = vld [vmem:[%s10528_s6 + $0x8] sm:$0xf]  ;;  %v7940_v63 = vor.u32 %v9696_v15, %v7937_v17 }
 0x7c1   : > { %v7944_v24 = vor.u32 %v9699_v21, %v7943_v19 }
 0x7c2   : > { %2565 = vadd.xlane.f32.xlu1 %v11048_v33  ;;  %2840 = vmatpush.bf16.msra.mxu1 %v8000_v11  ;;  %v9697_v11 = vld [vmem:[%s10528_s6 + $0xc] sm:$0xf] }
 0x7c3   : > { %v7948_v26 = vor.u32 %v9697_v11, %v7945_v23 }
 0x7c5   : > { %v2547_v28 = vpop.f32.mrf.mxu0 }
 0x7c6   : > { %v8009_v28 = vld [vmem:[%s10528_s6 + $0x98] sm:$0xf0] }
 0x81d   : > { %v2562_v20 = vpop.xlane.xlu0 %2561 }
 0x81e   : > { %v2567_v35 = vmul.f32 %v2562_v20, %v10731_v45  ;;  %v8012_v20 = vor.u32 %v9713_v31, %v8009_v28 }
 0x820   : > { %v11053_v29 = vsub.f32 %v11040_v25, %v2567_v35  ;;  %v7983_v35 = vld [vmem:[%s10528_s6 + $0x60] sm:$0xf]  ;;  %2894 = vmatpush.bf16.msrb.mxu0 %v8012_v20 }
 0x822   : > { %v2573_v39 = vmul.f32 %v11053_v29, %v11053_v29 }
 0x824   : > { %2576 = vadd.xlane.f32.xlu0 %v2573_v39  ;;  %v9710_v39 = vld [vmem:[%s10528_s6 + $0x6c] sm:$0xf0]  ;;  %2895 = vmatpush.bf16.msrb.mxu0 %v7996_v50 }
 0x825   : > { %v2564_v34 = vpop.xlane.xlu2 %2563 }
 0x826   : > { %v2568_v2 = vmul.f32 %v2564_v34, %v10731_v45  ;;  %v9708_v34 = vld [vmem:[%s10528_s6 + $0x64] sm:$0xf] }
 0x828   : > { %v11059_v36 = vsub.f32 %v11044_v30, %v2568_v2  ;;  %v7984_v2 = vor.u32 %v9710_v39, %v7983_v35  ;;  %2896 = vmatpush.bf16.msrb.mxu0 %v7980_v59 }
 0x82a   : > { %v2574_v37 = vmul.f32 %v11059_v36, %v11059_v36  ;;  %2841 = vmatpush.bf16.msra.mxu1 %v7984_v2 }
 0x82c   : > { %2578 = vadd.xlane.f32.xlu0 %v2574_v37  ;;  %v7985_v37 = vld [vmem:[%s10528_s6 + $0x70] sm:$0xf0]  ;;  %2897 = vmatpush.bf16.msrb.mxu0 %v7964_v10  ;;  %v9759_v10 = vld [vmem:[%s12820_s1 + $0xf8] sm:$0xff] }
 0x82e   : > { %2842 = vmatpush.bf16.msra.mxu1 %v7968_v54 }
 0x830   : > { %2898 = vmatpush.bf16.msrb.mxu0 %v7948_v26  ;;  %v9734_v26 = vld [vmem:[%s12820_s1 + $0x30] sm:$0xff] }
 0x832   : > { %2843 = vmatpush.bf16.msra.mxu1 %v7952_v62 }
 0x834   : > { %3479 = vmatpush.bf16.msra.mxu0 %v9759_v10 }
 0x835   : > { %v2566_v40 = vpop.xlane.xlu1 %2565 }
 0x836   : > { %v2569_v42 = vmul.f32 %v2566_v40, %v10731_v45  ;;  %v7991_v40 = vld [vmem:[%s10528_s6 + $0x68] sm:$0xf]  ;;  %2844 = vmatpush.bf16.msra.mxu1 %v7936_v18 }
 0x838   : > { %v11065_v38 = vsub.f32 %v11048_v33, %v2569_v42  ;;  %v9711_v42 = vld [vmem:[%s10528_s6 + $0x74] sm:$0xf0] }
 0x839   : > { %v7992_v41 = vor.u32 %v9711_v42, %v7991_v40 }
 0x83a   : > { %v2575_v43 = vmul.f32 %v11065_v38, %v11065_v38 }
 0x83b   : > { %2877 = vmatpush.bf16.msra.mxu3 %v7992_v41 }
 0x83c   : > { %2580 = vadd.xlane.f32.xlu0 %v2575_v43  ;;  %v7988_v43 = vor.u32 %v9708_v34, %v7985_v37 }
 0x83e   : > { %2859 = vmatpush.bf16.msra.mxu2 %v7988_v43 }
 0x83f   : > { %2878 = vmatpush.bf16.msra.mxu3 %v7976_v57 }
 0x842   : > { %2860 = vmatpush.bf16.msra.mxu2 %v7972_v12  ;;  %v10123_v12 = vld [vmem:[%s10523_s30] ss:$0 sm:$0xff] }
 0x843   : > { %2879 = vmatpush.bf16.msra.mxu3 %v7960_v6  ;;  %v2667_v6 = vld [vmem:[%s12819_s28] sm:$0xf] }
 0x844   : > { %v11142_v7 = vperm.slane %v2667_v6, 0  ;;  %v11144_v8 = vperm.slane %v2667_v6, 3  ;;  %v11155_v18 = vperm.slane %v2667_v6, 1  ;;  %v11158_v19 = vperm.slane %v2667_v6, 2 }
 0x846   : > { %2861 = vmatpush.bf16.msra.mxu2 %v7956_v55 }
 0x847   : > { %2880 = vmatpush.bf16.msra.mxu3 %v7944_v24 }
 0x84a   : > { %2862 = vmatpush.bf16.msra.mxu2 %v7940_v63 }
 0x897   : > { %v2577_v3 = vpop.xlane.xlu0 %2576 }
 0x898   : > { %v2582_v9 = vmul.f32 %v2577_v3, %v10731_v45 }
 0x89a   : > { %v2585_v4 = vadd.f32 1e-05, %v2582_v9  ;;  %v9735_v9 = vld [vmem:[%s12820_s1 + $0x38] sm:$0xff] }
 0x89b   : > { %3425 = vmatpush.bf16.msrb.mxu1 %v9735_v9  ;;  %v9740_v9 = vld [vmem:[%s12820_s1 + $0x60] sm:$0xff] }
 0x89c   : > { %10195 = vrsqrt.f32 %v2585_v4  ;;  %vm2594_vm10 = vweird.f32 %v2585_v4 }
 0x89f   : > { %v2579_v27 = vpop.xlane.xlu0 %2578  ;;  %3426 = vmatpush.bf16.msrb.mxu1 %v9734_v26 }
 0x8a0   : > { %v2583_v16 = vmul.f32 %v2579_v27, %v10731_v45  ;;  %v9758_v27 = vld [vmem:[%s12820_s1 + $0xf0] sm:$0xff] }
 0x8a1   : > { %3480 = vmatpush.bf16.msra.mxu0 %v9758_v27 }
 0x8a2   : > { %v10196_v31 = vpop.eup %10195  ;;  %v2586_v28 = vadd.f32 1e-05, %v2583_v16 }
 0x8a3   : > { %v2589_v20 = vmul.f32 %v10196_v31, %v2585_v4  ;;  %vm2595_vm9 = vweird.f32 %v10196_v31 }
 0x8a4   : > { %10197 = vrsqrt.f32 %v2586_v28  ;;  %vm2596_vm11 = vmor %vm2594_vm10, %vm2595_vm9  ;;  %vm2604_vm13 = vweird.f32 %v2586_v28 }
 0x8a5   : > { %v2590_v35 = vmul.f32 %v10196_v31, %v2589_v20 }
 0x8a7   : > { %v2591_v39 = vmul.f32 0.5, %v2590_v35 }
 0x8a9   : > { %v2592_v34 = vsub.f32 1.5, %v2591_v39  ;;  %v9743_v39 = vld [vmem:[%s12820_s1 + $0x78] sm:$0xff] }
 0x8aa   : > { %v10198_v2 = vpop.eup %10197  ;;  %3443 = vmatpush.bf16.msrb.mxu2 %v9743_v39 }
 0x8ab   : > { %v2593_v37 = vmul.f32 %v10196_v31, %v2592_v34  ;;  %v2599_v40 = vmul.f32 %v10198_v2, %v2586_v28  ;;  %vm2605_vm12 = vweird.f32 %v10198_v2  ;;  %v9751_v34 = vld [vmem:[%s12820_s1 + $0xb8] sm:$0xff] }
 0x8ac   : > { %vm2606_vm14 = vmor %vm2604_vm13, %vm2605_vm12  ;;  %3461 = vmatpush.bf16.msrb.mxu3 %v9751_v34 }
 0x8ad   : > { %v2600_v42 = vmul.f32 %v10198_v2, %v2599_v40  ;;  %v2597_v43 = vsel %vm2596_vm11, %v10196_v31, %v2593_v37 }
 0x8ae   : > { %v2618_v51 = vmul.f32 %v2597_v43, %v11053_v29  ;;  %v9733_v43 = vld [vmem:[%s12820_s1 + $0x28] sm:$0xff] }
 0x8af   : > { %v2601_v41 = vmul.f32 0.5, %v2600_v42  ;;  %v2581_v47 = vpop.xlane.xlu0 %2580  ;;  %3427 = vmatpush.bf16.msrb.mxu1 %v9733_v43 }
 0x8b0   : > { %v2584_v48 = vmul.f32 %v2581_v47, %v10731_v45  ;;  %v2624_v46 = vmul.f32 %v10122_v53, %v2618_v51 }
 0x8b1   : > { %v2602_v50 = vsub.f32 1.5, %v2601_v41  ;;  %v9757_v41 = vld [vmem:[%s12820_s1 + $0xe8] sm:$0xff] }
 0x8b2   : > { %v2587_v52 = vadd.f32 1e-05, %v2584_v48  ;;  %v2630_v22 = vadd.f32 %v10123_v12, %v2624_v46  ;;  %3481 = vmatpush.bf16.msra.mxu0 %v9757_v41 }
 0x8b3   : > { %v2603_v54 = vmul.f32 %v10198_v2, %v2602_v50 }
 0x8b4   : > { %10199 = vrsqrt.f32 %v2587_v52  ;;  %vm2614_vm0 = vweird.f32 %v2587_v52 }
 0x8b5   : > { %v2607_v44 = vsel %vm2606_vm14, %v10198_v2, %v2603_v54 }
 0x8b6   : > { %v2619_v56 = vmul.f32 %v2607_v44, %v11059_v36 }
 0x8b8   : > { %v2625_v57 = vmul.f32 %v10122_v53, %v2619_v56 }
 0x8ba   : > { %v10200_v5 = vpop.eup %10199  ;;  %v2631_v59 = vadd.f32 %v10123_v12, %v2625_v57 }
 0x8bb   : > { %v2609_v49 = vmul.f32 %v10200_v5, %v2587_v52  ;;  %vm2615_vm15 = vweird.f32 %v10200_v5  ;;  %v9742_v52 = vld [vmem:[%s12820_s1 + $0x70] sm:$0xff] }
 0x8bc   : > { %v2633_v60 = vpack.c.bf16 %v2631_v59, %v2630_v22  ;;  %vm2616_vm1 = vmor %vm2614_vm0, %vm2615_vm15  ;;  %3444 = vmatpush.bf16.msrb.mxu2 %v9742_v52  ;;  %v9732_v22 = vld [vmem:[%s12820_s1 + $0x20] sm:$0xff]  ;;  %v9753_v52 = vld [vmem:[%s12820_s1 + $0xc8] sm:$0xff] }
 0x8bd   : > { %v2610_v61 = vmul.f32 %v10200_v5, %v2609_v49  ;;  %v9756_v59 = vld [vmem:[%s12820_s1 + $0xe0] sm:$0xff]  ;;  %3428 = vmatpush.bf16.msrb.mxu1 %v9732_v22 }
 0x8be   : > { %2845 = vmatmul.bf16.vlgmr.msra.gmra.mxu1 %v2633_v60  ;;  %2863 = vmatmul.bf16.vlgmr.msra.gmra.mxu2 %v2633_v60 }
 0x8bf   : > { %v2611_v29 = vmul.f32 0.5, %v2610_v61  ;;  %2881 = vmatmul.bf16.vlgmr.msra.gmra.mxu3 %v2633_v60  ;;  %2899 = vmatmul.bf16.vlgmr.msrb.gmra.mxu0 %v2633_v60  ;;  %v9741_v61 = vld [vmem:[%s12820_s1 + $0x68] sm:$0xff] }
 0x8c0   : > { %3482 = vmatpush.bf16.msra.mxu0 %v9756_v59  ;;  %3445 = vmatpush.bf16.msrb.mxu2 %v9741_v61  ;;  %v9738_v61 = vld [vmem:[%s12820_s1 + $0x50] sm:$0xff] }
 0x8c1   : > { %v2612_v62 = vsub.f32 1.5, %v2611_v29  ;;  %v9749_v29 = vld [vmem:[%s12820_s1 + $0xa8] sm:$0xff] }
 0x8c3   : > { %v2613_v0 = vmul.f32 %v10200_v5, %v2612_v62 }
 0x8c4   : > { %3446 = vmatpush.bf16.msrb.mxu2 %v9740_v9 }
 0x8c5   : > { %v2617_v36 = vsel %vm2616_vm1, %v10200_v5, %v2613_v0 }
 0x8c6   : > { %v2620_v58 = vmul.f32 %v2617_v36, %v11065_v38  ;;  %v9731_v36 = vld [vmem:[%s12820_s1 + $0x18] sm:$0xff] }
 0x8c7   : > { %3429 = vmatpush.bf16.msrb.mxu1 %v9731_v36 }
 0x8c8   : > { %v2626_v1 = vmul.f32 %v10122_v53, %v2620_v58  ;;  %v9750_v53 = vld [vmem:[%s12820_s1 + $0xb0] sm:$0xff]  ;;  %v9755_v58 = vld [vmem:[%s12820_s1 + $0xd8] sm:$0xff] }
 0x8c9   : > { %3462 = vmatpush.bf16.msrb.mxu3 %v9750_v53  ;;  %3483 = vmatpush.bf16.msra.mxu0 %v9755_v58 }
 0x8ca   : > { %v2632_v3 = vadd.f32 %v10123_v12, %v2626_v1 }
 0x8cc   : > { %v2634_v55 = vpack.c.bf16 %v2632_v3, %v2632_v3 }
 0x8cd   : > { %3463 = vmatpush.bf16.msrb.mxu3 %v9749_v29  ;;  %v9746_v29 = vld [vmem:[%s12820_s1 + $0x90] sm:$0xff] }
 0x8ce   : > { %2850 = vmatmul.bf16.gmra.mxu1 %v2634_v55  ;;  %2868 = vmatmul.bf16.gmra.mxu2 %v2634_v55 }
 0x8cf   : > { %2886 = vmatmul.bf16.gmra.mxu3 %v2634_v55  ;;  %2904 = vmatmul.bf16.gmra.mxu0 %v2634_v55 }
 0x93b   : > { %v2846_v14 = vpop.f32.mrf.mxu1 }
 0x93c   : > { %v11149_v13 = vadd.f32 %v2846_v14, %v11142_v7  ;;  %v2900_v38 = vpop.f32.mrf.mxu0 }
 0x93d   : > { %v11152_v15 = vadd.f32 %v2900_v38, %v11144_v8 }
 0x93e   : > { %v8061_v4 = vmul.f32 -1.702, %v11149_v13 }
 0x93f   : > { %v8064_v17 = vmul.f32 -1.702, %v11152_v15 }
 0x940   : > { %v2933_v63 = vmul.f32 1.442695, %v8061_v4  ;;  %v9748_v4 = vld [vmem:[%s12820_s1 + $0xa0] sm:$0xff] }
 0x941   : > { %v2939_v21 = vmul.f32 1.442695, %v8064_v17  ;;  %v2864_v11 = vpop.f32.mrf.mxu2  ;;  %3464 = vmatpush.bf16.msrb.mxu3 %v9748_v4 }
 0x942   : > { %10201 = vpow2.f32 %v2933_v63  ;;  %v11161_v23 = vadd.f32 %v2864_v11, %v11155_v18  ;;  %v2882_v24 = vpop.f32.mrf.mxu3  ;;  %v9730_v11 = vld [vmem:[%s12820_s1 + $0x10] sm:$0xff] }
 0x943   : > { %10203 = vpow2.f32 %v2939_v21  ;;  %v11166_v16 = vadd.f32 %v2882_v24, %v11158_v19  ;;  %v2848_v31 = vpop.f32.mrf.mxu1  ;;  %v9754_v24 = vld [vmem:[%s12820_s1 + $0xd0] sm:$0xff]  ;;  %3430 = vmatpush.bf16.msrb.mxu1 %v9730_v11  ;;  %v9752_v11 = vld [vmem:[%s12820_s1 + $0xc0] sm:$0xff] }
 0x944   : > { %v8062_v28 = vmul.f32 -1.702, %v11161_v23  ;;  %v11170_v20 = vadd.f32 %v2848_v31, %v11142_v7  ;;  %v2902_v35 = vpop.f32.mrf.mxu0  ;;  %3484 = vmatpush.bf16.msra.mxu0 %v9754_v24 }
 0x945   : > { %v8063_v2 = vmul.f32 -1.702, %v11166_v16  ;;  %v11176_v37 = vadd.f32 %v2902_v35, %v11144_v8 }
 0x946   : > { %v2935_v40 = vmul.f32 1.442695, %v8062_v28  ;;  %v8065_v42 = vmul.f32 -1.702, %v11170_v20 }
 0x947   : > { %v2937_v47 = vmul.f32 1.442695, %v8063_v2  ;;  %v8068_v48 = vmul.f32 -1.702, %v11176_v37 }
 0x948   : > { %v10202_v50 = vpop.eup %10201  ;;  %10205 = vpow2.f32 %v2935_v40  ;;  %v2941_v51 = vmul.f32 1.442695, %v8065_v42  ;;  %v9739_v40 = vld [vmem:[%s12820_s1 + $0x58] sm:$0xff]  ;;  %3485 = vmatpush.bf16.msra.mxu0 %v9753_v52 }
 0x949   : > { %v10204_v54 = vpop.eup %10203  ;;  %v11184_v44 = vadd.f32 1.0, %v10202_v50  ;;  %10207 = vpow2.f32 %v2937_v47  ;;  %v2947_v56 = vmul.f32 1.442695, %v8068_v48  ;;  %v2866_v46 = vpop.f32.mrf.mxu2  ;;  %v9747_v47 = vld [vmem:[%s12820_s1 + $0x98] sm:$0xff]  ;;  %3447 = vmatpush.bf16.msrb.mxu2 %v9739_v40 }
 0x94a   : > { %v11186_v12 = vadd.f32 1.0, %v10204_v54  ;;  %10209 = vpow2.f32 %v2941_v51  ;;  %v11189_v57 = vadd.f32 %v2866_v46, %v11155_v18  ;;  %v2884_v5 = vpop.f32.mrf.mxu3  ;;  %v9729_v51 = vld [vmem:[%s12820_s1 + $0x8] sm:$0xff]  ;;  %3465 = vmatpush.bf16.msrb.mxu3 %v9747_v47 }
 0x94b   : > { %10211 = vrcp.f32 %v11184_v44  ;;  %v2851_v49 = vpop.f32.mrf.mxu1  ;;  %vm2974_vm2 = vweird.f32 %v11184_v44  ;;  %v2978_v35 = vand.u32 2147483647, %v11184_v44  ;;  %v2980_v39 = vand.u32 2147483648, %v11184_v44  ;;  %3431 = vmatpush.bf16.msrb.mxu1 %v9729_v51  ;;  %v9745_v47 = vld [vmem:[%s12820_s1 + $0x88] sm:$0xff] }
 0x94c   : > { %10213 = vrcp.f32 %v11186_v12  ;;  %v11195_v60 = vpop.f32.mrf.mxu0  ;;  %v8066_v62 = vmul.f32 -1.702, %v11189_v57  ;;  %v11233_v41 = vadd.f32 %v2884_v5, %v11158_v19  ;;  %vm3019_vm9 = vweird.f32 %v11186_v12  ;;  %3486 = vmatpush.bf16.msra.mxu0 %v9752_v11 }
 0x94d   : > { %10215 = vpow2.f32 %v2947_v56  ;;  %v3023_v50 = vand.u32 2147483647, %v11186_v12  ;;  %v3025_v56 = vand.u32 2147483648, %v11186_v12  ;;  %v11248_v46 = vadd.f32 %v2851_v49, %v11142_v7  ;;  %3448 = vmatpush.bf16.msrb.mxu2 %v9738_v61 }
 0x94e   : > { %v10206_v0 = vpop.eup %10205  ;;  %v2943_v14 = vmul.f32 1.442695, %v8066_v62  ;;  %vm11259_vm12 = vcmp.eq.f32.partialorder %v2978_v35, 8.507059e+37  ;;  %v2981_v49 = vor.u32 1.1754944e-38, %v2980_v39  ;;  %3466 = vmatpush.bf16.msrb.mxu3 %v9746_v29  ;;  %v9736_v29 = vld [vmem:[%s12820_s1 + $0x40] sm:$0xff] }
 0x94f   : > { %v10208_v1 = vpop.eup %10207  ;;  %v11202_v3 = vadd.f32 1.0, %v10206_v0  ;;  %v8067_v0 = vmul.f32 -1.702, %v11233_v41  ;;  %vm11273_vm14 = vcmp.eq.f32.partialorder %v3023_v50, 8.507059e+37 }
 0x950   : > { %v10210_v55 = vpop.eup %10209  ;;  %v11204_v6 = vadd.f32 1.0, %v10208_v1 }
 0x951   : > { %v11207_v10 = vpop.eup %10211  ;;  %10217 = vrcp.f32 %v11202_v3  ;;  %v11210_v38 = vpop.f32.mrf.mxu2  ;;  %v11227_v34 = vadd.f32 1.0, %v10210_v55 }
 0x952   : > { %v11213_v17 = vpop.eup %10213  ;;  %v2970_v63 = vmul.f32 %v11207_v10, %v11184_v44  ;;  %10219 = vrcp.f32 %v11204_v6  ;;  %v11218_v21 = vpop.f32.mrf.mxu3  ;;  %vm2975_vm10 = vweird.f32 %v11207_v10  ;;  %3467 = vmatpush.bf16.msrb.mxu3 %v9745_v47 }
 0x953   : > { %v10216_v26 = vpop.eup %10215  ;;  %v3015_v27 = vmul.f32 %v11213_v17, %v11186_v12  ;;  %v2853_v31 = vpop.f32.mrf.mxu1  ;;  %10221 = vpow2.f32 %v2943_v14  ;;  %vm3020_vm11 = vweird.f32 %v11213_v17  ;;  %vm11269_vm13 = vmor %vm2974_vm2, %vm2975_vm10  ;;  %v3038_v14 = vand.u32 2147483647, %v11227_v34 }
 0x954   : > { %v2971_v28 = vsub.f32 1.0, %v2970_v63  ;;  %v2907_v2 = vpop.f32.mrf.mxu0  ;;  %v11230_v43 = vadd.f32 1.0, %v10216_v26  ;;  %10223 = vrcp.f32 %v11227_v34  ;;  %v9728_v63 = vld [vmem:[%s12820_s1] sm:$0xff]  ;;  %vm11286_vm15 = vmor %vm3019_vm9, %vm3020_vm11  ;;  %v3026_v26 = vor.u32 1.1754944e-38, %v3025_v56 }
 0x955   : > { %v3016_v42 = vsub.f32 1.0, %v3015_v27  ;;  %v2993_v27 = vand.u32 2147483647, %v11202_v3  ;;  %v8069_v31 = vmul.f32 -1.702, %v11248_v46  ;;  %v2995_v2 = vand.u32 2147483648, %v11202_v3  ;;  %3432 = vmatpush.bf16.msrb.mxu1 %v9728_v63 }
 0x956   : > { %v2972_v48 = vmul.f32 %v11207_v10, %v2971_v28  ;;  %10225 = vrcp.f32 %v11230_v43  ;;  %v11294_v28 = vadd.f32 %v11195_v60, %v11144_v8  ;;  %v3040_v40 = vand.u32 2147483648, %v11227_v34 }
 0x957   : > { %v11242_v53 = vpop.eup %10217  ;;  %v3017_v54 = vmul.f32 %v11213_v17, %v3016_v42  ;;  %v9737_v42 = vld [vmem:[%s12820_s1 + $0x48] sm:$0xff]  ;;  %vm3034_vm1 = vweird.f32 %v11227_v34  ;;  %v2945_v60 = vmul.f32 1.442695, %v8067_v0  ;;  %vm11310_vm2 = vcmp.eq.f32.partialorder %v3038_v14, 8.507059e+37 }
 0x958   : > { %v11250_v5 = vpop.eup %10219  ;;  %v2973_v22 = vadd.f32 %v11207_v10, %v2972_v48  ;;  %v2985_v59 = vmul.f32 %v11242_v53, %v11202_v3  ;;  %vm2990_vm0 = vweird.f32 %v11242_v53  ;;  %3449 = vmatpush.bf16.msrb.mxu2 %v9737_v42  ;;  %vm2989_vm9 = vweird.f32 %v11202_v3 }
 0x959   : > { %v3018_v62 = vadd.f32 %v11213_v17, %v3017_v54  ;;  %v2871_v36 = vpop.f32.mrf.mxu2  ;;  %v3000_v9 = vmul.f32 %v11250_v5, %v11204_v6  ;;  %v10222_v44 = vpop.eup %10221  ;;  %vm3079_vm10 = vweird.f32 %v11230_v43  ;;  %v3083_v61 = vand.u32 2147483647, %v11230_v43 }
 0x95a   : > { %v2986_v55 = vsub.f32 1.0, %v2985_v59  ;;  %v2889_v4 = vpop.f32.mrf.mxu3  ;;  %v10224_v35 = vpop.eup %10223  ;;  %v2977_v39 = vsel %vm11269_vm13, %v11207_v10, %v2973_v22  ;;  %v11314_v51 = vadd.f32 1.0, %v10222_v44  ;;  %v3041_v59 = vor.u32 1.1754944e-38, %v3040_v40 }
 0x95b   : > { %v3022_v12 = vsel %vm11286_vm15, %v11213_v17, %v3018_v62  ;;  %v3030_v8 = vmul.f32 %v10224_v35, %v11227_v34  ;;  %v3001_v17 = vsub.f32 1.0, %v3000_v9  ;;  %v2982_v52 = vsel %vm11259_vm12, %v2981_v49, %v2977_v39  ;;  %v9744_v62 = vld [vmem:[%s12820_s1 + $0x80] sm:$0xff] }
 0x95c   : > { %v10226_v10 = vpop.eup %10225  ;;  %v2987_v48 = vmul.f32 %v11242_v53, %v2986_v55  ;;  %v3027_v54 = vsel %vm11273_vm14, %v3026_v26, %v3022_v12  ;;  %10227 = vrcp.f32 %v11314_v51  ;;  %vm3035_vm11 = vweird.f32 %v10224_v35  ;;  %3450 = vmatpush.bf16.msrb.mxu2 %v9736_v29  ;;  %3468 = vmatpush.bf16.msrb.mxu3 %v9744_v62 }
 0x95d   : > { %v3031_v56 = vsub.f32 1.0, %v3030_v8  ;;  %v3075_v22 = vmul.f32 %v10226_v10, %v11230_v43  ;;  %v3085_v0 = vand.u32 2147483648, %v11230_v43  ;;  %v3149_v36 = vmul.f32 %v2982_v52, %v11149_v13  ;;  %vm3036_vm15 = vmor %vm3034_vm1, %vm3035_vm11 }
 0x95e   : > { %v3152_v58 = vmul.f32 %v3027_v54, %v11152_v15  ;;  %v11331_v1 = vadd.f32 %v11242_v53, %v2987_v48  ;;  %v3002_v55 = vmul.f32 %v11250_v5, %v3001_v17  ;;  %vm3005_vm12 = vweird.f32 %v11250_v5 }
 0x95f   : > { %v3032_v7 = vmul.f32 %v10224_v35, %v3031_v56  ;;  %v3076_v49 = vsub.f32 1.0, %v3075_v22  ;;  %vm3080_vm13 = vweird.f32 %v10226_v10  ;;  %10229 = vpow2.f32 %v2945_v60 }
 0x960   : > { %vm3004_vm14 = vweird.f32 %v11204_v6  ;;  %vm11339_vm8 = vcmp.eq.f32.partialorder %v3083_v61, 8.507059e+37  ;;  %v2949_v15 = vmul.f32 1.442695, %v8069_v31  ;;  %v8072_v4 = vmul.f32 -1.702, %v11294_v28  ;;  %vm3081_vm1 = vmor %vm3079_vm10, %vm3080_vm13 }
 0x961   : > { %v3033_v9 = vadd.f32 %v10224_v35, %v3032_v7  ;;  %v3077_v14 = vmul.f32 %v10226_v10, %v3076_v49  ;;  %v11346_v63 = vadd.f32 %v11210_v38, %v11155_v18  ;;  %vm11348_vm7 = vcmp.eq.f32.partialorder %v2993_v27, 8.507059e+37 }
 0x962   : > { %v3086_v26 = vor.u32 1.1754944e-38, %v3085_v0  ;;  %v11354_v34 = vadd.f32 %v11218_v21, %v11158_v19  ;;  %v10228_v39 = vpop.eup %10227  ;;  %10231 = vpow2.f32 %v2949_v15  ;;  %v2955_v18 = vmul.f32 1.442695, %v8072_v4 }
 0x963   : > { %v3037_v44 = vsel %vm3036_vm15, %v10224_v35, %v3033_v9  ;;  %v3078_v24 = vadd.f32 %v10226_v10, %v3077_v14  ;;  %v8070_v38 = vmul.f32 -1.702, %v11346_v63  ;;  %v3003_v27 = vadd.f32 %v11250_v5, %v3002_v55 }
 0x964   : > { %v3042_v31 = vsel %vm11310_vm2, %v3041_v59, %v3037_v44  ;;  %v3045_v19 = vmul.f32 %v10228_v39, %v11314_v51  ;;  %vm11369_vm2 = vmor %vm2989_vm9, %vm2990_vm0  ;;  %10233 = vpow2.f32 %v2955_v18  ;;  %v8071_v42 = vmul.f32 -1.702, %v11354_v34 }
 0x965   : > { %v3153_v35 = vmul.f32 %v3042_v31, %v11170_v20  ;;  %v3082_v12 = vsel %vm3081_vm1, %v10226_v10, %v3078_v24  ;;  %v2951_v40 = vmul.f32 1.442695, %v8070_v38  ;;  %v10230_v47 = vpop.eup %10229  ;;  %v2992_v20 = vsel %vm11369_vm2, %v11242_v53, %v11331_v1  ;;  %vm11394_vm0 = vmor %vm3004_vm14, %vm3005_vm12 }
 0x966   : > { %v3087_v43 = vsel %vm11339_vm8, %v3086_v26, %v3082_v12  ;;  %v3046_v10 = vsub.f32 1.0, %v3045_v19  ;;  %v3055_v48 = vand.u32 2147483648, %v11314_v51  ;;  %v11382_v17 = vadd.f32 1.0, %v10230_v47 }
 0x967   : > { %v3161_v8 = vpack.c.bf16 %v3153_v35, %v3149_v36  ;;  %v3156_v60 = vmul.f32 %v3087_v43, %v11176_v37  ;;  %10235 = vpow2.f32 %v2951_v40  ;;  %v2953_v50 = vmul.f32 1.442695, %v8071_v42 }
 0x968   : > { %v3047_v54 = vmul.f32 %v10228_v39, %v3046_v10  ;;  %vm3050_vm8 = vweird.f32 %v10228_v39  ;;  %v3053_v56 = vand.u32 2147483647, %v11314_v51  ;;  %v10232_v22 = vpop.eup %10231  ;;  %v2996_v53 = vor.u32 1.1754944e-38, %v2995_v2 }
 0x969   : > { %v3164_v52 = vpack.c.bf16 %v3156_v60, %v3152_v58  ;;  %3433 = vmatmul.bf16.vlgmr.msrb.gmra.mxu1 %v3161_v8  ;;  %v3008_v59 = vand.u32 2147483647, %v11204_v6  ;;  %v3010_v37 = vand.u32 2147483648, %v11204_v6  ;;  %10237 = vrcp.f32 %v11382_v17 }
 0x96a   : > { %v3048_v29 = vadd.f32 %v10228_v39, %v3047_v54  ;;  %vm3049_vm9 = vweird.f32 %v11314_v51  ;;  %v11399_v62 = vadd.f32 1.0, %v10232_v22  ;;  %10239 = vpow2.f32 %v2953_v50  ;;  %v10234_v3 = vpop.eup %10233 }
 0x96b   : > { %3487 = vmatmul.bf16.vlgmr.msra.gmra.mxu0 %v3164_v52  ;;  %v2997_v2 = vsel %vm11348_vm7, %v2996_v53, %v2992_v20  ;;  %v3007_v7 = vsel %vm11394_vm0, %v11250_v5, %v3003_v27  ;;  %vm3051_vm10 = vmor %vm3049_vm9, %vm3050_vm8  ;;  %v3056_v6 = vor.u32 1.1754944e-38, %v3055_v48  ;;  %vm3054_vm11 = vcmp.eq.f32.partialorder %v3053_v56, 8.507059e+37 }
 0x96c   : > { %v3052_v49 = vsel %vm3051_vm10, %v10228_v39, %v3048_v29  ;;  %10241 = vrcp.f32 %v11399_v62  ;;  %v11408_v51 = vadd.f32 1.0, %v10234_v3  ;;  %v3011_v36 = vor.u32 1.1754944e-38, %v3010_v37 }
 0x96d   : > { %v10236_v0 = vpop.eup %10235  ;;  %v3057_v58 = vsel %vm3054_vm11, %v3056_v6, %v3052_v49  ;;  %v3150_v1 = vmul.f32 %v2997_v2, %v11161_v23  ;;  %vm3009_vm12 = vcmp.eq.f32.partialorder %v3008_v59, 8.507059e+37  ;;  %v3068_v11 = vand.u32 2147483647, %v11382_v17 }
 0x96e   : > { %v3154_v55 = vmul.f32 %v3057_v58, %v11189_v57  ;;  %10243 = vrcp.f32 %v11408_v51  ;;  %v3012_v9 = vsel %vm3009_vm12, %v3011_v36, %v3007_v7  ;;  %v11413_v14 = vadd.f32 1.0, %v10236_v0 }
 0x96f   : > { %v10238_v5 = vpop.eup %10237  ;;  %v3070_v44 = vand.u32 2147483648, %v11382_v17  ;;  %v3151_v57 = vmul.f32 %v3012_v9, %v11166_v16  ;;  %v3098_v39 = vand.u32 2147483647, %v11399_v62  ;;  %vm3064_vm7 = vweird.f32 %v11382_v17 }
 0x970   : > { %v10240_v13 = vpop.eup %10239  ;;  %v3162_v15 = vpack.c.bf16 %v3154_v55, %v3150_v1  ;;  %v3060_v4 = vmul.f32 %v10238_v5, %v11382_v17  ;;  %10245 = vrcp.f32 %v11413_v14  ;;  %v3100_v18 = vand.u32 2147483648, %v11399_v62 }
 0x971   : > { %v11419_v23 = vadd.f32 1.0, %v10240_v13  ;;  %vm3065_vm13 = vweird.f32 %v10238_v5  ;;  %v3143_v35 = vand.u32 2147483647, %v11408_v51  ;;  %v3145_v12 = vand.u32 2147483648, %v11408_v51 }
 0x972   : > { %v10242_v24 = vpop.eup %10241  ;;  %v3061_v26 = vsub.f32 1.0, %v3060_v4  ;;  %3451 = vmatmul.bf16.vlgmr.msrb.gmra.mxu2 %v3162_v15  ;;  %vm11429_vm14 = vcmp.eq.f32.partialorder %v3068_v11, 8.507059e+37  ;;  %v3071_v19 = vor.u32 1.1754944e-38, %v3070_v44  ;;  %vm3139_vm15 = vweird.f32 %v11408_v51  ;;  %vm3066_vm8 = vmor %vm3064_vm7, %vm3065_vm13 }
 0x973   : > { %10247 = vrcp.f32 %v11419_v23  ;;  %v3090_v31 = vmul.f32 %v10242_v24, %v11399_v62  ;;  %vm3094_vm1 = vweird.f32 %v11399_v62  ;;  %vm11436_vm2 = vcmp.eq.f32.partialorder %v3098_v39, 8.507059e+37 }
 0x974   : > { %v10244_v38 = vpop.eup %10243  ;;  %v3062_v27 = vmul.f32 %v10238_v5, %v3061_v26  ;;  %vm3095_vm0 = vweird.f32 %v10242_v24  ;;  %v3101_v60 = vor.u32 1.1754944e-38, %v3100_v18  ;;  %vm11442_vm9 = vcmp.eq.f32.partialorder %v3143_v35, 8.507059e+37 }
 0x975   : > { %v3135_v21 = vmul.f32 %v10244_v38, %v11408_v51  ;;  %v3091_v43 = vsub.f32 1.0, %v3090_v31  ;;  %v3146_v50 = vor.u32 1.1754944e-38, %v3145_v12  ;;  %vm3140_vm10 = vweird.f32 %v10244_v38  ;;  %vm3096_vm11 = vmor %vm3094_vm1, %vm3095_vm0 }
 0x976   : > { %v3063_v40 = vadd.f32 %v10238_v5, %v3062_v27  ;;  %v10246_v47 = vpop.eup %10245  ;;  %v3113_v37 = vand.u32 2147483647, %v11413_v14  ;;  %v3115_v2 = vand.u32 2147483648, %v11413_v14  ;;  %vm3141_vm7 = vmor %vm3139_vm15, %vm3140_vm10  ;;  %vm3109_vm13 = vweird.f32 %v11413_v14 }
 0x977   : > { %v3136_v20 = vsub.f32 1.0, %v3135_v21  ;;  %v3092_v8 = vmul.f32 %v10242_v24, %v3091_v43  ;;  %v3105_v52 = vmul.f32 %v10246_v47, %v11413_v14  ;;  %vm3110_vm12 = vweird.f32 %v10246_v47 }
 0x978   : > { %v3067_v10 = vsel %vm3066_vm8, %v10238_v5, %v3063_v40  ;;  %vm3111_vm15 = vmor %vm3109_vm13, %vm3110_vm12  ;;  %v3116_v5 = vor.u32 1.1754944e-38, %v3115_v2  ;;  %v3130_v9 = vand.u32 2147483648, %v11419_v23  ;;  %v3128_v13 = vand.u32 2147483647, %v11419_v23  ;;  %v10124_v40 = vld [vmem:[%s12845_s2] ss:$0 sm:$0xff] }
 0x979   : > { %v10248_v54 = vpop.eup %10247  ;;  %v3072_v56 = vsel %vm11429_vm14, %v3071_v19, %v3067_v10  ;;  %v3137_v22 = vmul.f32 %v10244_v38, %v3136_v20  ;;  %v3093_v17 = vadd.f32 %v10242_v24, %v3092_v8  ;;  %v3106_v59 = vsub.f32 1.0, %v3105_v52 }
 0x97a   : > { %v3155_v53 = vmul.f32 %v3072_v56, %v11233_v41  ;;  %v3120_v61 = vmul.f32 %v10248_v54, %v11419_v23  ;;  %vm3124_vm14 = vweird.f32 %v11419_v23  ;;  %vm3125_vm1 = vweird.f32 %v10248_v54 }
 0x97b   : > { %v3138_v29 = vadd.f32 %v10244_v38, %v3137_v22  ;;  %v3097_v3 = vsel %vm3096_vm11, %v10242_v24, %v3093_v17  ;;  %v3107_v6 = vmul.f32 %v10246_v47, %v3106_v59  ;;  %vm3126_vm8 = vmor %vm3124_vm14, %vm3125_vm1  ;;  %v3131_v44 = vor.u32 1.1754944e-38, %v3130_v9  ;;  %v8330_v9 = vld [vmem:[%s12817_s3 + $0x170] sm:$0xf] }
 0x97c   : > { %v3163_v7 = vpack.c.bf16 %v3155_v53, %v3151_v57  ;;  %v3102_v41 = vsel %vm11436_vm2, %v3101_v60, %v3097_v3  ;;  %v3121_v62 = vsub.f32 1.0, %v3120_v61  ;;  %vm3114_vm2 = vcmp.eq.f32.partialorder %v3113_v37, 8.507059e+37 }
 0x97d   : > { %v3142_v49 = vsel %vm3141_vm7, %v10244_v38, %v3138_v29  ;;  %v3157_v0 = vmul.f32 %v3102_v41, %v11248_v46  ;;  %v3108_v58 = vadd.f32 %v10246_v47, %v3107_v6  ;;  %vm3129_vm0 = vcmp.eq.f32.partialorder %v3128_v13, 8.507059e+37 }
 0x97e   : > { %v3147_v36 = vsel %vm11442_vm9, %v3146_v50, %v3142_v49  ;;  %3469 = vmatmul.bf16.vlgmr.msrb.gmra.mxu3 %v3163_v7  ;;  %v3122_v1 = vmul.f32 %v10248_v54, %v3121_v62 }
 0x97f   : > { %v3160_v51 = vmul.f32 %v3147_v36, %v11294_v28  ;;  %v3165_v55 = vpack.c.bf16 %v3157_v0, %v3157_v0  ;;  %v3112_v46 = vsel %vm3111_vm15, %v10246_v47, %v3108_v58  ;;  %v8322_v58 = vld [vmem:[%s12817_s3 + $0x168] sm:$0xf] }
 0x980   : > { %v3123_v14 = vadd.f32 %v10248_v54, %v3122_v1  ;;  %v3117_v4 = vsel %vm3114_vm2, %v3116_v5, %v3112_v46  ;;  %v9782_v1 = vld [vmem:[%s12817_s3 + $0x170] sm:$0xf0]  ;;  %v8324_v5 = vld [vmem:[%s12817_s3 + $0x174] sm:$0xf0]  ;;  %v9783_v46 = vld [vmem:[%s12817_s3 + $0x178] sm:$0xf0] }
 0x981   : > { %v3168_v15 = vpack.c.bf16 %v3160_v51, %v3160_v51  ;;  %3438 = vmatmul.bf16.gmra.mxu1 %v3165_v55  ;;  %v3158_v11 = vmul.f32 %v3117_v4, %v11346_v63  ;;  %v9781_v51 = vld [vmem:[%s12817_s3 + $0x16c] sm:$0xf]  ;;  %v8323_v55 = vor.u32 %v9782_v1, %v8322_v58  ;;  %v8331_v13 = vor.u32 %v9783_v46, %v8330_v9  ;;  %v9779_v4 = vld [vmem:[%s12817_s3 + $0x158] sm:$0xf0]  ;;  %v8250_v1 = vld [vmem:[%s12817_s3 + $0xd8] sm:$0xf] }
 0x982   : > { %v3127_v28 = vsel %vm3126_vm8, %v10248_v54, %v3123_v14  ;;  %v8327_v14 = vor.u32 %v9781_v51, %v8324_v5  ;;  %v9764_v51 = vld [vmem:[%s12817_s3 + $0xe0] sm:$0xf0]  ;;  %v9763_v5 = vld [vmem:[%s12817_s3 + $0xdc] sm:$0xf]  ;;  %v8252_v9 = vld [vmem:[%s12817_s3 + $0xe4] sm:$0xf0] }
 0x983   : > { %3492 = vmatmul.bf16.gmra.mxu0 %v3168_v15  ;;  %v3166_v24 = vpack.c.bf16 %v3158_v11, %v3158_v11  ;;  %v3132_v57 = vsel %vm3129_vm0, %v3131_v44, %v3127_v28  ;;  %3755 = vmatpush.bf16.msra.mxu1 %v8323_v55  ;;  %v8310_v15 = vld [vmem:[%s12817_s3 + $0x150] sm:$0xf]  ;;  %v9778_v11 = vld [vmem:[%s12817_s3 + $0x154] sm:$0xf]  ;;  %v8312_v44 = vld [vmem:[%s12817_s3 + $0x15c] sm:$0xf0]  ;;  %v8251_v55 = vor.u32 %v9764_v51, %v8250_v1 }
 0x984   : > { %v3159_v26 = vmul.f32 %v3132_v57, %v11354_v34  ;;  %3773 = vmatpush.bf16.msra.mxu2 %v8327_v14  ;;  %3791 = vmatpush.bf16.msra.mxu3 %v8331_v13  ;;  %v8311_v28 = vor.u32 %v9779_v4, %v8310_v15  ;;  %v9780_v57 = vld [vmem:[%s12817_s3 + $0x160] sm:$0xf0]  ;;  %v8258_v46 = vld [vmem:[%s12817_s3 + $0xe0] sm:$0xf]  ;;  %v8255_v14 = vor.u32 %v9763_v5, %v8252_v9  ;;  %v9765_v13 = vld [vmem:[%s12817_s3 + $0xe8] sm:$0xf0] }
 0x985   : > { %3456 = vmatmul.bf16.gmra.mxu2 %v3166_v24  ;;  %v8318_v24 = vld [vmem:[%s12817_s3 + $0x158] sm:$0xf]  ;;  %v8259_v15 = vor.u32 %v9765_v13, %v8258_v46  ;;  %v8238_v4 = vld [vmem:[%s12817_s3 + $0xc0] sm:$0xf] }
 0x986   : > { %v3167_v39 = vpack.c.bf16 %v3159_v26, %v3159_v26  ;;  %v8315_v26 = vor.u32 %v9778_v11, %v8312_v44  ;;  %v9761_v11 = vld [vmem:[%s12817_s3 + $0xc8] sm:$0xf0]  ;;  %v8235_v51 = vld [vmem:[%s10503_s8 + $0x3] sm:$0x7] }
 0x987   : > { %3756 = vmatpush.bf16.msra.mxu1 %v8311_v28  ;;  %v9760_v28 = vld [vmem:[%s12817_s3 + $0xc4] sm:$0xf]  ;;  %v8239_v44 = vor.u32 %v9761_v11, %v8238_v4 }
 0x988   : > { %3774 = vmatpush.bf16.msra.mxu2 %v8315_v26  ;;  %v9762_v26 = vld [vmem:[%s12817_s3 + $0xd0] sm:$0xf0] }
 0x98e   : > { %3474 = vmatmul.bf16.gmra.mxu3 %v3167_v39  ;;  %v8319_v39 = vor.u32 %v9780_v57, %v8318_v24  ;;  %v8240_v24 = vld [vmem:[%s12817_s3 + $0xcc] sm:$0xf0]  ;;  %v8246_v57 = vld [vmem:[%s12817_s3 + $0xc8] sm:$0xf] }
 0x990   : > { %3792 = vmatpush.bf16.msra.mxu3 %v8319_v39 }
 0x9e6   : > { %v3434_v31 = vpop.f32.mrf.mxu1 }
 0x9e8   : > { %v3488_v18 = vpop.f32.mrf.mxu0 }
 0x9ee   : > { %v3436_v38 = vpop.f32.mrf.mxu1 }
 0x9f0   : > { %v3490_v23 = vpop.f32.mrf.mxu0 }
 0x9f5   : > { %v3452_v27 = vpop.f32.mrf.mxu2 }
 0x9f6   : > { %v3453_v35 = vadd.f32 %v3452_v27, %v3434_v31  ;;  %v8298_v31 = vld [vmem:[%s12817_s3 + $0x138] sm:$0xf] }
 0x9fd   : > { %v3454_v63 = vpop.f32.mrf.mxu2 }
 0x9fe   : > { %v3439_v12 = vpop.f32.mrf.mxu1  ;;  %v3455_v47 = vadd.f32 %v3454_v63, %v3436_v38  ;;  %v9775_v38 = vld [vmem:[%s12817_s3 + $0x13c] sm:$0xf] }
 0xa00   : > { %v3493_v16 = vpop.f32.mrf.mxu0 }
 0xa01   : > { %v3470_v19 = vpop.f32.mrf.mxu3 }
 0xa02   : > { %v3471_v21 = vadd.f32 %v3470_v19, %v3453_v35  ;;  %v8306_v35 = vld [vmem:[%s12817_s3 + $0x140] sm:$0xf] }
 0xa03   : > { %v8286_v19 = vld [vmem:[%s12817_s3 + $0x120] sm:$0xf] }
 0xa04   : > { %v3489_v43 = vadd.f32 %v3488_v18, %v3471_v21  ;;  %v9776_v18 = vld [vmem:[%s12817_s3 + $0x140] sm:$0xf0]  ;;  %v9773_v21 = vld [vmem:[%s12817_s3 + $0x128] sm:$0xf0] }
 0xa05   : > { %v8299_v27 = vor.u32 %v9776_v18, %v8298_v31  ;;  %v8243_v31 = vor.u32 %v9760_v28, %v8240_v24  ;;  %v8247_v18 = vor.u32 %v9762_v26, %v8246_v57 }
 0xa06   : > { %v3497_v42 = vadd.f32 %v3489_v43, %v11040_v25  ;;  %v3441_v20 = vpop.f32.mrf.mxu1  ;;  %v9772_v43 = vld [vmem:[%s12817_s3 + $0x124] sm:$0xf] }
 0xa07   : > { %3757 = vmatpush.bf16.msra.mxu1 %v8299_v27  ;;  %v9774_v20 = vld [vmem:[%s12817_s3 + $0x130] sm:$0xf0] }
 0xa08   : > { %v11474_v34 = vadd.f32 %v10124_v40, %v3497_v42  ;;  %v3495_v8 = vpop.f32.mrf.mxu0  ;;  %v3457_v10 = vpop.f32.mrf.mxu2  ;;  %v8288_v42 = vld [vmem:[%s12817_s3 + $0x12c] sm:$0xf0] }
 0xa09   : > { %v3472_v60 = vpop.f32.mrf.mxu3  ;;  %v3458_v54 = vadd.f32 %v3457_v10, %v3439_v12  ;;  %v9777_v12 = vld [vmem:[%s12817_s3 + $0x148] sm:$0xf0]  ;;  %v8291_v8 = vor.u32 %v9772_v43, %v8288_v42  ;;  %v8274_v10 = vld [vmem:[%s12817_s3 + $0x108] sm:$0xf] }
 0xa0a   : > { %v3473_v48 = vadd.f32 %v3472_v60, %v3455_v47  ;;  %3511 = vadd.xlane.f32.xlu0 %v11474_v34  ;;  %v8294_v47 = vld [vmem:[%s12817_s3 + $0x128] sm:$0xf] }
 0xa0b   : > { %v8295_v60 = vor.u32 %v9774_v20, %v8294_v47 }
 0xa0c   : > { %v3491_v50 = vadd.f32 %v3490_v23, %v3473_v48  ;;  %v8300_v23 = vld [vmem:[%s12817_s3 + $0x144] sm:$0xf0]  ;;  %v9770_v48 = vld [vmem:[%s12817_s3 + $0x110] sm:$0xf0] }
 0xa0d   : > { %v8303_v63 = vor.u32 %v9775_v38, %v8300_v23 }
 0xa0e   : > { %v3498_v52 = vadd.f32 %v3491_v50, %v11044_v30  ;;  %v9769_v50 = vld [vmem:[%s12817_s3 + $0x10c] sm:$0xf] }
 0xa0f   : > { %3775 = vmatpush.bf16.msra.mxu2 %v8303_v63 }
 0xa10   : > { %v11478_v56 = vadd.f32 %v10124_v40, %v3498_v52  ;;  %v3459_v17 = vpop.f32.mrf.mxu2  ;;  %v8275_v52 = vor.u32 %v9770_v48, %v8274_v10 }
 0xa11   : > { %v3475_v22 = vpop.f32.mrf.mxu3  ;;  %v9771_v17 = vld [vmem:[%s12817_s3 + $0x118] sm:$0xf0] }
 0xa12   : > { %v3476_v53 = vadd.f32 %v3475_v22, %v3458_v54  ;;  %3513 = vadd.xlane.f32.xlu0 %v11478_v56  ;;  %v8276_v54 = vld [vmem:[%s12817_s3 + $0x114] sm:$0xf0]  ;;  %v8282_v22 = vld [vmem:[%s12817_s3 + $0x110] sm:$0xf] }
 0xa13   : > { %3776 = vmatpush.bf16.msra.mxu2 %v8291_v8 }
 0xa14   : > { %v3494_v25 = vadd.f32 %v3493_v16, %v3476_v53  ;;  %v8307_v16 = vor.u32 %v9777_v12, %v8306_v35  ;;  %v8279_v53 = vor.u32 %v9769_v50, %v8276_v54  ;;  %v10125_v50 = vld [vmem:[%s10488_s25 + $0x1] ss:$0 sm:$0xff] }
 0xa16   : > { %v3499_v59 = vadd.f32 %v3494_v25, %v11048_v33  ;;  %3793 = vmatpush.bf16.msra.mxu3 %v8307_v16  ;;  %v8283_v25 = vor.u32 %v9771_v17, %v8282_v22 }
 0xa17   : > { %3777 = vmatpush.bf16.msra.mxu2 %v8279_v53 }
 0xa18   : > { %v11482_v37 = vadd.f32 %v10124_v40, %v3499_v59  ;;  %v8287_v40 = vor.u32 %v9773_v21, %v8286_v19  ;;  %v8262_v59 = vld [vmem:[%s12817_s3 + $0xf0] sm:$0xf] }
 0xa19   : > { %v3477_v61 = vpop.f32.mrf.mxu3 }
 0xa1a   : > { %3515 = vadd.xlane.f32.xlu2 %v11482_v37  ;;  %3758 = vmatpush.bf16.msra.mxu1 %v8287_v40  ;;  %v9767_v61 = vld [vmem:[%s12817_s3 + $0xf8] sm:$0xf0] }
 0xa1b   : > { %3794 = vmatpush.bf16.msra.mxu3 %v8295_v60 }
 0xa1e   : > { %3759 = vmatpush.bf16.msra.mxu1 %v8275_v52 }
 0xa1f   : > { %3795 = vmatpush.bf16.msra.mxu3 %v8283_v25  ;;  %v10126_v25 = vld [vmem:[%s10493_s29 + $0x1] ss:$0 sm:$0xff] }
 0xa7d   : > { %v3512_v29 = vpop.xlane.xlu0 %3511 }
 0xa7e   : > { %v3517_v30 = vmul.f32 %v3512_v29, %v10731_v45  ;;  %v9766_v29 = vld [vmem:[%s12817_s3 + $0xf4] sm:$0xf] }
 0xa80   : > { %v11487_v3 = vsub.f32 %v11474_v34, %v3517_v30 }
 0xa82   : > { %v3523_v2 = vmul.f32 %v11487_v3, %v11487_v3 }
 0xa84   : > { %3526 = vadd.xlane.f32.xlu1 %v3523_v2  ;;  %v8263_v2 = vor.u32 %v9767_v61, %v8262_v59 }
 0xa85   : > { %v3514_v33 = vpop.xlane.xlu0 %3513 }
 0xa86   : > { %v3518_v7 = vmul.f32 %v3514_v33, %v10731_v45  ;;  %v8264_v33 = vld [vmem:[%s12817_s3 + $0xfc] sm:$0xf0]  ;;  %3760 = vmatpush.bf16.msra.mxu1 %v8263_v2 }
 0xa88   : > { %v11493_v41 = vsub.f32 %v11478_v56, %v3518_v7  ;;  %v8270_v7 = vld [vmem:[%s12817_s3 + $0xf8] sm:$0xf] }
 0xa8a   : > { %v3524_v6 = vmul.f32 %v11493_v41, %v11493_v41  ;;  %3761 = vmatpush.bf16.msra.mxu1 %v8251_v55  ;;  %v3621_v55 = vperm.slane %v8235_v51, 0 }
 0xa8c   : > { %3528 = vadd.xlane.f32.xlu0 %v3524_v6  ;;  %v9768_v6 = vld [vmem:[%s12817_s3 + $0x100] sm:$0xf0]  ;;  %s12892_s3 = sld [smem:[#allocation21_spill]] }
 0xa8d   : > { %v3516_v62 = vpop.xlane.xlu2 %3515 }
 0xa8e   : > { %v3519_v49 = vmul.f32 %v3516_v62, %v10731_v45  ;;  %3762 = vmatpush.bf16.msra.mxu1 %v8239_v44 }
 0xa90   : > { %v11499_v0 = vsub.f32 %v11482_v37, %v3519_v49  ;;  %v8267_v49 = vor.u32 %v9766_v29, %v8264_v33 }
 0xa92   : > { %v3525_v36 = vmul.f32 %v11499_v0, %v11499_v0  ;;  %3778 = vmatpush.bf16.msra.mxu2 %v8267_v49 }
 0xa94   : > { %3530 = vadd.xlane.f32.xlu2 %v3525_v36  ;;  %v8271_v36 = vor.u32 %v9768_v6, %v8270_v7 }
 0xa96   : > { %3796 = vmatpush.bf16.msra.mxu3 %v8271_v36  ;;  %3779 = vmatpush.bf16.msra.mxu2 %v8255_v14 }
 0xa9a   : > { %3797 = vmatpush.bf16.msra.mxu3 %v8259_v15  ;;  %3780 = vmatpush.bf16.msra.mxu2 %v8243_v31  ;;  %v3622_v15 = vperm.slane %v8235_v51, 1 }
 0xa9e   : > { %3798 = vmatpush.bf16.msra.mxu3 %v8247_v18 }
 0xaf7   : > { %v3527_v30 = vpop.xlane.xlu1 %3526 }
 0xaf8   : > { %v3532_v62 = vmul.f32 %v3527_v30, %v10731_v45 }
 0xafa   : > { %v3535_v58 = vadd.f32 1e-05, %v3532_v62 }
 0xafc   : > { %10249 = vrsqrt.f32 %v3535_v58  ;;  %vm3544_vm10 = vweird.f32 %v3535_v58 }
 0xaff   : > { %v3529_v39 = vpop.xlane.xlu0 %3528 }
 0xb00   : > { %v3533_v38 = vmul.f32 %v3529_v39, %v10731_v45  ;;  %v3623_v39 = vperm.slane %v8235_v51, 2 }
 0xb02   : > { %v10250_v27 = vpop.eup %10249  ;;  %v3536_v23 = vadd.f32 1e-05, %v3533_v38 }
 0xb03   : > { %v3539_v35 = vmul.f32 %v10250_v27, %v3535_v58  ;;  %vm3545_vm9 = vweird.f32 %v10250_v27 }
 0xb04   : > { %10251 = vrsqrt.f32 %v3536_v23  ;;  %vm3546_vm11 = vmor %vm3544_vm10, %vm3545_vm9  ;;  %vm3554_vm7 = vweird.f32 %v3536_v23 }
 0xb05   : > { %v3540_v12 = vmul.f32 %v10250_v27, %v3539_v35 }
 0xb07   : > { %v3541_v63 = vmul.f32 0.5, %v3540_v12  ;;  %v3531_v16 = vpop.xlane.xlu2 %3530 }
 0xb08   : > { %v3534_v19 = vmul.f32 %v3531_v16, %v10731_v45 }
 0xb09   : > { %v3542_v21 = vsub.f32 1.5, %v3541_v63 }
 0xb0a   : > { %v10252_v43 = vpop.eup %10251  ;;  %v3537_v40 = vadd.f32 1e-05, %v3534_v19 }
 0xb0b   : > { %v3543_v42 = vmul.f32 %v10250_v27, %v3542_v21  ;;  %v3549_v47 = vmul.f32 %v10252_v43, %v3536_v23  ;;  %vm3555_vm12 = vweird.f32 %v10252_v43 }
 0xb0c   : > { %10253 = vrsqrt.f32 %v3537_v40  ;;  %vm3556_vm13 = vmor %vm3554_vm7, %vm3555_vm12  ;;  %vm3564_vm1 = vweird.f32 %v3537_v40 }
 0xb0d   : > { %v3550_v20 = vmul.f32 %v10252_v43, %v3549_v47  ;;  %v3547_v8 = vsel %vm3546_vm11, %v10250_v27, %v3543_v42 }
 0xb0e   : > { %v3568_v52 = vmul.f32 %v3547_v8, %v11487_v3 }
 0xb0f   : > { %v3551_v60 = vmul.f32 0.5, %v3550_v20 }
 0xb10   : > { %v3574_v59 = vmul.f32 %v10125_v50, %v3568_v52 }
 0xb11   : > { %v3552_v10 = vsub.f32 1.5, %v3551_v60 }
 0xb12   : > { %v10254_v48 = vpop.eup %10253  ;;  %v3580_v33 = vadd.f32 %v10126_v25, %v3574_v59 }
 0xb13   : > { %v3553_v54 = vmul.f32 %v10252_v43, %v3552_v10  ;;  %v3559_v22 = vmul.f32 %v10254_v48, %v3537_v40  ;;  %vm3565_vm14 = vweird.f32 %v10254_v48 }
 0xb14   : > { %vm3566_vm15 = vmor %vm3564_vm1, %vm3565_vm14 }
 0xb15   : > { %v3557_v17 = vsel %vm3556_vm13, %v10252_v43, %v3553_v54  ;;  %v3560_v53 = vmul.f32 %v10254_v48, %v3559_v22 }
 0xb16   : > { %v3569_v61 = vmul.f32 %v3557_v17, %v11493_v41 }
 0xb17   : > { %v3561_v29 = vmul.f32 0.5, %v3560_v53 }
 0xb18   : > { %v3575_v30 = vmul.f32 %v10125_v50, %v3569_v61 }
 0xb19   : > { %v3562_v2 = vsub.f32 1.5, %v3561_v29 }
 0xb1a   : > { %v3581_v7 = vadd.f32 %v10126_v25, %v3575_v30 }
 0xb1b   : > { %v3563_v6 = vmul.f32 %v10254_v48, %v3562_v2 }
 0xb1c   : > { %v3583_v3 = vpack.c.bf16 %v3581_v7, %v3580_v33 }
 0xb1d   : > { %v3567_v62 = vsel %vm3566_vm15, %v10254_v48, %v3563_v6 }
 0xb1e   : > { %3763 = vmatmul.bf16.vlgmr.msra.gmra.mxu1 %v3583_v3  ;;  %3781 = vmatmul.bf16.vlgmr.msra.gmra.mxu2 %v3583_v3  ;;  %v3570_v49 = vmul.f32 %v3567_v62, %v11499_v0 }
 0xb1f   : > { %3799 = vmatmul.bf16.vlgmr.msra.gmra.mxu3 %v3583_v3 }
 0xb20   : > { %v3576_v36 = vmul.f32 %v10125_v50, %v3570_v49 }
 0xb22   : > { %v3582_v58 = vadd.f32 %v10126_v25, %v3576_v36 }
 0xb24   : > { %v3584_v41 = vpack.c.bf16 %v3582_v58, %v3582_v58 }
 0xb2e   : > { %3768 = vmatmul.bf16.gmra.mxu1 %v3584_v41  ;;  %3786 = vmatmul.bf16.gmra.mxu2 %v3584_v41 }
 0xb2f   : > { %3804 = vmatmul.bf16.gmra.mxu3 %v3584_v41 }
 0xb9b   : > { %v3764_v1 = vpop.f32.mrf.mxu1 }
 0xb9c   : > { %v3765_v14 = vadd.f32 %v3764_v1, %v3621_v55 }
 0xba1   : > { %v3782_v5 = vpop.f32.mrf.mxu2 }
 0xba2   : > { %v3800_v9 = vpop.f32.mrf.mxu3  ;;  %v3783_v0 = vadd.f32 %v3782_v5, %v3622_v15 }
 0xba3   : > { %v3766_v46 = vpop.f32.mrf.mxu1  ;;  %v3801_v43 = vadd.f32 %v3800_v9, %v3623_v39 }
 0xba4   : > { %v3767_v13 = vadd.f32 %v3766_v46, %v3621_v55 }
 0xba6   : > { %v3809_v4 = vpack.c.bf16 %v3767_v13, %v3765_v14 }
 0xba8   : > { %3915 = vrot.lane.b32.xlu2 %v3809_v4, %s10452_s22 }
 0xba9   : > { %v3784_v11 = vpop.f32.mrf.mxu2 }
 0xbaa   : > { %v3785_v28 = vadd.f32 %v3784_v11, %v3622_v15  ;;  %v3802_v44 = vpop.f32.mrf.mxu3 }
 0xbab   : > { %v3769_v24 = vpop.f32.mrf.mxu1  ;;  %v3803_v16 = vadd.f32 %v3802_v44, %v3623_v39 }
 0xbac   : > { %v3811_v57 = vpack.c.bf16 %v3785_v28, %v3783_v0  ;;  %v3770_v26 = vadd.f32 %v3769_v24, %v3621_v55 }
 0xbad   : > { %v11574_v42 = vpack.c.bf16 %v3803_v16, %v3801_v43 }
 0xbae   : > { %3921 = vrot.lane.b32.xlu0 %v3811_v57, %s10452_s22  ;;  %v11563_v35 = vpack.c.bf16 %v3770_v26, %v3770_v26  ;;  %v3820_v20 = vsel %vm1976_vm4, %v3811_v57, 0 }
 0xbb0   : > { %4145 = vrot.lane.b32.xlu2 %v3811_v57, %s10453_s23 }
 0xbb1   : > { %v3787_v31 = vpop.f32.mrf.mxu2 }
 0xbb2   : > { %v3788_v18 = vadd.f32 %v3787_v31, %v3622_v15  ;;  %v3805_v38 = vpop.f32.mrf.mxu3 }
 0xbb3   : > { %v3806_v27 = vadd.f32 %v3805_v38, %v3623_v39  ;;  %v3771_v23 = vpop.f32.mrf.mxu1 }
 0xbb4   : > { %v3812_v12 = vpack.c.bf16 %v3788_v18, %v3788_v18 }
 0xbb5   : > { %v11565_v63 = vpack.c.bf16 %v3806_v27, %v3806_v27 }
 0xbb6   : > { %3923 = vrot.lane.b32.xlu1 %v3812_v12, %s10452_s22  ;;  %3917 = vrot.lane.b32.xlu0 %v11563_v35, %s10452_s22  ;;  %v3823_v19 = vsel %vm1976_vm4, %v3812_v12, 0 }
 0xbb7   : > { %3831 = vmatpush.bf16.xpose.msrb.mxu0 %v3823_v19  ;;  %v3893_v21 = vsel %vm2057_vm3, %v11565_v63, 0 }
 0xbb8   : > { %3901 = vmatpush.bf16.msrb.mxu1 %v3893_v21  ;;  %4034 = vrot.lane.b32.xlu2 %v3811_v57, %s10454_s26 }
 0xbb9   : > { %v3789_v40 = vpop.f32.mrf.mxu2 }
 0xbba   : > { %v3807_v47 = vpop.f32.mrf.mxu3 }
 0xbbc   : > { %3902 = vmatpush.bf16.msrb.mxu1 %v11574_v42 }
 0xbbe   : > { %4147 = vrot.lane.b32.xlu1 %v3812_v12, %s10453_s23  ;;  %4036 = vrot.lane.b32.xlu0 %v3812_v12, %s10454_s26 }
 0xbbf   : > { %3832 = vmatpush.bf16.xpose.msrb.mxu0 %v3820_v20 }
 0xbc0   : > { %4000 = vrot.lane.b32.xlu2 %v11565_v63, %s10452_s22 }
 0xbc6   : > { %4030 = vrot.lane.b32.xlu0 %v3809_v4, %s10454_s26  ;;  %4141 = vrot.lane.b32.xlu1 %v3809_v4, %s10453_s23 }
 0xbc7   : > { %8332 = vmatmul.msk.bf16.vlgmr.msrb.gmra.mxu0 %vm1976_vm4, %v3809_v4 }
 0xbce   : > { %4143 = vrot.lane.b32.xlu0 %v11563_v35, %s10453_s23 }
 0xbd7   : > { %8333 = vmatmul.msk.bf16.gmra.mxu0 %vm1976_vm4, %v11563_v35 }
 0xc02   : > { %v3916_v8 = vpop.permute.xlu2 %3915 }
 0xc0a   : > { %v4146_v60 = vpop.permute.xlu2 %4145 }
 0xc0b   : > { %v4156_v2 = vsel %vm1976_vm4, %v4146_v60, 0 }
 0xc12   : > { %v4035_v10 = vpop.permute.xlu2 %4034 }
 0xc13   : > { %v4045_v30 = vsel %vm1976_vm4, %v4035_v10, 0 }
 0xc1a   : > { %v4001_v48 = vpop.permute.xlu2 %4000 }
 0xc1b   : > { %v4010_v50 = vsel %vm2057_vm3, %v4001_v48, 0 }
 0xc1c   : > { %4018 = vmatpush.bf16.msrb.mxu3 %v4010_v50 }
 0xc20   : > { %v3922_v52 = vpop.permute.xlu0 %3921 }
 0xc21   : > { %v3932_v59 = vsel %vm1976_vm4, %v3922_v52, 0 }
 0xc28   : > { %v3924_v54 = vpop.permute.xlu1 %3923  ;;  %v3918_v22 = vpop.permute.xlu0 %3917 }
 0xc29   : > { %v3935_v17 = vsel %vm1976_vm4, %v3924_v54, 0 }
 0xc2a   : > { %3943 = vmatpush.bf16.xpose.msrb.mxu2 %v3935_v17 }
 0xc30   : > { %v4148_v53 = vpop.permute.xlu1 %4147  ;;  %v4037_v25 = vpop.permute.xlu0 %4036 }
 0xc31   : > { %v4159_v61 = vsel %vm1976_vm4, %v4148_v53, 0  ;;  %v4048_v29 = vsel %vm1976_vm4, %v4037_v25, 0 }
 0xc32   : > { %3944 = vmatpush.bf16.xpose.msrb.mxu2 %v3932_v59  ;;  %4056 = vmatpush.bf16.xpose.msra.mxu0 %v4048_v29 }
 0xc38   : > { %v4031_v33 = vpop.permute.xlu0 %4030  ;;  %v4142_v5 = vpop.permute.xlu1 %4141 }
 0xc39   : > { %8336 = vmatmul.msk.bf16.vlgmr.msrb.gmra.mxu2 %vm1976_vm4, %v3916_v8 }
 0xc3a   : > { %4167 = vmatpush.bf16.xpose.msra.mxu2 %v4159_v61  ;;  %4057 = vmatpush.bf16.xpose.msra.mxu0 %v4045_v30 }
 0xc40   : > { %v4144_v14 = vpop.permute.xlu0 %4143 }
 0xc41   : > { %8340 = vmatmul.msk.bf16.vlgmr.msra.gmra.mxu0 %vm1976_vm4, %v4031_v33 }
 0xc42   : > { %4168 = vmatpush.bf16.xpose.msra.mxu2 %v4156_v2 }
 0xc44   : > { %v3834_v7 = vpop.f32.mrf.mxu0 }
 0xc45   : > { %v3843_v6 = vmul.f32 0.17677669, %v3834_v7 }
 0xc47   : > { %v11600_v3 = vsel %vm1673_vm5, %v3843_v6, -1e+30 }
 0xc48   : > { %v3849_v62 = vsel %vm2013_vm6, %v11600_v3, -inf }
 0xc49   : > { %3850 = vmax.xlane.f32.xlu0 %v3849_v62  ;;  %8337 = vmatmul.msk.bf16.gmra.mxu2 %vm1976_vm4, %v3918_v22 }
 0xc4c   : > { %v3836_v49 = vpop.f32.mrf.mxu0 }
 0xc4d   : > { %v3844_v36 = vmul.f32 0.17677669, %v3836_v49 }
 0xc4f   : > { %v3847_v58 = vsel %vm1673_vm5, %v3844_v36, -1e+30 }
 0xc50   : > { %v3852_v41 = vsel %vm2013_vm6, %v3847_v58, -inf }
 0xc51   : > { %3853 = vmax.xlane.f32.xlu1 %v3852_v41 }
 0xc54   : > { %v3839_v1 = vpop.f32.mrf.mxu0 }
 0xc55   : > { %v3845_v51 = vmul.f32 0.17677669, %v3839_v1 }
 0xc57   : > { %v11610_v55 = vsel %vm1673_vm5, %v3845_v51, -1e+30 }
 0xc58   : > { %v3855_v9 = vsel %vm2013_vm6, %v11610_v55, -inf }
 0xc59   : > { %3856 = vmax.xlane.f32.xlu0 %v3855_v9  ;;  %8344 = vmatmul.msk.bf16.vlgmr.msra.gmra.mxu2 %vm1976_vm4, %v4142_v5 }
 0xc5c   : > { %v3841_v46 = vpop.f32.mrf.mxu0 }
 0xc69   : > { %8345 = vmatmul.msk.bf16.gmra.mxu2 %vm1976_vm4, %v4144_v14 }
 0xc6d   : > { %3998 = vrot.lane.b32.xlu0 %v11574_v42, %s10452_s22 }
 0xcbc   : > { %v3946_v13 = vpop.f32.mrf.mxu2  ;;  %v3851_v19 = vpop.xlane.xlu0 %3850 }
 0xcbd   : > { %v3955_v28 = vmul.f32 0.17677669, %v3946_v13  ;;  %v3858_v61 = vsub.f32 %v11600_v3, %v3851_v19 }
 0xcbe   : > { %v4059_v15 = vpop.f32.mrf.mxu0 }
 0xcbf   : > { %v4068_v4 = vmul.f32 0.17677669, %v4059_v15  ;;  %v3958_v39 = vsel %vm1673_vm5, %v3955_v28, -1e+30  ;;  %v3861_v29 = vmul.f32 1.442695, %v3858_v61 }
 0xcc0   : > { %v3961_v38 = vsel %vm2013_vm6, %v3958_v39, -inf }
 0xcc1   : > { %v4071_v11 = vsel %vm1673_vm5, %v4068_v4, -1e+30 }
 0xcc2   : > { %v4074_v0 = vsel %vm2013_vm6, %v4071_v11, -inf }
 0xcc3   : > { %4075 = vmax.xlane.f32.xlu1 %v4074_v0 }
 0xcc4   : > { %v3948_v44 = vpop.f32.mrf.mxu2  ;;  %v3854_v24 = vpop.xlane.xlu1 %3853 }
 0xcc5   : > { %v3859_v31 = vsub.f32 %v3847_v58, %v3854_v24  ;;  %v3956_v23 = vmul.f32 0.17677669, %v3948_v44 }
 0xcc6   : > { %v4061_v57 = vpop.f32.mrf.mxu0 }
 0xcc7   : > { %v4069_v26 = vmul.f32 0.17677669, %v4061_v57  ;;  %v3863_v16 = vmul.f32 1.442695, %v3859_v31  ;;  %v3959_v21 = vsel %vm1673_vm5, %v3956_v23, -1e+30 }
 0xcc8   : > { %v3964_v43 = vsel %vm2013_vm6, %v3959_v21, -inf }
 0xcc9   : > { %v4072_v18 = vsel %vm1673_vm5, %v4069_v26, -1e+30  ;;  %10255 = vpow2.f32 %v3863_v16 }
 0xcca   : > { %v4077_v27 = vsel %vm2013_vm6, %v4072_v18, -inf  ;;  %10257 = vpow2.f32 %v3861_v29 }
 0xccb   : > { %3962 = vmax.xlane.f32.xlu1 %v3961_v38  ;;  %4078 = vmax.xlane.f32.xlu2 %v4077_v27 }
 0xccc   : > { %v3951_v12 = vpop.f32.mrf.mxu2  ;;  %v3857_v20 = vpop.xlane.xlu0 %3856 }
 0xccd   : > { %v3957_v60 = vmul.f32 0.17677669, %v3951_v12  ;;  %v3860_v15 = vsub.f32 %v11610_v55, %v3857_v20 }
 0xccf   : > { %v11630_v47 = vpop.eup %10255  ;;  %v3960_v50 = vsel %vm1673_vm5, %v3957_v60, -1e+30  ;;  %v3865_v44 = vmul.f32 1.442695, %v3860_v15 }
 0xcd0   : > { %v3870_v8 = vsel %vm2013_vm6, %v11630_v47, 0.0  ;;  %v3967_v52 = vsel %vm2013_vm6, %v3960_v50, -inf  ;;  %v11645_v30 = vpop.eup %10257 }
 0xcd1   : > { %v3867_v2 = vsel %vm2013_vm6, %v11645_v30, 0.0 }
 0xcd3   : > { %3965 = vmax.xlane.f32.xlu2 %v3964_v43 }
 0xcd4   : > { %v3953_v40 = vpop.f32.mrf.mxu2 }
 0xcdb   : > { %3871 = vadd.xlane.f32.xlu2 %v3870_v8 }
 0xcdc   : > { %v4170_v10 = vpop.f32.mrf.mxu2 }
 0xcdf   : > { %v3999_v48 = vpop.permute.xlu0 %3998 }
 0xce0   : > { %4019 = vmatpush.bf16.msrb.mxu3 %v3999_v48 }
 0xce3   : > { %3968 = vmax.xlane.f32.xlu2 %v3967_v52 }
 0xce4   : > { %v4172_v54 = vpop.f32.mrf.mxu2  ;;  %4032 = vrot.lane.b32.xlu1 %v11563_v35, %s10454_s26  ;;  %v4179_v35 = vmul.f32 0.17677669, %v4170_v10 }
 0xce5   : > { %v4180_v22 = vmul.f32 0.17677669, %v4172_v54 }
 0xce6   : > { %v11651_v33 = vsel %vm1673_vm5, %v4179_v35, -1e+30 }
 0xce7   : > { %v4183_v17 = vsel %vm1673_vm5, %v4180_v22, -1e+30  ;;  %v4185_v7 = vsel %vm2013_vm6, %v11651_v33, -inf }
 0xce8   : > { %v4188_v53 = vsel %vm2013_vm6, %v4183_v17, -inf }
 0xceb   : > { %4189 = vmax.xlane.f32.xlu2 %v4188_v53 }
 0xcec   : > { %v11642_v25 = vpop.f32.mrf.mxu2 }
 0xcf4   : > { %v4177_v59 = vpop.f32.mrf.mxu2 }
 0xd0e   : > { %3868 = vadd.xlane.f32.xlu1 %v3867_v2 }
 0xd16   : > { %4186 = vmax.xlane.f32.xlu1 %v4185_v7 }
 0xd36   : > { %v4076_v6 = vpop.xlane.xlu1 %4075 }
 0xd37   : > { %v4083_v62 = vsub.f32 %v4071_v11, %v4076_v6 }
 0xd39   : > { %v4086_v3 = vmul.f32 1.442695, %v4083_v62  ;;  %v4181_v62 = vmul.f32 0.17677669, %v11642_v25 }
 0xd3b   : > { %10259 = vpow2.f32 %v4086_v3  ;;  %v4184_v3 = vsel %vm1673_vm5, %v4181_v62, -1e+30 }
 0xd3e   : > { %v3963_v49 = vpop.xlane.xlu1 %3962  ;;  %v4079_v36 = vpop.xlane.xlu2 %4078 }
 0xd3f   : > { %v3970_v58 = vsub.f32 %v3958_v39, %v3963_v49  ;;  %v4084_v41 = vsub.f32 %v4072_v18, %v4079_v36 }
 0xd41   : > { %v11655_v1 = vpop.eup %10259  ;;  %v3973_v51 = vmul.f32 1.442695, %v3970_v58  ;;  %v4088_v5 = vmul.f32 1.442695, %v4084_v41 }
 0xd42   : > { %v4092_v9 = vsel %vm2013_vm6, %v11655_v1, 0.0 }
 0xd43   : > { %10261 = vpow2.f32 %v3973_v51  ;;  %4093 = vadd.xlane.f32.xlu1 %v4092_v9 }
 0xd44   : > { %10263 = vpow2.f32 %v4088_v5  ;;  %v4191_v5 = vsel %vm2013_vm6, %v4184_v3, -inf }
 0xd46   : > { %v3966_v46 = vpop.xlane.xlu2 %3965 }
 0xd47   : > { %v3971_v14 = vsub.f32 %v3959_v21, %v3966_v46 }
 0xd49   : > { %v11659_v13 = vpop.eup %10261  ;;  %v3975_v4 = vmul.f32 1.442695, %v3971_v14 }
 0xd4a   : > { %v11662_v11 = vpop.eup %10263  ;;  %v3979_v0 = vsel %vm2013_vm6, %v11659_v13, 0.0 }
 0xd4b   : > { %10265 = vpow2.f32 %v3975_v4  ;;  %3980 = vadd.xlane.f32.xlu2 %v3979_v0  ;;  %v4095_v28 = vsel %vm2013_vm6, %v11662_v11, 0.0 }
 0xd4c   : > { %4096 = vadd.xlane.f32.xlu1 %v4095_v28  ;;  %10267 = vpow2.f32 %v3865_v44 }
 0xd4e   : > { %v3872_v24 = vpop.xlane.xlu2 %3871 }
 0xd51   : > { %v10266_v57 = vpop.eup %10265 }
 0xd52   : > { %v3982_v26 = vsel %vm2013_vm6, %v10266_v57, 0.0  ;;  %v10268_v31 = vpop.eup %10267 }
 0xd53   : > { %3983 = vadd.xlane.f32.xlu0 %v3982_v26  ;;  %v3873_v27 = vsel %vm2013_vm6, %v10268_v31, 0.0 }
 0xd56   : > { %v4033_v55 = vpop.permute.xlu1 %4032  ;;  %v3969_v39 = vpop.xlane.xlu2 %3968 }
 0xd57   : > { %v3972_v18 = vsub.f32 %v3960_v50, %v3969_v39  ;;  %8341 = vmatmul.msk.bf16.gmra.mxu0 %vm1976_vm4, %v4033_v55 }
 0xd59   : > { %v3977_v38 = vmul.f32 1.442695, %v3972_v18 }
 0xd5b   : > { %10269 = vpow2.f32 %v3977_v38  ;;  %3874 = vadd.xlane.f32.xlu0 %v3873_v27 }
 0xd5e   : > { %v4190_v23 = vpop.xlane.xlu2 %4189 }
 0xd5f   : > { %v4195_v12 = vsub.f32 %v4183_v17, %v4190_v23 }
 0xd61   : > { %v10270_v16 = vpop.eup %10269  ;;  %v4199_v19 = vmul.f32 1.442695, %v4195_v12 }
 0xd62   : > { %v3985_v21 = vsel %vm2013_vm6, %v10270_v16, 0.0 }
 0xd63   : > { %10271 = vpow2.f32 %v4199_v19  ;;  %4222 = vrot.lane.b32.xlu2 %v11565_v63, %s10453_s23  ;;  %3986 = vadd.xlane.f32.xlu1 %v3985_v21 }
 0xd64   : > { %10273 = vrcp.f32 %v3872_v24 }
 0xd69   : > { %v11674_v43 = vpop.eup %10271 }
 0xd6a   : > { %v4206_v40 = vsel %vm2013_vm6, %v11674_v43, 0.0  ;;  %v10274_v8 = vpop.eup %10273 }
 0xd6b   : > { %4207 = vadd.xlane.f32.xlu1 %v4206_v40  ;;  %v3880_v10 = vmul.f32 %v10274_v8, %v11630_v47 }
 0xd6f   : > { %4109 = vrot.lane.b32.xlu0 %v11574_v42, %s10454_s26 }
 0xd81   : > { %v3869_v20 = vpop.xlane.xlu1 %3868 }
 0xd82   : > { %10275 = vrcp.f32 %v3869_v20 }
 0xd84   : > { %4111 = vrot.lane.b32.xlu1 %v11565_v63, %s10454_s26 }
 0xd88   : > { %v10276_v60 = vpop.eup %10275 }
 0xd89   : > { %v3879_v48 = vmul.f32 %v10276_v60, %v11645_v30  ;;  %v4187_v50 = vpop.xlane.xlu1 %4186 }
 0xd8a   : > { %v4194_v52 = vsub.f32 %v11651_v33, %v4187_v50 }
 0xd8b   : > { %v3882_v54 = vpack.c.bf16 %v3880_v10, %v3879_v48 }
 0xd8c   : > { %v4197_v22 = vmul.f32 1.442695, %v4194_v52 }
 0xd8d   : > { %8334 = vmatmul.msk.bf16.vlgmr.msrb.gmra.mxu1 %vm2013_vm6, %v3882_v54 }
 0xd8e   : > { %10277 = vpow2.f32 %v4197_v22 }
 0xd94   : > { %v10278_v17 = vpop.eup %10277 }
 0xd95   : > { %v4203_v53 = vsel %vm2013_vm6, %v10278_v17, 0.0 }
 0xd96   : > { %4204 = vadd.xlane.f32.xlu2 %v4203_v53 }
 0xdae   : > { %4220 = vrot.lane.b32.xlu2 %v11574_v42, %s10453_s23 }
 0xdb6   : > { %v4094_v59 = vpop.xlane.xlu1 %4093 }
 0xdbe   : > { %v3981_v63 = vpop.xlane.xlu2 %3980 }
 0xdbf   : > { %10279 = vrcp.f32 %v3981_v63  ;;  %v4097_v35 = vpop.xlane.xlu1 %4096 }
 0xdc5   : > { %v10280_v30 = vpop.eup %10279 }
 0xdc6   : > { %v3984_v47 = vpop.xlane.xlu0 %3983  ;;  %v4223_v61 = vpop.permute.xlu2 %4222  ;;  %v3991_v33 = vmul.f32 %v10280_v30, %v11659_v13 }
 0xdc7   : > { %10281 = vrcp.f32 %v3984_v47  ;;  %v4232_v29 = vsel %vm2057_vm3, %v4223_v61, 0 }
 0xdc8   : > { %4240 = vmatpush.bf16.msra.mxu3 %v4232_v29 }
 0xdcd   : > { %v10282_v2 = vpop.eup %10281 }
 0xdce   : > { %v3992_v7 = vmul.f32 %v10282_v2, %v10266_v57  ;;  %v3875_v6 = vpop.xlane.xlu0 %3874 }
 0xdcf   : > { %10283 = vrcp.f32 %v3875_v6 }
 0xdd0   : > { %v3994_v42 = vpack.c.bf16 %v3992_v7, %v3991_v33 }
 0xdd2   : > { %8338 = vmatmul.msk.bf16.vlgmr.msrb.gmra.mxu3 %vm2013_vm6, %v3994_v42 }
 0xdd4   : > { %v4064_v49 = vpop.f32.mrf.mxu0 }
 0xdd5   : > { %v10284_v36 = vpop.eup %10283  ;;  %v4070_v58 = vmul.f32 0.17677669, %v4064_v49 }
 0xdd6   : > { %v3881_v41 = vmul.f32 %v10284_v36, %v10268_v31  ;;  %v3987_v51 = vpop.xlane.xlu1 %3986 }
 0xdd7   : > { %10285 = vrcp.f32 %v3987_v51  ;;  %4192 = vmax.xlane.f32.xlu2 %v4191_v5  ;;  %v4073_v9 = vsel %vm1673_vm5, %v4070_v58, -1e+30  ;;  %v9791_v58 = vld [vmem:[%s10508_s14 + $0x78] sm:$0xff]  ;;  %v9789_v51 = vld [vmem:[%s10508_s14 + $0x68] sm:$0xff]  ;;  %v9788_v5 = vld [vmem:[%s10508_s14 + $0x60] sm:$0xff] }
 0xdd8   : > { %v4080_v25 = vsel %vm2013_vm6, %v4073_v9, -inf  ;;  %v3883_v46 = vpack.c.bf16 %v3881_v41, %v3881_v41  ;;  %10287 = vrcp.f32 %v4097_v35  ;;  %4364 = vmatpush.bf16.msrb.mxu0 %v9791_v58  ;;  %v9790_v41 = vld [vmem:[%s10508_s14 + $0x70] sm:$0xff]  ;;  %v9821_v58 = vld [vmem:[%s10528_s6 + $0x1ec] sm:$0xf] }
 0xdd9   : > { %4081 = vmax.xlane.f32.xlu1 %v4080_v25  ;;  %10289 = vrcp.f32 %v4094_v59  ;;  %v9786_v25 = vld [vmem:[%s10508_s14 + $0x50] sm:$0xff] }
 0xdda   : > { %8335 = vmatmul.msk.bf16.gmra.mxu1 %vm2013_vm6, %v3883_v46  ;;  %v9785_v46 = vld [vmem:[%s10508_s14 + $0x48] sm:$0xff] }
 0xddc   : > { %v4066_v14 = vpop.f32.mrf.mxu0  ;;  %4365 = vmatpush.bf16.msrb.mxu0 %v9790_v41  ;;  %v8556_v41 = vld [vmem:[%s10528_s6 + $0x1f8] sm:$0xf0] }
 0xddd   : > { %v10286_v13 = vpop.eup %10285  ;;  %v9784_v14 = vld [vmem:[%s10508_s14 + $0x40] sm:$0xff] }
 0xdde   : > { %v3993_v15 = vmul.f32 %v10286_v13, %v10270_v16  ;;  %v4208_v0 = vpop.xlane.xlu1 %4207  ;;  %v10288_v28 = vpop.eup %10287 }
 0xddf   : > { %v10290_v24 = vpop.eup %10289  ;;  %v4105_v57 = vmul.f32 %v10288_v28, %v11662_v11  ;;  %10291 = vrcp.f32 %v4208_v0 }
 0xde0   : > { %v3995_v4 = vpack.c.bf16 %v3993_v15, %v3993_v15  ;;  %v4104_v26 = vmul.f32 %v10290_v24, %v11655_v1  ;;  %4366 = vmatpush.bf16.msrb.mxu0 %v9789_v51  ;;  %v8559_v51 = vor.u32 %v9821_v58, %v8556_v41 }
 0xde1   : > { %v4110_v55 = vpop.permute.xlu0 %4109 }
 0xde2   : > { %8339 = vmatmul.msk.bf16.gmra.mxu3 %vm2013_vm6, %v3995_v4  ;;  %v4107_v39 = vpack.c.bf16 %v4105_v57, %v4104_v26 }
 0xde4   : > { %4367 = vmatpush.bf16.msrb.mxu0 %v9788_v5  ;;  %v8530_v5 = vld [vmem:[%s10528_s6 + $0x1c0] sm:$0xf] }
 0xde5   : > { %v10292_v18 = vpop.eup %10291 }
 0xde6   : > { %v4216_v27 = vmul.f32 %v10292_v18, %v11674_v43 }
 0xdf6   : > { %v4112_v44 = vpop.permute.xlu1 %4111 }
 0xdf7   : > { %v4121_v32 = vsel %vm2057_vm3, %v4112_v44, 0  ;;  %vm12846_vm3 = vcmask 523264  }
 0xdf8   : > { %4129 = vmatpush.bf16.msra.mxu1 %v4121_v32  ;;  %vm12847_vm5 = vmmov %vm12846_vm3 }
 0xdf9   : > { %vm12850_vm8 = vmmov %vm12846_vm3 }
 0xdfc   : > { %4130 = vmatpush.bf16.msra.mxu1 %v4110_v55 }
 0xdff   : > { %8342 = vmatmul.msk.bf16.vlgmr.msra.gmra.mxu1 %vm2013_vm6, %v4107_v39 }
 0xe09   : > { %v4205_v31 = vpop.xlane.xlu2 %4204 }
 0xe0a   : > { %10293 = vrcp.f32 %v4205_v31  ;;  %v11707_v11 = vpop.f32.mrf.mxu1 }
 0xe10   : > { %v10294_v38 = vpop.eup %10293 }
 0xe11   : > { %v4215_v23 = vmul.f32 %v10294_v38, %v10278_v17  ;;  %v4221_v12 = vpop.permute.xlu2 %4220 }
 0xe12   : > { %4241 = vmatpush.bf16.msra.mxu3 %v4221_v12  ;;  %v11709_v8 = vpop.f32.mrf.mxu1 }
 0xe13   : > { %v4218_v16 = vpack.c.bf16 %v4216_v27, %v4215_v23 }
 0xe15   : > { %8346 = vmatmul.msk.bf16.vlgmr.msra.gmra.mxu3 %vm2013_vm6, %v4218_v16 }
 0xe4a   : > { %v4193_v1 = vpop.xlane.xlu2 %4192 }
 0xe4b   : > { %v4196_v19 = vsub.f32 %v4184_v3, %v4193_v1  ;;  %v10127_v1 = vld [vmem:[%s10513_s19 + $0x1] ss:$0 sm:$0xff] }
 0xe4c   : > { %v4082_v21 = vpop.xlane.xlu1 %4081 }
 0xe4d   : > { %v4201_v40 = vmul.f32 1.442695, %v4196_v19  ;;  %v4085_v20 = vsub.f32 %v4073_v9, %v4082_v21  ;;  %v9787_v9 = vld [vmem:[%s10508_s14 + $0x58] sm:$0xff] }
 0xe4e   : > { %4368 = vmatpush.bf16.msrb.mxu0 %v9787_v9  ;;  %v9818_v9 = vld [vmem:[%s10528_s6 + $0x1cc] sm:$0xf0] }
 0xe4f   : > { %10295 = vpow2.f32 %v4201_v40  ;;  %v4090_v60 = vmul.f32 1.442695, %v4085_v20 }
 0xe51   : > { %10297 = vpow2.f32 %v4090_v60 }
 0xe52   : > { %4369 = vmatpush.bf16.msrb.mxu0 %v9786_v25  ;;  %v9816_v25 = vld [vmem:[%s10528_s6 + $0x1c4] sm:$0xf] }
 0xe55   : > { %v10296_v10 = vpop.eup %10295  ;;  %v4021_v43 = vpop.f32.mrf.mxu3 }
 0xe56   : > { %v4209_v48 = vsel %vm2013_vm6, %v10296_v10, 0.0  ;;  %4370 = vmatpush.bf16.msrb.mxu0 %v9785_v46  ;;  %v8531_v46 = vor.u32 %v9818_v9, %v8530_v5  ;;  %v9801_v5 = vld [vmem:[%s10528_s6 + $0x14c] sm:$0xf]  ;;  %v8476_v9 = vld [vmem:[%s10528_s6 + $0x158] sm:$0xf0] }
 0xe57   : > { %v10298_v50 = vpop.eup %10297  ;;  %v11712_v52 = vpop.f32.mrf.mxu1  ;;  %4210 = vadd.xlane.f32.xlu0 %v4209_v48 }
 0xe58   : > { %v4098_v54 = vsel %vm2013_vm6, %v10298_v50, 0.0 }
 0xe59   : > { %4099 = vadd.xlane.f32.xlu2 %v4098_v54 }
 0xe5a   : > { %4371 = vmatpush.bf16.msrb.mxu0 %v9784_v14  ;;  %v8532_v14 = vld [vmem:[%s10528_s6 + $0x1d0] sm:$0xf0] }
 0xe5d   : > { %v4023_v22 = vpop.f32.mrf.mxu3 }
 0xe5e   : > { %v10102_v59 = vpack.i.bf16 %v4023_v22, %v4021_v43  ;;  %4729 = vmatpush.bf16.msra.mxu0 %v8559_v51 }
 0xe5f   : > { %v3911_v17 = vpop.f32.mrf.mxu1 }
 0xe65   : > { %v4026_v53 = vpop.f32.mrf.mxu3 }
 0xe6d   : > { %v4028_v63 = vpop.f32.mrf.mxu3 }
 0xe71   : > { %10103 = vrot.lane.b32.xlu2 %v10102_v59, %s10453_s23 }
 0xe79   : > { %4259 = vrot.lane.b32.xlu2 %v4026_v53, %s10453_s23  ;;  %s12882_s23 = sld [smem:[#allocation11_spill]] }
 0xe7c   : > { %v4132_v47 = vpop.f32.mrf.mxu1 }
 0xe84   : > { %v4134_v61 = vpop.f32.mrf.mxu1 }
 0xe85   : > { %v10107_v29 = vpack.i.bf16 %v4134_v61, %v4132_v47 }
 0xe87   : > { %10108 = vrot.lane.b32.xlu1 %v10107_v29, %s10454_s26 }
 0xe98   : > { %v4243_v30 = vpop.f32.mrf.mxu3 }
 0xea0   : > { %v4245_v2 = vpop.f32.mrf.mxu3 }
 0xea1   : > { %v10112_v35 = vpack.i.bf16 %v4245_v2, %v4243_v30 }
 0xea3   : > { %10113 = vrot.lane.b32.xlu0 %v10112_v35, %s10452_s22 }
 0xeca   : > { %v4211_v33 = vpop.xlane.xlu0 %4210 }
 0xecb   : > { %10299 = vrcp.f32 %v4211_v33  ;;  %v8546_v33 = vld [vmem:[%s10528_s6 + $0x1e0] sm:$0xf] }
 0xecc   : > { %v4100_v7 = vpop.xlane.xlu2 %4099 }
 0xecd   : > { %10301 = vrcp.f32 %v4100_v7  ;;  %v9822_v7 = vld [vmem:[%s10528_s6 + $0x1ec] sm:$0xf0] }
 0xed1   : > { %v10300_v6 = vpop.eup %10299 }
 0xed2   : > { %v4217_v62 = vmul.f32 %v10300_v6, %v10296_v10  ;;  %v9820_v6 = vld [vmem:[%s10528_s6 + $0x1e4] sm:$0xf] }
 0xed3   : > { %v10302_v42 = vpop.eup %10301 }
 0xed4   : > { %v4106_v3 = vmul.f32 %v10302_v42, %v10298_v50  ;;  %v4219_v49 = vpack.c.bf16 %v4217_v62, %v4217_v62  ;;  %v10104_v13 = vpop.permute.xlu2 %10103  ;;  %v8547_v62 = vor.u32 %v9822_v7, %v8546_v33  ;;  %v8548_v42 = vld [vmem:[%s10528_s6 + $0x1f0] sm:$0xf0]  ;;  %v8466_v7 = vld [vmem:[%s10528_s6 + $0x140] sm:$0xf] }
 0xed5   : > { %v10106_v4 = vunpack.i.h.bf16 %v10104_v13  ;;  %v10105_v0 = vunpack.i.l.bf16 %v10104_v13  ;;  %v8538_v13 = vld [vmem:[%s10528_s6 + $0x1c8] sm:$0xf] }
 0xed6   : > { %8347 = vmatmul.msk.bf16.gmra.mxu3 %vm2013_vm6, %v4219_v49  ;;  %v4108_v36 = vpack.c.bf16 %v4106_v3, %v4106_v3  ;;  %v8554_v3 = vld [vmem:[%s10528_s6 + $0x1e8] sm:$0xf]  ;;  %v9823_v49 = vld [vmem:[%s10528_s6 + $0x1f4] sm:$0xf0]  ;;  %4675 = vmatpush.bf16.msrb.mxu1 %v8547_v62  ;;  %v9800_v62 = vld [vmem:[%s10528_s6 + $0x144] sm:$0xf] }
 0xed7   : > { %v4289_v24 = vsel %vm1976_vm4, %v11709_v8, %v10106_v4  ;;  %v4288_v57 = vsel %vm1976_vm4, %v11707_v11, %v10105_v0  ;;  %v8535_v4 = vor.u32 %v9816_v25, %v8532_v14  ;;  %v8479_v25 = vor.u32 %v9801_v5, %v8476_v9  ;;  %v8450_v14 = vld [vmem:[%s10528_s6 + $0x120] sm:$0xf] }
 0xed8   : > { %8343 = vmatmul.msk.bf16.gmra.mxu1 %vm2013_vm6, %v4108_v36  ;;  %vm12848_vm6 = vcmask 785408   ;;  %v8551_v36 = vor.u32 %v9820_v6, %v8548_v42  ;;  %v9802_v6 = vld [vmem:[%s10528_s6 + $0x14c] sm:$0xf0] }
 0xed9   : > { %vm12849_vm2 = vmmov %vm12848_vm6 }
 0xeda   : > { %vm12851_vm0 = vmmov %vm12849_vm2  ;;  %4693 = vmatpush.bf16.msrb.mxu2 %v8551_v36  ;;  %4676 = vmatpush.bf16.msrb.mxu1 %v8531_v46  ;;  %v8474_v36 = vld [vmem:[%s10528_s6 + $0x148] sm:$0xf] }
 0xedc   : > { %v4260_v10 = vpop.permute.xlu2 %4259 }
 0xedd   : > { %v4290_v48 = vsel %vm1976_vm4, %v11712_v52, %v4260_v10 }
 0xede   : > { %4694 = vmatpush.bf16.msrb.mxu2 %v8535_v4  ;;  %v9796_v4 = vld [vmem:[%s10528_s6 + $0x124] sm:$0xf] }
 0xef9   : > { %v10109_v15 = vpop.permute.xlu1 %10108 }
 0xefa   : > { %v10111_v28 = vunpack.i.h.bf16 %v10109_v15  ;;  %v10110_v44 = vunpack.i.l.bf16 %v10109_v15  ;;  %v9819_v15 = vld [vmem:[%s10528_s6 + $0x1d4] sm:$0xf0] }
 0xefb   : > { %v8539_v0 = vor.u32 %v9819_v15, %v8538_v13  ;;  %v9798_v13 = vld [vmem:[%s10528_s6 + $0x12c] sm:$0xf0] }
 0xefc   : > { %v4292_v39 = vsel %vm12846_vm3, %v4289_v24, %v10111_v28  ;;  %v4291_v31 = vsel %vm12847_vm5, %v4288_v57, %v10110_v44  ;;  %v9817_v28 = vld [vmem:[%s10528_s6 + $0x1cc] sm:$0xf]  ;;  %v8540_v44 = vld [vmem:[%s10528_s6 + $0x1d8] sm:$0xf0]  ;;  %v8514_v24 = vld [vmem:[%s10528_s6 + $0x1a0] sm:$0xf]  ;;  %v8451_v15 = vor.u32 %v9798_v13, %v8450_v14 }
 0xefd   : > { %v9814_v57 = vld [vmem:[%s10528_s6 + $0x1ac] sm:$0xf0] }
 0xf15   : > { %v10114_v32 = vpop.permute.xlu0 %10113 }
 0xf16   : > { %v10116_v26 = vunpack.i.h.bf16 %v10114_v32  ;;  %v10115_v55 = vunpack.i.l.bf16 %v10114_v32  ;;  %v8543_v32 = vor.u32 %v9817_v28, %v8540_v44  ;;  %v8458_v28 = vld [vmem:[%s10528_s6 + $0x128] sm:$0xf] }
 0xf18   : > { %v4294_v18 = vsel %vm12848_vm6, %v4291_v31, %v10115_v55  ;;  %v4295_v38 = vsel %vm12849_vm2, %v4292_v39, %v10116_v26  ;;  %v9812_v26 = vld [vmem:[%s10528_s6 + $0x1a4] sm:$0xf]  ;;  %4730 = vmatpush.bf16.msra.mxu0 %v8543_v32  ;;  %v8515_v55 = vor.u32 %v9814_v57, %v8514_v24  ;;  %v8516_v39 = vld [vmem:[%s10528_s6 + $0x1b0] sm:$0xf0]  ;;  %v8522_v31 = vld [vmem:[%s10528_s6 + $0x1a8] sm:$0xf] }
 0xf19   : > { %v4297_v27 = vpack.c.bf16 %v4295_v38, %v4294_v18  ;;  %v9815_v18 = vld [vmem:[%s10528_s6 + $0x1b4] sm:$0xf0]  ;;  %v8519_v38 = vor.u32 %v9812_v26, %v8516_v39  ;;  %v9797_v24 = vld [vmem:[%s10528_s6 + $0x12c] sm:$0xf]  ;;  %v8460_v57 = vld [vmem:[%s10528_s6 + $0x138] sm:$0xf0] }
 0xf1a   : > { %4677 = vmatpush.bf16.msrb.mxu1 %v8515_v55  ;;  %v9799_v32 = vld [vmem:[%s10528_s6 + $0x134] sm:$0xf0]  ;;  %v8463_v55 = vor.u32 %v9797_v24, %v8460_v57  ;;  %v8434_v39 = vld [vmem:[%s10528_s6 + $0x100] sm:$0xf] }
 0xf1b   : > { %4372 = vmatmul.bf16.vlgmr.msrb.gmra.mxu0 %v4297_v27  ;;  %v8523_v27 = vor.u32 %v9815_v18, %v8522_v31  ;;  %4695 = vmatpush.bf16.msrb.mxu2 %v8519_v38  ;;  %v8459_v26 = vor.u32 %v9799_v32, %v8458_v28  ;;  %v9794_v31 = vld [vmem:[%s10528_s6 + $0x10c] sm:$0xf0]  ;;  %v9792_v18 = vld [vmem:[%s10528_s6 + $0x104] sm:$0xf]  ;;  %v9831_v28 = vld [vmem:[%s12820_s1 + $0x138] sm:$0xff] }
 0xf1c   : > { %v8435_v38 = vor.u32 %v9794_v31, %v8434_v39 }
 0xf55   : > { %v4137_v23 = vpop.f32.mrf.mxu1 }
 0xf56   : > { %4271 = vrot.lane.b32.xlu1 %v4137_v23, %s10454_s26  ;;  %v9813_v23 = vld [vmem:[%s10528_s6 + $0x1ac] sm:$0xf]  ;;  %s12883_s26 = sld [smem:[#allocation13_spill]] }
 0xf59   : > { %v4248_v12 = vpop.f32.mrf.mxu3 }
 0xf5a   : > { %4283 = vrot.lane.b32.xlu0 %v4248_v12, %s10452_s22  ;;  %v8524_v12 = vld [vmem:[%s10528_s6 + $0x1b8] sm:$0xf0]  ;;  %s12881_s22 = sld [smem:[#allocation10_spill]] }
 0xf5d   : > { %v4139_v16 = vpop.f32.mrf.mxu1 }
 0xf5e   : > { %v8527_v16 = vor.u32 %v9813_v23, %v8524_v12  ;;  %v8442_v23 = vld [vmem:[%s10528_s6 + $0x108] sm:$0xf]  ;;  %v9795_v12 = vld [vmem:[%s10528_s6 + $0x114] sm:$0xf0] }
 0xf60   : > { %4731 = vmatpush.bf16.msra.mxu0 %v8527_v16 }
 0xf61   : > { %v4250_v11 = vpop.f32.mrf.mxu3 }
 0xf62   : > { %v8498_v11 = vld [vmem:[%s10528_s6 + $0x180] sm:$0xf] }
 0xf98   : > { %v4373_v19 = vpop.f32.mrf.mxu0 }
 0xf99   : > { %v4382_v21 = vadd.f32 %v4373_v19, %v11474_v34  ;;  %v9808_v19 = vld [vmem:[%s10528_s6 + $0x184] sm:$0xf] }
 0xf9b   : > { %v11741_v40 = vadd.f32 %v10127_v1, %v4382_v21 }
 0xf9d   : > { %4397 = vadd.xlane.f32.xlu2 %v11741_v40 }
 0xfa0   : > { %v4375_v20 = vpop.f32.mrf.mxu0 }
 0xfa1   : > { %v4383_v8 = vadd.f32 %v4375_v20, %v11478_v56  ;;  %v8500_v20 = vld [vmem:[%s10528_s6 + $0x190] sm:$0xf0] }
 0xfa2   : > { %v8503_v10 = vor.u32 %v9808_v19, %v8500_v20  ;;  %v9793_v19 = vld [vmem:[%s10528_s6 + $0x10c] sm:$0xf] }
 0xfa3   : > { %v4391_v60 = vadd.f32 %v10127_v1, %v4383_v8  ;;  %v8506_v8 = vld [vmem:[%s10528_s6 + $0x188] sm:$0xf] }
 0xfa4   : > { %4696 = vmatpush.bf16.msrb.mxu2 %v8503_v10 }
 0xfa5   : > { %4399 = vadd.xlane.f32.xlu1 %v4391_v60 }
 0xfc8   : > { %v4272_v43 = vpop.permute.xlu1 %4271 }
 0xfc9   : > { %v4293_v50 = vsel %vm12850_vm8, %v4290_v48, %v4272_v43  ;;  %v9809_v48 = vld [vmem:[%s10528_s6 + $0x18c] sm:$0xf] }
 0xfcc   : > { %v4284_v54 = vpop.permute.xlu0 %4283 }
 0xfcd   : > { %v4296_v22 = vsel %vm12851_vm0, %v4293_v50, %v4284_v54  ;;  %v8508_v50 = vld [vmem:[%s10528_s6 + $0x198] sm:$0xf0] }
 0xfce   : > { %v4298_v34 = vpack.c.bf16 %v4296_v22, %v4296_v22  ;;  %v8511_v54 = vor.u32 %v9809_v48, %v8508_v50  ;;  %v8482_v22 = vld [vmem:[%s10528_s6 + $0x160] sm:$0xf] }
 0xfd0   : > { %4377 = vmatmul.bf16.gmra.mxu0 %v4298_v34  ;;  %v9806_v34 = vld [vmem:[%s10528_s6 + $0x16c] sm:$0xf0] }
 0xfd1   : > { %4732 = vmatpush.bf16.msra.mxu0 %v8511_v54 }
0x1010   : > { %v4398_v17 = vpop.xlane.xlu2 %4397 }
0x1011   : > { %v4403_v53 = vmul.f32 %v4398_v17, %v10731_v45  ;;  %v9804_v17 = vld [vmem:[%s10528_s6 + $0x164] sm:$0xf] }
0x1013   : > { %v11751_v56 = vsub.f32 %v11741_v40, %v4403_v53  ;;  %v8483_v53 = vor.u32 %v9806_v34, %v8482_v22 }
0x1015   : > { %v4409_v63 = vmul.f32 %v11751_v56, %v11751_v56 }
0x1017   : > { %4412 = vadd.xlane.f32.xlu0 %v4409_v63  ;;  %v8484_v63 = vld [vmem:[%s10528_s6 + $0x170] sm:$0xf0] }
0x1018   : > { %v4400_v52 = vpop.xlane.xlu1 %4399 }
0x1019   : > { %v4404_v59 = vmul.f32 %v4400_v52, %v10731_v45  ;;  %v8490_v52 = vld [vmem:[%s10528_s6 + $0x168] sm:$0xf] }
0x101b   : > { %v11756_v47 = vsub.f32 %v4391_v60, %v4404_v59  ;;  %v9811_v60 = vld [vmem:[%s10528_s6 + $0x194] sm:$0xf0] }
0x101c   : > { %v8507_v43 = vor.u32 %v9811_v60, %v8506_v8  ;;  %v9807_v59 = vld [vmem:[%s10528_s6 + $0x174] sm:$0xf0] }
0x101d   : > { %v4410_v61 = vmul.f32 %v11756_v47, %v11756_v47 }
0x101f   : > { %4414 = vadd.xlane.f32.xlu2 %v4410_v61  ;;  %v8487_v61 = vor.u32 %v9804_v17, %v8484_v63 }
0x1021   : > { %4697 = vmatpush.bf16.msrb.mxu2 %v8487_v61  ;;  %v11831_v61 = vld [vmem:[%s10518_s24 + $0x1] ss:$0 sm:$0xff] }
0x104d   : > { %v4378_v29 = vpop.f32.mrf.mxu0 }
0x104e   : > { %v4384_v30 = vadd.f32 %v4378_v29, %v11482_v37  ;;  %v8555_v37 = vor.u32 %v9823_v49, %v8554_v3  ;;  %v8491_v29 = vor.u32 %v9807_v59, %v8490_v52  ;;  %v8467_v3 = vor.u32 %v9802_v6, %v8466_v7  ;;  %v8468_v49 = vld [vmem:[%s10528_s6 + $0x150] sm:$0xf0] }
0x104f   : > { %v8471_v41 = vor.u32 %v9800_v62, %v8468_v49 }
0x1050   : > { %v11761_v2 = vadd.f32 %v10127_v1, %v4384_v30  ;;  %4711 = vmatpush.bf16.msrb.mxu3 %v8555_v37  ;;  %v9810_v1 = vld [vmem:[%s10528_s6 + $0x18c] sm:$0xf0]  ;;  %v9805_v30 = vld [vmem:[%s10528_s6 + $0x16c] sm:$0xf]  ;;  %v9803_v37 = vld [vmem:[%s10528_s6 + $0x154] sm:$0xf0] }
0x1051   : > { %v8499_v21 = vor.u32 %v9810_v1, %v8498_v11  ;;  %v8475_v51 = vor.u32 %v9803_v37, %v8474_v36  ;;  %4698 = vmatpush.bf16.msrb.mxu2 %v8471_v41  ;;  %v8443_v1 = vor.u32 %v9795_v12, %v8442_v23  ;;  %v9830_v23 = vld [vmem:[%s12820_s1 + $0x130] sm:$0xff] }
0x1052   : > { %4401 = vadd.xlane.f32.xlu1 %v11761_v2  ;;  %v9838_v12 = vld [vmem:[%s12820_s1 + $0x170] sm:$0xff] }
0x1053   : > { %4678 = vmatpush.bf16.msrb.mxu1 %v8499_v21  ;;  %v8444_v21 = vld [vmem:[%s10528_s6 + $0x118] sm:$0xf0] }
0x1054   : > { %4712 = vmatpush.bf16.msrb.mxu3 %v8539_v0  ;;  %v8452_v0 = vld [vmem:[%s10528_s6 + $0x130] sm:$0xf0]  ;;  %v8447_v8 = vor.u32 %v9793_v19, %v8444_v21 }
0x1055   : > { %v4380_v35 = vpop.f32.mrf.mxu0  ;;  %v8455_v44 = vor.u32 %v9796_v4, %v8452_v0  ;;  %v9854_v19 = vld [vmem:[%s12820_s1 + $0x1f0] sm:$0xff] }
0x1056   : > { %v8492_v35 = vld [vmem:[%s10528_s6 + $0x178] sm:$0xf0] }
0x1057   : > { %4679 = vmatpush.bf16.msrb.mxu1 %v8483_v53  ;;  %v8495_v33 = vor.u32 %v9805_v30, %v8492_v35  ;;  %4699 = vmatpush.bf16.msrb.mxu2 %v8455_v44  ;;  %v9839_v44 = vld [vmem:[%s12820_s1 + $0x178] sm:$0xff] }
0x1058   : > { %4713 = vmatpush.bf16.msrb.mxu3 %v8523_v27  ;;  %v8436_v27 = vld [vmem:[%s10528_s6 + $0x110] sm:$0xf0] }
0x1059   : > { %4733 = vmatpush.bf16.msra.mxu0 %v8495_v33  ;;  %v8439_v11 = vor.u32 %v9792_v18, %v8436_v27  ;;  %v11835_v33 = vld [vmem:[%s10523_s30 + $0x1] ss:$0 sm:$0xff] }
0x105b   : > { %4680 = vmatpush.bf16.msrb.mxu1 %v8467_v3  ;;  %4700 = vmatpush.bf16.msrb.mxu2 %v8439_v11 }
0x105c   : > { %4714 = vmatpush.bf16.msrb.mxu3 %v8507_v43 }
0x105d   : > { %4734 = vmatpush.bf16.msra.mxu0 %v8479_v25 }
0x105f   : > { %4681 = vmatpush.bf16.msrb.mxu1 %v8451_v15  ;;  %5280 = vmatpush.bf16.msra.mxu2 %v9839_v44  ;;  %v9842_v44 = vld [vmem:[%s12820_s1 + $0x190] sm:$0xff] }
0x1060   : > { %4715 = vmatpush.bf16.msrb.mxu3 %v8491_v29 }
0x1061   : > { %4735 = vmatpush.bf16.msra.mxu0 %v8463_v55  ;;  %v9855_v55 = vld [vmem:[%s12820_s1 + $0x1f8] sm:$0xff] }
0x1063   : > { %4682 = vmatpush.bf16.msrb.mxu1 %v8435_v38  ;;  %5281 = vmatpush.bf16.msra.mxu2 %v9838_v12  ;;  %v9825_v12 = vld [vmem:[%s12820_s1 + $0x108] sm:$0xff] }
0x1064   : > { %4716 = vmatpush.bf16.msrb.mxu3 %v8475_v51 }
0x1065   : > { %4736 = vmatpush.bf16.msra.mxu0 %v8447_v8 }
0x1067   : > { %5264 = vmatpush.bf16.msra.mxu1 %v9831_v28 }
0x1068   : > { %4717 = vmatpush.bf16.msrb.mxu3 %v8459_v26  ;;  %v9847_v26 = vld [vmem:[%s12820_s1 + $0x1b8] sm:$0xff] }
0x1069   : > { %5312 = vmatpush.bf16.msrb.mxu0 %v9855_v55 }
0x106b   : > { %5265 = vmatpush.bf16.msra.mxu1 %v9830_v23 }
0x106c   : > { %4718 = vmatpush.bf16.msrb.mxu3 %v8443_v1 }
0x106d   : > { %5313 = vmatpush.bf16.msrb.mxu0 %v9854_v19  ;;  %v9841_v19 = vld [vmem:[%s12820_s1 + $0x188] sm:$0xff] }
0x1070   : > { %5296 = vmatpush.bf16.msra.mxu3 %v9847_v26 }
0x108a   : > { %v4413_v42 = vpop.xlane.xlu0 %4412 }
0x108b   : > { %v4418_v58 = vmul.f32 %v4413_v42, %v10731_v45 }
0x108d   : > { %v4421_v46 = vadd.f32 1e-05, %v4418_v58  ;;  %v8431_v58 = vld [vmem:[%s12819_s28 + $0x4] sm:$0xf] }
0x108e   : > { %v11849_v9 = vperm.slane %v8431_v58, 0  ;;  %v11851_v25 = vperm.slane %v8431_v58, 3  ;;  %v11867_v24 = vperm.slane %v8431_v58, 2 }
0x108f   : > { %10303 = vrsqrt.f32 %v4421_v46  ;;  %vm4430_vm9 = vweird.f32 %v4421_v46 }
0x1092   : > { %v4415_v16 = vpop.xlane.xlu2 %4414 }
0x1093   : > { %v4419_v20 = vmul.f32 %v4415_v16, %v10731_v45  ;;  %v9846_v16 = vld [vmem:[%s12820_s1 + $0x1b0] sm:$0xff] }
0x1094   : > { %5297 = vmatpush.bf16.msra.mxu3 %v9846_v16  ;;  %v9833_v16 = vld [vmem:[%s12820_s1 + $0x148] sm:$0xff] }
0x1095   : > { %v10304_v60 = vpop.eup %10303  ;;  %v4422_v10 = vadd.f32 1e-05, %v4419_v20 }
0x1096   : > { %v4425_v43 = vmul.f32 %v10304_v60, %v4421_v46  ;;  %vm4431_vm4 = vweird.f32 %v10304_v60 }
0x1097   : > { %10305 = vrsqrt.f32 %v4422_v10  ;;  %vm4432_vm10 = vmor %vm4430_vm9, %vm4431_vm4  ;;  %vm4440_vm12 = vweird.f32 %v4422_v10 }
0x1098   : > { %v4426_v48 = vmul.f32 %v10304_v60, %v4425_v43  ;;  %v9829_v43 = vld [vmem:[%s12820_s1 + $0x128] sm:$0xff] }
0x1099   : > { %5266 = vmatpush.bf16.msra.mxu1 %v9829_v43  ;;  %v9832_v43 = vld [vmem:[%s12820_s1 + $0x140] sm:$0xff] }
0x109a   : > { %v4427_v50 = vmul.f32 0.5, %v4426_v48  ;;  %v9837_v48 = vld [vmem:[%s12820_s1 + $0x168] sm:$0xff] }
0x109b   : > { %5282 = vmatpush.bf16.msra.mxu2 %v9837_v48 }
0x109c   : > { %v4428_v54 = vsub.f32 1.5, %v4427_v50 }
0x109d   : > { %v10306_v22 = vpop.eup %10305 }
0x109e   : > { %v4429_v34 = vmul.f32 %v10304_v60, %v4428_v54  ;;  %v4435_v17 = vmul.f32 %v10306_v22, %v4422_v10  ;;  %vm4441_vm11 = vweird.f32 %v10306_v22 }
0x109f   : > { %vm4442_vm7 = vmor %vm4440_vm12, %vm4441_vm11 }
0x10a0   : > { %v4436_v53 = vmul.f32 %v10306_v22, %v4435_v17  ;;  %v4433_v63 = vsel %vm4432_vm10, %v10304_v60, %v4429_v34  ;;  %v9853_v34 = vld [vmem:[%s12820_s1 + $0x1e8] sm:$0xff] }
0x10a1   : > { %v4454_v29 = vmul.f32 %v4433_v63, %v11751_v56  ;;  %5314 = vmatpush.bf16.msrb.mxu0 %v9853_v34 }
0x10a2   : > { %v4437_v52 = vmul.f32 0.5, %v4436_v53 }
0x10a3   : > { %v4460_v7 = vmul.f32 %v11831_v61, %v4454_v29  ;;  %v9828_v29 = vld [vmem:[%s12820_s1 + $0x120] sm:$0xff] }
0x10a4   : > { %v4438_v59 = vsub.f32 1.5, %v4437_v52  ;;  %5267 = vmatpush.bf16.msra.mxu1 %v9828_v29 }
0x10a5   : > { %v4466_v42 = vadd.f32 %v11835_v33, %v4460_v7  ;;  %v9844_v7 = vld [vmem:[%s12820_s1 + $0x1a0] sm:$0xff] }
0x10a6   : > { %v4439_v30 = vmul.f32 %v10306_v22, %v4438_v59 }
0x10a8   : > { %v4443_v35 = vsel %vm4442_vm7, %v10306_v22, %v4439_v30  ;;  %v9845_v22 = vld [vmem:[%s12820_s1 + $0x1a8] sm:$0xff]  ;;  %v9836_v30 = vld [vmem:[%s12820_s1 + $0x160] sm:$0xff] }
0x10a9   : > { %v4455_v6 = vmul.f32 %v4443_v35, %v11756_v47  ;;  %5298 = vmatpush.bf16.msra.mxu3 %v9845_v22  ;;  %5283 = vmatpush.bf16.msra.mxu2 %v9836_v30 }
0x10ab   : > { %v4461_v62 = vmul.f32 %v11831_v61, %v4455_v6  ;;  %v9852_v6 = vld [vmem:[%s12820_s1 + $0x1e0] sm:$0xff] }
0x10ac   : > { %5315 = vmatpush.bf16.msrb.mxu0 %v9852_v6 }
0x10ad   : > { %v4467_v3 = vadd.f32 %v11835_v33, %v4461_v62  ;;  %5299 = vmatpush.bf16.msra.mxu3 %v9844_v7 }
0x10af   : > { %v4469_v49 = vpack.c.bf16 %v4467_v3, %v4466_v42 }
0x10b1   : > { %4683 = vmatmul.bf16.vlgmr.msrb.gmra.mxu1 %v4469_v49  ;;  %4701 = vmatmul.bf16.vlgmr.msrb.gmra.mxu2 %v4469_v49 }
0x10b2   : > { %4719 = vmatmul.bf16.vlgmr.msrb.gmra.mxu3 %v4469_v49  ;;  %4737 = vmatmul.bf16.vlgmr.msra.gmra.mxu0 %v4469_v49 }
0x10c5   : > { %v4402_v56 = vpop.xlane.xlu1 %4401 }
0x10c6   : > { %v4405_v36 = vmul.f32 %v4402_v56, %v10731_v45 }
0x10c8   : > { %v11844_v37 = vsub.f32 %v11761_v2, %v4405_v36  ;;  %v11856_v2 = vperm.slane %v8431_v58, 1  ;;  %v9827_v36 = vld [vmem:[%s12820_s1 + $0x118] sm:$0xff] }
0x10c9   : > { %5268 = vmatpush.bf16.msra.mxu1 %v9827_v36 }
0x10ca   : > { %v4411_v47 = vmul.f32 %v11844_v37, %v11844_v37 }
0x10cc   : > { %4416 = vadd.xlane.f32.xlu2 %v4411_v47  ;;  %v9835_v47 = vld [vmem:[%s12820_s1 + $0x158] sm:$0xff] }
0x10cd   : > { %5284 = vmatpush.bf16.msra.mxu2 %v9835_v47 }
0x112e   : > { %v4684_v41 = vpop.f32.mrf.mxu1 }
0x112f   : > { %v4738_v5 = vpop.f32.mrf.mxu0  ;;  %v11854_v46 = vadd.f32 %v4684_v41, %v11849_v9  ;;  %v9843_v41 = vld [vmem:[%s12820_s1 + $0x198] sm:$0xff] }
0x1130   : > { %v11859_v13 = vadd.f32 %v4738_v5, %v11851_v25  ;;  %5300 = vmatpush.bf16.msra.mxu3 %v9843_v41 }
0x1131   : > { %v8560_v4 = vmul.f32 -1.702, %v11854_v46 }
0x1132   : > { %v8563_v31 = vmul.f32 -1.702, %v11859_v13 }
0x1133   : > { %v4771_v38 = vmul.f32 1.442695, %v8560_v4  ;;  %v9834_v4 = vld [vmem:[%s12820_s1 + $0x150] sm:$0xff] }
0x1134   : > { %v4702_v51 = vpop.f32.mrf.mxu2  ;;  %v4777_v20 = vmul.f32 1.442695, %v8563_v31  ;;  %5285 = vmatpush.bf16.msra.mxu2 %v9834_v4  ;;  %5301 = vmatpush.bf16.msra.mxu3 %v9842_v44 }
0x1135   : > { %v4720_v14 = vpop.f32.mrf.mxu3  ;;  %v11865_v32 = vadd.f32 %v4702_v51, %v11856_v2  ;;  %10307 = vpow2.f32 %v4771_v38  ;;  %v9851_v51 = vld [vmem:[%s12820_s1 + $0x1d8] sm:$0xff] }
0x1136   : > { %v4686_v15 = vpop.f32.mrf.mxu1  ;;  %v11886_v1 = vadd.f32 %v4720_v14, %v11867_v24  ;;  %10309 = vpow2.f32 %v4777_v20  ;;  %5316 = vmatpush.bf16.msrb.mxu0 %v9851_v51 }
0x1137   : > { %v4740_v57 = vpop.f32.mrf.mxu0  ;;  %v11872_v39 = vadd.f32 %v4686_v15, %v11849_v9  ;;  %v8561_v11 = vmul.f32 -1.702, %v11865_v32  ;;  %v9826_v15 = vld [vmem:[%s12820_s1 + $0x110] sm:$0xff] }
0x1138   : > { %v11879_v27 = vadd.f32 %v4740_v57, %v11851_v25  ;;  %v8562_v54 = vmul.f32 -1.702, %v11886_v1  ;;  %v9850_v57 = vld [vmem:[%s12820_s1 + $0x1d0] sm:$0xff]  ;;  %5269 = vmatpush.bf16.msra.mxu1 %v9826_v15  ;;  %5286 = vmatpush.bf16.msra.mxu2 %v9833_v16 }
0x1139   : > { %v8564_v21 = vmul.f32 -1.702, %v11872_v39  ;;  %v4773_v50 = vmul.f32 1.442695, %v8561_v11  ;;  %5302 = vmatpush.bf16.msra.mxu3 %v9841_v19 }
0x113a   : > { %v8567_v10 = vmul.f32 -1.702, %v11879_v27  ;;  %v4775_v35 = vmul.f32 1.442695, %v8562_v54  ;;  %5317 = vmatpush.bf16.msrb.mxu0 %v9850_v57  ;;  %v9848_v54 = vld [vmem:[%s12820_s1 + $0x1c0] sm:$0xff] }
0x113b   : > { %v4779_v17 = vmul.f32 1.442695, %v8564_v21  ;;  %10311 = vpow2.f32 %v4773_v50  ;;  %v10308_v62 = vpop.eup %10307  ;;  %v9849_v21 = vld [vmem:[%s12820_s1 + $0x1c8] sm:$0xff]  ;;  %v9840_v50 = vld [vmem:[%s12820_s1 + $0x180] sm:$0xff] }
0x113c   : > { %v4704_v0 = vpop.f32.mrf.mxu2  ;;  %v4785_v52 = vmul.f32 1.442695, %v8567_v10  ;;  %v10310_v49 = vpop.eup %10309  ;;  %v11906_v56 = vadd.f32 1.0, %v10308_v62  ;;  %5270 = vmatpush.bf16.msra.mxu1 %v9825_v12  ;;  %v9824_v10 = vld [vmem:[%s12820_s1 + $0x100] sm:$0xff]  ;;  %5287 = vmatpush.bf16.msra.mxu2 %v9832_v43  ;;  %s12888_s1 = sld [smem:[#allocation19_spill]] }
0x113d   : > { %v11876_v18 = vadd.f32 %v4704_v0, %v11856_v2  ;;  %v4722_v60 = vpop.f32.mrf.mxu3  ;;  %10313 = vpow2.f32 %v4779_v17  ;;  %v11916_v28 = vadd.f32 1.0, %v10310_v49  ;;  %5303 = vmatpush.bf16.msra.mxu3 %v9840_v50 }
0x113e   : > { %v11898_v53 = vadd.f32 %v4722_v60, %v11867_v24  ;;  %5318 = vmatpush.bf16.msrb.mxu0 %v9849_v21  ;;  %v4818_v29 = vand.u32 2147483648, %v11906_v56  ;;  %vm4812_vm1 = vweird.f32 %v11906_v56 }
0x113f   : > { %v8565_v8 = vmul.f32 -1.702, %v11876_v18  ;;  %v4417_v59 = vpop.xlane.xlu2 %4416  ;;  %v4861_v49 = vand.u32 2147483647, %v11916_v28  ;;  %v4863_v36 = vand.u32 2147483648, %v11916_v28  ;;  %vm4857_vm5 = vweird.f32 %v11916_v28 }
0x1140   : > { %v8566_v42 = vmul.f32 -1.702, %v11898_v53  ;;  %v4420_v3 = vmul.f32 %v4417_v59, %v10731_v45  ;;  %5271 = vmatpush.bf16.msra.mxu1 %v9824_v10  ;;  %v11972_v41 = vor.u32 1.1754944e-38, %v4818_v29 }
0x1141   : > { %v4781_v63 = vmul.f32 1.442695, %v8565_v8  ;;  %v10312_v5 = vpop.eup %10311 }
0x1142   : > { %v4783_v58 = vmul.f32 1.442695, %v8566_v42  ;;  %v11912_v14 = vadd.f32 1e-05, %v4420_v3  ;;  %v11921_v31 = vadd.f32 1.0, %v10312_v5  ;;  %5319 = vmatpush.bf16.msrb.mxu0 %v9848_v54 }
0x1143   : > { %10315 = vpow2.f32 %v4781_v63  ;;  %v10314_v0 = vpop.eup %10313  ;;  %v4816_v3 = vand.u32 2147483647, %v11906_v56 }
0x1144   : > { %10317 = vpow2.f32 %v4785_v52  ;;  %v11923_v23 = vadd.f32 1.0, %v10314_v0  ;;  %v4833_v4 = vand.u32 2147483648, %v11921_v31  ;;  %vm4450_vm14 = vweird.f32 %v11912_v14 }
0x1145   : > { %10319 = vpow2.f32 %v4775_v35  ;;  %v4831_v16 = vand.u32 2147483647, %v11921_v31  ;;  %vm4827_vm8 = vweird.f32 %v11921_v31 }
0x1146   : > { %10321 = vrcp.f32 %v11906_v56  ;;  %v11999_v10 = vor.u32 1.1754944e-38, %v4833_v4  ;;  %vm4872_vm2 = vweird.f32 %v11923_v23 }
0x1147   : > { %10323 = vpow2.f32 %v4783_v58 }
0x1148   : > { %10325 = vrsqrt.f32 %v11912_v14 }
0x1149   : > { %v10316_v26 = vpop.eup %10315  ;;  %10327 = vrcp.f32 %v11916_v28 }
0x114a   : > { %v10318_v55 = vpop.eup %10317  ;;  %v11929_v11 = vadd.f32 1.0, %v10316_v26  ;;  %10329 = vrcp.f32 %v11921_v31 }
0x114b   : > { %v10320_v38 = vpop.eup %10319  ;;  %v11933_v20 = vadd.f32 1.0, %v10318_v55  ;;  %10331 = vrcp.f32 %v11923_v23 }
0x114c   : > { %v11936_v8 = vadd.f32 1.0, %v10320_v38  ;;  %v11938_v60 = vpop.eup %10321  ;;  %10333 = vrcp.f32 %v11929_v11  ;;  %v11988_v38 = vor.u32 1.1754944e-38, %v4863_v36 }
0x114d   : > { %v10324_v48 = vpop.eup %10323  ;;  %10335 = vrcp.f32 %v11933_v20  ;;  %v4808_v59 = vmul.f32 %v11938_v60, %v11906_v56  ;;  %vm4813_vm15 = vweird.f32 %v11938_v60  ;;  %vm4917_vm7 = vweird.f32 %v11933_v20 }
0x114e   : > { %v10326_v22 = vpop.eup %10325  ;;  %v11947_v34 = vadd.f32 1.0, %v10324_v48  ;;  %10337 = vrcp.f32 %v11936_v8  ;;  %vm4842_vm4 = vweird.f32 %v11936_v8  ;;  %vm12034_vm12 = vmor %vm4812_vm1, %vm4813_vm15 }
0x114f   : > { %v11949_v17 = vpop.eup %10327  ;;  %v4445_v63 = vmul.f32 %v10326_v22, %v11912_v14  ;;  %v4809_v58 = vsub.f32 1.0, %v4808_v59  ;;  %vm4451_vm13 = vweird.f32 %v10326_v22 }
0x1150   : > { %10339 = vrcp.f32 %v11947_v34  ;;  %v11954_v52 = vpop.eup %10329  ;;  %v4853_v7 = vmul.f32 %v11949_v17, %v11916_v28  ;;  %vm4452_vm3 = vmor %vm4450_vm14, %vm4451_vm13  ;;  %vm4858_vm6 = vweird.f32 %v11949_v17  ;;  %vm12042_vm14 = vcmp.eq.f32.partialorder %v4816_v3, 8.507059e+37 }
0x1151   : > { %v4446_v30 = vmul.f32 %v10326_v22, %v4445_v63  ;;  %v11959_v35 = vpop.eup %10331  ;;  %v4823_v12 = vmul.f32 %v11954_v52, %v11921_v31  ;;  %v4810_v19 = vmul.f32 %v11938_v60, %v4809_v58  ;;  %v4846_v63 = vand.u32 2147483647, %v11936_v8  ;;  %vm12050_vm1 = vmor %vm4857_vm5, %vm4858_vm6 }
0x1152   : > { %v11963_v6 = vpop.eup %10333  ;;  %v4854_v15 = vsub.f32 1.0, %v4853_v7  ;;  %v4868_v0 = vmul.f32 %v11959_v35, %v11923_v23  ;;  %v4848_v7 = vand.u32 2147483648, %v11936_v8  ;;  %vm4828_vm0 = vweird.f32 %v11954_v52 }
0x1153   : > { %v4447_v62 = vmul.f32 0.5, %v4446_v30  ;;  %v11965_v42 = vpop.eup %10335  ;;  %v4883_v44 = vmul.f32 %v11963_v6, %v11929_v11  ;;  %v4824_v30 = vsub.f32 1.0, %v4823_v12  ;;  %vm4873_vm10 = vweird.f32 %v11959_v35 }
0x1154   : > { %v11970_v47 = vpop.eup %10337  ;;  %v4913_v57 = vmul.f32 %v11965_v42, %v11933_v20  ;;  %v4869_v43 = vsub.f32 1.0, %v4868_v0  ;;  %v4855_v54 = vmul.f32 %v11949_v17, %v4854_v15  ;;  %vm4918_vm13 = vweird.f32 %v11965_v42 }
0x1155   : > { %v4448_v51 = vsub.f32 1.5, %v4447_v62  ;;  %v4838_v14 = vmul.f32 %v11970_v47, %v11936_v8  ;;  %v4884_v48 = vsub.f32 1.0, %v4883_v44  ;;  %v4876_v62 = vand.u32 2147483647, %v11923_v23  ;;  %vm12075_vm6 = vmor %vm4917_vm7, %vm4918_vm13 }
0x1156   : > { %v11974_v5 = vpop.eup %10339  ;;  %v4914_v59 = vsub.f32 1.0, %v4913_v57  ;;  %vm4843_vm9 = vweird.f32 %v11970_v47  ;;  %v4825_v57 = vmul.f32 %v11954_v52, %v4824_v30  ;;  %vm4888_vm15 = vweird.f32 %v11963_v6  ;;  %vm12115_vm13 = vmor %vm4827_vm8, %vm4828_vm0 }
0x1157   : > { %v4898_v26 = vmul.f32 %v11974_v5, %v11947_v34  ;;  %v4449_v55 = vmul.f32 %v10326_v22, %v4448_v51  ;;  %v4839_v58 = vsub.f32 1.0, %v4838_v14  ;;  %v4870_v51 = vmul.f32 %v11959_v35, %v4869_v43  ;;  %vm12132_vm8 = vmor %vm4842_vm4, %vm4843_vm9 }
0x1158   : > { %v4885_v15 = vmul.f32 %v11963_v6, %v4884_v48  ;;  %v4915_v0 = vmul.f32 %v11965_v42, %v4914_v59  ;;  %vm12026_vm11 = vcmp.eq.f32.partialorder %v4876_v62, 8.507059e+37  ;;  %v4923_v43 = vand.u32 2147483648, %v11933_v20 }
0x1159   : > { %v4453_v21 = vsel %vm4452_vm3, %v10326_v22, %v4449_v55  ;;  %v4899_v29 = vsub.f32 1.0, %v4898_v26  ;;  %v12008_v22 = vadd.f32 %v11938_v60, %v4810_v19  ;;  %v4840_v12 = vmul.f32 %v11970_v47, %v4839_v58  ;;  %vm12062_vm3 = vmor %vm4872_vm2, %vm4873_vm10 }
0x115a   : > { %v4456_v50 = vmul.f32 %v4453_v21, %v11844_v37  ;;  %v4878_v37 = vand.u32 2147483648, %v11923_v23  ;;  %v4921_v19 = vand.u32 2147483647, %v11933_v20  ;;  %v4871_v21 = vadd.f32 %v11959_v35, %v4870_v51 }
0x115b   : > { %v4900_v44 = vmul.f32 %v11974_v5, %v4899_v29  ;;  %v4886_v48 = vadd.f32 %v11963_v6, %v4885_v15  ;;  %vm4903_vm5 = vweird.f32 %v11974_v5  ;;  %v4826_v29 = vadd.f32 %v11954_v52, %v4825_v57 }
0x115c   : > { %v4462_v36 = vmul.f32 %v11831_v61, %v4456_v50  ;;  %v12018_v61 = vadd.f32 %v11949_v17, %v4855_v54  ;;  %v4916_v50 = vadd.f32 %v11965_v42, %v4915_v0  ;;  %v4893_v54 = vand.u32 2147483648, %v11929_v11 }
0x115d   : > { %v4901_v59 = vadd.f32 %v11974_v5, %v4900_v44  ;;  %vm4887_vm2 = vweird.f32 %v11929_v11  ;;  %v4891_v30 = vand.u32 2147483647, %v11929_v11  ;;  %v4908_v62 = vand.u32 2147483648, %v11947_v34 }
0x115e   : > { %v4468_v4 = vadd.f32 %v11835_v33, %v4462_v36  ;;  %v4815_v36 = vsel %vm12034_vm12, %v11938_v60, %v12008_v22  ;;  %v4841_v58 = vadd.f32 %v11970_v47, %v4840_v12  ;;  %vm12089_vm10 = vmor %vm4887_vm2, %vm4888_vm15  ;;  %vm4902_vm7 = vweird.f32 %v11947_v34 }
0x115f   : > { %v4906_v51 = vand.u32 2147483647, %v11947_v34  ;;  %v4860_v11 = vsel %vm12050_vm1, %v11949_v17, %v12018_v61  ;;  %v4875_v60 = vsel %vm12062_vm3, %v11959_v35, %v4871_v21  ;;  %v4879_v22 = vor.u32 1.1754944e-38, %v4878_v37  ;;  %vm12107_vm12 = vmor %vm4902_vm7, %vm4903_vm5 }
0x1160   : > { %v4470_v33 = vpack.c.bf16 %v4468_v4, %v4468_v4  ;;  %v4890_v15 = vsel %vm12089_vm10, %v11963_v6, %v4886_v48  ;;  %v4920_v17 = vsel %vm12075_vm6, %v11965_v42, %v4916_v50  ;;  %vm4922_vm1 = vcmp.eq.f32.partialorder %v4921_v19, 8.507059e+37 }
0x1161   : > { %v4894_v35 = vor.u32 1.1754944e-38, %v4893_v54  ;;  %v4905_v6 = vsel %vm12107_vm12, %v11974_v5, %v4901_v59  ;;  %v4830_v37 = vsel %vm12115_vm13, %v11954_v52, %v4826_v29  ;;  %v4924_v0 = vor.u32 1.1754944e-38, %v4923_v43 }
0x1162   : > { %4688 = vmatmul.bf16.gmra.mxu1 %v4470_v33  ;;  %4706 = vmatmul.bf16.gmra.mxu2 %v4470_v33  ;;  %vm4892_vm0 = vcmp.eq.f32.partialorder %v4891_v30, 8.507059e+37  ;;  %v4909_v42 = vor.u32 1.1754944e-38, %v4908_v62  ;;  %v4845_v44 = vsel %vm12132_vm8, %v11970_v47, %v4841_v58  ;;  %v4880_v5 = vsel %vm12026_vm11, %v4879_v22, %v4875_v60 }
0x1163   : > { %4724 = vmatmul.bf16.gmra.mxu3 %v4470_v33  ;;  %4742 = vmatmul.bf16.gmra.mxu0 %v4470_v33  ;;  %v4895_v57 = vsel %vm4892_vm0, %v4894_v35, %v4890_v15  ;;  %vm4907_vm15 = vcmp.eq.f32.partialorder %v4906_v51, 8.507059e+37  ;;  %vm4832_vm3 = vcmp.eq.f32.partialorder %v4831_v16, 8.507059e+37  ;;  %v4849_v52 = vor.u32 1.1754944e-38, %v4848_v7 }
0x1164   : > { %v4925_v33 = vsel %vm4922_vm1, %v4924_v0, %v4920_v17  ;;  %v4910_v55 = vsel %vm4907_vm15, %v4909_v42, %v4905_v6  ;;  %v4820_v12 = vsel %vm12042_vm14, %v11972_v41, %v4815_v36  ;;  %vm4862_vm4 = vcmp.eq.f32.partialorder %v4861_v49, 8.507059e+37 }
0x1165   : > { %v4835_v47 = vsel %vm4832_vm3, %v11999_v10, %v4830_v37  ;;  %vm4847_vm9 = vcmp.eq.f32.partialorder %v4846_v63, 8.507059e+37  ;;  %v4865_v31 = vsel %vm4862_vm4, %v11988_v38, %v4860_v11  ;;  %v4991_v26 = vmul.f32 %v4880_v5, %v11872_v39 }
0x1166   : > { %v4850_v16 = vsel %vm4847_vm9, %v4849_v52, %v4845_v44  ;;  %v4992_v7 = vmul.f32 %v4895_v57, %v11876_v18  ;;  %v4994_v19 = vmul.f32 %v4925_v33, %v11879_v27  ;;  %v4993_v14 = vmul.f32 %v4910_v55, %v11898_v53 }
0x1167   : > { %v4987_v41 = vmul.f32 %v4820_v12, %v11854_v46  ;;  %v4988_v28 = vmul.f32 %v4835_v47, %v11865_v32  ;;  %v4990_v49 = vmul.f32 %v4865_v31, %v11859_v13  ;;  %v4989_v8 = vmul.f32 %v4850_v16, %v11886_v1  ;;  %v9858_v12 = vld [vmem:[%s12876_s7 + $0x10] sm:$0xff] }
0x1169   : > { %v4999_v10 = vpack.c.bf16 %v4991_v26, %v4987_v41  ;;  %v5000_v63 = vpack.c.bf16 %v4992_v7, %v4988_v28  ;;  %v5002_v38 = vpack.c.bf16 %v4994_v19, %v4990_v49  ;;  %v5001_v56 = vpack.c.bf16 %v4993_v14, %v4989_v8  ;;  %v10130_v8 = vld [vmem:[%s12845_s2 + $0x1] ss:$0 sm:$0xff]  ;;  %s12889_s2 = sld [smem:[#allocation20_spill]] }
0x1172   : > { %5272 = vmatmul.bf16.vlgmr.msra.gmra.mxu1 %v4999_v10  ;;  %5288 = vmatmul.bf16.vlgmr.msra.gmra.mxu2 %v5000_v63 }
0x1173   : > { %5304 = vmatmul.bf16.vlgmr.msra.gmra.mxu3 %v5001_v56  ;;  %5320 = vmatmul.bf16.vlgmr.msrb.gmra.mxu0 %v5002_v38 }
0x11df   : > { %v4689_v39 = vpop.f32.mrf.mxu1 }
0x11e0   : > { %v12163_v18 = vadd.f32 %v4689_v39, %v11849_v9  ;;  %v4743_v27 = vpop.f32.mrf.mxu0 }
0x11e1   : > { %v12166_v46 = vadd.f32 %v4743_v27, %v11851_v25 }
0x11e2   : > { %v8568_v13 = vmul.f32 -1.702, %v12163_v18 }
0x11e3   : > { %v8571_v32 = vmul.f32 -1.702, %v12166_v46 }
0x11e4   : > { %v4787_v1 = vmul.f32 1.442695, %v8568_v13 }
0x11e5   : > { %v4793_v53 = vmul.f32 1.442695, %v8571_v32  ;;  %v4707_v21 = vpop.f32.mrf.mxu2 }
0x11e6   : > { %10341 = vpow2.f32 %v4787_v1  ;;  %v12171_v43 = vadd.f32 %v4707_v21, %v11856_v2  ;;  %v4725_v48 = vpop.f32.mrf.mxu3 }
0x11e7   : > { %10343 = vpow2.f32 %v4793_v53  ;;  %v12174_v9 = vadd.f32 %v4725_v48, %v11867_v24  ;;  %v4691_v3 = vpop.f32.mrf.mxu1 }
0x11e8   : > { %v8569_v25 = vmul.f32 -1.702, %v12171_v43  ;;  %v4745_v50 = vpop.f32.mrf.mxu0 }
0x11e9   : > { %v8570_v54 = vmul.f32 -1.702, %v12174_v9 }
0x11ea   : > { %v4789_v59 = vmul.f32 1.442695, %v8569_v25 }
0x11eb   : > { %v4791_v29 = vmul.f32 1.442695, %v8570_v54 }
0x11ec   : > { %v10342_v23 = vpop.eup %10341  ;;  %10345 = vpow2.f32 %v4789_v59 }
0x11ed   : > { %v10344_v30 = vpop.eup %10343  ;;  %v4803_v62 = vadd.f32 1.0, %v10342_v23  ;;  %10347 = vpow2.f32 %v4791_v29  ;;  %v4709_v2 = vpop.f32.mrf.mxu2 }
0x11ee   : > { %v4806_v36 = vadd.f32 1.0, %v10344_v30  ;;  %v4727_v58 = vpop.f32.mrf.mxu3 }
0x11ef   : > { %10349 = vrcp.f32 %v4803_v62  ;;  %v5273_v20 = vpop.f32.mrf.mxu1  ;;  %v4936_v35 = vand.u32 2147483647, %v4803_v62  ;;  %v4938_v37 = vand.u32 2147483648, %v4803_v62  ;;  %vm4932_vm11 = vweird.f32 %v4803_v62 }
0x11f0   : > { %10351 = vrcp.f32 %v4806_v36  ;;  %v5321_v24 = vpop.f32.mrf.mxu0  ;;  %v4981_v0 = vand.u32 2147483647, %v4806_v36  ;;  %v4983_v5 = vand.u32 2147483648, %v4806_v36  ;;  %vm4977_vm14 = vweird.f32 %v4806_v36 }
0x11f1   : > { %vm12184_vm6 = vcmp.eq.f32.partialorder %v4936_v35, 8.507059e+37  ;;  %v4939_v16 = vor.u32 1.1754944e-38, %v4938_v37 }
0x11f2   : > { %v10346_v51 = vpop.eup %10345  ;;  %vm12188_vm10 = vcmp.eq.f32.partialorder %v4981_v0, 8.507059e+37  ;;  %v4984_v41 = vor.u32 1.1754944e-38, %v4983_v5 }
0x11f3   : > { %v10348_v11 = vpop.eup %10347  ;;  %v12178_v60 = vadd.f32 1.0, %v10346_v51 }
0x11f4   : > { %v12180_v22 = vadd.f32 1.0, %v10348_v11 }
0x11f5   : > { %v10350_v15 = vpop.eup %10349  ;;  %10353 = vrcp.f32 %v12178_v60  ;;  %v5289_v4 = vpop.f32.mrf.mxu2  ;;  %v4951_v63 = vand.u32 2147483647, %v12178_v60  ;;  %v4953_v38 = vand.u32 2147483648, %v12178_v60  ;;  %vm4947_vm8 = vweird.f32 %v12178_v60 }
0x11f6   : > { %v10352_v34 = vpop.eup %10351  ;;  %v4928_v17 = vmul.f32 %v10350_v15, %v4803_v62  ;;  %10355 = vrcp.f32 %v12180_v22  ;;  %v5305_v6 = vpop.f32.mrf.mxu3  ;;  %v5290_v57 = vadd.f32 %v5289_v4, %v5273_v20  ;;  %vm4933_vm5 = vweird.f32 %v10350_v15 }
0x11f7   : > { %v4973_v61 = vmul.f32 %v10352_v34, %v4806_v36  ;;  %v5275_v42 = vpop.f32.mrf.mxu1  ;;  %vm4978_vm2 = vweird.f32 %v10352_v34  ;;  %vm4934_vm7 = vmor %vm4932_vm11, %vm4933_vm5  ;;  %v4968_v32 = vand.u32 2147483648, %v12180_v22  ;;  %v4966_v30 = vand.u32 2147483647, %v12180_v22 }
0x11f8   : > { %v4929_v44 = vsub.f32 1.0, %v4928_v17  ;;  %v5323_v52 = vpop.f32.mrf.mxu0  ;;  %v5306_v47 = vadd.f32 %v5305_v6, %v5290_v57  ;;  %vm4979_vm12 = vmor %vm4977_vm14, %vm4978_vm2  ;;  %vm4962_vm15 = vweird.f32 %v12180_v22  ;;  %vm4952_vm3 = vcmp.eq.f32.partialorder %v4951_v63, 8.507059e+37  ;;  %v9863_v17 = vld [vmem:[%s12876_s7 + $0x38] sm:$0xff]  ;;  %v9862_v57 = vld [vmem:[%s12876_s7 + $0x30] sm:$0xff] }
0x11f9   : > { %v4974_v33 = vsub.f32 1.0, %v4973_v61  ;;  %vm4967_vm9 = vcmp.eq.f32.partialorder %v4966_v30, 8.507059e+37  ;;  %5430 = vmatpush.bf16.msrb.mxu1 %v9863_v17  ;;  %v9861_v52 = vld [vmem:[%s12876_s7 + $0x28] sm:$0xff]  ;;  %v9870_v30 = vld [vmem:[%s12879_s0 + $0xa0] sm:$0xf0] }
0x11fa   : > { %v4930_v55 = vmul.f32 %v10350_v15, %v4929_v44  ;;  %v5322_v49 = vadd.f32 %v5321_v24, %v5306_v47  ;;  %v9857_v47 = vld [vmem:[%s12876_s7 + $0x8] sm:$0xff] }
0x11fb   : > { %v10354_v31 = vpop.eup %10353  ;;  %v4975_v26 = vmul.f32 %v10352_v34, %v4974_v33  ;;  %v9860_v33 = vld [vmem:[%s12876_s7 + $0x20] sm:$0xff]  ;;  %v8799_v17 = vld [vmem:[%s12879_s0 + $0x8] sm:$0xf] }
0x11fc   : > { %v10356_v19 = vpop.eup %10355  ;;  %v4931_v14 = vadd.f32 %v10350_v15, %v4930_v55  ;;  %v4943_v28 = vmul.f32 %v10354_v31, %v12178_v60  ;;  %v5328_v53 = vadd.f32 %v5322_v49, %v11741_v40  ;;  %vm4948_vm13 = vweird.f32 %v10354_v31  ;;  %v9859_v55 = vld [vmem:[%s12876_s7 + $0x18] sm:$0xff] }
0x11fd   : > { %v4976_v10 = vadd.f32 %v10352_v34, %v4975_v26  ;;  %v4958_v56 = vmul.f32 %v10356_v19, %v12180_v22  ;;  %v5291_v39 = vpop.f32.mrf.mxu2  ;;  %vm4963_vm1 = vweird.f32 %v10356_v19  ;;  %vm4949_vm0 = vmor %vm4947_vm8, %vm4948_vm13  ;;  %5431 = vmatpush.bf16.msrb.mxu1 %v9862_v57 }
0x11fe   : > { %v4935_v27 = vsel %vm4934_vm7, %v10350_v15, %v4931_v14  ;;  %v4944_v13 = vsub.f32 1.0, %v4943_v28  ;;  %v5307_v1 = vpop.f32.mrf.mxu3  ;;  %v5334_v59 = vadd.f32 %v10130_v8, %v5328_v53  ;;  %vm4964_vm4 = vmor %vm4962_vm15, %vm4963_vm1 }
0x11ff   : > { %v4940_v21 = vsel %vm12184_vm6, %v4939_v16, %v4935_v27  ;;  %v4980_v48 = vsel %vm4979_vm12, %v10352_v34, %v4976_v10  ;;  %v4959_v3 = vsub.f32 1.0, %v4958_v56  ;;  %v10131_v10 = vld [vmem:[%s12877_s10] ss:$0 sm:$0xff]  ;;  %vm5445_vm6 = vcmask 1040384   ;;  %s12884_s10 = sld [smem:[#allocation15_spill]] }
0x1200   : > { %v4995_v25 = vmul.f32 %v4940_v21, %v12163_v18  ;;  %v4985_v50 = vsel %vm12188_vm10, %v4984_v41, %v4980_v48  ;;  %v4945_v54 = vmul.f32 %v10354_v31, %v4944_v13  ;;  %5337 = vadd.xlane.f32.xlu0 %v5334_v59  ;;  %v4954_v18 = vor.u32 1.1754944e-38, %v4953_v38  ;;  %v10132_v56 = vld [vmem:[%s12878_s11] ss:$0 sm:$0xff]  ;;  %v8827_v21 = vld [vmem:[%s12879_s0 + $0xb0] sm:$0xf]  ;;  %s12885_s11 = sld [smem:[#allocation18_spill]] }
0x1201   : > { %v4998_v29 = vmul.f32 %v4985_v50, %v12166_v46  ;;  %v4960_v23 = vmul.f32 %v10356_v19, %v4959_v3  ;;  %v4969_v46 = vor.u32 1.1754944e-38, %v4968_v32  ;;  %5432 = vmatpush.bf16.msrb.mxu1 %v9861_v52  ;;  %v9871_v48 = vld [vmem:[%s12879_s0 + $0xb8] sm:$0xf0] }
0x1202   : > { %v5003_v40 = vpack.c.bf16 %v4995_v25, %v4995_v25  ;;  %v4946_v62 = vadd.f32 %v10354_v31, %v4945_v54  ;;  %v8828_v3 = vor.u32 %v9871_v48, %v8827_v21  ;;  %v9875_v52 = vld [vmem:[%s12880_s18 + $0x18] sm:$0xff] }
0x1203   : > { %v5006_v2 = vpack.c.bf16 %v4998_v29, %v4998_v29  ;;  %v4961_v36 = vadd.f32 %v10356_v19, %v4960_v23  ;;  %v8823_v23 = vld [vmem:[%s12879_s0 + $0x98] sm:$0xf] }
0x1204   : > { %v4950_v58 = vsel %vm4949_vm0, %v10354_v31, %v4946_v62  ;;  %5276 = vmatmul.bf16.gmra.mxu1 %v5003_v40  ;;  %v9856_v31 = vld [vmem:[%s12876_s7] sm:$0xff]  ;;  %5539 = vmatpush.bf16.msrb.mxu2 %v8828_v3  ;;  %v8824_v40 = vor.u32 %v9870_v30, %v8823_v23 }
0x1205   : > { %v4955_v20 = vsel %vm4952_vm3, %v4954_v18, %v4950_v58  ;;  %v4965_v24 = vsel %vm4964_vm4, %v10356_v19, %v4961_v36  ;;  %5324 = vmatmul.bf16.gmra.mxu0 %v5006_v2  ;;  %5433 = vmatpush.bf16.msrb.mxu1 %v9860_v33  ;;  %v8819_v62 = vld [vmem:[%s12879_s0 + $0x80] sm:$0xf]  ;;  %v9869_v2 = vld [vmem:[%s12879_s0 + $0x88] sm:$0xf0]  ;;  %v8815_v36 = vld [vmem:[%s12879_s0 + $0x68] sm:$0xf] }
0x1206   : > { %v4996_v51 = vmul.f32 %v4955_v20, %v12171_v43  ;;  %v4970_v11 = vsel %vm4967_vm9, %v4969_v46, %v4965_v24  ;;  %v8820_v18 = vor.u32 %v9869_v2, %v8819_v62  ;;  %v9868_v58 = vld [vmem:[%s12879_s0 + $0x70] sm:$0xf0]  ;;  %v8811_v20 = vld [vmem:[%s12879_s0 + $0x50] sm:$0xf]  ;;  %v9867_v24 = vld [vmem:[%s12879_s0 + $0x58] sm:$0xf0] }
0x1207   : > { %v4997_v60 = vmul.f32 %v4970_v11, %v12174_v9  ;;  %v8816_v46 = vor.u32 %v9868_v58, %v8815_v36  ;;  %v8807_v11 = vld [vmem:[%s12879_s0 + $0x38] sm:$0xf]  ;;  %v8975_v3 = vld [vmem:[%s12885_s11 + $0xe0] sm:$0xf]  ;;  %v9909_v62 = vld [vmem:[%s12885_s11 + $0xec] sm:$0xf] }
0x1208   : > { %v5004_v15 = vpack.c.bf16 %v4996_v51, %v4996_v51  ;;  %5540 = vmatpush.bf16.msrb.mxu2 %v8824_v40  ;;  %v8812_v51 = vor.u32 %v9867_v24, %v8811_v20  ;;  %v9911_v23 = vld [vmem:[%s12885_s11 + $0xf4] sm:$0xf0]  ;;  %v8985_v2 = vld [vmem:[%s12885_s11 + $0xf8] sm:$0xf0] }
0x1209   : > { %v5005_v4 = vpack.c.bf16 %v4997_v60, %v4997_v60  ;;  %5434 = vmatpush.bf16.msrb.mxu1 %v9859_v55  ;;  %v9866_v60 = vld [vmem:[%s12879_s0 + $0x40] sm:$0xf0] }
0x120a   : > { %5292 = vmatmul.bf16.gmra.mxu2 %v5004_v15  ;;  %v8808_v15 = vor.u32 %v9866_v60, %v8807_v11  ;;  %v9906_v11 = vld [vmem:[%s12885_s11 + $0xcc] sm:$0xf0]  ;;  %v9904_v60 = vld [vmem:[%s12885_s11 + $0xc4] sm:$0xf] }
0x120b   : > { %5308 = vmatmul.bf16.gmra.mxu3 %v5005_v4  ;;  %v8803_v4 = vld [vmem:[%s12879_s0 + $0x20] sm:$0xf] }
0x120c   : > { %5541 = vmatpush.bf16.msrb.mxu2 %v8820_v18  ;;  %v8988_v18 = vor.u32 %v9909_v62, %v8985_v2 }
0x120d   : > { %5435 = vmatpush.bf16.msrb.mxu1 %v9858_v12  ;;  %v9874_v12 = vld [vmem:[%s12880_s18 + $0x10] sm:$0xff] }
0x1210   : > { %5542 = vmatpush.bf16.msrb.mxu2 %v8816_v46 }
0x1211   : > { %5436 = vmatpush.bf16.msrb.mxu1 %v9857_v47 }
0x1214   : > { %5543 = vmatpush.bf16.msrb.mxu2 %v8812_v51  ;;  %v8959_v51 = vld [vmem:[%s12885_s11 + $0xc0] sm:$0xf] }
0x1215   : > { %5437 = vmatpush.bf16.msrb.mxu1 %v9856_v31 }
0x1218   : > { %5544 = vmatpush.bf16.msrb.mxu2 %v8808_v15  ;;  %v8960_v15 = vor.u32 %v9906_v11, %v8959_v51  ;;  %v9884_v51 = vld [vmem:[%s12885_s11 + $0x24] sm:$0xf] }
0x1273   : > { %v5338_v22 = vpop.xlane.xlu0 %5337 }
0x1274   : > { %v5339_v34 = vmul.f32 %v5338_v22, %v10731_v45  ;;  %v9865_v22 = vld [vmem:[%s12879_s0 + $0x28] sm:$0xf0] }
0x1276   : > { %v5340_v35 = vsub.f32 %v5334_v59, %v5339_v34  ;;  %v8804_v34 = vor.u32 %v9865_v22, %v8803_v4  ;;  %v8961_v4 = vld [vmem:[%s12885_s11 + $0xd0] sm:$0xf0]  ;;  %v8967_v22 = vld [vmem:[%s12885_s11 + $0xc8] sm:$0xf] }
0x1278   : > { %v5341_v6 = vmul.f32 %v5340_v35, %v5340_v35  ;;  %5545 = vmatpush.bf16.msrb.mxu2 %v8804_v34  ;;  %v9907_v34 = vld [vmem:[%s12885_s11 + $0xd4] sm:$0xf0] }
0x127a   : > { %5342 = vadd.xlane.f32.xlu1 %v5341_v6 }
0x1281   : > { %v5277_v43 = vpop.f32.mrf.mxu1 }
0x1282   : > { %v5325_v37 = vpop.f32.mrf.mxu0  ;;  %v9879_v43 = vld [vmem:[%s12880_s18 + $0x38] sm:$0xff] }
0x1283   : > { %5618 = vmatpush.bf16.msrb.mxu3 %v9879_v43  ;;  %v8969_v43 = vld [vmem:[%s12885_s11 + $0xd8] sm:$0xf0] }
0x1289   : > { %v5278_v9 = vpop.f32.mrf.mxu1 }
0x128a   : > { %v5326_v61 = vpop.f32.mrf.mxu0 }
0x128b   : > { %v9878_v61 = vld [vmem:[%s12880_s18 + $0x30] sm:$0xff] }
0x128c   : > { %5619 = vmatpush.bf16.msrb.mxu3 %v9878_v61  ;;  %v9902_v61 = vld [vmem:[%s12885_s11 + $0xac] sm:$0xf0] }
0x128d   : > { %v5293_v0 = vpop.f32.mrf.mxu2 }
0x128e   : > { %v5309_v42 = vpop.f32.mrf.mxu3 }
0x128f   : > { %v9877_v42 = vld [vmem:[%s12880_s18 + $0x28] sm:$0xff] }
0x1290   : > { %5620 = vmatpush.bf16.msrb.mxu3 %v9877_v42 }
0x1295   : > { %v5294_v44 = vpop.f32.mrf.mxu2 }
0x1296   : > { %v5310_v5 = vpop.f32.mrf.mxu3  ;;  %v9876_v44 = vld [vmem:[%s12880_s18 + $0x20] sm:$0xff] }
0x1297   : > { %5621 = vmatpush.bf16.msrb.mxu3 %v9876_v44  ;;  %v8945_v44 = vld [vmem:[%s12885_s11 + $0xb0] sm:$0xf0] }
0x129b   : > { %5622 = vmatpush.bf16.msrb.mxu3 %v9875_v52 }
0x129f   : > { %5623 = vmatpush.bf16.msrb.mxu3 %v9874_v12  ;;  %v8953_v12 = vld [vmem:[%s12885_s11 + $0xb8] sm:$0xf0] }
0x12ed   : > { %v5343_v16 = vpop.xlane.xlu1 %5342 }
0x12ee   : > { %v5344_v26 = vmul.f32 %v5343_v16, %v10731_v45  ;;  %v9873_v16 = vld [vmem:[%s12880_s18 + $0x8] sm:$0xff] }
0x12ef   : > { %5624 = vmatpush.bf16.msrb.mxu3 %v9873_v16  ;;  %v9898_v16 = vld [vmem:[%s12885_s11 + $0x8c] sm:$0xf0] }
0x12f0   : > { %v5345_v7 = vadd.f32 1e-05, %v5344_v26  ;;  %v5443_v26 = vld [vmem:[%s12881_s22] sm:$0x1]  ;;  %s12886_s22 = sld [smem:[#allocation16_spill]] }
0x12f2   : > { %10357 = vrsqrt.f32 %v5345_v7  ;;  %vm5352_vm14 = vweird.f32 %v5345_v7 }
0x12f8   : > { %v10358_v19 = vpop.eup %10357 }
0x12f9   : > { %v5347_v14 = vmul.f32 %v10358_v19, %v5345_v7  ;;  %vm5353_vm11 = vweird.f32 %v10358_v19 }
0x12fa   : > { %vm5354_vm5 = vmor %vm5352_vm14, %vm5353_vm11 }
0x12fb   : > { %v5348_v41 = vmul.f32 %v10358_v19, %v5347_v14  ;;  %v5444_v14 = vld [vmem:[%s12882_s23] sm:$0x1]  ;;  %s12887_s23 = sld [smem:[#allocation17_spill]] }
0x12fd   : > { %v5349_v28 = vmul.f32 0.5, %v5348_v41 }
0x12ff   : > { %v5350_v49 = vsub.f32 1.5, %v5349_v28 }
0x1301   : > { %v5351_v8 = vmul.f32 %v10358_v19, %v5350_v49 }
0x1303   : > { %v5355_v63 = vsel %vm5354_vm5, %v10358_v19, %v5351_v8  ;;  %v9872_v8 = vld [vmem:[%s12880_s18] sm:$0xff] }
0x1304   : > { %v5356_v38 = vmul.f32 %v5355_v63, %v5340_v35  ;;  %v9864_v35 = vld [vmem:[%s12879_s0 + $0x10] sm:$0xf0]  ;;  %5625 = vmatpush.bf16.msrb.mxu3 %v9872_v8  ;;  %v9897_v8 = vld [vmem:[%s12885_s11 + $0x8c] sm:$0xf] }
0x1305   : > { %v8800_v6 = vor.u32 %v9864_v35, %v8799_v17  ;;  %v8964_v17 = vor.u32 %v9904_v60, %v8961_v4  ;;  %v8968_v35 = vor.u32 %v9907_v34, %v8967_v22  ;;  %v8881_v60 = vld [vmem:[%s12885_s11 + $0x30] sm:$0xf0]  ;;  %v9887_v4 = vld [vmem:[%s12885_s11 + $0x34] sm:$0xf0] }
0x1306   : > { %v5360_v39 = vmul.f32 %v10131_v10, %v5356_v38  ;;  %v5487_v10 = vld [vmem:[%s12883_s26] sm:$0x7]  ;;  %v8884_v22 = vor.u32 %v9884_v51, %v8881_v60  ;;  %v9935_v51 = vld [vmem:[%s12889_s2 + $0xb8] sm:$0xff] }
0x1307   : > { %5546 = vmatpush.bf16.msrb.mxu2 %v8800_v6  ;;  %v5537_v63 = vperm.slane %v5487_v10, 2  ;;  %v9905_v6 = vld [vmem:[%s12885_s11 + $0xcc] sm:$0xf]  ;;  %v8937_v10 = vld [vmem:[%s12885_s11 + $0x98] sm:$0xf0] }
0x1308   : > { %v5364_v27 = vadd.f32 %v10132_v56, %v5360_v39  ;;  %5900 = vmatpush.bf16.msra.mxu3 %v8988_v18  ;;  %v9889_v18 = vld [vmem:[%s12885_s11 + $0x4c] sm:$0xf] }
0x130a   : > { %v5365_v13 = vpack.c.bf16 %v5364_v27, %v5364_v27 }
0x130c   : > { %5438 = vmatmul.bf16.vlgmr.msrb.gmra.mxu1 %v5365_v13  ;;  %v5569_v13 = vld [vmem:[%s12884_s10] sm:$0x1] }
0x1389   : > { %v5439_v32 = vpop.f32.mrf.mxu1 }
0x138a   : > { %v5446_v1 = vsel %vm5445_vm6, %v5439_v32, 0.0 }
0x138b   : > { %5447 = vadd.xlane.f32.xlu2 %v5446_v1 }
0x1391   : > { %v5441_v53 = vpop.f32.mrf.mxu1 }
0x13fe   : > { %v5448_v25 = vpop.xlane.xlu2 %5447 }
0x13ff   : > { %v5449_v50 = vmul.f32 %v5448_v25, %v10731_v45  ;;  %v9910_v25 = vld [vmem:[%s12885_s11 + $0xec] sm:$0xf0] }
0x1401   : > { %v5450_v54 = vsub.f32 %v5439_v32, %v5449_v50  ;;  %v9908_v50 = vld [vmem:[%s12885_s11 + $0xe4] sm:$0xf] }
0x1403   : > { %v5451_v59 = vmul.f32 %v5450_v54, %v5450_v54 }
0x1405   : > { %v5452_v29 = vsel %vm5445_vm6, %v5451_v59, 0.0  ;;  %v8977_v59 = vld [vmem:[%s12885_s11 + $0xf0] sm:$0xf0] }
0x1406   : > { %5453 = vadd.xlane.f32.xlu0 %v5452_v29  ;;  %v8983_v29 = vld [vmem:[%s12885_s11 + $0xe8] sm:$0xf]  ;;  %v8980_v30 = vor.u32 %v9908_v50, %v8977_v59  ;;  %v8895_v50 = vld [vmem:[%s12885_s11 + $0x40] sm:$0xf]  ;;  %v9888_v59 = vld [vmem:[%s12885_s11 + $0x44] sm:$0xf] }
0x1407   : > { %v8984_v40 = vor.u32 %v9911_v23, %v8983_v29  ;;  %v8897_v23 = vld [vmem:[%s12885_s11 + $0x50] sm:$0xf0] }
0x1408   : > { %5874 = vmatpush.bf16.msra.mxu1 %v8980_v30  ;;  %v8903_v30 = vld [vmem:[%s12885_s11 + $0x48] sm:$0xf]  ;;  %v8900_v62 = vor.u32 %v9888_v59, %v8897_v23  ;;  %v9918_v23 = vld [vmem:[%s12889_s2 + $0x30] sm:$0xff] }
0x1409   : > { %5887 = vmatpush.bf16.msra.mxu2 %v8984_v40  ;;  %v9891_v40 = vld [vmem:[%s12885_s11 + $0x54] sm:$0xf0] }
0x140a   : > { %v8904_v2 = vor.u32 %v9891_v40, %v8903_v30  ;;  %v9926_v30 = vld [vmem:[%s12889_s2 + $0x70] sm:$0xff] }
0x140c   : > { %5875 = vmatpush.bf16.msra.mxu1 %v8964_v17  ;;  %v9885_v17 = vld [vmem:[%s12885_s11 + $0x2c] sm:$0xf] }
0x140d   : > { %5888 = vmatpush.bf16.msra.mxu2 %v8968_v35  ;;  %v8889_v35 = vld [vmem:[%s12885_s11 + $0x38] sm:$0xf0] }
0x1479   : > { %v5454_v37 = vpop.xlane.xlu0 %5453 }
0x147a   : > { %v5455_v9 = vmul.f32 %v5454_v37, %v10731_v45  ;;  %v8972_v37 = vor.u32 %v9905_v6, %v8969_v43  ;;  %v8892_v6 = vor.u32 %v9885_v17, %v8889_v35  ;;  %v8863_v43 = vld [vmem:[%s12885_s11] sm:$0xf]  ;;  %v9934_v35 = vld [vmem:[%s12889_s2 + $0xb0] sm:$0xff] }
0x147c   : > { %v5456_v0 = vadd.f32 1e-05, %v5455_v9  ;;  %v8943_v9 = vld [vmem:[%s12885_s11 + $0xa0] sm:$0xf]  ;;  %5901 = vmatpush.bf16.msra.mxu3 %v8972_v37  ;;  %v9882_v37 = vld [vmem:[%s12885_s11 + $0xc] sm:$0xf0] }
0x147d   : > { %v8944_v42 = vor.u32 %v9902_v61, %v8943_v9  ;;  %v9880_v9 = vld [vmem:[%s12885_s11 + $0x4] sm:$0xf]  ;;  %v8864_v61 = vor.u32 %v9882_v37, %v8863_v43 }
0x147e   : > { %10359 = vrsqrt.f32 %v5456_v0  ;;  %vm5463_vm10 = vweird.f32 %v5456_v0  ;;  %v9916_v43 = vld [vmem:[%s12889_s2 + $0x20] sm:$0xff] }
0x1484   : > { %v10360_v5 = vpop.eup %10359 }
0x1485   : > { %v5458_v57 = vmul.f32 %v10360_v5, %v5456_v0  ;;  %vm5464_vm2 = vweird.f32 %v10360_v5  ;;  %v9900_v0 = vld [vmem:[%s12885_s11 + $0xa4] sm:$0xf] }
0x1486   : > { %vm5465_vm7 = vmor %vm5463_vm10, %vm5464_vm2  ;;  %v8948_v52 = vor.u32 %v9900_v0, %v8945_v44  ;;  %v8865_v0 = vld [vmem:[%s12885_s11 + $0x10] sm:$0xf0]  ;;  %v9883_v44 = vld [vmem:[%s12885_s11 + $0x14] sm:$0xf0] }
0x1487   : > { %v5459_v33 = vmul.f32 %v10360_v5, %v5458_v57  ;;  %v9903_v57 = vld [vmem:[%s12885_s11 + $0xb4] sm:$0xf0] }
0x1488   : > { %5876 = vmatpush.bf16.msra.mxu1 %v8948_v52  ;;  %v9881_v52 = vld [vmem:[%s12885_s11 + $0xc] sm:$0xf] }
0x1489   : > { %v5460_v55 = vmul.f32 0.5, %v5459_v33 }
0x148b   : > { %v5461_v47 = vsub.f32 1.5, %v5460_v55  ;;  %v9901_v55 = vld [vmem:[%s12885_s11 + $0xac] sm:$0xf] }
0x148d   : > { %v5462_v31 = vmul.f32 %v10360_v5, %v5461_v47  ;;  %v8956_v47 = vor.u32 %v9901_v55, %v8953_v12 }
0x148f   : > { %v5466_v7 = vsel %vm5465_vm7, %v10360_v5, %v5462_v31  ;;  %v8951_v5 = vld [vmem:[%s12885_s11 + $0xa8] sm:$0xf]  ;;  %v8927_v31 = vld [vmem:[%s12885_s11 + $0x80] sm:$0xf]  ;;  %5902 = vmatpush.bf16.msra.mxu3 %v8956_v47 }
0x1490   : > { %v5467_v19 = vmul.f32 %v5466_v7, %v5450_v54  ;;  %v8976_v54 = vor.u32 %v9910_v25, %v8975_v3  ;;  %v8952_v33 = vor.u32 %v9903_v57, %v8951_v5  ;;  %v8928_v7 = vor.u32 %v9898_v16, %v8927_v31  ;;  %v8921_v3 = vld [vmem:[%s12885_s11 + $0x78] sm:$0xf0] }
0x1491   : > { %v8868_v5 = vor.u32 %v9880_v9, %v8865_v0  ;;  %v9924_v9 = vld [vmem:[%s12889_s2 + $0x60] sm:$0xff] }
0x1492   : > { %v5468_v41 = vmul.f32 %v5467_v19, %v5443_v26  ;;  %5861 = vmatpush.bf16.msra.mxu0 %v8976_v54  ;;  %5889 = vmatpush.bf16.msra.mxu2 %v8952_v33  ;;  %v9896_v26 = vld [vmem:[%s12885_s11 + $0x84] sm:$0xf]  ;;  %v8929_v19 = vld [vmem:[%s12885_s11 + $0x90] sm:$0xf0]  ;;  %v9890_v54 = vld [vmem:[%s12885_s11 + $0x4c] sm:$0xf0] }
0x1493   : > { %v8896_v29 = vor.u32 %v9890_v54, %v8895_v50  ;;  %v8873_v33 = vld [vmem:[%s12885_s11 + $0x18] sm:$0xf0] }
0x1494   : > { %v5469_v28 = vadd.f32 %v5468_v41, %v5444_v14  ;;  %v8935_v14 = vld [vmem:[%s12885_s11 + $0x88] sm:$0xf]  ;;  %v9899_v41 = vld [vmem:[%s12885_s11 + $0x94] sm:$0xf0]  ;;  %v8876_v55 = vor.u32 %v9881_v52, %v8873_v33 }
0x1496   : > { %v5470_v49 = vpack.c.bf16 %v5469_v28, %v5469_v28  ;;  %5862 = vmatpush.bf16.msra.mxu0 %v8960_v15  ;;  %v8887_v15 = vld [vmem:[%s12885_s11 + $0x28] sm:$0xf] }
0x1497   : > { %v8888_v34 = vor.u32 %v9887_v4, %v8887_v15  ;;  %v9917_v4 = vld [vmem:[%s12889_s2 + $0x28] sm:$0xff] }
0x1498   : > { %5547 = vmatmul.bf16.vlgmr.msrb.gmra.mxu2 %v5470_v49  ;;  %v8936_v49 = vor.u32 %v9899_v41, %v8935_v14 }
0x149a   : > { %5863 = vmatpush.bf16.msra.mxu0 %v8944_v42  ;;  %5890 = vmatpush.bf16.msra.mxu2 %v8936_v49  ;;  %v8871_v42 = vld [vmem:[%s12885_s11 + $0x8] sm:$0xf] }
0x149b   : > { %v8872_v57 = vor.u32 %v9883_v44, %v8871_v42  ;;  %v9933_v44 = vld [vmem:[%s12889_s2 + $0xa8] sm:$0xff] }
0x149e   : > { %5864 = vmatpush.bf16.msra.mxu0 %v8928_v7 }
0x151b   : > { %v5548_v38 = vpop.f32.mrf.mxu2 }
0x151c   : > { %v5549_v56 = vadd.f32 %v5548_v38, %v5537_v63  ;;  %v8940_v63 = vor.u32 %v9897_v8, %v8937_v10  ;;  %v8911_v38 = vld [vmem:[%s12885_s11 + $0x60] sm:$0xf] }
0x151d   : > { %v5633_v10 = vld [vmem:[%s12887_s23] sm:$0x1] }
0x151e   : > { %v5552_v39 = vpack.c.bf16 %v5549_v56, %v5549_v56  ;;  %v9894_v56 = vld [vmem:[%s12885_s11 + $0x6c] sm:$0xf0]  ;;  %5903 = vmatpush.bf16.msra.mxu3 %v8940_v63 }
0x1520   : > { %5626 = vmatmul.bf16.vlgmr.msrb.gmra.mxu3 %v5552_v39  ;;  %v9892_v39 = vld [vmem:[%s12885_s11 + $0x64] sm:$0xf] }
0x1523   : > { %v5550_v27 = vpop.f32.mrf.mxu2 }
0x1524   : > { %v8912_v27 = vor.u32 %v9894_v56, %v8911_v38 }
0x1526   : > { %5865 = vmatpush.bf16.msra.mxu0 %v8912_v27 }
0x152a   : > { %5866 = vmatpush.bf16.msra.mxu0 %v8896_v29 }
0x15a3   : > { %v5627_v32 = vpop.f32.mrf.mxu3 }
0x15a4   : > { %v5628_v1 = vadd.f32 %v5627_v32, %v5569_v13  ;;  %v8913_v13 = vld [vmem:[%s12885_s11 + $0x70] sm:$0xf0]  ;;  %v8919_v32 = vld [vmem:[%s12885_s11 + $0x68] sm:$0xf] }
0x15a6   : > { %v5631_v53 = vadd.f32 %v5628_v1, %v5469_v28  ;;  %v8932_v28 = vor.u32 %v9896_v26, %v8929_v19  ;;  %v9895_v1 = vld [vmem:[%s12885_s11 + $0x74] sm:$0xf0] }
0x15a8   : > { %v5634_v21 = vsel %vm5445_vm6, %v5631_v53, 0.0  ;;  %5877 = vmatpush.bf16.msra.mxu1 %v8932_v28  ;;  %v5632_v28 = vld [vmem:[%s12886_s22] sm:$0x1] }
0x15a9   : > { %5635 = vadd.xlane.f32.xlu1 %v5634_v21  ;;  %v8920_v21 = vor.u32 %v9895_v1, %v8919_v32 }
0x15ab   : > { %v5629_v48 = vpop.f32.mrf.mxu3  ;;  %5891 = vmatpush.bf16.msra.mxu2 %v8920_v21  ;;  %v9919_v21 = vld [vmem:[%s12889_s2 + $0x38] sm:$0xff] }
0x15ac   : > { %v9893_v48 = vld [vmem:[%s12885_s11 + $0x6c] sm:$0xf] }
0x15ad   : > { %v8924_v25 = vor.u32 %v9893_v48, %v8921_v3  ;;  %v9927_v48 = vld [vmem:[%s12889_s2 + $0x78] sm:$0xff] }
0x15af   : > { %5904 = vmatpush.bf16.msra.mxu3 %v8924_v25  ;;  %5892 = vmatpush.bf16.msra.mxu2 %v8904_v2 }
0x15b3   : > { %5893 = vmatpush.bf16.msra.mxu2 %v8888_v34 }
0x15b7   : > { %5894 = vmatpush.bf16.msra.mxu2 %v8872_v57 }
0x15bb   : > { %6360 = vmatpush.bf16.msrb.mxu2 %v9935_v51 }
0x15bf   : > { %6361 = vmatpush.bf16.msrb.mxu2 %v9934_v35 }
0x15c3   : > { %6362 = vmatpush.bf16.msrb.mxu2 %v9933_v44  ;;  %v9912_v44 = vld [vmem:[%s12889_s2] sm:$0xff] }
0x161c   : > { %v5636_v36 = vpop.xlane.xlu1 %5635 }
0x161d   : > { %v5637_v58 = vmul.f32 %v5636_v36, %v10731_v45  ;;  %v8905_v36 = vld [vmem:[%s12885_s11 + $0x58] sm:$0xf0] }
0x161f   : > { %v12268_v46 = vsub.f32 %v5631_v53, %v5637_v58  ;;  %v8916_v53 = vor.u32 %v9892_v39, %v8913_v13  ;;  %v8908_v58 = vor.u32 %v9889_v18, %v8905_v36  ;;  %v5691_v39 = vld [vmem:[%s12888_s1] sm:$0xf] }
0x1620   : > { %v5853_v27 = vperm.slane %v5691_v39, 0  ;;  %v5854_v13 = vperm.slane %v5691_v39, 1  ;;  %v5855_v50 = vperm.slane %v5691_v39, 2  ;;  %v5856_v54 = vperm.slane %v5691_v39, 3  ;;  %v9922_v39 = vld [vmem:[%s12889_s2 + $0x50] sm:$0xff] }
0x1621   : > { %v5639_v20 = vmul.f32 %v12268_v46, %v12268_v46  ;;  %5878 = vmatpush.bf16.msra.mxu1 %v8916_v53  ;;  %5905 = vmatpush.bf16.msra.mxu3 %v8908_v58 }
0x1623   : > { %v5640_v24 = vsel %vm5445_vm6, %v5639_v20, 0.0  ;;  %v8879_v20 = vld [vmem:[%s12885_s11 + $0x20] sm:$0xf] }
0x1624   : > { %5641 = vadd.xlane.f32.xlu2 %v5640_v24  ;;  %v9886_v24 = vld [vmem:[%s12885_s11 + $0x2c] sm:$0xf0] }
0x1625   : > { %5879 = vmatpush.bf16.msra.mxu1 %v8900_v62  ;;  %v8880_v11 = vor.u32 %v9886_v24, %v8879_v20  ;;  %5906 = vmatpush.bf16.msra.mxu3 %v8892_v6  ;;  %v9942_v6 = vld [vmem:[%s12889_s2 + $0xf0] sm:$0xff] }
0x1627   : > { %5867 = vmatpush.bf16.msra.mxu0 %v8880_v11  ;;  %v9943_v11 = vld [vmem:[%s12889_s2 + $0xf8] sm:$0xff] }
0x1629   : > { %5880 = vmatpush.bf16.msra.mxu1 %v8884_v22  ;;  %5907 = vmatpush.bf16.msra.mxu3 %v8876_v55  ;;  %v9925_v22 = vld [vmem:[%s12889_s2 + $0x68] sm:$0xff] }
0x162b   : > { %5868 = vmatpush.bf16.msra.mxu0 %v8864_v61 }
0x162d   : > { %5881 = vmatpush.bf16.msra.mxu1 %v8868_v5  ;;  %6373 = vmatpush.bf16.msrb.mxu3 %v9943_v11  ;;  %v9941_v5 = vld [vmem:[%s12889_s2 + $0xe8] sm:$0xff] }
0x162f   : > { %6334 = vmatpush.bf16.msrb.mxu0 %v9919_v21 }
0x1631   : > { %6347 = vmatpush.bf16.msrb.mxu1 %v9927_v48  ;;  %6374 = vmatpush.bf16.msrb.mxu3 %v9942_v6  ;;  %v9931_v48 = vld [vmem:[%s12889_s2 + $0x98] sm:$0xff] }
0x1633   : > { %6335 = vmatpush.bf16.msrb.mxu0 %v9918_v23 }
0x1635   : > { %6348 = vmatpush.bf16.msrb.mxu1 %v9926_v30  ;;  %6375 = vmatpush.bf16.msrb.mxu3 %v9941_v5  ;;  %v9920_v5 = vld [vmem:[%s12889_s2 + $0x40] sm:$0xff] }
0x1637   : > { %6336 = vmatpush.bf16.msrb.mxu0 %v9917_v4  ;;  %v9930_v4 = vld [vmem:[%s12889_s2 + $0x90] sm:$0xff] }
0x1639   : > { %6349 = vmatpush.bf16.msrb.mxu1 %v9925_v22  ;;  %v9938_v22 = vld [vmem:[%s12889_s2 + $0xd0] sm:$0xff] }
0x163b   : > { %6337 = vmatpush.bf16.msrb.mxu0 %v9916_v43 }
0x163d   : > { %6350 = vmatpush.bf16.msrb.mxu1 %v9924_v9 }
0x1697   : > { %v5642_v12 = vpop.xlane.xlu2 %5641 }
0x1698   : > { %v5643_v47 = vmul.f32 %v5642_v12, %v10731_v45  ;;  %v9915_v12 = vld [vmem:[%s12889_s2 + $0x18] sm:$0xff] }
0x1699   : > { %6338 = vmatpush.bf16.msrb.mxu0 %v9915_v12 }
0x169a   : > { %v5644_v31 = vadd.f32 1e-05, %v5643_v47  ;;  %v9923_v47 = vld [vmem:[%s12889_s2 + $0x58] sm:$0xff] }
0x169b   : > { %6351 = vmatpush.bf16.msrb.mxu1 %v9923_v47 }
0x169c   : > { %10361 = vrsqrt.f32 %v5644_v31  ;;  %vm5651_vm13 = vweird.f32 %v5644_v31 }
0x169f   : > { %6352 = vmatpush.bf16.msrb.mxu1 %v9922_v39 }
0x16a2   : > { %v10362_v16 = vpop.eup %10361 }
0x16a3   : > { %v5646_v26 = vmul.f32 %v10362_v16, %v5644_v31  ;;  %vm5652_vm12 = vweird.f32 %v10362_v16 }
0x16a4   : > { %vm5653_vm1 = vmor %vm5651_vm13, %vm5652_vm12 }
0x16a5   : > { %v5647_v7 = vmul.f32 %v10362_v16, %v5646_v26 }
0x16a7   : > { %v5648_v19 = vmul.f32 0.5, %v5647_v7 }
0x16a9   : > { %v5649_v14 = vsub.f32 1.5, %v5648_v19 }
0x16ab   : > { %v5650_v41 = vmul.f32 %v10362_v16, %v5649_v14  ;;  %v9932_v14 = vld [vmem:[%s12889_s2 + $0xa0] sm:$0xff] }
0x16ac   : > { %6363 = vmatpush.bf16.msrb.mxu2 %v9932_v14 }
0x16ad   : > { %v5654_v49 = vsel %vm5653_vm1, %v10362_v16, %v5650_v41  ;;  %v9940_v41 = vld [vmem:[%s12889_s2 + $0xe0] sm:$0xff] }
0x16ae   : > { %v5655_v8 = vmul.f32 %v5654_v49, %v12268_v46  ;;  %6376 = vmatpush.bf16.msrb.mxu3 %v9940_v41 }
0x16b0   : > { %v5656_v63 = vmul.f32 %v5655_v8, %v5632_v28  ;;  %6364 = vmatpush.bf16.msrb.mxu2 %v9931_v48 }
0x16b2   : > { %v12333_v38 = vadd.f32 %v5656_v63, %v5633_v10 }
0x16b4   : > { %v5658_v56 = vpack.c.bf16 %v12333_v38, %v12333_v38  ;;  %6365 = vmatpush.bf16.msrb.mxu2 %v9930_v4 }
0x16b6   : > { %5869 = vmatmul.bf16.vlgmr.msra.gmra.mxu0 %v5658_v56  ;;  %5882 = vmatmul.bf16.vlgmr.msra.gmra.mxu1 %v5658_v56 }
0x16b7   : > { %5895 = vmatmul.bf16.vlgmr.msra.gmra.mxu2 %v5658_v56  ;;  %5908 = vmatmul.bf16.vlgmr.msra.gmra.mxu3 %v5658_v56  ;;  %v9914_v56 = vld [vmem:[%s12889_s2 + $0x10] sm:$0xff] }
0x16b8   : > { %6339 = vmatpush.bf16.msrb.mxu0 %v9914_v56 }
0x1733   : > { %v5870_v32 = vpop.f32.mrf.mxu0  ;;  %v5883_v46 = vpop.f32.mrf.mxu1 }
0x1734   : > { %v12338_v1 = vadd.f32 %v5870_v32, %v5853_v27  ;;  %v12340_v53 = vadd.f32 %v5883_v46, %v5854_v13 }
0x1736   : > { %v12345_v3 = vmul.f32 0.70710677, %v12338_v1  ;;  %v12348_v25 = vmul.f32 0.70710677, %v12340_v53 }
0x1738   : > { %v12351_v59 = vand.u32 2147483647, %v12345_v3  ;;  %v12354_v29 = vand.u32 2147483647, %v12348_v25 }
0x173a   : > { %v5921_v40 = vmul.f32 0.3275911, %v12351_v59  ;;  %v5922_v62 = vmul.f32 0.3275911, %v12354_v29  ;;  %v5896_v2 = vpop.f32.mrf.mxu2  ;;  %v5909_v18 = vpop.f32.mrf.mxu3  ;;  %v6025_v33 = vsub.f32 0.0, %v12351_v59  ;;  %v6026_v49 = vsub.f32 0.0, %v12354_v29 }
0x173b   : > { %v12360_v36 = vadd.f32 %v5896_v2, %v5855_v50  ;;  %v12362_v58 = vadd.f32 %v5909_v18, %v5856_v54  ;;  %v5872_v20 = vpop.f32.mrf.mxu0  ;;  %v5885_v24 = vpop.f32.mrf.mxu1  ;;  %v9939_v50 = vld [vmem:[%s12889_s2 + $0xd8] sm:$0xff]  ;;  %v9921_v2 = vld [vmem:[%s12889_s2 + $0x48] sm:$0xff] }
0x173c   : > { %v12366_v60 = vadd.f32 1.0, %v5921_v40  ;;  %v12368_v15 = vadd.f32 1.0, %v5922_v62  ;;  %v6029_v10 = vmul.f32 %v6025_v33, %v12351_v59  ;;  %v6030_v59 = vmul.f32 %v6026_v49, %v12354_v29  ;;  %v9913_v62 = vld [vmem:[%s12889_s2 + $0x8] sm:$0xff]  ;;  %6377 = vmatpush.bf16.msrb.mxu3 %v9939_v50  ;;  %6353 = vmatpush.bf16.msrb.mxu1 %v9921_v2 }
0x173d   : > { %v12373_v34 = vmul.f32 0.70710677, %v12360_v36  ;;  %v12377_v17 = vmul.f32 0.70710677, %v12362_v58  ;;  %6340 = vmatpush.bf16.msrb.mxu0 %v9913_v62 }
0x173e   : > { %10363 = vrcp.f32 %v12366_v60  ;;  %v5940_v8 = vand.u32 2147483648, %v12366_v60  ;;  %v5938_v13 = vand.u32 2147483647, %v12366_v60  ;;  %v5955_v32 = vand.u32 2147483648, %v12368_v15 }
0x173f   : > { %10365 = vrcp.f32 %v12368_v15  ;;  %v12384_v37 = vand.u32 2147483647, %v12373_v34  ;;  %v12388_v61 = vand.u32 2147483647, %v12377_v17  ;;  %v5953_v21 = vand.u32 2147483647, %v12368_v15 }
0x1740   : > { %vm5934_vm15 = vweird.f32 %v12366_v60  ;;  %v5941_v30 = vor.u32 1.1754944e-38, %v5940_v8  ;;  %vm5949_vm4 = vweird.f32 %v12368_v15  ;;  %vm5939_vm9 = vcmp.eq.f32.partialorder %v5938_v13, 8.507059e+37  ;;  %6378 = vmatpush.bf16.msrb.mxu3 %v9938_v22  ;;  %6354 = vmatpush.bf16.msrb.mxu1 %v9920_v5 }
0x1741   : > { %v5923_v57 = vmul.f32 0.3275911, %v12384_v37  ;;  %v5924_v55 = vmul.f32 0.3275911, %v12388_v61  ;;  %v12431_v20 = vmul.f32 1.442695, %v6029_v10  ;;  %6341 = vmatpush.bf16.msrb.mxu0 %v9912_v44 }
0x1742   : > { %v5898_v0 = vpop.f32.mrf.mxu2  ;;  %v5911_v42 = vpop.f32.mrf.mxu3  ;;  %v5956_v24 = vor.u32 1.1754944e-38, %v5955_v32  ;;  %vm5954_vm14 = vcmp.eq.f32.partialorder %v5953_v21, 8.507059e+37  ;;  %v6035_v43 = vmul.f32 1.442695, %v6030_v59  ;;  %v6027_v10 = vsub.f32 0.0, %v12384_v37 }
0x1743   : > { %v12398_v26 = vadd.f32 1.0, %v5923_v57  ;;  %v12401_v19 = vadd.f32 1.0, %v5924_v55  ;;  %v6028_v23 = vsub.f32 0.0, %v12388_v61 }
0x1744   : > { %v10364_v52 = vpop.eup %10363 }
0x1745   : > { %v10366_v31 = vpop.eup %10365  ;;  %v5930_v16 = vmul.f32 %v10364_v52, %v12366_v60  ;;  %10367 = vrcp.f32 %v12398_v26  ;;  %vm5935_vm8 = vweird.f32 %v10364_v52  ;;  %v5970_v33 = vand.u32 2147483648, %v12398_v26 }
0x1746   : > { %v5945_v7 = vmul.f32 %v10366_v31, %v12368_v15  ;;  %10369 = vrcp.f32 %v12401_v19  ;;  %vm5950_vm0 = vweird.f32 %v10366_v31  ;;  %vm12420_vm3 = vmor %vm5934_vm15, %vm5935_vm8  ;;  %vm5964_vm10 = vweird.f32 %v12398_v26 }
0x1747   : > { %v5931_v28 = vsub.f32 1.0, %v5930_v16  ;;  %vm5951_vm11 = vmor %vm5949_vm4, %vm5950_vm0  ;;  %v9929_v16 = vld [vmem:[%s12889_s2 + $0x88] sm:$0xff]  ;;  %v5971_v56 = vor.u32 1.1754944e-38, %v5970_v33  ;;  %vm5979_vm12 = vweird.f32 %v12401_v19  ;;  %10371 = vpow2.f32 %v12431_v20 }
0x1748   : > { %v5946_v63 = vsub.f32 1.0, %v5945_v7  ;;  %v9937_v7 = vld [vmem:[%s12889_s2 + $0xc8] sm:$0xff]  ;;  %6366 = vmatpush.bf16.msrb.mxu2 %v9929_v16  ;;  %10373 = vpow2.f32 %v6035_v43  ;;  %vm6049_vm0 = vcmp.ge.f32.partialorder %v12345_v3, 0.0  ;;  %vm6050_vm15 = vcmp.ge.f32.partialorder %v12348_v25, 0.0 }
0x1749   : > { %v5932_v27 = vmul.f32 %v10364_v52, %v5931_v28  ;;  %v5983_v28 = vand.u32 2147483647, %v12401_v19  ;;  %6379 = vmatpush.bf16.msrb.mxu3 %v9937_v7  ;;  %vm6052_vm4 = vcmp.ge.f32.partialorder %v12377_v17, 0.0 }
0x174a   : > { %v5947_v46 = vmul.f32 %v10366_v31, %v5946_v63 }
0x174b   : > { %v5933_v54 = vadd.f32 %v10364_v52, %v5932_v27  ;;  %v12427_v18 = vpop.eup %10367  ;;  %vm5984_vm8 = vcmp.eq.f32.partialorder %v5983_v28, 8.507059e+37 }
0x174c   : > { %v5948_v40 = vadd.f32 %v10366_v31, %v5947_v46  ;;  %v10370_v51 = vpop.eup %10369  ;;  %v5960_v15 = vmul.f32 %v12427_v18, %v12398_v26  ;;  %vm5965_vm5 = vweird.f32 %v12427_v18  ;;  %v9936_v46 = vld [vmem:[%s12889_s2 + $0xc0] sm:$0xff] }
0x174d   : > { %v5937_v29 = vsel %vm12420_vm3, %v10364_v52, %v5933_v54  ;;  %v5975_v9 = vmul.f32 %v10370_v51, %v12401_v19  ;;  %v5968_v52 = vand.u32 2147483647, %v12398_v26  ;;  %vm5980_vm2 = vweird.f32 %v10370_v51  ;;  %vm5966_vm7 = vmor %vm5964_vm10, %vm5965_vm5  ;;  %v9928_v26 = vld [vmem:[%s12889_s2 + $0x80] sm:$0xff]  ;;  %6380 = vmatpush.bf16.msrb.mxu3 %v9936_v46  ;;  %v10372_v44 = vpop.eup %10371 }
0x174e   : > { %v12434_v11 = vsel %vm5939_vm9, %v5941_v30, %v5937_v29  ;;  %v5952_v60 = vsel %vm5951_vm11, %v10366_v31, %v5948_v40  ;;  %v5961_v42 = vsub.f32 1.0, %v5960_v15  ;;  %v5985_v31 = vand.u32 2147483648, %v12401_v19  ;;  %vm5981_vm1 = vmor %vm5979_vm12, %vm5980_vm2  ;;  %6367 = vmatpush.bf16.msrb.mxu2 %v9928_v26 }
0x174f   : > { %v5989_v35 = vmul.f32 1.0614054, %v12434_v11  ;;  %v12441_v6 = vsel %vm5954_vm14, %v5956_v24, %v5952_v60  ;;  %v5976_v55 = vsub.f32 1.0, %v5975_v9  ;;  %vm5969_vm13 = vcmp.eq.f32.partialorder %v5968_v52, 8.507059e+37 }
0x1750   : > { %v5990_v0 = vmul.f32 1.0614054, %v12441_v6  ;;  %v5962_v47 = vmul.f32 %v12427_v18, %v5961_v42  ;;  %v5986_v32 = vor.u32 1.1754944e-38, %v5985_v31  ;;  %v6031_v29 = vmul.f32 %v6027_v10, %v12384_v37  ;;  %v10374_v37 = vpop.eup %10373 }
0x1751   : > { %v5993_v57 = vadd.f32 -1.4531521, %v5989_v35  ;;  %v5977_v41 = vmul.f32 %v10370_v51, %v5976_v55  ;;  %v6032_v15 = vmul.f32 %v6028_v23, %v12388_v61  ;;  %vm6051_vm3 = vcmp.ge.f32.partialorder %v12373_v34, 0.0 }
0x1752   : > { %v5994_v12 = vadd.f32 -1.4531521, %v5990_v0  ;;  %v5963_v8 = vadd.f32 %v12427_v18, %v5962_v47  ;;  %v6037_v20 = vmul.f32 1.442695, %v6031_v29 }
0x1753   : > { %v5997_v14 = vmul.f32 %v5993_v57, %v12434_v11  ;;  %v5978_v39 = vadd.f32 %v10370_v51, %v5977_v41  ;;  %v6039_v57 = vmul.f32 1.442695, %v6032_v15 }
0x1754   : > { %v5998_v49 = vmul.f32 %v5994_v12, %v12441_v6  ;;  %v5967_v13 = vsel %vm5966_vm7, %v12427_v18, %v5963_v8  ;;  %10375 = vpow2.f32 %v6037_v20 }
0x1755   : > { %v6001_v63 = vadd.f32 1.4214138, %v5997_v14  ;;  %v5972_v48 = vsel %vm5969_vm13, %v5971_v56, %v5967_v13  ;;  %v5982_v50 = vsel %vm5981_vm1, %v10370_v51, %v5978_v39  ;;  %10377 = vpow2.f32 %v6039_v57 }
0x1756   : > { %v6002_v27 = vadd.f32 1.4214138, %v5998_v49  ;;  %v5991_v59 = vmul.f32 1.0614054, %v5972_v48  ;;  %v5987_v19 = vsel %vm5984_vm8, %v5986_v32, %v5982_v50  ;;  %v6061_v49 = vmul.f32 0.5, %v12338_v1 }
0x1757   : > { %v6005_v21 = vmul.f32 %v6001_v63, %v12434_v11  ;;  %v5992_v40 = vmul.f32 1.0614054, %v5987_v19  ;;  %v6062_v39 = vmul.f32 0.5, %v12340_v53  ;;  %v6063_v53 = vmul.f32 0.5, %v12360_v36 }
0x1758   : > { %v6006_v54 = vmul.f32 %v6002_v27, %v12441_v6  ;;  %v5995_v2 = vadd.f32 -1.4531521, %v5991_v59 }
0x1759   : > { %v6009_v30 = vadd.f32 -0.28449672, %v6005_v21  ;;  %v5996_v24 = vadd.f32 -1.4531521, %v5992_v40  ;;  %v6064_v40 = vmul.f32 0.5, %v12362_v58 }
0x175a   : > { %v6010_v62 = vadd.f32 -0.28449672, %v6006_v54  ;;  %v5999_v60 = vmul.f32 %v5995_v2, %v5972_v48  ;;  %v10376_v56 = vpop.eup %10375 }
0x175b   : > { %v6013_v18 = vmul.f32 %v6009_v30, %v12434_v11  ;;  %v6000_v22 = vmul.f32 %v5996_v24, %v5987_v19  ;;  %v10378_v32 = vpop.eup %10377 }
0x175c   : > { %v6014_v51 = vmul.f32 %v6010_v62, %v12441_v6  ;;  %v6003_v9 = vadd.f32 1.4214138, %v5999_v60  ;;  %v6141_v60 = vld [vmem:[%s12892_s3] sm:$0x1] }
0x175d   : > { %v6017_v4 = vadd.f32 0.2548296, %v6013_v18  ;;  %v6004_v42 = vadd.f32 1.4214138, %v6000_v22 }
0x175e   : > { %v6018_v35 = vadd.f32 0.2548296, %v6014_v51  ;;  %v6007_v43 = vmul.f32 %v6003_v9, %v5972_v48 }
0x175f   : > { %v6021_v0 = vmul.f32 %v6017_v4, %v12434_v11  ;;  %v6008_v33 = vmul.f32 %v6004_v42, %v5987_v19 }
0x1760   : > { %v6022_v5 = vmul.f32 %v6018_v35, %v12441_v6  ;;  %v6011_v12 = vadd.f32 -0.28449672, %v6007_v43  ;;  %v9951_v43 = vld [vmem:[%s12879_s0 + $0x178] sm:$0xf0] }
0x1761   : > { %v6041_v52 = vmul.f32 %v10372_v44, %v6021_v0  ;;  %v6012_v61 = vadd.f32 -0.28449672, %v6008_v33 }
0x1762   : > { %v6042_v55 = vmul.f32 %v10374_v37, %v6022_v5  ;;  %v6015_v16 = vmul.f32 %v6011_v12, %v5972_v48  ;;  %v9164_v5 = vld [vmem:[%s12879_s0 + $0x170] sm:$0xf]  ;;  %v9160_v12 = vld [vmem:[%s12879_s0 + $0x158] sm:$0xf] }
0x1763   : > { %v6045_v47 = vsub.f32 1.0, %v6041_v52  ;;  %v6016_v11 = vmul.f32 %v6012_v61, %v5987_v19  ;;  %v9165_v57 = vor.u32 %v9951_v43, %v9164_v5 }
0x1764   : > { %v6046_v31 = vsub.f32 1.0, %v6042_v55  ;;  %v6019_v41 = vadd.f32 0.2548296, %v6015_v16  ;;  %v9949_v16 = vld [vmem:[%s12879_s0 + $0x148] sm:$0xf0] }
0x1765   : > { %v6053_v7 = vsub.f32 0.0, %v6045_v47  ;;  %v6020_v28 = vadd.f32 0.2548296, %v6016_v11  ;;  %6484 = vmatpush.bf16.msra.mxu0 %v9165_v57  ;;  %v9152_v11 = vld [vmem:[%s12879_s0 + $0x128] sm:$0xf] }
0x1766   : > { %v6054_v14 = vsub.f32 0.0, %v6046_v31  ;;  %v6023_v63 = vmul.f32 %v6019_v41, %v5972_v48  ;;  %v9364_v57 = vld [vmem:[%s12885_s11 + $0x1e0] sm:$0xf] }
0x1767   : > { %v6057_v6 = vsel %vm6049_vm0, %v6045_v47, %v6053_v7  ;;  %v6024_v13 = vmul.f32 %v6020_v28, %v5987_v19  ;;  %v9950_v47 = vld [vmem:[%s12879_s0 + $0x160] sm:$0xf0]  ;;  %v9947_v28 = vld [vmem:[%s12879_s0 + $0x118] sm:$0xf0] }
0x1768   : > { %v6065_v8 = vadd.f32 1.0, %v6057_v6  ;;  %v6058_v10 = vsel %vm6050_vm15, %v6046_v31, %v6054_v14  ;;  %v6043_v46 = vmul.f32 %v10376_v56, %v6023_v63  ;;  %v9161_v61 = vor.u32 %v9950_v47, %v9160_v12  ;;  %v9156_v31 = vld [vmem:[%s12879_s0 + $0x140] sm:$0xf]  ;;  %v9948_v14 = vld [vmem:[%s12879_s0 + $0x130] sm:$0xf0] }
0x1769   : > { %v6066_v27 = vadd.f32 1.0, %v6058_v10  ;;  %v6044_v21 = vmul.f32 %v10378_v32, %v6024_v13  ;;  %v9157_v7 = vor.u32 %v9949_v16, %v9156_v31  ;;  %v9153_v41 = vor.u32 %v9948_v14, %v9152_v11  ;;  %v9148_v6 = vld [vmem:[%s12879_s0 + $0x110] sm:$0xf]  ;;  %v9946_v10 = vld [vmem:[%s12879_s0 + $0x100] sm:$0xf0] }
0x176a   : > { %v6069_v26 = vmul.f32 %v6065_v8, %v6061_v49  ;;  %v6047_v54 = vsub.f32 1.0, %v6043_v46  ;;  %6485 = vmatpush.bf16.msra.mxu0 %v9161_v61  ;;  %v9149_v49 = vor.u32 %v9947_v28, %v9148_v6  ;;  %v9144_v8 = vld [vmem:[%s12879_s0 + $0xf8] sm:$0xf]  ;;  %v9140_v56 = vld [vmem:[%s12879_s0 + $0xe0] sm:$0xf] }
0x176b   : > { %v6070_v3 = vmul.f32 %v6066_v27, %v6062_v39  ;;  %v6048_v25 = vsub.f32 1.0, %v6044_v21  ;;  %v9145_v63 = vor.u32 %v9946_v10, %v9144_v8  ;;  %v9945_v39 = vld [vmem:[%s12879_s0 + $0xe8] sm:$0xf0]  ;;  %v9136_v13 = vld [vmem:[%s12879_s0 + $0xc8] sm:$0xf]  ;;  %v9959_v46 = vld [vmem:[%s12880_s18 + $0x78] sm:$0xff] }
0x176c   : > { %v6073_v50 = vpack.c.bf16 %v6069_v26, %v6069_v26  ;;  %v6055_v23 = vsub.f32 0.0, %v6047_v54  ;;  %v9141_v27 = vor.u32 %v9945_v39, %v9140_v56  ;;  %v9944_v32 = vld [vmem:[%s12879_s0 + $0xd0] sm:$0xf0]  ;;  %6565 = vmatpush.bf16.msra.mxu1 %v9959_v46  ;;  %s12894_s0 = sld [smem:[#allocation23_spill]]  ;;  %v9991_v12 = vld [vmem:[%s12885_s11 + $0x1f4] sm:$0xf0] }
0x176d   : > { %v6074_v59 = vpack.c.bf16 %v6070_v3, %v6070_v3  ;;  %v6056_v1 = vsub.f32 0.0, %v6048_v25  ;;  %v9137_v26 = vor.u32 %v9944_v32, %v9136_v13  ;;  %v9989_v31 = vld [vmem:[%s12885_s11 + $0x1ec] sm:$0xf]  ;;  %v9374_v16 = vld [vmem:[%s12885_s11 + $0x1f8] sm:$0xf0] }
0x176e   : > { %6342 = vmatmul.bf16.vlgmr.msrb.gmra.mxu0 %v6073_v50  ;;  %v6059_v48 = vsel %vm6051_vm3, %v6047_v54, %v6055_v23  ;;  %v9958_v50 = vld [vmem:[%s12880_s18 + $0x70] sm:$0xff]  ;;  %v9984_v10 = vld [vmem:[%s12885_s11 + $0x1c4] sm:$0xf]  ;;  %v9356_v39 = vld [vmem:[%s12885_s11 + $0x1c8] sm:$0xf] }
0x176f   : > { %6355 = vmatmul.bf16.vlgmr.msrb.gmra.mxu1 %v6074_v59  ;;  %v6067_v19 = vadd.f32 1.0, %v6059_v48  ;;  %v6060_v30 = vsel %vm6052_vm4, %v6048_v25, %v6056_v1  ;;  %6486 = vmatpush.bf16.msra.mxu0 %v9157_v7  ;;  %v9957_v59 = vld [vmem:[%s12880_s18 + $0x68] sm:$0xff]  ;;  %v9956_v25 = vld [vmem:[%s12880_s18 + $0x60] sm:$0xff]  ;;  %v9955_v48 = vld [vmem:[%s12880_s18 + $0x58] sm:$0xff]  ;;  %v9377_v7 = vor.u32 %v9989_v31, %v9374_v16 }
0x1770   : > { %v6068_v62 = vadd.f32 1.0, %v6060_v30  ;;  %6566 = vmatpush.bf16.msra.mxu1 %v9958_v50  ;;  %v9954_v30 = vld [vmem:[%s12880_s18 + $0x50] sm:$0xff]  ;;  %v9358_v46 = vld [vmem:[%s12885_s11 + $0x1d8] sm:$0xf0] }
0x1771   : > { %v6071_v2 = vmul.f32 %v6067_v19, %v6063_v53  ;;  %v9986_v8 = vld [vmem:[%s12885_s11 + $0x1cc] sm:$0xf0]  ;;  %v9350_v56 = vld [vmem:[%s12885_s11 + $0x1d0] sm:$0xf0] }
0x1772   : > { %v6072_v18 = vmul.f32 %v6068_v62, %v6064_v40  ;;  %v9353_v13 = vor.u32 %v9984_v10, %v9350_v56  ;;  %v9982_v50 = vld [vmem:[%s12885_s11 + $0x1ac] sm:$0xf0]  ;;  %v9270_v10 = vld [vmem:[%s12885_s11 + $0x130] sm:$0xf0]  ;;  %v9967_v56 = vld [vmem:[%s12885_s11 + $0x134] sm:$0xf0] }
0x1773   : > { %v6075_v29 = vpack.c.bf16 %v6071_v2, %v6071_v2  ;;  %6487 = vmatpush.bf16.msra.mxu0 %v9153_v41  ;;  %v9953_v2 = vld [vmem:[%s12880_s18 + $0x48] sm:$0xff] }
0x1774   : > { %v6076_v24 = vpack.c.bf16 %v6072_v18, %v6072_v18  ;;  %6567 = vmatpush.bf16.msra.mxu1 %v9957_v59  ;;  %v6387_v18 = vld [vmem:[%s12893_s5] sm:$0x1] }
0x1775   : > { %6368 = vmatmul.bf16.vlgmr.msrb.gmra.mxu2 %v6075_v29 }
0x1776   : > { %6381 = vmatmul.bf16.vlgmr.msrb.gmra.mxu3 %v6076_v24 }
0x1777   : > { %6488 = vmatpush.bf16.msra.mxu0 %v9149_v49  ;;  %v9348_v49 = vld [vmem:[%s12885_s11 + $0x1c0] sm:$0xf] }
0x1778   : > { %6568 = vmatpush.bf16.msra.mxu1 %v9956_v25  ;;  %v9334_v25 = vld [vmem:[%s12885_s11 + $0x1b0] sm:$0xf0] }
0x177b   : > { %6489 = vmatpush.bf16.msra.mxu0 %v9145_v63  ;;  %v9349_v63 = vor.u32 %v9986_v8, %v9348_v49  ;;  %v9964_v49 = vld [vmem:[%s12885_s11 + $0x124] sm:$0xf] }
0x177c   : > { %6569 = vmatpush.bf16.msra.mxu1 %v9955_v48 }
0x177f   : > { %6490 = vmatpush.bf16.msra.mxu0 %v9141_v27  ;;  %v9987_v27 = vld [vmem:[%s12885_s11 + $0x1d4] sm:$0xf0] }
0x1780   : > { %6570 = vmatpush.bf16.msra.mxu1 %v9954_v30  ;;  %v9357_v32 = vor.u32 %v9987_v27, %v9356_v39  ;;  %v9342_v30 = vld [vmem:[%s12885_s11 + $0x1b8] sm:$0xf0]  ;;  %v9273_v39 = vor.u32 %v9964_v49, %v9270_v10 }
0x1783   : > { %6491 = vmatpush.bf16.msra.mxu0 %v9137_v26  ;;  %v9985_v26 = vld [vmem:[%s12885_s11 + $0x1cc] sm:$0xf] }
0x1784   : > { %6571 = vmatpush.bf16.msra.mxu1 %v9953_v2  ;;  %v9978_v2 = vld [vmem:[%s12885_s11 + $0x18c] sm:$0xf0] }
0x17eb   : > { %v6343_v34 = vpop.f32.mrf.mxu0 }
0x17ec   : > { %v6356_v51 = vpop.f32.mrf.mxu1  ;;  %v6344_v4 = vadd.f32 %v6343_v34, %v6141_v60  ;;  %v6388_v34 = vld [vmem:[%s12894_s0] sm:$0x1] }
0x17ee   : > { %v6357_v36 = vadd.f32 %v6356_v51, %v6344_v4  ;;  %v9133_v4 = vld [vmem:[%s12883_s26 + $0x3] sm:$0x7] }
0x17f3   : > { %v6345_v15 = vpop.f32.mrf.mxu0 }
0x17f4   : > { %v6358_v17 = vpop.f32.mrf.mxu1 }
0x17f5   : > { %v9952_v17 = vld [vmem:[%s12880_s18 + $0x40] sm:$0xff] }
0x17f6   : > { %6572 = vmatpush.bf16.msra.mxu1 %v9952_v17  ;;  %v9977_v17 = vld [vmem:[%s12885_s11 + $0x18c] sm:$0xf] }
0x17f8   : > { %v6369_v22 = vpop.f32.mrf.mxu2 }
0x17f9   : > { %v6370_v35 = vadd.f32 %v6369_v22, %v6357_v36  ;;  %v6382_v9 = vpop.f32.mrf.mxu3  ;;  %v6482_v36 = vperm.slane %v9133_v4, 2  ;;  %v9326_v4 = vld [vmem:[%s12885_s11 + $0x198] sm:$0xf0] }
0x17fa   : > { %6851 = vmatpush.bf16.msrb.mxu1 %v9377_v7  ;;  %v9969_v7 = vld [vmem:[%s12885_s11 + $0x14c] sm:$0xf] }
0x17fb   : > { %v6383_v58 = vadd.f32 %v6382_v9, %v6370_v35 }
0x17fd   : > { %v6386_v0 = vadd.f32 %v6383_v58, %v12333_v38 }
0x17ff   : > { %v6389_v20 = vsel %vm5445_vm6, %v6386_v0, 0.0 }
0x1800   : > { %v6371_v42 = vpop.f32.mrf.mxu2  ;;  %6390 = vadd.xlane.f32.xlu0 %v6389_v20 }
0x1801   : > { %v6384_v44 = vpop.f32.mrf.mxu3 }
0x1873   : > { %v6391_v37 = vpop.xlane.xlu0 %6390 }
0x1874   : > { %v6392_v52 = vmul.f32 %v6391_v37, %v10731_v45  ;;  %v9990_v37 = vld [vmem:[%s12885_s11 + $0x1ec] sm:$0xf0] }
0x1876   : > { %v6393_v33 = vsub.f32 %v6386_v0, %v6392_v52  ;;  %v9182_v0 = vld [vmem:[%s12884_s10 + $0x1] sm:$0x1]  ;;  %v9988_v52 = vld [vmem:[%s12885_s11 + $0x1e4] sm:$0xf] }
0x1878   : > { %v6394_v38 = vmul.f32 %v6393_v33, %v6393_v33 }
0x187a   : > { %v6395_v55 = vsel %vm5445_vm6, %v6394_v38, 0.0  ;;  %v9366_v38 = vld [vmem:[%s12885_s11 + $0x1f0] sm:$0xf0] }
0x187b   : > { %6396 = vadd.xlane.f32.xlu1 %v6395_v55  ;;  %v9372_v55 = vld [vmem:[%s12885_s11 + $0x1e8] sm:$0xf]  ;;  %v9369_v47 = vor.u32 %v9988_v52, %v9366_v38  ;;  %v9284_v52 = vld [vmem:[%s12885_s11 + $0x140] sm:$0xf]  ;;  %v9968_v38 = vld [vmem:[%s12885_s11 + $0x144] sm:$0xf] }
0x187c   : > { %v9373_v61 = vor.u32 %v9991_v12, %v9372_v55  ;;  %v9286_v12 = vld [vmem:[%s12885_s11 + $0x150] sm:$0xf0] }
0x187d   : > { %6825 = vmatpush.bf16.msra.mxu3 %v9369_v47  ;;  %v9292_v47 = vld [vmem:[%s12885_s11 + $0x148] sm:$0xf]  ;;  %v9289_v31 = vor.u32 %v9968_v38, %v9286_v12  ;;  %v10014_v38 = vld [vmem:[%s12889_s2 + $0x1b0] sm:$0xff] }
0x187e   : > { %6838 = vmatpush.bf16.msrb.mxu0 %v9373_v61  ;;  %v9971_v61 = vld [vmem:[%s12885_s11 + $0x154] sm:$0xf0] }
0x187f   : > { %v9293_v16 = vor.u32 %v9971_v61, %v9292_v47 }
0x1881   : > { %6826 = vmatpush.bf16.msra.mxu3 %v9353_v13  ;;  %v9965_v13 = vld [vmem:[%s12885_s11 + $0x12c] sm:$0xf] }
0x1882   : > { %6839 = vmatpush.bf16.msrb.mxu0 %v9357_v32  ;;  %v9278_v32 = vld [vmem:[%s12885_s11 + $0x138] sm:$0xf0] }
0x18ee   : > { %v6397_v3 = vpop.xlane.xlu1 %6396 }
0x18ef   : > { %v6398_v21 = vmul.f32 %v6397_v3, %v10731_v45  ;;  %v9361_v3 = vor.u32 %v9985_v26, %v9358_v46  ;;  %v9252_v26 = vld [vmem:[%s12885_s11 + $0x100] sm:$0xf]  ;;  %v9281_v46 = vor.u32 %v9965_v13, %v9278_v32  ;;  %v10021_v13 = vld [vmem:[%s12889_s2 + $0x1e8] sm:$0xff]  ;;  %v9998_v32 = vld [vmem:[%s12889_s2 + $0x130] sm:$0xff] }
0x18f1   : > { %v6399_v54 = vadd.f32 1e-05, %v6398_v21  ;;  %v9332_v21 = vld [vmem:[%s12885_s11 + $0x1a0] sm:$0xf]  ;;  %6852 = vmatpush.bf16.msrb.mxu1 %v9361_v3  ;;  %v9962_v3 = vld [vmem:[%s12885_s11 + $0x10c] sm:$0xf0] }
0x18f2   : > { %v9333_v59 = vor.u32 %v9982_v50, %v9332_v21  ;;  %v9960_v21 = vld [vmem:[%s12885_s11 + $0x104] sm:$0xf]  ;;  %v9254_v50 = vld [vmem:[%s12885_s11 + $0x110] sm:$0xf0] }
0x18f3   : > { %10379 = vrsqrt.f32 %v6399_v54  ;;  %vm6406_vm11 = vweird.f32 %v6399_v54 }
0x18f9   : > { %v10380_v23 = vpop.eup %10379 }
0x18fa   : > { %v6401_v1 = vmul.f32 %v10380_v23, %v6399_v54  ;;  %vm6407_vm9 = vweird.f32 %v10380_v23  ;;  %v9980_v54 = vld [vmem:[%s12885_s11 + $0x1a4] sm:$0xf] }
0x18fb   : > { %vm6408_vm14 = vmor %vm6406_vm11, %vm6407_vm9  ;;  %v9337_v48 = vor.u32 %v9980_v54, %v9334_v25  ;;  %v9253_v54 = vor.u32 %v9962_v3, %v9252_v26  ;;  %v9260_v25 = vld [vmem:[%s12885_s11 + $0x108] sm:$0xf]  ;;  %v10006_v3 = vld [vmem:[%s12889_s2 + $0x170] sm:$0xff] }
0x18fc   : > { %v6402_v53 = vmul.f32 %v10380_v23, %v6401_v1  ;;  %v9983_v1 = vld [vmem:[%s12885_s11 + $0x1b4] sm:$0xf0] }
0x18fd   : > { %6827 = vmatpush.bf16.msra.mxu3 %v9337_v48 }
0x18fe   : > { %v6403_v19 = vmul.f32 0.5, %v6402_v53 }
0x1900   : > { %v6404_v40 = vsub.f32 1.5, %v6403_v19  ;;  %v9981_v19 = vld [vmem:[%s12885_s11 + $0x1ac] sm:$0xf] }
0x1902   : > { %v6405_v62 = vmul.f32 %v10380_v23, %v6404_v40  ;;  %v9345_v40 = vor.u32 %v9981_v19, %v9342_v30 }
0x1904   : > { %v6409_v29 = vsel %vm6408_vm14, %v10380_v23, %v6405_v62  ;;  %v9340_v23 = vld [vmem:[%s12885_s11 + $0x1a8] sm:$0xf]  ;;  %v9316_v62 = vld [vmem:[%s12885_s11 + $0x180] sm:$0xf]  ;;  %6853 = vmatpush.bf16.msrb.mxu1 %v9345_v40 }
0x1905   : > { %v6410_v24 = vmul.f32 %v6409_v29, %v6393_v33  ;;  %v9365_v33 = vor.u32 %v9990_v37, %v9364_v57  ;;  %v9341_v53 = vor.u32 %v9983_v1, %v9340_v23  ;;  %v9317_v29 = vor.u32 %v9978_v2, %v9316_v62  ;;  %v9310_v57 = vld [vmem:[%s12885_s11 + $0x178] sm:$0xf0]  ;;  %v9963_v23 = vld [vmem:[%s12885_s11 + $0x114] sm:$0xf0]  ;;  %v9961_v1 = vld [vmem:[%s12885_s11 + $0x10c] sm:$0xf] }
0x1906   : > { %v9261_v48 = vor.u32 %v9963_v23, %v9260_v25  ;;  %v9997_v25 = vld [vmem:[%s12889_s2 + $0x128] sm:$0xff] }
0x1907   : > { %v6411_v51 = vmul.f32 %v6410_v24, %v6387_v18  ;;  %6812 = vmatpush.bf16.msra.mxu2 %v9365_v33  ;;  %6840 = vmatpush.bf16.msrb.mxu0 %v9341_v53  ;;  %v9976_v18 = vld [vmem:[%s12885_s11 + $0x184] sm:$0xf]  ;;  %v9318_v24 = vld [vmem:[%s12885_s11 + $0x190] sm:$0xf0]  ;;  %v9970_v33 = vld [vmem:[%s12885_s11 + $0x14c] sm:$0xf0] }
0x1908   : > { %v9285_v55 = vor.u32 %v9970_v33, %v9284_v52  ;;  %v9262_v53 = vld [vmem:[%s12885_s11 + $0x118] sm:$0xf0] }
0x1909   : > { %v6412_v60 = vadd.f32 %v6411_v51, %v6388_v34  ;;  %v9324_v34 = vld [vmem:[%s12885_s11 + $0x188] sm:$0xf]  ;;  %v9979_v51 = vld [vmem:[%s12885_s11 + $0x194] sm:$0xf0]  ;;  %v9265_v19 = vor.u32 %v9961_v1, %v9262_v53 }
0x190a   : > { %v10005_v1 = vld [vmem:[%s12889_s2 + $0x168] sm:$0xff]  ;;  %v10011_v53 = vld [vmem:[%s12889_s2 + $0x198] sm:$0xff] }
0x190b   : > { %v6413_v15 = vpack.c.bf16 %v6412_v60, %v6412_v60  ;;  %6813 = vmatpush.bf16.msra.mxu2 %v9349_v63  ;;  %v9276_v63 = vld [vmem:[%s12885_s11 + $0x128] sm:$0xf] }
0x190c   : > { %v9277_v27 = vor.u32 %v9967_v56, %v9276_v63 }
0x190d   : > { %6492 = vmatmul.bf16.vlgmr.msra.gmra.mxu0 %v6413_v15  ;;  %v9325_v15 = vor.u32 %v9979_v51, %v9324_v34 }
0x190f   : > { %6814 = vmatpush.bf16.msra.mxu2 %v9333_v59  ;;  %6841 = vmatpush.bf16.msrb.mxu0 %v9325_v15  ;;  %v9257_v59 = vor.u32 %v9960_v21, %v9254_v50  ;;  %v10012_v21 = vld [vmem:[%s12889_s2 + $0x1a0] sm:$0xff] }
0x1910   : > { %v10020_v50 = vld [vmem:[%s12889_s2 + $0x1e0] sm:$0xff] }
0x1913   : > { %6815 = vmatpush.bf16.msra.mxu2 %v9317_v29 }
0x198a   : > { %v6493_v22 = vpop.f32.mrf.mxu0 }
0x198b   : > { %v6494_v35 = vadd.f32 %v6493_v22, %v6482_v36  ;;  %v9329_v36 = vor.u32 %v9977_v17, %v9326_v4  ;;  %v9300_v22 = vld [vmem:[%s12885_s11 + $0x160] sm:$0xf] }
0x198c   : > { %v9216_v4 = vld [vmem:[%s12887_s23 + $0x1] sm:$0x1] }
0x198d   : > { %v6497_v9 = vpack.c.bf16 %v6494_v35, %v6494_v35  ;;  %v9974_v35 = vld [vmem:[%s12885_s11 + $0x16c] sm:$0xf0]  ;;  %6854 = vmatpush.bf16.msrb.mxu1 %v9329_v36 }
0x198f   : > { %6573 = vmatmul.bf16.vlgmr.msra.gmra.mxu1 %v6497_v9  ;;  %v9972_v9 = vld [vmem:[%s12885_s11 + $0x164] sm:$0xf] }
0x1992   : > { %v6495_v58 = vpop.f32.mrf.mxu0 }
0x1993   : > { %v9301_v58 = vor.u32 %v9974_v35, %v9300_v22 }
0x1995   : > { %6816 = vmatpush.bf16.msra.mxu2 %v9301_v58 }
0x1999   : > { %6817 = vmatpush.bf16.msra.mxu2 %v9285_v55  ;;  %v10022_v55 = vld [vmem:[%s12889_s2 + $0x1f0] sm:$0xff] }
0x1a0c   : > { %v6574_v20 = vpop.f32.mrf.mxu1 }
0x1a0d   : > { %v6575_v42 = vadd.f32 %v9182_v0, %v6574_v20  ;;  %v9302_v0 = vld [vmem:[%s12885_s11 + $0x170] sm:$0xf0]  ;;  %v9308_v20 = vld [vmem:[%s12885_s11 + $0x168] sm:$0xf] }
0x1a0f   : > { %v6578_v44 = vadd.f32 %v6575_v42, %v6412_v60  ;;  %v9321_v60 = vor.u32 %v9976_v18, %v9318_v24  ;;  %v9975_v42 = vld [vmem:[%s12885_s11 + $0x174] sm:$0xf0] }
0x1a11   : > { %v6583_v5 = vsel %vm5445_vm6, %v6578_v44, 0.0  ;;  %6828 = vmatpush.bf16.msra.mxu3 %v9321_v60  ;;  %v9215_v60 = vld [vmem:[%s12886_s22 + $0x1] sm:$0x1] }
0x1a12   : > { %6584 = vadd.xlane.f32.xlu2 %v6583_v5  ;;  %v9309_v5 = vor.u32 %v9975_v42, %v9308_v20  ;;  %v10015_v20 = vld [vmem:[%s12889_s2 + $0x1b8] sm:$0xff] }
0x1a13   : > { %v10023_v42 = vld [vmem:[%s12889_s2 + $0x1f8] sm:$0xff] }
0x1a14   : > { %v6576_v43 = vpop.f32.mrf.mxu1  ;;  %6842 = vmatpush.bf16.msrb.mxu0 %v9309_v5 }
0x1a15   : > { %v9973_v43 = vld [vmem:[%s12885_s11 + $0x16c] sm:$0xf] }
0x1a16   : > { %v9313_v37 = vor.u32 %v9973_v43, %v9310_v57 }
0x1a18   : > { %6855 = vmatpush.bf16.msrb.mxu1 %v9313_v37  ;;  %6843 = vmatpush.bf16.msrb.mxu0 %v9293_v16 }
0x1a1c   : > { %6844 = vmatpush.bf16.msrb.mxu0 %v9277_v27  ;;  %v10013_v27 = vld [vmem:[%s12889_s2 + $0x1a8] sm:$0xff] }
0x1a20   : > { %6845 = vmatpush.bf16.msrb.mxu0 %v9261_v48 }
0x1a24   : > { %7313 = vmatpush.bf16.msra.mxu0 %v10015_v20 }
0x1a28   : > { %7314 = vmatpush.bf16.msra.mxu0 %v10014_v38 }
0x1a2c   : > { %7315 = vmatpush.bf16.msra.mxu0 %v10013_v27 }
0x1a30   : > { %7316 = vmatpush.bf16.msra.mxu0 %v10012_v21 }
0x1a34   : > { %7317 = vmatpush.bf16.msra.mxu0 %v10011_v53  ;;  %v10001_v53 = vld [vmem:[%s12889_s2 + $0x148] sm:$0xff] }
0x1a85   : > { %v6585_v11 = vpop.xlane.xlu2 %6584 }
0x1a86   : > { %v6586_v14 = vmul.f32 %v6585_v11, %v10731_v45  ;;  %v9294_v11 = vld [vmem:[%s12885_s11 + $0x158] sm:$0xf0] }
0x1a88   : > { %v12529_v41 = vsub.f32 %v6578_v44, %v6586_v14  ;;  %v9305_v44 = vor.u32 %v9972_v9, %v9302_v0  ;;  %v9297_v14 = vor.u32 %v9969_v7, %v9294_v11  ;;  %v9249_v9 = vld [vmem:[%s12888_s1 + $0x4] sm:$0xf]  ;;  %v9999_v11 = vld [vmem:[%s12889_s2 + $0x138] sm:$0xff]  ;;  %s12895_s1 = sld [smem:[#allocation24_spill]] }
0x1a89   : > { %v6806_v58 = vperm.slane %v9249_v9, 2  ;;  %v6807_v0 = vperm.slane %v9249_v9, 3  ;;  %v6804_v57 = vperm.slane %v9249_v9, 0  ;;  %v6805_v37 = vperm.slane %v9249_v9, 1 }
0x1a8a   : > { %v6588_v6 = vmul.f32 %v12529_v41, %v12529_v41  ;;  %6829 = vmatpush.bf16.msra.mxu3 %v9305_v44  ;;  %6856 = vmatpush.bf16.msrb.mxu1 %v9297_v14  ;;  %v10007_v14 = vld [vmem:[%s12889_s2 + $0x178] sm:$0xff] }
0x1a8c   : > { %v6589_v28 = vsel %vm5445_vm6, %v6588_v6, 0.0  ;;  %v9268_v6 = vld [vmem:[%s12885_s11 + $0x120] sm:$0xf] }
0x1a8d   : > { %6590 = vadd.xlane.f32.xlu0 %v6589_v28  ;;  %v9966_v28 = vld [vmem:[%s12885_s11 + $0x12c] sm:$0xf0] }
0x1a8e   : > { %6830 = vmatpush.bf16.msra.mxu3 %v9289_v31  ;;  %v9269_v8 = vor.u32 %v9966_v28, %v9268_v6  ;;  %6857 = vmatpush.bf16.msrb.mxu1 %v9281_v46 }
0x1a90   : > { %6818 = vmatpush.bf16.msra.mxu2 %v9269_v8 }
0x1a92   : > { %6831 = vmatpush.bf16.msra.mxu3 %v9273_v39  ;;  %6858 = vmatpush.bf16.msrb.mxu1 %v9265_v19  ;;  %v10019_v19 = vld [vmem:[%s12889_s2 + $0x1d8] sm:$0xff] }
0x1a94   : > { %6819 = vmatpush.bf16.msra.mxu2 %v9253_v54 }
0x1a96   : > { %6832 = vmatpush.bf16.msra.mxu3 %v9257_v59  ;;  %7326 = vmatpush.bf16.msra.mxu1 %v10023_v42 }
0x1a98   : > { %7287 = vmatpush.bf16.msrb.mxu2 %v9999_v11 }
0x1a9a   : > { %7327 = vmatpush.bf16.msra.mxu1 %v10022_v55  ;;  %7300 = vmatpush.bf16.msrb.mxu3 %v10007_v14 }
0x1a9c   : > { %7288 = vmatpush.bf16.msrb.mxu2 %v9998_v32  ;;  %v10008_v32 = vld [vmem:[%s12889_s2 + $0x180] sm:$0xff] }
0x1a9e   : > { %7328 = vmatpush.bf16.msra.mxu1 %v10021_v13  ;;  %7301 = vmatpush.bf16.msrb.mxu3 %v10006_v3  ;;  %v10016_v3 = vld [vmem:[%s12889_s2 + $0x1c0] sm:$0xff] }
0x1aa0   : > { %7289 = vmatpush.bf16.msrb.mxu2 %v9997_v25 }
0x1aa2   : > { %7329 = vmatpush.bf16.msra.mxu1 %v10020_v50  ;;  %7302 = vmatpush.bf16.msrb.mxu3 %v10005_v1 }
0x1aa6   : > { %7330 = vmatpush.bf16.msra.mxu1 %v10019_v19 }
0x1b00   : > { %v6591_v30 = vpop.xlane.xlu0 %6590 }
0x1b01   : > { %v6592_v40 = vmul.f32 %v6591_v30, %v10731_v45 }
0x1b03   : > { %v6593_v62 = vadd.f32 1e-05, %v6592_v40 }
0x1b05   : > { %10381 = vrsqrt.f32 %v6593_v62  ;;  %vm6600_vm2 = vweird.f32 %v6593_v62 }
0x1b0b   : > { %v10382_v2 = vpop.eup %10381 }
0x1b0c   : > { %v6595_v18 = vmul.f32 %v10382_v2, %v6593_v62  ;;  %vm6601_vm5 = vweird.f32 %v10382_v2 }
0x1b0d   : > { %vm6602_vm10 = vmor %vm6600_vm2, %vm6601_vm5 }
0x1b0e   : > { %v6596_v29 = vmul.f32 %v10382_v2, %v6595_v18  ;;  %v10004_v18 = vld [vmem:[%s12889_s2 + $0x160] sm:$0xff] }
0x1b0f   : > { %7303 = vmatpush.bf16.msrb.mxu3 %v10004_v18 }
0x1b10   : > { %v6597_v24 = vmul.f32 0.5, %v6596_v29 }
0x1b12   : > { %v6598_v34 = vsub.f32 1.5, %v6597_v24 }
0x1b14   : > { %v6599_v51 = vmul.f32 %v10382_v2, %v6598_v34 }
0x1b16   : > { %v6603_v15 = vsel %vm6602_vm10, %v10382_v2, %v6599_v51  ;;  %v9996_v2 = vld [vmem:[%s12889_s2 + $0x120] sm:$0xff]  ;;  %v10010_v51 = vld [vmem:[%s12889_s2 + $0x190] sm:$0xff] }
0x1b17   : > { %v6604_v17 = vmul.f32 %v6603_v15, %v12529_v41  ;;  %7290 = vmatpush.bf16.msrb.mxu2 %v9996_v2  ;;  %7318 = vmatpush.bf16.msra.mxu0 %v10010_v51 }
0x1b19   : > { %v6605_v36 = vmul.f32 %v9215_v60, %v6604_v17  ;;  %v10018_v60 = vld [vmem:[%s12889_s2 + $0x1d0] sm:$0xff] }
0x1b1a   : > { %7331 = vmatpush.bf16.msra.mxu1 %v10018_v60 }
0x1b1b   : > { %v12594_v22 = vadd.f32 %v9216_v4, %v6605_v36 }
0x1b1d   : > { %v6607_v35 = vpack.c.bf16 %v12594_v22, %v12594_v22 }
0x1b1f   : > { %6820 = vmatmul.bf16.vlgmr.msra.gmra.mxu2 %v6607_v35  ;;  %6833 = vmatmul.bf16.vlgmr.msra.gmra.mxu3 %v6607_v35 }
0x1b20   : > { %6846 = vmatmul.bf16.vlgmr.msrb.gmra.mxu0 %v6607_v35  ;;  %6859 = vmatmul.bf16.vlgmr.msrb.gmra.mxu1 %v6607_v35 }
0x1b9d   : > { %v6847_v44 = vpop.f32.mrf.mxu0  ;;  %v6860_v41 = vpop.f32.mrf.mxu1 }
0x1b9e   : > { %v12601_v5 = vadd.f32 %v6847_v44, %v6806_v58  ;;  %v12603_v43 = vadd.f32 %v6860_v41, %v6807_v0  ;;  %v9995_v58 = vld [vmem:[%s12889_s2 + $0x118] sm:$0xff] }
0x1b9f   : > { %v10003_v44 = vld [vmem:[%s12889_s2 + $0x158] sm:$0xff]  ;;  %7291 = vmatpush.bf16.msrb.mxu2 %v9995_v58 }
0x1ba0   : > { %v12606_v52 = vmul.f32 0.70710677, %v12601_v5  ;;  %v12609_v33 = vmul.f32 0.70710677, %v12603_v43  ;;  %7304 = vmatpush.bf16.msrb.mxu3 %v10003_v44 }
0x1ba2   : > { %v12614_v12 = vand.u32 2147483647, %v12606_v52  ;;  %v12617_v47 = vand.u32 2147483647, %v12609_v33  ;;  %v6821_v61 = vpop.f32.mrf.mxu2  ;;  %v6834_v31 = vpop.f32.mrf.mxu3 }
0x1ba3   : > { %v12619_v16 = vadd.f32 %v6821_v61, %v6804_v57  ;;  %v12621_v7 = vadd.f32 %v6834_v31, %v6805_v37  ;;  %v10009_v57 = vld [vmem:[%s12889_s2 + $0x188] sm:$0xff] }
0x1ba4   : > { %v6874_v6 = vmul.f32 0.3275911, %v12614_v12  ;;  %v6875_v28 = vmul.f32 0.3275911, %v12617_v47  ;;  %v6978_v17 = vsub.f32 0.0, %v12614_v12  ;;  %v6979_v4 = vsub.f32 0.0, %v12617_v47  ;;  %7319 = vmatpush.bf16.msra.mxu0 %v10009_v57 }
0x1ba5   : > { %v12628_v49 = vmul.f32 0.70710677, %v12619_v16  ;;  %v12631_v8 = vmul.f32 0.70710677, %v12621_v7  ;;  %v6849_v10 = vpop.f32.mrf.mxu0  ;;  %v6862_v63 = vpop.f32.mrf.mxu1  ;;  %v10017_v37 = vld [vmem:[%s12889_s2 + $0x1c8] sm:$0xff] }
0x1ba6   : > { %v12633_v56 = vadd.f32 1.0, %v6874_v6  ;;  %v12635_v39 = vadd.f32 1.0, %v6875_v28  ;;  %v6982_v61 = vmul.f32 %v6978_v17, %v12614_v12  ;;  %v12684_v31 = vmul.f32 %v6979_v4, %v12617_v47  ;;  %v9994_v28 = vld [vmem:[%s12889_s2 + $0x110] sm:$0xff]  ;;  %7332 = vmatpush.bf16.msra.mxu1 %v10017_v37  ;;  %v9992_v4 = vld [vmem:[%s12889_s2 + $0x100] sm:$0xff] }
0x1ba7   : > { %v12641_v26 = vand.u32 2147483647, %v12628_v49  ;;  %v12645_v46 = vand.u32 2147483647, %v12631_v8  ;;  %v10002_v10 = vld [vmem:[%s12889_s2 + $0x150] sm:$0xff]  ;;  %7292 = vmatpush.bf16.msrb.mxu2 %v9994_v28 }
0x1ba8   : > { %10383 = vrcp.f32 %v12633_v56  ;;  %v6919_v36 = vand.u32 2147483647, %v12633_v56  ;;  %v6921_v35 = vand.u32 2147483648, %v12633_v56  ;;  %v6934_v20 = vand.u32 2147483647, %v12635_v39  ;;  %7305 = vmatpush.bf16.msrb.mxu3 %v10002_v10  ;;  %7320 = vmatpush.bf16.msra.mxu0 %v10008_v32 }
0x1ba9   : > { %10385 = vrcp.f32 %v12635_v39  ;;  %v6872_v23 = vmul.f32 0.3275911, %v12641_v26  ;;  %v6873_v48 = vmul.f32 0.3275911, %v12645_v46  ;;  %v6936_v42 = vand.u32 2147483648, %v12635_v39 }
0x1baa   : > { %v6823_v54 = vpop.f32.mrf.mxu2  ;;  %v6836_v59 = vpop.f32.mrf.mxu3  ;;  %vm6915_vm13 = vweird.f32 %v12633_v56  ;;  %v6922_v11 = vor.u32 1.1754944e-38, %v6921_v35  ;;  %vm6930_vm8 = vweird.f32 %v12635_v39  ;;  %vm6920_vm0 = vcmp.eq.f32.partialorder %v6919_v36, 8.507059e+37  ;;  %7333 = vmatpush.bf16.msra.mxu1 %v10016_v3  ;;  %v10000_v36 = vld [vmem:[%s12889_s2 + $0x140] sm:$0xff] }
0x1bab   : > { %v12657_v30 = vadd.f32 1.0, %v6872_v23  ;;  %v12659_v62 = vadd.f32 1.0, %v6873_v48  ;;  %vm6935_vm3 = vcmp.eq.f32.partialorder %v6934_v20, 8.507059e+37  ;;  %v6937_v47 = vor.u32 1.1754944e-38, %v6936_v42  ;;  %v9993_v48 = vld [vmem:[%s12889_s2 + $0x108] sm:$0xff] }
0x1bac   : > { %v6988_v51 = vmul.f32 1.442695, %v6982_v61  ;;  %7293 = vmatpush.bf16.msrb.mxu2 %v9993_v48  ;;  %7306 = vmatpush.bf16.msrb.mxu3 %v10001_v53  ;;  %v6976_v58 = vsub.f32 0.0, %v12641_v26  ;;  %v6977_v37 = vsub.f32 0.0, %v12645_v46 }
0x1bad   : > { %10387 = vrcp.f32 %v12657_v30  ;;  %v6889_v54 = vand.u32 2147483647, %v12657_v30  ;;  %v6891_v59 = vand.u32 2147483648, %v12657_v30  ;;  %vm6885_vm9 = vweird.f32 %v12657_v30 }
0x1bae   : > { %v10384_v40 = vpop.eup %10383  ;;  %10389 = vrcp.f32 %v12659_v62  ;;  %v6906_v2 = vand.u32 2147483648, %v12659_v62  ;;  %vm6900_vm5 = vweird.f32 %v12659_v62 }
0x1baf   : > { %v10386_v29 = vpop.eup %10385  ;;  %v6911_v24 = vmul.f32 %v10384_v40, %v12633_v56  ;;  %vm6916_vm7 = vweird.f32 %v10384_v40  ;;  %vm6890_vm2 = vcmp.eq.f32.partialorder %v6889_v54, 8.507059e+37  ;;  %10391 = vpow2.f32 %v6988_v51 }
0x1bb0   : > { %v6926_v34 = vmul.f32 %v10386_v29, %v12635_v39  ;;  %vm6931_vm12 = vweird.f32 %v10386_v29  ;;  %vm6917_vm1 = vmor %vm6915_vm13, %vm6916_vm7  ;;  %7294 = vmatpush.bf16.msrb.mxu2 %v9992_v4  ;;  %7307 = vmatpush.bf16.msrb.mxu3 %v10000_v36  ;;  %vm7003_vm13 = vcmp.ge.f32.partialorder %v12609_v33, 0.0 }
0x1bb1   : > { %v6912_v15 = vsub.f32 1.0, %v6911_v24  ;;  %vm6932_vm15 = vmor %vm6930_vm8, %vm6931_vm12  ;;  %vm7002_vm12 = vcmp.ge.f32.partialorder %v12606_v52, 0.0  ;;  %vm7001_vm8 = vcmp.ge.f32.partialorder %v12631_v8, 0.0 }
0x1bb2   : > { %v6927_v9 = vsub.f32 1.0, %v6926_v34 }
0x1bb3   : > { %v6913_v0 = vmul.f32 %v10384_v40, %v6912_v15  ;;  %v12679_v38 = vpop.eup %10387 }
0x1bb4   : > { %v6928_v41 = vmul.f32 %v10386_v29, %v6927_v9  ;;  %v6881_v6 = vmul.f32 %v12679_v38, %v12657_v30  ;;  %v10390_v63 = vpop.eup %10389  ;;  %vm6886_vm4 = vweird.f32 %v12679_v38  ;;  %v6892_v30 = vor.u32 1.1754944e-38, %v6891_v59 }
0x1bb5   : > { %v6914_v55 = vadd.f32 %v10384_v40, %v6913_v0  ;;  %v6896_v39 = vmul.f32 %v10390_v63, %v12659_v62  ;;  %vm6901_vm11 = vweird.f32 %v10390_v63  ;;  %vm6887_vm14 = vmor %vm6885_vm9, %vm6886_vm4  ;;  %v6907_v0 = vor.u32 1.1754944e-38, %v6906_v2  ;;  %v10392_v59 = vpop.eup %10391 }
0x1bb6   : > { %v6929_v14 = vadd.f32 %v10386_v29, %v6928_v41  ;;  %v6882_v13 = vsub.f32 1.0, %v6881_v6  ;;  %vm6902_vm10 = vmor %vm6900_vm5, %vm6901_vm11  ;;  %v6990_v41 = vmul.f32 1.442695, %v12684_v31  ;;  %v6981_v31 = vmul.f32 %v6977_v37, %v12645_v46 }
0x1bb7   : > { %v6918_v12 = vsel %vm6917_vm1, %v10384_v40, %v6914_v55  ;;  %v6897_v1 = vsub.f32 1.0, %v6896_v39  ;;  %v6904_v40 = vand.u32 2147483647, %v12659_v62  ;;  %vm7000_vm1 = vcmp.ge.f32.partialorder %v12628_v49, 0.0 }
0x1bb8   : > { %v12693_v56 = vsel %vm6920_vm0, %v6922_v11, %v6918_v12  ;;  %v6933_v27 = vsel %vm6932_vm15, %v10386_v29, %v6929_v14  ;;  %v6883_v23 = vmul.f32 %v12679_v38, %v6882_v13  ;;  %v6980_v14 = vmul.f32 %v6976_v58, %v12641_v26 }
0x1bb9   : > { %v6942_v21 = vmul.f32 1.0614054, %v12693_v56  ;;  %v12699_v50 = vsel %vm6935_vm3, %v6937_v47, %v6933_v27  ;;  %v6898_v24 = vmul.f32 %v10390_v63, %v6897_v1  ;;  %vm6905_vm7 = vcmp.eq.f32.partialorder %v6904_v40, 8.507059e+37 }
0x1bba   : > { %v6943_v25 = vmul.f32 1.0614054, %v12699_v50  ;;  %v6884_v29 = vadd.f32 %v12679_v38, %v6883_v23  ;;  %10393 = vpow2.f32 %v6990_v41  ;;  %v6984_v39 = vmul.f32 1.442695, %v6980_v14 }
0x1bbb   : > { %v6946_v19 = vadd.f32 -1.4531521, %v6942_v21  ;;  %v6899_v17 = vadd.f32 %v10390_v63, %v6898_v24  ;;  %v6986_v54 = vmul.f32 1.442695, %v6981_v31  ;;  %vm12896_vm5 = vcmask 523264  }
0x1bbc   : > { %v6947_v18 = vadd.f32 -1.4531521, %v6943_v25  ;;  %v6888_v15 = vsel %vm6887_vm14, %v12679_v38, %v6884_v29  ;;  %10395 = vpow2.f32 %v6984_v39 }
0x1bbd   : > { %v6950_v34 = vmul.f32 %v6946_v19, %v12693_v56  ;;  %v6893_v9 = vsel %vm6890_vm2, %v6892_v30, %v6888_v15  ;;  %v6903_v62 = vsel %vm6902_vm10, %v10390_v63, %v6899_v17  ;;  %10397 = vpow2.f32 %v6986_v54  ;;  %v10031_v54 = vld [vmem:[%s12895_s1 + $0x38] sm:$0xff] }
0x1bbe   : > { %v6951_v60 = vmul.f32 %v6947_v18, %v12699_v50  ;;  %v6940_v42 = vmul.f32 1.0614054, %v6893_v9  ;;  %v6908_v57 = vsel %vm6905_vm7, %v6907_v0, %v6903_v62  ;;  %v7014_v15 = vmul.f32 0.5, %v12601_v5  ;;  %7434 = vmatpush.bf16.msra.mxu2 %v10031_v54 }
0x1bbf   : > { %v6954_v35 = vadd.f32 1.4214138, %v6950_v34  ;;  %v6941_v61 = vmul.f32 1.0614054, %v6908_v57  ;;  %v7015_v0 = vmul.f32 0.5, %v12603_v43 }
0x1bc0   : > { %v6955_v20 = vadd.f32 1.4214138, %v6951_v60  ;;  %v6944_v55 = vadd.f32 -1.4531521, %v6940_v42  ;;  %v10394_v48 = vpop.eup %10393 }
0x1bc1   : > { %v6958_v44 = vmul.f32 %v6954_v35, %v12693_v56  ;;  %v6945_v10 = vadd.f32 -1.4531521, %v6941_v61 }
0x1bc2   : > { %v6959_v38 = vmul.f32 %v6955_v20, %v12699_v50  ;;  %v6948_v28 = vmul.f32 %v6944_v55, %v6893_v9  ;;  %v7012_v55 = vmul.f32 0.5, %v12619_v16 }
0x1bc3   : > { %v6962_v11 = vadd.f32 -0.28449672, %v6958_v44  ;;  %v6949_v27 = vmul.f32 %v6945_v10, %v6908_v57 }
0x1bc4   : > { %v6963_v6 = vadd.f32 -0.28449672, %v6959_v38  ;;  %v6952_v47 = vadd.f32 1.4214138, %v6948_v28 }
0x1bc5   : > { %v6966_v63 = vmul.f32 %v6962_v11, %v12693_v56  ;;  %v6953_v21 = vadd.f32 1.4214138, %v6949_v27  ;;  %v7013_v11 = vmul.f32 0.5, %v12621_v7 }
0x1bc6   : > { %v6967_v12 = vmul.f32 %v6963_v6, %v12699_v50  ;;  %v6956_v3 = vmul.f32 %v6952_v47, %v6893_v9 }
0x1bc7   : > { %v6970_v13 = vadd.f32 0.2548296, %v6966_v63  ;;  %v6957_v1 = vmul.f32 %v6953_v21, %v6908_v57 }
0x1bc8   : > { %v6971_v32 = vadd.f32 0.2548296, %v6967_v12  ;;  %v6960_v23 = vadd.f32 -0.28449672, %v6956_v3  ;;  %v9442_v12 = vld [vmem:[%s12892_s3 + $0x1] sm:$0x1] }
0x1bc9   : > { %v6974_v26 = vmul.f32 %v6970_v13, %v12693_v56  ;;  %v6961_v40 = vadd.f32 -0.28449672, %v6957_v1 }
0x1bca   : > { %v6975_v25 = vmul.f32 %v6971_v32, %v12699_v50  ;;  %v6964_v19 = vmul.f32 %v6960_v23, %v6893_v9  ;;  %v10396_v50 = vpop.eup %10395 }
0x1bcb   : > { %v6994_v53 = vmul.f32 %v10392_v59, %v6974_v26  ;;  %v6965_v24 = vmul.f32 %v6961_v40, %v6908_v57  ;;  %v10398_v58 = vpop.eup %10397  ;;  %v10026_v40 = vld [vmem:[%s12895_s1 + $0x10] sm:$0xff] }
0x1bcc   : > { %v6995_v46 = vmul.f32 %v10394_v48, %v6975_v25  ;;  %v6968_v29 = vadd.f32 0.2548296, %v6964_v19  ;;  %v10027_v19 = vld [vmem:[%s12895_s1 + $0x18] sm:$0xff] }
0x1bcd   : > { %v6998_v2 = vsub.f32 1.0, %v6994_v53  ;;  %v6969_v30 = vadd.f32 0.2548296, %v6965_v24  ;;  %v10029_v53 = vld [vmem:[%s12895_s1 + $0x28] sm:$0xff] }
0x1bce   : > { %v6999_v18 = vsub.f32 1.0, %v6995_v46  ;;  %v6972_v51 = vmul.f32 %v6968_v29, %v6893_v9  ;;  %v10028_v46 = vld [vmem:[%s12895_s1 + $0x20] sm:$0xff] }
0x1bcf   : > { %v7006_v34 = vsub.f32 0.0, %v6998_v2  ;;  %v6973_v35 = vmul.f32 %v6969_v30, %v6908_v57 }
0x1bd0   : > { %v7007_v56 = vsub.f32 0.0, %v6999_v18  ;;  %v6992_v36 = vmul.f32 %v10396_v50, %v6972_v51 }
0x1bd1   : > { %v7010_v60 = vsel %vm7002_vm12, %v6998_v2, %v7006_v34  ;;  %v6993_v52 = vmul.f32 %v10398_v58, %v6973_v35  ;;  %v10025_v2 = vld [vmem:[%s12895_s1 + $0x8] sm:$0xff]  ;;  %v9572_v35 = vld [vmem:[%s12894_s0 + $0x1] sm:$0x1]  ;;  %s1150_s0 = scalar_lea.vmem %s10653_s12, %s12898_s16 }
0x1bd2   : > { %v7018_v17 = vadd.f32 1.0, %v7010_v60  ;;  %v7011_v4 = vsel %vm7003_vm13, %v6999_v18, %v7007_v56  ;;  %v6996_v62 = vsub.f32 1.0, %v6992_v36  ;;  %v10024_v18 = vld [vmem:[%s12895_s1] sm:$0xff] }
0x1bd3   : > { %v7019_v20 = vadd.f32 1.0, %v7011_v4  ;;  %v6997_v37 = vsub.f32 1.0, %v6993_v52 }
0x1bd4   : > { %v7022_v42 = vmul.f32 %v7018_v17, %v7014_v15  ;;  %v7004_v41 = vsub.f32 0.0, %v6996_v62  ;;  %v9571_v17 = vld [vmem:[%s12893_s5 + $0x1] sm:$0x1] }
0x1bd5   : > { %v7023_v44 = vmul.f32 %v7019_v20, %v7015_v0  ;;  %v7005_v33 = vsub.f32 0.0, %v6997_v37  ;;  %v7385_v20 = vld [vmem:[%s10638_s20] sm:$0x1] }
0x1bd6   : > { %v7026_v9 = vpack.c.bf16 %v7022_v42, %v7022_v42  ;;  %v7008_v5 = vsel %vm7000_vm1, %v6996_v62, %v7004_v41 }
0x1bd7   : > { %v7027_v38 = vpack.c.bf16 %v7023_v44, %v7023_v44  ;;  %v7016_v57 = vadd.f32 1.0, %v7008_v5  ;;  %v7009_v43 = vsel %vm7001_vm8, %v6997_v37, %v7005_v33 }
0x1bd8   : > { %7321 = vmatmul.bf16.vlgmr.msra.gmra.mxu0 %v7026_v9  ;;  %v7017_v14 = vadd.f32 1.0, %v7009_v43 }
0x1bd9   : > { %7334 = vmatmul.bf16.vlgmr.msra.gmra.mxu1 %v7027_v38  ;;  %v7020_v61 = vmul.f32 %v7016_v57, %v7012_v55  ;;  %v10035_v38 = vld [vmem:[%s10643_s27 + $0x18] sm:$0xff]  ;;  %v10034_v55 = vld [vmem:[%s10643_s27 + $0x10] sm:$0xff] }
0x1bda   : > { %v7021_v28 = vmul.f32 %v7017_v14, %v7013_v11  ;;  %7528 = vmatpush.bf16.msra.mxu3 %v10035_v38  ;;  %v10033_v14 = vld [vmem:[%s10643_s27 + $0x8] sm:$0xff] }
0x1bdb   : > { %v7024_v6 = vpack.c.bf16 %v7020_v61, %v7020_v61 }
0x1bdc   : > { %v7025_v10 = vpack.c.bf16 %v7021_v28, %v7021_v28 }
0x1bdd   : > { %7295 = vmatmul.bf16.vlgmr.msrb.gmra.mxu2 %v7024_v6 }
0x1bde   : > { %7308 = vmatmul.bf16.vlgmr.msrb.gmra.mxu3 %v7025_v10  ;;  %v10032_v10 = vld [vmem:[%s10643_s27] sm:$0xff] }
0x1bdf   : > { %7529 = vmatpush.bf16.msra.mxu3 %v10034_v55 }
0x1be3   : > { %7530 = vmatpush.bf16.msra.mxu3 %v10033_v14 }
0x1be7   : > { %7531 = vmatpush.bf16.msra.mxu3 %v10032_v10 }
0x1c55   : > { %v7322_v49 = vpop.f32.mrf.mxu0 }
0x1c56   : > { %v7335_v63 = vpop.f32.mrf.mxu1 }
0x1c5d   : > { %v7324_v31 = vpop.f32.mrf.mxu0 }
0x1c5e   : > { %v7337_v16 = vpop.f32.mrf.mxu1 }
0x1c60   : > { %v7296_v47 = vpop.f32.mrf.mxu2 }
0x1c61   : > { %v7297_v27 = vadd.f32 %v9442_v12, %v7296_v47  ;;  %v7309_v8 = vpop.f32.mrf.mxu3 }
0x1c63   : > { %v7310_v13 = vadd.f32 %v7309_v8, %v7297_v27 }
0x1c65   : > { %v7323_v39 = vadd.f32 %v7322_v49, %v7310_v13 }
0x1c67   : > { %v7336_v32 = vadd.f32 %v7335_v63, %v7323_v39 }
0x1c68   : > { %v7298_v7 = vpop.f32.mrf.mxu2 }
0x1c69   : > { %v7339_v3 = vadd.f32 %v7336_v32, %v12594_v22  ;;  %v7311_v21 = vpop.f32.mrf.mxu3  ;;  %v10030_v22 = vld [vmem:[%s12895_s1 + $0x30] sm:$0xff] }
0x1c6a   : > { %7435 = vmatpush.bf16.msra.mxu2 %v10030_v22 }
0x1c6b   : > { %v7344_v26 = vsel %vm5445_vm6, %v7339_v3, 0.0 }
0x1c6c   : > { %7345 = vadd.xlane.f32.xlu1 %v7344_v26 }
0x1c6e   : > { %7436 = vmatpush.bf16.msra.mxu2 %v10029_v53 }
0x1c72   : > { %7437 = vmatpush.bf16.msra.mxu2 %v10028_v46  ;;  %v7496_v46 = vld [vmem:[%s10648_s4] sm:$0x1] }
0x1c76   : > { %7438 = vmatpush.bf16.msra.mxu2 %v10027_v19 }
0x1c7a   : > { %7439 = vmatpush.bf16.msra.mxu2 %v10026_v40 }
0x1c7e   : > { %7440 = vmatpush.bf16.msra.mxu2 %v10025_v2 }
0x1c82   : > { %7441 = vmatpush.bf16.msra.mxu2 %v10024_v18 }
0x1cdf   : > { %v7346_v59 = vpop.xlane.xlu1 %7345 }
0x1ce0   : > { %v7347_v25 = vmul.f32 %v7346_v59, %v10731_v45 }
0x1ce2   : > { %v7348_v23 = vsub.f32 %v7339_v3, %v7347_v25 }
0x1ce4   : > { %v7349_v1 = vmul.f32 %v7348_v23, %v7348_v23 }
0x1ce6   : > { %v7350_v48 = vsel %vm5445_vm6, %v7349_v1, 0.0 }
0x1ce7   : > { %7351 = vadd.xlane.f32.xlu2 %v7350_v48 }
0x1d5a   : > { %v7352_v29 = vpop.xlane.xlu2 %7351 }
0x1d5b   : > { %v7353_v24 = vmul.f32 %v7352_v29, %v10731_v45 }
0x1d5d   : > { %v7354_v34 = vadd.f32 1e-05, %v7353_v24 }
0x1d5f   : > { %10399 = vrsqrt.f32 %v7354_v34  ;;  %vm7361_vm0 = vweird.f32 %v7354_v34 }
0x1d65   : > { %v10400_v56 = vpop.eup %10399 }
0x1d66   : > { %v7356_v51 = vmul.f32 %v10400_v56, %v7354_v34  ;;  %vm7362_vm6 = vweird.f32 %v10400_v56 }
0x1d67   : > { %vm7363_vm15 = vmor %vm7361_vm0, %vm7362_vm6 }
0x1d68   : > { %v7357_v30 = vmul.f32 %v10400_v56, %v7356_v51 }
0x1d6a   : > { %v7358_v50 = vmul.f32 0.5, %v7357_v30 }
0x1d6c   : > { %v7359_v60 = vsub.f32 1.5, %v7358_v50 }
0x1d6e   : > { %v7360_v15 = vmul.f32 %v10400_v56, %v7359_v60 }
0x1d70   : > { %v7364_v4 = vsel %vm7363_vm15, %v10400_v56, %v7360_v15 }
0x1d71   : > { %v7365_v36 = vmul.f32 %v7364_v4, %v7348_v23 }
0x1d73   : > { %v7366_v58 = vmul.f32 %v9571_v17, %v7365_v36 }
0x1d75   : > { %v7367_v0 = vadd.f32 %v9572_v35, %v7366_v58 }
0x1d77   : > { %v7368_v45 = vpack.c.bf16 %v7367_v0, %v7367_v0 }
0x1d79   : > { %7442 = vmatmul.bf16.vlgmr.msra.gmra.mxu2 %v7368_v45 }
0x1dfc   : > { %v7443_v42 = vpop.f32.mrf.mxu2 }
0x1dfd   : > { %v7444_v62 = vadd.f32 %v7443_v42, %v7385_v20 }
0x1dff   : > { %v7447_v52 = vmul.f32 0.70710677, %v7444_v62  ;;  %v7484_v1 = vmul.f32 0.5, %v7444_v62 }
0x1e01   : > { %v7448_v44 = vand.u32 2147483647, %v7447_v52  ;;  %vm7481_vm14 = vcmp.ge.f32.partialorder %v7447_v52, 0.0 }
0x1e03   : > { %v7449_v9 = vmul.f32 0.3275911, %v7448_v44  ;;  %v7475_v31 = vsub.f32 0.0, %v7448_v44 }
0x1e04   : > { %v7445_v41 = vpop.f32.mrf.mxu2 }
0x1e05   : > { %v7450_v37 = vadd.f32 1.0, %v7449_v9  ;;  %v7476_v47 = vmul.f32 %v7475_v31, %v7448_v44 }
0x1e07   : > { %10401 = vrcp.f32 %v7450_v37  ;;  %v7462_v43 = vand.u32 2147483648, %v7450_v37  ;;  %v7460_v11 = vand.u32 2147483647, %v7450_v37  ;;  %vm7456_vm4 = vweird.f32 %v7450_v37 }
0x1e08   : > { %v7477_v13 = vmul.f32 1.442695, %v7476_v47 }
0x1e09   : > { %v7463_v28 = vor.u32 1.1754944e-38, %v7462_v43  ;;  %vm7461_vm11 = vcmp.eq.f32.partialorder %v7460_v11, 8.507059e+37 }
0x1e0a   : > { %10403 = vpow2.f32 %v7477_v13 }
0x1e0d   : > { %v10402_v5 = vpop.eup %10401 }
0x1e0e   : > { %v7452_v33 = vmul.f32 %v10402_v5, %v7450_v37  ;;  %vm7457_vm3 = vweird.f32 %v10402_v5 }
0x1e0f   : > { %vm7458_vm9 = vmor %vm7456_vm4, %vm7457_vm3 }
0x1e10   : > { %v7453_v57 = vsub.f32 1.0, %v7452_v33  ;;  %v10404_v26 = vpop.eup %10403 }
0x1e12   : > { %v7454_v61 = vmul.f32 %v10402_v5, %v7453_v57 }
0x1e14   : > { %v7455_v6 = vadd.f32 %v10402_v5, %v7454_v61 }
0x1e16   : > { %v7459_v49 = vsel %vm7458_vm9, %v10402_v5, %v7455_v6 }
0x1e17   : > { %v7464_v63 = vsel %vm7461_vm11, %v7463_v28, %v7459_v49 }
0x1e18   : > { %v7466_v16 = vmul.f32 1.0614054, %v7464_v63 }
0x1e1a   : > { %v7467_v12 = vadd.f32 -1.4531521, %v7466_v16 }
0x1e1c   : > { %v7468_v27 = vmul.f32 %v7467_v12, %v7464_v63 }
0x1e1e   : > { %v7469_v8 = vadd.f32 1.4214138, %v7468_v27 }
0x1e20   : > { %v7470_v39 = vmul.f32 %v7469_v8, %v7464_v63 }
0x1e22   : > { %v7471_v32 = vadd.f32 -0.28449672, %v7470_v39 }
0x1e24   : > { %v7472_v7 = vmul.f32 %v7471_v32, %v7464_v63 }
0x1e26   : > { %v7473_v3 = vadd.f32 0.2548296, %v7472_v7 }
0x1e28   : > { %v7474_v21 = vmul.f32 %v7473_v3, %v7464_v63 }
0x1e2a   : > { %v7479_v54 = vmul.f32 %v10404_v26, %v7474_v21 }
0x1e2c   : > { %v7480_v59 = vsub.f32 1.0, %v7479_v54 }
0x1e2e   : > { %v7482_v25 = vsub.f32 0.0, %v7480_v59 }
0x1e30   : > { %v7483_v23 = vsel %vm7481_vm14, %v7480_v59, %v7482_v25 }
0x1e31   : > { %v7485_v48 = vadd.f32 1.0, %v7483_v23 }
0x1e33   : > { %v7486_v22 = vmul.f32 %v7485_v48, %v7484_v1 }
0x1e35   : > { %v7487_v53 = vpack.c.bf16 %v7486_v22, %v7486_v22 }
0x1e37   : > { %9621 = vmatmul.msk.bf16.vlgmr.msra.gmra.mxu3 %vm12896_vm5, %v7487_v53 }
0x1eba   : > { %v7533_v19 = vpop.f32.mrf.mxu3 }
0x1ebb   : > { %v7534_v40 = vadd.f32 %v7533_v19, %v7496_v46 }
0x1ebd   : > { %7537 = vst [vmem:[%s1150_s0] sm:$0x1] %v7534_v40 }
0x1ec2   : > { %v7535_v2 = vpop.f32.mrf.mxu3 }
0x1ec3 PF: > { %s87_s15 = sadd.s32 1, %s10411_s15  }
0x1ec4   : > { %p84_p4 = scmp.ge.s32.totalorder %s87_s15, 4  }
0x1ec6   :  { %86 = sbr.rel (!%p84_p4) target bundleno = 75 (0x4b), region = 264 }

</bundles_post_ra>
